<compile_context>
chip_gen: v7x
topology: tpu7x:2x2x1
jax: 0.10.0
libtpu: 0.0.40
codegen_flags: <defaults>
</compile_context>

<pallas_src>
import functools
import math

import jax
import jax.numpy as jnp
from jax.experimental import pallas as pl
from jax.experimental.pallas import tpu as pltpu


def _round_up(a: int, m: int) -> int:
    return ((a + m - 1) // m) * m


def _make_fused_siren_kernel(sine_flags):
    """Kernel computing the full SIREN stack on one (tm, in_f) row tile."""
    n_layers = len(sine_flags)
    assert n_layers >= 2, "expect at least input layer + output layer"

    def kernel(x_ref, *refs):
        # refs layout: w0, b0, w1, b1, ..., w_{L-1}, b_{L-1}, o_ref, act_ref
        w_refs = refs[0:2 * n_layers:2]
        b_refs = refs[1:2 * n_layers:2]
        o_ref = refs[2 * n_layers]
        act_ref = refs[2 * n_layers + 1]

        def dense(a, li):
            # Weights/activations arrive already in the compute dtype (bf16 by
            # default) -> no per-step recast of resident weights (review item).
            z = jnp.dot(a, w_refs[li][...], preferred_element_type=jnp.float32)
            z = z + b_refs[li][...]          # biases kept f32
            return jnp.sin(z) if sine_flags[li] else z

        # ---- layer 0: in_features is tiny (e.g. 2) -> VPU broadcast-FMA, f32 ----
        x = x_ref[...]
        in_f0 = x.shape[1]
        if in_f0 < 8:
            # TODO(synk): per review this K=2 layer could instead ride the
            # otherwise-idle MXU (jnp.dot) to free VALU/XLU slots for sin.
            w0 = w_refs[0][...]              # (in_f0, hidden), omega pre-folded, f32
            h = b_refs[0][...]
            for k in range(in_f0):
                h = h + x[:, k:k + 1] * w0[k:k + 1, :]
            if sine_flags[0]:
                h = jnp.sin(h)
        else:
            h = dense(x.astype(w_refs[0].dtype), 0)
        act_ref[...] = h.astype(act_ref.dtype)

        # ---- hidden layers (static unroll; activation stays in VMEM scratch) ----
        for li in range(1, n_layers - 1):
            act_ref[...] = dense(act_ref[...], li).astype(act_ref.dtype)

        # ---- final layer (plain linear if outermost_linear, else sine) ----
        y = dense(act_ref[...], n_layers - 1)
        # TODO(synk): with out_features == 1 this store is lane-sparse
        # (vst.msk); a lane-dense (tm//128, 128) slab via an in-kernel XLU
        # relayout would shave the store tail, but the bytes are tiny here.
        o_ref[...] = y.astype(o_ref.dtype)

    return kernel


@functools.partial(jax.jit, static_argnames=("sine_flags", "tm"))
def siren_forward(x, weights, biases, *, sine_flags, tm=None):
    """Fused SIREN forward.

    x       : (N, in_features) float32
    weights : tuple of (in_f, out_f), omega already folded in (bf16 by default,
              first tiny layer f32)
    biases  : tuple of (1, out_f) float32, omega already folded in
    sine_flags : tuple of bool, whether each layer applies sin
    tm      : optional row-tile override (rounded up to a multiple of 128)
    """
    n, in_f = x.shape
    n_layers = len(weights)
    widths = tuple(int(w.shape[1]) for w in weights)
    hidden = widths[0]
    out_f = widths[-1]
    if any(w != hidden for w in widths[:-1]):
        raise ValueError(
            "siren_forward requires uniform intermediate widths (single VMEM "
            f"activation scratch); got layer widths {widths}")

    act_dtype = jnp.dtype(weights[-1].dtype)   # compute dtype of the layer stack
    act_bytes = act_dtype.itemsize

    # ---- row-tile selection (review: big tiles, derived from hidden) ----
    n128 = _round_up(n, 128)
    scratch_budget = 4 << 20                   # activation-scratch budget
    if tm is None:
        tm_target = scratch_budget // max(1, hidden * act_bytes)
        tm_target = max(128, min(4096, (tm_target // 128) * 128))
    else:
        tm_target = max(128, _round_up(int(tm), 128))
    tm_eff = min(tm_target, n128)
    if n128 >= 2 * 128:                        # keep grid length >= 2 (v7x: 2 TCs)
        tm_eff = min(tm_eff, _round_up(n128 // 2, 128))
    n_pad = _round_up(n, tm_eff)
    if n_pad != n:
        x = jnp.pad(x, ((0, n_pad - n), (0, 0)))

    kernel = _make_fused_siren_kernel(sine_flags)

    in_specs = [pl.BlockSpec((tm_eff, in_f), lambda i: (i, 0))]
    operands = [x]
    for w, b in zip(weights, biases):
        # Full-array, constant-index weight/bias blocks: resident in VMEM for
        # the whole grid.
        # TODO(synk): at large hidden on v7x, pipeline_mode=pl.Buffered(1) on
        # these constant blocks would halve weight residency.
        in_specs.append(pl.BlockSpec(w.shape, lambda i: (0, 0)))
        in_specs.append(pl.BlockSpec(b.shape, lambda i: (0, 0)))
        operands.append(w)
        operands.append(b)

    # Explicit VMEM budget: double-buffered params + row tiles + scratch + headroom.
    param_bytes = sum(int(w.size) * w.dtype.itemsize + int(b.size) * b.dtype.itemsize
                      for w, b in zip(weights, biases))
    vmem_need = (2 * param_bytes
                 + 2 * tm_eff * in_f * x.dtype.itemsize
                 + 2 * tm_eff * out_f * 4
                 + tm_eff * hidden * act_bytes
                 + (4 << 20))
    vmem_limit = int(min(max(vmem_need, 32 << 20), 128 << 20))

    flops = 2 * n_pad * sum(int(w.shape[0]) * int(w.shape[1]) for w in weights)
    transcendentals = n_pad * sum(wd for wd, s in zip(widths, sine_flags) if s)
    bytes_accessed = n_pad * in_f * 4 + n_pad * out_f * 4 + param_bytes

    out = pl.pallas_call(
        kernel,
        out_shape=jax.ShapeDtypeStruct((n_pad, out_f), jnp.float32),
        grid_spec=pltpu.PrefetchScalarGridSpec(
            num_scalar_prefetch=0,
            grid=(n_pad // tm_eff,),
            in_specs=in_specs,
            out_specs=pl.BlockSpec((tm_eff, out_f), lambda i: (i, 0)),
            scratch_shapes=[pltpu.VMEM((tm_eff, hidden), act_dtype)],
        ),
        compiler_params=pltpu.CompilerParams(
            dimension_semantics=("parallel",),   # row tiles are independent
            vmem_limit_bytes=vmem_limit,
        ),
        cost_estimate=pl.CostEstimate(
            flops=int(flops),
            transcendentals=int(transcendentals),
            bytes_accessed=int(bytes_accessed),
        ),
    )(*operands)

    if n_pad != n:
        out = out[:n]
    return out


def init_siren_params(key, in_features, hidden_features, hidden_layers,
                      out_features, outermost_linear, first_omega_0,
                      hidden_omega_0):
    """Raw params in PyTorch convention: list of (W(out,in), b(out,), omega, sine)."""
    params = []

    def linear_params(k, fan_in, fan_out, w_lo, w_hi):
        kw, kb = jax.random.split(k)
        w = jax.random.uniform(kw, (fan_out, fan_in), jnp.float32, w_lo, w_hi)
        b_bound = 1.0 / math.sqrt(fan_in)   # PyTorch nn.Linear default bias init
        b = jax.random.uniform(kb, (fan_out,), jnp.float32, -b_bound, b_bound)
        return w, b

    keys = jax.random.split(key, hidden_layers + 2)

    # input layer (is_first): U(-1/in, 1/in)
    w, b = linear_params(keys[0], in_features, hidden_features,
                         -1.0 / in_features, 1.0 / in_features)
    params.append((w, b, first_omega_0, True))

    # hidden layers: U(-sqrt(6/in)/omega, sqrt(6/in)/omega)
    hb = math.sqrt(6.0 / hidden_features) / hidden_omega_0
    for li in range(hidden_layers):
        w, b = linear_params(keys[1 + li], hidden_features, hidden_features,
                             -hb, hb)
        params.append((w, b, hidden_omega_0, True))

    # output layer: plain linear if outermost_linear, else SineLayer
    w, b = linear_params(keys[-1], hidden_features, out_features, -hb, hb)
    params.append((w, b, hidden_omega_0, not outermost_linear))

    return params


def prepare_siren_params(params, dtype=jnp.bfloat16):
    """Fold omega into W/b, pre-transpose to (in_f, out_f), pre-cast weights
    to the compute dtype (bf16 default). The tiny first coordinate layer and
    all biases stay f32 (negligible bytes, avoids per-step casts and keeps
    the omega-amplified first layer accurate)."""
    weights, biases, flags = [], [], []
    for i, (w, b, omega, apply_sine) in enumerate(params):
        scale = jnp.float32(omega) if apply_sine else jnp.float32(1.0)
        wt = jnp.transpose(w).astype(jnp.float32) * scale        # (in_f, out_f)
        bt = (b.astype(jnp.float32) * scale).reshape(1, -1)      # (1, out_f)
        keep_f32 = (i == 0 and int(w.shape[1]) < 8)
        weights.append(wt if keep_f32 else wt.astype(dtype))
        biases.append(bt)
        flags.append(bool(apply_sine))
    return tuple(weights), tuple(biases), tuple(flags)


def siren_reference(x, params):
    """Pure-JAX f32 reference (unfolded omega) matching the PyTorch module."""
    out = x
    for (w, b, omega, apply_sine) in params:
        y = out @ w.T + b
        out = jnp.sin(omega * y) if apply_sine else y
    return out


def siren_reference_prepared(x, weights, biases, sine_flags):
    """Pure-JAX reference mirroring the kernel's precision path (prepared
    omega-folded params, activations cast to the compute dtype between layers)."""
    n_layers = len(weights)
    act_dtype = weights[-1].dtype
    h = x.astype(jnp.float32)
    for i, (w, b, s) in enumerate(zip(weights, biases, sine_flags)):
        z = jnp.dot(h.astype(w.dtype), w, preferred_element_type=jnp.float32) + b
        h = jnp.sin(z) if s else z
        if i < n_layers - 1:
            h = h.astype(act_dtype).astype(jnp.float32)
    return h


if __name__ == "__main__":
    key = jax.random.PRNGKey(0)
    k_param, k_x, k_x2 = jax.random.split(key, 3)

    # Small shapes consistent with the module.
    N = 256
    in_features = 2
    hidden_features = 128
    hidden_layers = 2
    out_features = 1
    outermost_linear = True
    first_omega_0 = 30.0
    hidden_omega_0 = 30.0

    params = init_siren_params(
        k_param, in_features, hidden_features, hidden_layers, out_features,
        outermost_linear, first_omega_0, hidden_omega_0,
    )

    # ---- default path: bf16 MXU weights, f32 accumulation ----
    weights, biases, sine_flags = prepare_siren_params(params)          # bf16
    x = jax.random.uniform(k_x, (N, in_features), jnp.float32, -1.0, 1.0)
    out = jax.block_until_ready(
        siren_forward(x, weights, biases, sine_flags=sine_flags))
    ref = siren_reference_prepared(x, weights, biases, sine_flags)
    assert out.shape == (N, out_features)
    assert jnp.allclose(out, ref, atol=1e-2, rtol=1e-2), \
        "bf16 path mismatch vs precision-matched reference"

    # Ragged N (padding path) + multi-tile grid with auto tile size.
    N2 = 600
    x2 = jax.random.uniform(k_x2, (N2, in_features), jnp.float32, -1.0, 1.0)
    out2 = jax.block_until_ready(
        siren_forward(x2, weights, biases, sine_flags=sine_flags))
    ref2 = siren_reference_prepared(x2, weights, biases, sine_flags)
    assert out2.shape == (N2, out_features)
    assert jnp.allclose(out2, ref2, atol=1e-2, rtol=1e-2), \
        "bf16 padded path mismatch"

    # ---- strict f32 path vs the PyTorch-faithful (unfolded-omega) reference ----
    weights32, biases32, sine_flags32 = prepare_siren_params(params, dtype=jnp.float32)
    out3 = jax.block_until_ready(
        siren_forward(x2, weights32, biases32, sine_flags=sine_flags32, tm=200))
    ref3 = siren_reference(x2, params)
    assert out3.shape == (N2, out_features)
    assert jnp.allclose(out3, ref3, atol=2e-4, rtol=2e-4), \
        "f32 path mismatch vs PyTorch-faithful reference"

    print("KERNEL_OK")
</pallas_src>

<mosaic_0001>
module attributes {stable_mosaic.version = 11 : i64} {
  func.func @kernel(%arg0: i32, %arg1: memref<128x2xf32, #tpu.memory_space<vmem>>, %arg2: memref<2x128xf32, #tpu.memory_space<vmem>>, %arg3: memref<1x128xf32, #tpu.memory_space<vmem>>, %arg4: memref<128x128xbf16, #tpu.memory_space<vmem>>, %arg5: memref<1x128xf32, #tpu.memory_space<vmem>>, %arg6: memref<128x128xbf16, #tpu.memory_space<vmem>>, %arg7: memref<1x128xf32, #tpu.memory_space<vmem>>, %arg8: memref<128x1xbf16, #tpu.memory_space<vmem>>, %arg9: memref<1x1xf32, #tpu.memory_space<vmem>>, %arg10: memref<128x1xf32, #tpu.memory_space<vmem>>, %arg11: memref<128x128xbf16, #tpu.memory_space<vmem>>) attributes {dimension_semantics = [#tpu.dimension_semantics<parallel>], iteration_bounds = array<i64: 2>, scalar_prefetch = 0 : i64, scratch_operands = 1 : i64, tpu.core_type = #tpu.core_type<tc>, window_params = [{transform_indices = @transform_0, window_bounds = array<i64: 128, 2>}, {pipeline_mode = #tpu.pipeline_mode<synchronous>, transform_indices = @transform_1, window_bounds = array<i64: 2, 128>}, {pipeline_mode = #tpu.pipeline_mode<synchronous>, transform_indices = @transform_2, window_bounds = array<i64: 1, 128>}, {pipeline_mode = #tpu.pipeline_mode<synchronous>, transform_indices = @transform_3, window_bounds = array<i64: 128, 128>}, {pipeline_mode = #tpu.pipeline_mode<synchronous>, transform_indices = @transform_4, window_bounds = array<i64: 1, 128>}, {pipeline_mode = #tpu.pipeline_mode<synchronous>, transform_indices = @transform_5, window_bounds = array<i64: 128, 128>}, {pipeline_mode = #tpu.pipeline_mode<synchronous>, transform_indices = @transform_6, window_bounds = array<i64: 1, 128>}, {pipeline_mode = #tpu.pipeline_mode<synchronous>, transform_indices = @transform_7, window_bounds = array<i64: 128, 1>}, {pipeline_mode = #tpu.pipeline_mode<synchronous>, transform_indices = @transform_8, window_bounds = array<i64: 1, 1>}, {transform_indices = @transform_9, window_bounds = array<i64: 128, 1>}]} {
    %c0 = arith.constant 0 : index
    %c0_0 = arith.constant 0 : index
    %0 = vector.load %arg1[%c0, %c0_0] : memref<128x2xf32, #tpu.memory_space<vmem>>, vector<128x2xf32>
    %c0_1 = arith.constant 0 : index
    %c0_2 = arith.constant 0 : index
    %1 = vector.load %arg2[%c0_1, %c0_2] : memref<2x128xf32, #tpu.memory_space<vmem>>, vector<2x128xf32>
    %c0_3 = arith.constant 0 : index
    %c0_4 = arith.constant 0 : index
    %2 = vector.load %arg3[%c0_3, %c0_4] : memref<1x128xf32, #tpu.memory_space<vmem>>, vector<1x128xf32>
    %3 = vector.extract_strided_slice %0 {offsets = [0, 0], sizes = [128, 1], strides = [1, 1]} : vector<128x2xf32> to vector<128x1xf32>
    %4 = vector.extract_strided_slice %1 {offsets = [0, 0], sizes = [1, 128], strides = [1, 1]} : vector<2x128xf32> to vector<1x128xf32>
    %5 = vector.broadcast %3 : vector<128x1xf32> to vector<128x128xf32>
    %6 = vector.broadcast %4 : vector<1x128xf32> to vector<128x128xf32>
    %7 = arith.mulf %5, %6 : vector<128x128xf32>
    %8 = vector.broadcast %2 : vector<1x128xf32> to vector<128x128xf32>
    %9 = arith.addf %8, %7 : vector<128x128xf32>
    %10 = vector.extract_strided_slice %0 {offsets = [0, 1], sizes = [128, 1], strides = [1, 1]} : vector<128x2xf32> to vector<128x1xf32>
    %11 = vector.extract_strided_slice %1 {offsets = [1, 0], sizes = [1, 128], strides = [1, 1]} : vector<2x128xf32> to vector<1x128xf32>
    %12 = vector.broadcast %10 : vector<128x1xf32> to vector<128x128xf32>
    %13 = vector.broadcast %11 : vector<1x128xf32> to vector<128x128xf32>
    %14 = arith.mulf %12, %13 : vector<128x128xf32>
    %15 = arith.addf %9, %14 : vector<128x128xf32>
    %16 = math.sin %15 : vector<128x128xf32>
    %17 = arith.truncf %16 : vector<128x128xf32> to vector<128x128xbf16>
    %c0_5 = arith.constant 0 : index
    %c0_6 = arith.constant 0 : index
    %18 = vector.load %arg11[%c0_5, %c0_6] : memref<128x128xbf16, #tpu.memory_space<vmem>>, vector<128x128xbf16>
    tpu.vector_store %arg11[%c0_5, %c0_6], %17 {strides = array<i32>} : memref<128x128xbf16, #tpu.memory_space<vmem>>, vector<128x128xbf16>,
    %c0_7 = arith.constant 0 : index
    %c0_8 = arith.constant 0 : index
    %19 = vector.load %arg11[%c0_7, %c0_8] : memref<128x128xbf16, #tpu.memory_space<vmem>>, vector<128x128xbf16>
    %c0_9 = arith.constant 0 : index
    %c0_10 = arith.constant 0 : index
    %20 = vector.load %arg4[%c0_9, %c0_10] : memref<128x128xbf16, #tpu.memory_space<vmem>>, vector<128x128xbf16>
    %cst = arith.constant dense<0.000000e+00> : vector<128x128xf32>
    %21 = tpu.matmul %19, %20, %cst {dimension_numbers = #tpu.dot_dimension_numbers<[1], [0], [0], [1], [0, 0, 1, 1], [], []>} : vector<128x128xbf16>, vector<128x128xbf16>, vector<128x128xf32> -> vector<128x128xf32>
    %c0_11 = arith.constant 0 : index
    %c0_12 = arith.constant 0 : index
    %22 = vector.load %arg5[%c0_11, %c0_12] : memref<1x128xf32, #tpu.memory_space<vmem>>, vector<1x128xf32>
    %23 = vector.broadcast %22 : vector<1x128xf32> to vector<128x128xf32>
    %24 = arith.addf %21, %23 : vector<128x128xf32>
    %25 = math.sin %24 : vector<128x128xf32>
    %26 = arith.truncf %25 : vector<128x128xf32> to vector<128x128xbf16>
    %c0_13 = arith.constant 0 : index
    %c0_14 = arith.constant 0 : index
    %27 = vector.load %arg11[%c0_13, %c0_14] : memref<128x128xbf16, #tpu.memory_space<vmem>>, vector<128x128xbf16>
    tpu.vector_store %arg11[%c0_13, %c0_14], %26 {strides = array<i32>} : memref<128x128xbf16, #tpu.memory_space<vmem>>, vector<128x128xbf16>,
    %c0_15 = arith.constant 0 : index
    %c0_16 = arith.constant 0 : index
    %28 = vector.load %arg11[%c0_15, %c0_16] : memref<128x128xbf16, #tpu.memory_space<vmem>>, vector<128x128xbf16>
    %c0_17 = arith.constant 0 : index
    %c0_18 = arith.constant 0 : index
    %29 = vector.load %arg6[%c0_17, %c0_18] : memref<128x128xbf16, #tpu.memory_space<vmem>>, vector<128x128xbf16>
    %cst_19 = arith.constant dense<0.000000e+00> : vector<128x128xf32>
    %30 = tpu.matmul %28, %29, %cst_19 {dimension_numbers = #tpu.dot_dimension_numbers<[1], [0], [0], [1], [0, 0, 1, 1], [], []>} : vector<128x128xbf16>, vector<128x128xbf16>, vector<128x128xf32> -> vector<128x128xf32>
    %c0_20 = arith.constant 0 : index
    %c0_21 = arith.constant 0 : index
    %31 = vector.load %arg7[%c0_20, %c0_21] : memref<1x128xf32, #tpu.memory_space<vmem>>, vector<1x128xf32>
    %32 = vector.broadcast %31 : vector<1x128xf32> to vector<128x128xf32>
    %33 = arith.addf %30, %32 : vector<128x128xf32>
    %34 = math.sin %33 : vector<128x128xf32>
    %35 = arith.truncf %34 : vector<128x128xf32> to vector<128x128xbf16>
    %c0_22 = arith.constant 0 : index
    %c0_23 = arith.constant 0 : index
    %36 = vector.load %arg11[%c0_22, %c0_23] : memref<128x128xbf16, #tpu.memory_space<vmem>>, vector<128x128xbf16>
    tpu.vector_store %arg11[%c0_22, %c0_23], %35 {strides = array<i32>} : memref<128x128xbf16, #tpu.memory_space<vmem>>, vector<128x128xbf16>,
    %c0_24 = arith.constant 0 : index
    %c0_25 = arith.constant 0 : index
    %37 = vector.load %arg11[%c0_24, %c0_25] : memref<128x128xbf16, #tpu.memory_space<vmem>>, vector<128x128xbf16>
    %c0_26 = arith.constant 0 : index
    %c0_27 = arith.constant 0 : index
    %38 = vector.load %arg8[%c0_26, %c0_27] : memref<128x1xbf16, #tpu.memory_space<vmem>>, vector<128x1xbf16>
    %cst_28 = arith.constant dense<0.000000e+00> : vector<128x1xf32>
    %39 = tpu.matmul %37, %38, %cst_28 {dimension_numbers = #tpu.dot_dimension_numbers<[1], [0], [0], [1], [0, 0, 1, 1], [], []>} : vector<128x128xbf16>, vector<128x1xbf16>, vector<128x1xf32> -> vector<128x1xf32>
    %c0_29 = arith.constant 0 : index
    %c0_30 = arith.constant 0 : index
    %40 = vector.load %arg9[%c0_29, %c0_30] : memref<1x1xf32, #tpu.memory_space<vmem>>, vector<1x1xf32>
    %41 = vector.broadcast %40 : vector<1x1xf32> to vector<128x1xf32>
    %42 = arith.addf %39, %41 : vector<128x1xf32>
    %c0_31 = arith.constant 0 : index
    %c0_32 = arith.constant 0 : index
    %43 = vector.load %arg10[%c0_31, %c0_32] : memref<128x1xf32, #tpu.memory_space<vmem>>, vector<128x1xf32>
    tpu.vector_store %arg10[%c0_31, %c0_32], %42 {strides = array<i32>} : memref<128x1xf32, #tpu.memory_space<vmem>>, vector<128x1xf32>,
    return
  }
  func.func @transform_0(%arg0: i32) -> (i32, i32) {
    %c0_i32 = arith.constant 0 : i32
    %c0_i32_0 = arith.constant 0 : i32
    return %arg0, %c0_i32 : i32, i32
  }
  func.func @transform_1(%arg0: i32) -> (i32, i32) {
    %c0_i32 = arith.constant 0 : i32
    %c0_i32_0 = arith.constant 0 : i32
    %c0_i32_1 = arith.constant 0 : i32
    return %c0_i32, %c0_i32_0 : i32, i32
  }
  func.func @transform_2(%arg0: i32) -> (i32, i32) {
    %c0_i32 = arith.constant 0 : i32
    %c0_i32_0 = arith.constant 0 : i32
    %c0_i32_1 = arith.constant 0 : i32
    return %c0_i32, %c0_i32_0 : i32, i32
  }
  func.func @transform_3(%arg0: i32) -> (i32, i32) {
    %c0_i32 = arith.constant 0 : i32
    %c0_i32_0 = arith.constant 0 : i32
    %c0_i32_1 = arith.constant 0 : i32
    return %c0_i32, %c0_i32_0 : i32, i32
  }
  func.func @transform_4(%arg0: i32) -> (i32, i32) {
    %c0_i32 = arith.constant 0 : i32
    %c0_i32_0 = arith.constant 0 : i32
    %c0_i32_1 = arith.constant 0 : i32
    return %c0_i32, %c0_i32_0 : i32, i32
  }
  func.func @transform_5(%arg0: i32) -> (i32, i32) {
    %c0_i32 = arith.constant 0 : i32
    %c0_i32_0 = arith.constant 0 : i32
    %c0_i32_1 = arith.constant 0 : i32
    return %c0_i32, %c0_i32_0 : i32, i32
  }
  func.func @transform_6(%arg0: i32) -> (i32, i32) {
    %c0_i32 = arith.constant 0 : i32
    %c0_i32_0 = arith.constant 0 : i32
    %c0_i32_1 = arith.constant 0 : i32
    return %c0_i32, %c0_i32_0 : i32, i32
  }
  func.func @transform_7(%arg0: i32) -> (i32, i32) {
    %c0_i32 = arith.constant 0 : i32
    %c0_i32_0 = arith.constant 0 : i32
    %c0_i32_1 = arith.constant 0 : i32
    return %c0_i32, %c0_i32_0 : i32, i32
  }
  func.func @transform_8(%arg0: i32) -> (i32, i32) {
    %c0_i32 = arith.constant 0 : i32
    %c0_i32_0 = arith.constant 0 : i32
    %c0_i32_1 = arith.constant 0 : i32
    return %c0_i32, %c0_i32_0 : i32, i32
  }
  func.func @transform_9(%arg0: i32) -> (i32, i32) {
    %c0_i32 = arith.constant 0 : i32
    %c0_i32_0 = arith.constant 0 : i32
    return %arg0, %c0_i32 : i32, i32
  }
}

</mosaic_0001>

<bundles_post_ra>
// kernel: siren_forward.1
= control target key start
LH: loop header
LB: loop body
LE: loop exit
PB: predicated region body
PF: predicated region fallthrough
CT: control target
= control target key end

     0   :  { %s7118_s11 = smov 0   ;;  %s12406_s0 = inlined_call_operand.vmem [shape: f32[256,2], index: 0, kind: input, shape index: {}]   ;;  %s12407_s1 = inlined_call_operand.vmem [shape: f32[2,128], index: 1, kind: input, shape index: {}]   ;;  %s12408_s2 = inlined_call_operand.vmem [shape: f32[1,128], index: 2, kind: input, shape index: {}]   ;;  %s12409_s3 = inlined_call_operand.vmem [shape: bf16[128,128], index: 3, kind: input, shape index: {}]   ;;  %s12410_s4 = inlined_call_operand.vmem [shape: f32[1,128], index: 4, kind: input, shape index: {}]   ;;  %s12411_s5 = inlined_call_operand.vmem [shape: bf16[128,128], index: 5, kind: input, shape index: {}]   ;;  %s12412_s6 = inlined_call_operand.vmem [shape: f32[1,128], index: 6, kind: input, shape index: {}]   ;;  %s12413_s7 = inlined_call_operand.vmem [shape: bf16[128,1], index: 7, kind: input, shape index: {}]   ;;  %s12414_s8 = inlined_call_operand.<no memory space> [shape: f32[1,1], index: 8, kind: input, shape index: {}]   ;;  %s12415_s9 = inlined_call_operand.vmem [shape: f32[256,1], index: 9, kind: output, shape index: {}]  }
   0x1   :  { %v14_v0 = vstv %s12414_s8 }
   0x2   :  { %15 = vst [vmem:[#allocation3] sm:$0x1] %v14_v0 }
   0x3 LB: > { %s6220_s12 = sadd.s32 4294967295, %s7055_s11   ;;  %p6224_p0 = scmp.ge.s32.totalorder %s7055_s11, 1  ;;  %s7055_s11 = sphi %s7118_s11, %s21_s11  }
   0x4   : > { %p290_p1 = scmp.lt.s32.totalorder %s7055_s11, 3 }
   0x6   : > { %p291_p2 = pnand %p6224_p0, %p290_p1 }
   0x8   : > { %294 = sbr.rel (%p291_p2) target bundleno = 1939 (0x793), region = 56 }
   0xf   : > { %s6225_s13 = sshll.u32 %s6220_s12, 4  ;;  %v7057_v1 = vmov 0   ;;  %v7058_v8 = vmov 1   ;;  %v437_v19 = vlaneseq  ;;  %v355_v24 = vld [vmem:[%s12407_s1] sm:$0x3] }
  0x10   : > { %6820 = vset.pattern.permute.xlu1 %v7057_v1  ;;  %6819 = vset.pattern.permute.xlu0 %v7057_v1  ;;  %p327_p3 = scmp.lt.s32.totalorder %s6225_s13, 31  ;;  %v7169_v32 = vld [vmem:[%s12408_s2] ss:$0 sm:$0xff]  ;;  %v12436_v54 = vmov 920167782  }
  0x11   : > { %v438_v20 = vshrl.u32 %v437_v19, 7  ;;  %v12432_v58 = vmov 2102212464   ;;  %v12434_v60 = vmov 1326507024  }
  0x12   : > { %s13155_s13 = smov (!%p327_p3, %s6225_s13), 31  ;;  %v12422_v63 = vmov 2475754826  }
  0x13   : > { %s6226_s8 = sshll.u32 %s13155_s13, 3  ;;  %v439_v23 = vsub.s32 0, %v438_v20  ;;  %v545_v28 = vsub.s32 1, %v438_v20 }
  0x14   : > { %s7134_s16 = scalar_lea.vmem %s12406_s0, %s6226_s8  ;;  %s12369_s26 = scalar_lea.vmem %s12415_s9, %s6226_s8 }
  0x15   : > { %v341_v2 = vld [vmem:[%s7134_s16 + $0x10] sm:$0xff]  ;;  %v339_v3 = vld [vmem:[%s7134_s16] sm:$0xff]  ;;  %v342_v4 = vld [vmem:[%s7134_s16 + $0x18] sm:$0xff]  ;;  %v7159_v27 = vrot.slane %v355_v24, %v439_v23  ;;  %v7171_v33 = vrot.slane %v355_v24, %v545_v28 }
  0x16   : > { %369 = vperm.xlu1 %6820, %v341_v2   ;;  %359 = vperm.xlu0 %6819, %v339_v3   ;;  %v340_v5 = vld [vmem:[%s7134_s16 + $0x8] sm:$0xff]  ;;  %v343_v10 = vld [vmem:[%s7134_s16 + $0x20] sm:$0xff]  ;;  %v345_v11 = vld [vmem:[%s7134_s16 + $0x30] sm:$0xff] }
  0x17   : > { %v344_v6 = vld [vmem:[%s7134_s16 + $0x28] sm:$0xff]  ;;  %v346_v12 = vld [vmem:[%s7134_s16 + $0x38] sm:$0xff]  ;;  %v347_v13 = vld [vmem:[%s7134_s16 + $0x40] sm:$0xff] }
  0x18   : > { %v348_v7 = vld [vmem:[%s7134_s16 + $0x48] sm:$0xff]  ;;  %v350_v14 = vld [vmem:[%s7134_s16 + $0x58] sm:$0xff]  ;;  %v349_v15 = vld [vmem:[%s7134_s16 + $0x50] sm:$0xff] }
  0x19   : > { %v352_v9 = vld [vmem:[%s7134_s16 + $0x68] sm:$0xff]  ;;  %v351_v16 = vld [vmem:[%s7134_s16 + $0x60] sm:$0xff]  ;;  %v354_v17 = vld [vmem:[%s7134_s16 + $0x78] sm:$0xff] }
  0x1a   : > { %374 = vperm.xlu1 %6820, %v342_v4   ;;  %364 = vperm.xlu0 %6819, %v340_v5   ;;  %v353_v18 = vld [vmem:[%s7134_s16 + $0x70] sm:$0xff] }
  0x1e   : > { %6821 = vset.pattern.permute.xlu1 %v7058_v8  ;;  %384 = vperm.xlu0 %6819, %v344_v6  }
  0x1f   : > { %484 = vperm.xlu1 %6821, %v340_v5  }
  0x22   : > { %404 = vperm.xlu0 %6819, %v348_v7  }
  0x23   : > { %488 = vperm.xlu1 %6821, %v341_v2  }
  0x26   : > { %424 = vperm.xlu0 %6819, %v352_v9  }
  0x27   : > { %6822 = vset.pattern.permute.xlu1 %v7057_v1 }
  0x28   : > { %379 = vperm.xlu1 %6822, %v343_v10  }
  0x2a   : > { %6827 = vset.pattern.permute.xlu0 %v7058_v8 }
  0x2b   : > { %480 = vperm.xlu0 %6827, %v339_v3  }
  0x2c   : > { %389 = vperm.xlu1 %6822, %v345_v11  }
  0x2f   : > { %492 = vperm.xlu0 %6827, %v342_v4  }
  0x30   : > { %394 = vperm.xlu1 %6822, %v346_v12  }
  0x33   : > { %496 = vperm.xlu0 %6827, %v343_v10  }
  0x34   : > { %6823 = vset.pattern.permute.xlu1 %v7058_v8 }
  0x35   : > { %500 = vperm.xlu1 %6823, %v344_v6  }
  0x37   : > { %508 = vperm.xlu0 %6827, %v346_v12  }
  0x39   : > { %504 = vperm.xlu1 %6823, %v345_v11  }
  0x3b   : > { %512 = vperm.xlu0 %6827, %v347_v13  }
  0x3d   : > { %6824 = vset.pattern.permute.xlu1 %v7057_v1 }
  0x3e   : > { %399 = vperm.xlu1 %6824, %v347_v13  }
  0x3f   : > { %524 = vperm.xlu0 %6827, %v350_v14  }
  0x42   : > { %409 = vperm.xlu1 %6824, %v349_v15  }
  0x43   : > { %528 = vperm.xlu0 %6827, %v351_v16  }
  0x46   : > { %414 = vperm.xlu1 %6824, %v350_v14  }
  0x47   : > { %540 = vperm.xlu0 %6827, %v354_v17  }
  0x4a   : > { %6825 = vset.pattern.permute.xlu1 %v7058_v8 }
  0x4b   : > { %516 = vperm.xlu1 %6825, %v348_v7  }
  0x4f   : > { %520 = vperm.xlu1 %6825, %v349_v15  }
  0x53   : > { %6826 = vset.pattern.permute.xlu1 %v7057_v1  ;;  %v12426_v1 = vmov 2131351028  }
  0x54   : > { %419 = vperm.xlu1 %6826, %v351_v16  }
  0x58   : > { %429 = vperm.xlu1 %6826, %v353_v18  }
  0x5c   : > { %434 = vperm.xlu1 %6826, %v354_v17  }
  0x60   : > { %6828 = vset.pattern.permute.xlu1 %v7058_v8 }
  0x61   : > { %532 = vperm.xlu1 %6828, %v352_v9   ;;  %v12424_v9 = vmov 683565275  }
  0x65   : > { %536 = vperm.xlu1 %6828, %v353_v18  }
  0x95   : > { %v370_v21 = vpop.permute.xlu1 %369  ;;  %v7152_v22 = vpop.permute.xlu0 %359 }
  0x96   : > { %v443_v31 = vmul.f32 %v7159_v27, %v370_v21 }
  0x98   : > { %v465_v36 = vadd.f32 %v7169_v32, %v443_v31 }
  0x99   : > { %v375_v25 = vpop.permute.xlu1 %374  ;;  %v7157_v26 = vpop.permute.xlu0 %364 }
  0x9a   : > { %v444_v47 = vmul.f32 %v7159_v27, %v375_v25 }
  0x9c   : > { %v466_v51 = vadd.f32 %v7169_v32, %v444_v47 }
  0x9d   : > { %v7161_v29 = vpop.permute.xlu0 %384 }
  0x9e   : > { %v7163_v30 = vpop.permute.xlu1 %484  ;;  %v446_v47 = vmul.f32 %v7159_v27, %v7161_v29 }
  0xa1   : > { %v7173_v34 = vpop.permute.xlu0 %404 }
  0xa2   : > { %v489_v35 = vpop.permute.xlu1 %488 }
  0xa3   : > { %v549_v37 = vmul.f32 %v7171_v33, %v489_v35 }
  0xa5   : > { %v7177_v38 = vadd.f32 %v549_v37, %v465_v36  ;;  %v7179_v39 = vpop.permute.xlu0 %424 }
  0xa7   : > { %12677 = vst [vmem:[#allocation4_spill] sm:$0xff] %v7177_v38  ;;  %v790_v40 = vand.u32 2139095040, %v7177_v38  ;;  %v380_v52 = vpop.permute.xlu1 %379  ;;  %v12420_v56 = vand.u32 2147483647, %v7177_v38 }
  0xa8   : > { %v445_v62 = vmul.f32 %v7159_v27, %v380_v52 }
  0xa9   : > { %v791_v41 = vshrl.u32 %v790_v40, 23  ;;  %v794_v8 = vand.u32 8388607, %v12420_v56 }
  0xaa   : > { %v7182_v42 = vpop.permute.xlu0 %480  ;;  %v467_v14 = vadd.f32 %v7169_v32, %v445_v62 }
  0xab   : > { %v6238_v43 = vadd.s32 4294967169, %v791_v41  ;;  %v7213_v24 = vpop.permute.xlu1 %389  ;;  %v795_v31 = vor.u32 8388608, %v794_v8 }
  0xad   : > { %v797_v44 = vadd.s32 1, %v6238_v43 }
  0xae   : > { %v493_v46 = vpop.permute.xlu0 %492 }
  0xaf   : > { %vm798_vm0 = vcmp.gt.s32.totalorder %v797_v44, 0  ;;  %v550_v49 = vmul.f32 %v7171_v33, %v493_v46 }
  0xb0   : > { %v799_v45 = vsel %vm798_vm0, %v797_v44, 0 }
  0xb1   : > { %v801_v48 = vand.u32 31, %v799_v45  ;;  %v7187_v53 = vadd.f32 %v550_v49, %v466_v51  ;;  %v7191_v57 = vshrl.u32 %v799_v45, 5  ;;  %v7234_v49 = vshll.u32 %v795_v31, 8  ;;  %v395_v51 = vpop.permute.xlu1 %394 }
  0xb2   : > { %v497_v5 = vpop.permute.xlu0 %496 }
  0xb3   : > { %v802_v50 = vsub.s32 32, %v801_v48  ;;  %12678 = vst [vmem:[#allocation5_spill] sm:$0xff] %v7187_v53  ;;  %v813_v59 = vshll.u32 %v12432_v58, %v801_v48  ;;  %v894_v4 = vand.u32 2139095040, %v7187_v53  ;;  %v816_v7 = vshll.u32 %v12436_v54, %v801_v48 }
  0xb4   : > { %v804_v10 = vshll.u32 %v12424_v9, %v801_v48  ;;  %v807_v11 = vshll.u32 %v12422_v63, %v801_v48  ;;  %v810_v12 = vshll.u32 %v12426_v1, %v801_v48  ;;  %v551_v16 = vmul.f32 %v7171_v33, %v497_v5 }
  0xb5   : > { %v814_v55 = vshrl.u32 %v12436_v54, %v802_v50  ;;  %v817_v61 = vshrl.u32 %v12434_v60, %v802_v50  ;;  %v805_v0 = vshrl.u32 %v12422_v63, %v802_v50  ;;  %v808_v2 = vshrl.u32 %v12426_v1, %v802_v50 }
  0xb6   : > { %v811_v3 = vshrl.u32 %v12432_v58, %v802_v50  ;;  %v895_v15 = vshrl.u32 %v894_v4, 23  ;;  %vm822_vm1 = vcmp.lt.s32.totalorder %v7191_v57, 4  ;;  %v7211_v23 = vadd.f32 %v551_v16, %v467_v14 }
  0xb7   : > { %v815_v6 = vor.u32 %v814_v55, %v813_v59  ;;  %v818_v13 = vor.u32 %v817_v61, %v816_v7  ;;  %v806_v17 = vor.u32 %v805_v0, %v804_v10  ;;  %v809_v18 = vor.u32 %v808_v2, %v807_v11 }
  0xb8   : > { %v812_v19 = vor.u32 %v811_v3, %v810_v12  ;;  %v6242_v21 = vadd.s32 4294967169, %v895_v15  ;;  %12679 = vst [vmem:[#allocation6_spill] sm:$0xff] %v7211_v23  ;;  %vm819_vm2 = vcmp.lt.s32.totalorder %v7191_v57, 1  ;;  %vm821_vm3 = vcmp.lt.s32.totalorder %v7191_v57, 3 }
  0xb9   : > { %v828_v20 = vsel %vm822_vm1, %v815_v6, 920167782  ;;  %v832_v25 = vsel %vm822_vm1, %v818_v13, 1326507024  ;;  %v827_v35 = vsel %vm819_vm2, %v806_v17, %v809_v18  ;;  %v998_v37 = vand.u32 2139095040, %v7211_v23 }
  0xba   : > { %v901_v28 = vadd.s32 1, %v6242_v21  ;;  %v829_v36 = vsel %vm821_vm3, %v812_v19, %v828_v20  ;;  %vm820_vm4 = vcmp.lt.s32.totalorder %v7191_v57, 2  ;;  %v831_v40 = vsel %vm819_vm2, %v809_v18, %v812_v19  ;;  %v501_v21 = vpop.permute.xlu1 %500 }
  0xbb   : > { %v833_v41 = vsel %vm821_vm3, %v815_v6, %v832_v25  ;;  %v999_v44 = vshrl.u32 %v998_v37, 23  ;;  %v830_v45 = vsel %vm820_vm4, %v827_v35, %v829_v36  ;;  %v803_v48 = vshrl.u32 %v12424_v9, %v802_v50 }
  0xbc   : > { %vm902_vm5 = vcmp.gt.s32.totalorder %v901_v28, 0  ;;  %v824_v52 = vsel %vm822_vm1, %v812_v19, 2102212464  ;;  %v834_v55 = vsel %vm820_vm4, %v831_v40, %v833_v41  ;;  %v12419_v59 = vand.u32 2147483647, %v7187_v53 }
  0xbd   : > { %v903_v43 = vsel %vm902_vm5, %v901_v28, 0  ;;  %v7244_v62 = vmul.u32.u64.low %v7234_v49, %v830_v45  ;;  %v7245_v0 = vmul.u32.u64.high %v7234_v49, %v830_v45, %v7244_v62  ;;  %v6246_v50 = vadd.s32 4294967169, %v999_v44 }
  0xbe   : > { %v905_v46 = vand.u32 31, %v903_v43  ;;  %v7248_v29 = vshrl.u32 %v903_v43, 5  ;;  %v7264_v11 = vmul.u32.u64.low %v7234_v49, %v834_v55  ;;  %v7265_v12 = vmul.u32.u64.high %v7234_v49, %v834_v55, %v7264_v11 }
  0xbf   : > { %v898_v15 = vand.u32 8388607, %v12419_v59  ;;  %v1005_v31 = vadd.s32 1, %v6246_v50  ;;  %v442_v35 = vmul.f32 %v7159_v27, %v7157_v26  ;;  %v468_v40 = vadd.f32 %v7169_v32, %v446_v47  ;;  %v509_v47 = vpop.permute.xlu0 %508 }
  0xc0   : > { %v7241_v61 = vsub.s32 32, %v905_v46  ;;  %v908_v2 = vshll.u32 %v12424_v9, %v905_v46  ;;  %v917_v5 = vshll.u32 %v12432_v58, %v905_v46  ;;  %v920_v8 = vshll.u32 %v12436_v54, %v905_v46 }
  0xc1   : > { %v911_v13 = vshll.u32 %v12422_v63, %v905_v46  ;;  %v914_v14 = vshll.u32 %v12426_v1, %v905_v46  ;;  %vm926_vm6 = vcmp.lt.s32.totalorder %v7248_v29, 4  ;;  %v823_v41 = vsel %vm819_vm2, %v803_v48, %v806_v17 }
  0xc2   : > { %v909_v3 = vshrl.u32 %v12422_v63, %v7241_v61  ;;  %v912_v4 = vshrl.u32 %v12426_v1, %v7241_v61  ;;  %v915_v6 = vshrl.u32 %v12432_v58, %v7241_v61  ;;  %v918_v7 = vshrl.u32 %v12436_v54, %v7241_v61 }
  0xc3   : > { %v921_v10 = vshrl.u32 %v12434_v60, %v7241_v61  ;;  %v825_v43 = vsel %vm821_vm3, %v809_v18, %v824_v52  ;;  %v552_v44 = vmul.f32 %v7171_v33, %v501_v21  ;;  %v899_v45 = vor.u32 8388608, %v898_v15 }
  0xc4   : > { %v7271_v16 = vor.u32 %v909_v3, %v908_v2  ;;  %v919_v19 = vor.u32 %v918_v7, %v917_v5  ;;  %v7273_v25 = vor.u32 %v912_v4, %v911_v13  ;;  %v916_v28 = vor.u32 %v915_v6, %v914_v14 }
  0xc5   : > { %v922_v20 = vor.u32 %v921_v10, %v920_v8  ;;  %vm923_vm7 = vcmp.lt.s32.totalorder %v7248_v29, 1  ;;  %vm925_vm8 = vcmp.lt.s32.totalorder %v7248_v29, 3  ;;  %vm1006_vm9 = vcmp.gt.s32.totalorder %v1005_v31, 0 }
  0xc6   : > { %v932_v36 = vsel %vm926_vm6, %v919_v19, 920167782  ;;  %v931_v26 = vsel %vm923_vm7, %v7271_v16, %v7273_v25  ;;  %v935_v17 = vsel %vm923_vm7, %v7273_v25, %v916_v28  ;;  %v845_v48 = vadd.s32 1, %v7245_v0 }
  0xc7   : > { %v936_v37 = vsel %vm926_vm6, %v922_v20, 1326507024  ;;  %v933_v46 = vsel %vm925_vm8, %v916_v28, %v932_v36  ;;  %v448_v52 = vmul.f32 %v7159_v27, %v395_v51  ;;  %v1007_v55 = vsel %vm1006_vm9, %v1005_v31, 0 }
  0xc8   : > { %v937_v18 = vsel %vm925_vm8, %v919_v19, %v936_v37  ;;  %v826_v50 = vsel %vm820_vm4, %v823_v41, %v825_v43  ;;  %vm844_vm10 = vc.u32 %v7265_v12, %v7244_v62  ;;  %vm924_vm11 = vcmp.lt.s32.totalorder %v7248_v29, 2 }
  0xc9   : > { %v1009_v2 = vand.u32 31, %v1007_v55  ;;  %v934_v3 = vsel %vm924_vm11, %v931_v26, %v933_v46  ;;  %v938_v4 = vsel %vm924_vm11, %v935_v17, %v937_v18  ;;  %v12418_v5 = vand.u32 2147483647, %v7211_v23 }
  0xca   : > { %v554_v51 = vmul.f32 %v7171_v33, %v509_v47  ;;  %v7315_v6 = vadd.f32 %v7169_v32, %v442_v35  ;;  %v7317_v57 = vshll.u32 %v899_v45, 8  ;;  %v7319_v8 = vadd.f32 %v552_v44, %v468_v40 }
  0xcb   : > { %v1010_v7 = vsub.s32 32, %v1009_v2  ;;  %v548_v10 = vmul.f32 %v7171_v33, %v7163_v30  ;;  %v842_v11 = vmul.u32 %v7234_v49, %v826_v50  ;;  %v846_v13 = vsel %vm844_vm10, %v845_v48, %v7245_v0 }
  0xcc   : > { %12680 = vst [vmem:[#allocation7_spill] sm:$0xff] %v7319_v8  ;;  %v470_v14 = vadd.f32 %v7169_v32, %v448_v52  ;;  %v7327_v15 = vmul.u32.u64.low %v7317_v57, %v938_v4  ;;  %v7328_v19 = vmul.u32.u64.high %v7317_v57, %v938_v4, %v7327_v15  ;;  %v1002_v31 = vand.u32 8388607, %v12418_v5 }
  0xcd   : > { %v7331_v20 = vmul.u32.u64.low %v7317_v57, %v934_v3  ;;  %v7332_v21 = vmul.u32.u64.high %v7317_v57, %v934_v3, %v7331_v20  ;;  %v1013_v30 = vshrl.u32 %v12422_v63, %v1010_v7  ;;  %v1016_v49 = vshrl.u32 %v12426_v1, %v1010_v7 }
  0xce   : > { %v7339_v35 = vadd.f32 %v554_v51, %v470_v14  ;;  %v1012_v0 = vshll.u32 %v12424_v9, %v1009_v2  ;;  %v1015_v36 = vshll.u32 %v12422_v63, %v1009_v2  ;;  %v1019_v37 = vshrl.u32 %v12432_v58, %v1010_v7 }
  0xcf   : > { %v1102_v40 = vand.u32 2139095040, %v7319_v8  ;;  %v1008_v41 = vshrl.u32 %v1007_v55, 5  ;;  %v1018_v43 = vshll.u32 %v12426_v1, %v1009_v2  ;;  %v1021_v44 = vshll.u32 %v12432_v58, %v1009_v2 }
  0xd0   : > { %v1022_v45 = vshrl.u32 %v12436_v54, %v1010_v7  ;;  %v907_v26 = vshrl.u32 %v12424_v9, %v7241_v61  ;;  %v928_v46 = vsel %vm926_vm6, %v916_v28, 2102212464  ;;  %v1014_v17 = vor.u32 %v1013_v30, %v1012_v0 }
  0xd1   : > { %v1017_v18 = vor.u32 %v1016_v49, %v1015_v36  ;;  %v1020_v47 = vor.u32 %v1019_v37, %v1018_v43  ;;  %v1024_v52 = vshll.u32 %v12436_v54, %v1009_v2  ;;  %v1025_v55 = vshrl.u32 %v12434_v60, %v1010_v7 }
  0xd2   : > { %v1023_v48 = vor.u32 %v1022_v45, %v1021_v44  ;;  %v7354_v50 = vadd.s32 %v846_v13, %v842_v11  ;;  %v927_v3 = vsel %vm923_vm7, %v907_v26, %v7271_v16  ;;  %v1003_v4 = vor.u32 8388608, %v1002_v31 }
  0xd3   : > { %v12417_v61 = vand.u32 2147483647, %v7319_v8  ;;  %v929_v28 = vsel %vm925_vm8, %v7273_v25, %v928_v46  ;;  %v1026_v51 = vor.u32 %v1025_v55, %v1024_v52  ;;  %vm1027_vm12 = vcmp.lt.s32.totalorder %v1008_v41, 1 }
  0xd4   : > { %v1103_v14 = vshrl.u32 %v1102_v40, 23  ;;  %vm948_vm13 = vc.u32 %v7328_v19, %v7331_v20  ;;  %v949_v2 = vadd.s32 1, %v7332_v21  ;;  %vm1030_vm14 = vcmp.lt.s32.totalorder %v1008_v41, 4 }
  0xd5   : > { %v1035_v11 = vsel %vm1027_vm12, %v1014_v17, %v1017_v18  ;;  %vm1029_vm15 = vcmp.lt.s32.totalorder %v1008_v41, 3  ;;  %v1036_v16 = vsel %vm1030_vm14, %v1023_v48, 920167782  ;;  %v1039_v13 = vsel %vm1027_vm12, %v1017_v18, %v1020_v47 }
  0xd6   : > { %v1040_v15 = vsel %vm1030_vm14, %v1026_v51, 1326507024  ;;  %v930_v31 = vsel %vm924_vm11, %v927_v3, %v929_v28  ;;  %vm1028_vm0 = vcmp.lt.s32.totalorder %v1008_v41, 2  ;;  %v1037_v25 = vsel %vm1029_vm15, %v1020_v47, %v1036_v16 }
  0xd7   : > { %v1043_v30 = vshll.u32 %v1003_v4, 8  ;;  %v1032_v49 = vsel %vm1030_vm14, %v1020_v47, 2102212464  ;;  %v1038_v0 = vsel %vm1028_vm0, %v1035_v11, %v1037_v25  ;;  %v1041_v36 = vsel %vm1029_vm15, %v1023_v48, %v1040_v15 }
  0xd8   : > { %v6250_v37 = vadd.s32 4294967169, %v1103_v14  ;;  %v848_v40 = vadd.s32 536870912, %v7354_v50  ;;  %v950_v43 = vsel %vm948_vm13, %v949_v2, %v7332_v21  ;;  %v1011_v29 = vshrl.u32 %v12424_v9, %v1010_v7 }
  0xd9   : > { %v1042_v44 = vsel %vm1028_vm0, %v1039_v13, %v1041_v36  ;;  %v7383_v46 = vmul.u32.u64.low %v1043_v30, %v1038_v0  ;;  %v7384_v47 = vmul.u32.u64.high %v1043_v30, %v1038_v0, %v7383_v46  ;;  %v946_v48 = vmul.u32 %v7317_v57, %v930_v31 }
  0xda   : > { %v7380_v45 = vmul.u32.u64.low %v1043_v30, %v1042_v44  ;;  %v7381_v26 = vmul.u32.u64.high %v1043_v30, %v1042_v44, %v7380_v45  ;;  %v1031_v52 = vsel %vm1027_vm12, %v1011_v29, %v1014_v17  ;;  %v1033_v55 = vsel %vm1029_vm15, %v1017_v18, %v1032_v49  ;;  %v6829_v44 = vld [vmem:[%s12409_s3] sm:$0xff]  }
  0xdb   : > { %v1109_v3 = vadd.s32 1, %v6250_v37  ;;  %v7391_v21 = vadd.f32 %v548_v10, %v7315_v6  ;;  %v447_v7 = vmul.f32 %v7159_v27, %v7213_v24  ;;  %v7395_v4 = vshrl.u32 %v848_v40, 30  ;;  %v505_v24 = vpop.permute.xlu1 %504  ;;  %6499 = vmatprep.subr.bf16.mxu0 %v6829_v44 }
  0xdc   : > { %v7397_v28 = vadd.s32 %v950_v43, %v946_v48  ;;  %v1310_v51 = vand.u32 2139095040, %v7339_v35  ;;  %v1034_v57 = vsel %vm1028_vm0, %v1031_v52, %v1033_v55  ;;  %vm1052_vm2 = vc.u32 %v7381_v26, %v7383_v46  ;;  %6500 = vmatpush3.bf16.msra.mxu0 %v6829_v44 }
  0xdd   : > { %12681 = vst [vmem:[#allocation8_spill] sm:$0xff] %v7395_v4  ;;  %vm1110_vm1 = vcmp.gt.s32.totalorder %v1109_v3, 0  ;;  %v1053_v17 = vadd.s32 1, %v7384_v47  ;;  %v1106_v6 = vand.u32 8388607, %v12417_v61  ;;  %v7408_v14 = vmul.f32 %v7159_v27, %v7152_v22 }
  0xde   : > { %v1111_v18 = vsel %vm1110_vm1, %v1109_v3, 0  ;;  %v686_v41 = vand.u32 2139095040, %v7391_v21  ;;  %v952_v11 = vadd.s32 536870912, %v7397_v28  ;;  %v1050_v16 = vmul.u32 %v1043_v30, %v1034_v57 }
  0xdf   : > { %v1113_v10 = vand.u32 31, %v1111_v18  ;;  %v1054_v2 = vsel %vm1052_vm2, %v1053_v17, %v7384_v47  ;;  %v850_v15 = vshll.u32 %v7395_v4, 30  ;;  %v469_v31 = vadd.f32 %v7169_v32, %v447_v7 }
  0xe0   : > { %v1311_v25 = vshrl.u32 %v1310_v51, 23  ;;  %v553_v49 = vmul.f32 %v7171_v33, %v505_v24  ;;  %v7416_v0 = vadd.s32 %v1054_v2, %v1050_v16  ;;  %v1107_v36 = vor.u32 8388608, %v1106_v6 }
  0xe1   : > { %v1114_v13 = vsub.s32 32, %v1113_v10  ;;  %v1116_v22 = vshll.u32 %v12424_v9, %v1113_v10  ;;  %v1119_v37 = vshll.u32 %v12422_v63, %v1113_v10  ;;  %v1122_v30 = vshll.u32 %v12426_v1, %v1113_v10 }
  0xe2   : > { %v7427_v45 = vshrl.u32 %v952_v11, 30  ;;  %v1112_v47 = vshrl.u32 %v1111_v18, 5  ;;  %v1125_v48 = vshll.u32 %v12432_v58, %v1113_v10  ;;  %v6258_v51 = vadd.s32 4294967169, %v1311_v25  ;;  %v6830_v25 = vld [vmem:[%s12409_s3 + $0x8] sm:$0xff]  }
  0xe3   : > { %v1117_v40 = vshrl.u32 %v12422_v63, %v1114_v13  ;;  %v1120_v43 = vshrl.u32 %v12426_v1, %v1114_v13  ;;  %v1123_v29 = vshrl.u32 %v12432_v58, %v1114_v13  ;;  %v1126_v52 = vshrl.u32 %v12436_v54, %v1114_v13  ;;  %6501 = vmatprep.subr.bf16.mxu0 %v6830_v25 }
  0xe4   : > { %12682 = vst [vmem:[#allocation9_spill] sm:$0xff] %v7427_v45  ;;  %v687_v57 = vshrl.u32 %v686_v41, 23  ;;  %v1056_v17 = vadd.s32 536870912, %v7416_v0  ;;  %v7432_v24 = vadd.f32 %v553_v49, %v469_v31  ;;  %v7435_v2 = vsub.s32 %v7354_v50, %v850_v15  ;;  %6502 = vmatpush3.bf16.msra.mxu0 %v6830_v25 }
  0xe5   : > { %v1118_v55 = vor.u32 %v1117_v40, %v1116_v22  ;;  %v1121_v3 = vor.u32 %v1120_v43, %v1119_v37  ;;  %v1124_v7 = vor.u32 %v1123_v29, %v1122_v30  ;;  %v1127_v6 = vor.u32 %v1126_v52, %v1125_v48 }
  0xe6   : > { %v1128_v18 = vshll.u32 %v12436_v54, %v1113_v10  ;;  %v1129_v11 = vshrl.u32 %v12434_v60, %v1114_v13  ;;  %v12416_v16 = vand.u32 2147483647, %v7339_v35  ;;  %v954_v41 = vshll.u32 %v7427_v45, 30 }
  0xe7   : > { %vm1131_vm3 = vcmp.lt.s32.totalorder %v1112_v47, 1  ;;  %vm1134_vm4 = vcmp.lt.s32.totalorder %v1112_v47, 4  ;;  %v1147_v31 = vshll.u32 %v1107_v36, 8  ;;  %v1317_v15 = vadd.s32 1, %v6258_v51  ;;  %v6831_v36 = vld [vmem:[%s12409_s3 + $0x10] sm:$0xff]  }
  0xe8   : > { %v1130_v49 = vor.u32 %v1129_v11, %v1128_v18  ;;  %v1136_v22 = vsel %vm1134_vm4, %v1124_v7, 2102212464  ;;  %v1139_v50 = vsel %vm1131_vm3, %v1118_v55, %v1121_v3  ;;  %v7445_v10 = vshrl.u32 %v1056_v17, 30  ;;  %6503 = vmatprep.subr.bf16.mxu0 %v6831_v36 }
  0xe9   : > { %v1115_v37 = vshrl.u32 %v12424_v9, %v1114_v13  ;;  %vm1133_vm5 = vcmp.lt.s32.totalorder %v1112_v47, 3  ;;  %v1140_v40 = vsel %vm1134_vm4, %v1127_v6, 920167782  ;;  %vm1132_vm6 = vcmp.lt.s32.totalorder %v1112_v47, 2  ;;  %6504 = vmatpush3.bf16.msra.mxu0 %v6831_v36  ;;  %v6833_v36 = vld [vmem:[%s12409_s3 + $0x20] sm:$0xff]  }
  0xea   : > { %12683 = vst [vmem:[#allocation10_spill] sm:$0xff] %v7445_v10  ;;  %v1141_v43 = vsel %vm1133_vm5, %v1124_v7, %v1140_v40  ;;  %v1143_v30 = vsel %vm1131_vm3, %v1121_v3, %v1124_v7  ;;  %v1144_v29 = vsel %vm1134_vm4, %v1130_v49, 1326507024  ;;  %v1137_v48 = vsel %vm1133_vm5, %v1121_v3, %v1136_v22 }
  0xeb   : > { %v1135_v44 = vsel %vm1131_vm3, %v1115_v37, %v1118_v55  ;;  %v1142_v52 = vsel %vm1132_vm6, %v1139_v50, %v1141_v43  ;;  %v1145_v51 = vsel %vm1133_vm5, %v1127_v6, %v1144_v29  ;;  %v7455_v13 = vsub.s32 %v7397_v28, %v954_v41  ;;  %v6832_v6 = vld [vmem:[%s12409_s3 + $0x18] sm:$0xff]  }
  0xec   : > { %v1146_v17 = vsel %vm1132_vm6, %v1143_v30, %v1145_v51  ;;  %v7458_v18 = vmul.u32.u64.low %v1147_v31, %v1142_v52  ;;  %v7459_v11 = vmul.u32.u64.high %v1147_v31, %v1142_v52, %v7458_v18  ;;  %v1058_v7 = vshll.u32 %v7445_v10, 30  ;;  %6505 = vmatprep.subr.bf16.mxu0 %v6832_v6 }
  0xed   : > { %v7463_v25 = vmul.u32.u64.low %v1147_v31, %v1146_v17  ;;  %v7464_v49 = vmul.u32.u64.high %v1147_v31, %v1146_v17, %v7463_v25  ;;  %v1206_v55 = vand.u32 2139095040, %v7432_v24  ;;  %v463_v3 = vadd.f32 %v7169_v32, %v7408_v14  ;;  %6506 = vmatpush3.bf16.msra.mxu0 %v6832_v6 }
  0xee   : > { %v1138_v28 = vsel %vm1132_vm6, %v1135_v44, %v1137_v48  ;;  %vm1318_vm7 = vcmp.gt.s32.totalorder %v1317_v15, 0  ;;  %v6234_v41 = vadd.s32 4294967169, %v687_v57  ;;  %v853_v22 = vsub.s32 0, %v7435_v2  ;;  %6507 = vmatprep.subr.bf16.mxu0 %v6833_v36 }
  0xef   : > { %v547_v50 = vmul.f32 %v7171_v33, %v7182_v42  ;;  %v1319_v37 = vsel %vm1318_vm7, %v1317_v15, 0  ;;  %v957_v40 = vsub.s32 0, %v7455_v13  ;;  %v1157_v43 = vadd.s32 1, %v7459_v11 }
  0xf0   : > { %v1314_v14 = vand.u32 8388607, %v12416_v16  ;;  %v1321_v47 = vand.u32 31, %v1319_v37  ;;  %v7481_v30 = vsub.s32 %v7416_v0, %v1058_v7  ;;  %v1154_v29 = vmul.u32 %v1147_v31, %v1138_v28 }
  0xf1   : > { %vm1156_vm8 = vc.u32 %v7464_v49, %v7458_v18  ;;  %v1207_v57 = vshrl.u32 %v1206_v55, 23  ;;  %v7491_v44 = vadd.s32 1, %v6234_v41  ;;  %v7495_v0 = vmul.f32 %v7159_v27, %v7173_v34  ;;  %6508 = vmatpush3.bf16.msra.mxu0 %v6833_v36  ;;  %v6834_v41 = vld [vmem:[%s12409_s3 + $0x28] sm:$0xff]  }
  0xf2   : > { %v1158_v42 = vsel %vm1156_vm8, %v1157_v43, %v7459_v11  ;;  %v7486_v15 = vsub.s32 32, %v1321_v47  ;;  %v6239_v48 = vmin.u32 %v853_v22, %v7435_v2  ;;  %v7500_v52 = vadd.f32 %v547_v50, %v463_v3  ;;  %6509 = vmatprep.subr.bf16.mxu0 %v6834_v41 }
  0xf3   : > { %v7497_v31 = vadd.s32 %v1158_v42, %v1154_v29  ;;  %v6243_v11 = vmin.u32 %v957_v40, %v7455_v13  ;;  %v1061_v7 = vsub.s32 0, %v7481_v30  ;;  %v1315_v25 = vor.u32 8388608, %v1314_v14 }
  0xf4   : > { %v1325_v51 = vshrl.u32 %v12422_v63, %v7486_v15  ;;  %v1328_v17 = vshrl.u32 %v12426_v1, %v7486_v15  ;;  %v6254_v34 = vadd.s32 4294967169, %v1207_v57  ;;  %v1324_v28 = vshll.u32 %v12424_v9, %v1321_v47 }
  0xf5   : > { %v1160_v55 = vadd.s32 536870912, %v7497_v31  ;;  %v1327_v3 = vshll.u32 %v12422_v63, %v1321_v47  ;;  %v1331_v6 = vshrl.u32 %v12432_v58, %v7486_v15  ;;  %v7516_v22 = vshrl.u32 %v1319_v37, 5  ;;  %6510 = vmatpush3.bf16.msra.mxu0 %v6834_v41 }
  0xf6   : > { %v1330_v50 = vshll.u32 %v12426_v1, %v1321_v47  ;;  %v1333_v40 = vshll.u32 %v12432_v58, %v1321_v47  ;;  %v1334_v43 = vshrl.u32 %v12436_v54, %v7486_v15  ;;  %v1326_v14 = vor.u32 %v1325_v51, %v1324_v28 }
  0xf7   : > { %v1329_v29 = vor.u32 %v1328_v17, %v1327_v3  ;;  %v1336_v57 = vshll.u32 %v12436_v54, %v1321_v47  ;;  %v1337_v42 = vshrl.u32 %v12434_v60, %v7486_v15  ;;  %v582_v36 = vand.u32 2139095040, %v7500_v52  ;;  %v6835_v47 = vld [vmem:[%s12409_s3 + $0x30] sm:$0xff]  }
  0xf8   : > { %v6247_v37 = vmin.u32 %v1061_v7, %v7481_v30  ;;  %v1332_v16 = vor.u32 %v1331_v6, %v1330_v50  ;;  %v1335_v61 = vor.u32 %v1334_v43, %v1333_v40  ;;  %vm694_vm9 = vcmp.gt.s32.totalorder %v7491_v44, 0  ;;  %6511 = vmatprep.subr.bf16.mxu0 %v6835_v47  ;;  %v6836_v40 = vld [vmem:[%s12409_s3 + $0x38] sm:$0xff]  }
  0xf9   : > { %v855_v5 = vclz %v6239_v48  ;;  %v7528_v59 = vshrl.u32 %v1160_v55, 30  ;;  %v1338_v51 = vor.u32 %v1337_v42, %v1336_v57  ;;  %v1213_v17 = vadd.s32 1, %v6254_v34  ;;  %6512 = vmatpush3.bf16.msra.mxu0 %v6835_v47  ;;  %v7558_v47 = vpop.permute.xlu1 %399 }
  0xfa   : > { %v959_v28 = vclz %v6243_v11  ;;  %vm1339_vm10 = vcmp.lt.s32.totalorder %v7516_v22, 1  ;;  %vm1342_vm11 = vcmp.lt.s32.totalorder %v7516_v22, 4  ;;  %v12421_v7 = vand.u32 2147483647, %v7432_v24  ;;  %6513 = vmatprep.subr.bf16.mxu0 %v6836_v40 }
  0xfb   : > { %12684 = vst [vmem:[#allocation11_spill] sm:$0xff] %v7528_v59  ;;  %vm1341_vm12 = vcmp.lt.s32.totalorder %v7516_v22, 3  ;;  %v1347_v48 = vsel %vm1339_vm10, %v1326_v14, %v1329_v29  ;;  %v1348_v55 = vsel %vm1342_vm11, %v1335_v61, 920167782  ;;  %v7541_v34 = vshll.u32 %v1315_v25, 8 }
  0xfc   : > { %v1063_v3 = vclz %v6247_v37  ;;  %vm1340_vm13 = vcmp.lt.s32.totalorder %v7516_v22, 2  ;;  %v1349_v11 = vsel %vm1341_vm12, %v1332_v16, %v1348_v55  ;;  %v1351_v6 = vsel %vm1339_vm10, %v1329_v29, %v1332_v16 }
  0xfd   : > { %v1162_v41 = vshll.u32 %v7528_v59, 30  ;;  %v1350_v50 = vsel %vm1340_vm13, %v1347_v48, %v1349_v11  ;;  %v1352_v25 = vsel %vm1342_vm11, %v1338_v51, 1326507024  ;;  %vm1214_vm14 = vcmp.gt.s32.totalorder %v1213_v17, 0  ;;  %6514 = vmatpush3.bf16.msra.mxu0 %v6836_v40 }
  0xfe   : > { %v6240_v43 = vadd.s32 4294967294, %v855_v5  ;;  %v583_v57 = vshrl.u32 %v582_v36, 23  ;;  %v1353_v42 = vsel %vm1341_vm12, %v1335_v61, %v1352_v25  ;;  %v1215_v37 = vsel %vm1214_vm14, %v1213_v17, 0 }
  0xff   : > { %v6244_v55 = vadd.s32 4294967294, %v959_v28  ;;  %v1354_v48 = vsel %vm1340_vm13, %v1351_v6, %v1353_v42  ;;  %v7563_v11 = vmul.u32.u64.low %v7541_v34, %v1350_v50  ;;  %v7564_v51 = vmul.u32.u64.high %v7541_v34, %v1350_v50, %v7563_v11 }
 0x100   : > { %v1344_v5 = vsel %vm1342_vm11, %v1332_v16, 2102212464  ;;  %v7570_v36 = vmul.u32.u64.low %v7541_v34, %v1354_v48  ;;  %v7571_v56 = vmul.u32.u64.high %v7541_v34, %v1354_v48, %v7570_v36  ;;  %v1210_v61 = vand.u32 8388607, %v12421_v7 }
 0x101   : > { %v6248_v17 = vadd.s32 4294967294, %v1063_v3  ;;  %v7576_v28 = vsub.s32 %v7497_v31, %v1162_v41  ;;  %v1323_v6 = vshrl.u32 %v12424_v9, %v7486_v15  ;;  %v1217_v50 = vand.u32 31, %v1215_v37  ;;  %v7599_v41 = vpop.permute.xlu1 %409 }
 0x102   : > { %v7582_v25 = vadd.f32 %v7169_v32, %v7495_v0  ;;  %v7586_v16 = vmul.f32 %v7159_v27, %v7179_v39  ;;  %v1345_v3 = vsel %vm1341_vm12, %v1329_v29, %v1344_v5  ;;  %v7597_v15 = vsel %vm694_vm9, %v7491_v44, 0 }
 0x103   : > { %v1343_v42 = vsel %vm1339_vm10, %v1323_v6, %v1326_v14  ;;  %v7592_v31 = vsub.s32 32, %v1217_v50  ;;  %vm6241_vm15 = vcmp.lt.s32.totalorder %v6240_v43, 0  ;;  %v6230_v0 = vadd.s32 4294967169, %v583_v57 }
 0x104   : > { %vm6245_vm0 = vcmp.lt.s32.totalorder %v6244_v55, 0  ;;  %vm6249_vm1 = vcmp.lt.s32.totalorder %v6248_v17, 0  ;;  %v1165_v39 = vsub.s32 0, %v7576_v28  ;;  %v1211_v40 = vor.u32 8388608, %v1210_v61 }
 0x105   : > { %v1221_v14 = vshrl.u32 %v12422_v63, %v7592_v31  ;;  %v1346_v29 = vsel %vm1340_vm13, %v1343_v42, %v1345_v3  ;;  %v1365_v48 = vadd.s32 1, %v7564_v51  ;;  %v7607_v5 = vshrl.u32 %v1215_v37, 5 }
 0x106   : > { %v1220_v44 = vshll.u32 %v12424_v9, %v1217_v50  ;;  %v1223_v57 = vshll.u32 %v12422_v63, %v1217_v50  ;;  %v1224_v36 = vshrl.u32 %v12426_v1, %v7592_v31  ;;  %v1226_v6 = vshll.u32 %v12426_v1, %v1217_v50 }
 0x107   : > { %v1227_v61 = vshrl.u32 %v12432_v58, %v7592_v31  ;;  %vm1364_vm2 = vc.u32 %v7571_v56, %v7563_v11  ;;  %v1229_v42 = vshll.u32 %v12432_v58, %v1217_v50  ;;  %v1230_v37 = vshrl.u32 %v12436_v54, %v7592_v31 }
 0x108   : > { %v1222_v22 = vor.u32 %v1221_v14, %v1220_v44  ;;  %v1225_v3 = vor.u32 %v1224_v36, %v1223_v57  ;;  %v1232_v63 = vshll.u32 %v12436_v54, %v1217_v50  ;;  %v1233_v9 = vshrl.u32 %v12434_v60, %v7592_v31  ;;  %v7632_v44 = vpop.permute.xlu1 %414 }
 0x109   : > { %v1228_v7 = vor.u32 %v1227_v61, %v1226_v6  ;;  %v7625_v1 = vsel %vm6241_vm15, 0, %v6240_v43  ;;  %v7628_v59 = vsel %vm6245_vm0, 0, %v6244_v55  ;;  %v1231_v10 = vor.u32 %v1230_v37, %v1229_v42 }
 0x10a   : > { %v7630_v14 = vshll.u32 %v1211_v40, 8  ;;  %v6251_v58 = vmin.u32 %v1165_v39, %v7576_v28  ;;  %v1366_v57 = vsel %vm1364_vm2, %v1365_v48, %v7564_v51  ;;  %v1234_v36 = vor.u32 %v1233_v9, %v1232_v63 }
 0x10b   : > { %vm1235_vm3 = vcmp.lt.s32.totalorder %v7607_v5, 1  ;;  %v7638_v50 = vsel %vm6249_vm1, 0, %v6248_v17  ;;  %v1362_v43 = vmul.u32 %v7541_v34, %v1346_v29  ;;  %vm1238_vm4 = vcmp.lt.s32.totalorder %v7607_v5, 4 }
 0x10c   : > { %v1243_v55 = vsel %vm1235_vm3, %v1222_v22, %v1225_v3  ;;  %vm1237_vm5 = vcmp.lt.s32.totalorder %v7607_v5, 3  ;;  %v1244_v39 = vsel %vm1238_vm4, %v1231_v10, 920167782  ;;  %v1247_v63 = vsel %vm1235_vm3, %v1225_v3, %v1228_v7 }
 0x10d   : > { %v1248_v9 = vsel %vm1238_vm4, %v1234_v36, 1326507024  ;;  %v7651_v51 = vadd.s32 %v1366_v57, %v1362_v43  ;;  %vm1236_vm6 = vcmp.lt.s32.totalorder %v7607_v5, 2  ;;  %v1245_v34 = vsel %vm1237_vm5, %v1228_v7, %v1244_v39  ;;  %v517_v36 = vpop.permute.xlu1 %516 }
 0x10e   : > { %v1249_v17 = vsel %vm1237_vm5, %v1231_v10, %v1248_v9  ;;  %v863_v40 = vsub.s32 4294967266, %v7625_v1  ;;  %v1167_v29 = vclz %v6251_v58  ;;  %v1246_v48 = vsel %vm1236_vm6, %v1243_v55, %v1245_v34 }
 0x10f   : > { %v1250_v6 = vsel %vm1236_vm6, %v1247_v63, %v1249_v17  ;;  %v7663_v61 = vadd.s32 1, %v6230_v0  ;;  %v967_v42 = vsub.s32 4294967266, %v7628_v59  ;;  %v859_v10 = vsub.s32 32, %v7625_v1 }
 0x110   : > { %v7667_v37 = vmul.u32.u64.low %v7630_v14, %v1250_v6  ;;  %v7668_v57 = vmul.u32.u64.high %v7630_v14, %v1250_v6, %v7667_v37  ;;  %v1071_v43 = vsub.s32 4294967266, %v7638_v50  ;;  %v7678_v55 = vshrl.u32 %v7597_v15, 5 }
 0x111   : > { %v7673_v58 = vmul.u32.u64.low %v7630_v14, %v1246_v48  ;;  %v7674_v39 = vmul.u32.u64.high %v7630_v14, %v1246_v48, %v7673_v58  ;;  %v843_v0 = vadd.s32 %v7244_v62, %v7265_v12  ;;  %v7684_v63 = vadd.f32 %v7169_v32, %v7586_v16 }
 0x112   : > { %12685 = vst [vmem:[#allocation12_spill] sm:$0xff] %v7678_v55  ;;  %v1368_v9 = vadd.s32 536870912, %v7651_v51  ;;  %v864_v34 = vadd.s32 127, %v863_v40  ;;  %v6252_v17 = vadd.s32 4294967294, %v1167_v29  ;;  %v1240_v6 = vsel %vm1238_vm4, %v1228_v7, 2102212464 }
 0x113   : > { %v556_v48 = vmul.f32 %v7171_v33, %v517_v36  ;;  %vm590_vm7 = vcmp.gt.s32.totalorder %v7663_v61, 0  ;;  %v963_v37 = vsub.s32 32, %v7628_v59  ;;  %v968_v60 = vadd.s32 127, %v967_v42 }
 0x114   : > { %v12686_v62 = vmov 683565275   ;;  %v861_v54 = vshrl.u32 %v843_v0, %v859_v10  ;;  %v947_v16 = vadd.s32 %v7331_v20, %v7328_v19  ;;  %v1072_v45 = vadd.s32 127, %v1071_v43 }
 0x115   : > { %v1219_v12 = vshrl.u32 %v12686_v62, %v7592_v31  ;;  %v7697_v40 = vadd.f32 %v556_v48, %v7582_v25  ;;  %v860_v7 = vshll.u32 %v7435_v2, %v7625_v1  ;;  %v7701_v29 = vshrl.u32 %v1368_v9, 30 }
 0x116   : > { %v1241_v42 = vsel %vm1237_vm5, %v1225_v3, %v1240_v6  ;;  %v865_v31 = vshll.u32 %v864_v34, 23  ;;  %v1067_v10 = vsub.s32 32, %v7638_v50  ;;  %vm6253_vm8 = vcmp.lt.s32.totalorder %v6252_v17, 0 }
 0x117   : > { %12687 = vst [vmem:[#allocation13_spill] sm:$0xff] %v7697_v40  ;;  %12688 = vst [vmem:[#allocation14_spill] sm:$0xff] %v7701_v29  ;;  %v1239_v36 = vsel %vm1235_vm3, %v1219_v12, %v1222_v22  ;;  %v1261_v19 = vadd.s32 1, %v7674_v39  ;;  %v965_v20 = vshrl.u32 %v947_v16, %v963_v37  ;;  %v969_v25 = vshll.u32 %v968_v60, 23 }
 0x118   : > { %vm1260_vm9 = vc.u32 %v7668_v57, %v7673_v58  ;;  %v1518_v1 = vand.u32 2139095040, %v7697_v40  ;;  %v862_v2 = vor.u32 %v861_v54, %v860_v7  ;;  %v1051_v22 = vadd.s32 %v7383_v46, %v7381_v26 }
 0x119   : > { %v1073_v43 = vshll.u32 %v1072_v45, 23  ;;  %v1242_v3 = vsel %vm1236_vm6, %v1239_v36, %v1241_v42  ;;  %v964_v0 = vshll.u32 %v7455_v13, %v7628_v59  ;;  %v1170_v9 = vsel %vm6253_vm8, 0, %v6252_v17  ;;  %v513_v17 = vpop.permute.xlu0 %512 }
 0x11a   : > { %v1370_v34 = vshll.u32 %v7701_v29, 30  ;;  %v449_v60 = vmul.f32 %v7159_v27, %v7558_v47  ;;  %v866_v6 = vor.u32 4788187, %v865_v31  ;;  %v1069_v48 = vshrl.u32 %v1051_v22, %v1067_v10 }
 0x11b   : > { %v1262_v54 = vsel %vm1260_vm9, %v1261_v19, %v7674_v39  ;;  %v1519_v37 = vshrl.u32 %v1518_v1, 23  ;;  %v966_v12 = vor.u32 %v965_v20, %v964_v0  ;;  %v970_v26 = vor.u32 4788187, %v969_v25 }
 0x11c   : > { %v1068_v46 = vshll.u32 %v7481_v30, %v7638_v50  ;;  %v1258_v45 = vmul.u32 %v7630_v14, %v1242_v3  ;;  %v1074_v5 = vor.u32 4788187, %v1073_v43  ;;  %v1171_v59 = vsub.s32 32, %v1170_v9 }
 0x11d   : > { %v1175_v13 = vsub.s32 4294967266, %v1170_v9  ;;  %v6266_v16 = vadd.s32 4294967169, %v1519_v37  ;;  %v7726_v7 = vsub.s32 %v7651_v51, %v1370_v34  ;;  %v555_v39 = vmul.f32 %v7171_v33, %v513_v17 }
 0x11e   : > { %v7728_v47 = vadd.s32 %v1262_v54, %v1258_v45  ;;  %v471_v36 = vadd.f32 %v7169_v32, %v449_v60  ;;  %v7733_v42 = vand.u32 31, %v7597_v15  ;;  %v591_v30 = vsel %vm590_vm7, %v7663_v61, 0 }
 0x11f   : > { %v1070_v14 = vor.u32 %v1069_v48, %v1068_v46  ;;  %v1155_v50 = vadd.s32 %v7458_v18, %v7464_v49  ;;  %v867_v31 = vand.u32 2147483647, %v866_v6  ;;  %v869_v51 = vcvt.s32.f32 %v862_v2  ;;  %v521_v6 = vpop.permute.xlu1 %520 }
 0x120   : > { %12689 = vst [vmem:[#allocation15_spill] sm:$0xff] %v7733_v42  ;;  %v971_v10 = vand.u32 2147483647, %v970_v26  ;;  %v1525_v19 = vadd.s32 1, %v6266_v16  ;;  %v973_v20 = vcvt.s32.f32 %v966_v12  ;;  %v1075_v25 = vand.u32 2147483647, %v1074_v5 }
 0x121   : > { %v1173_v1 = vshrl.u32 %v1155_v50, %v1171_v59  ;;  %v1176_v22 = vadd.s32 127, %v1175_v13  ;;  %v1373_v32 = vsub.s32 0, %v7726_v7  ;;  %v1264_v15 = vadd.s32 536870912, %v7728_v47  ;;  %v525_v59 = vpop.permute.xlu0 %524 }
 0x122   : > { %v7742_v43 = vadd.f32 %v555_v39, %v471_v36  ;;  %vm1526_vm10 = vcmp.gt.s32.totalorder %v1525_v19, 0  ;;  %v7745_v61 = vsub.s32 32, %v7733_v42  ;;  %v7747_v3 = vand.u32 31, %v591_v30 }
 0x123   : > { %v1077_v18 = vcvt.s32.f32 %v1070_v14  ;;  %v12440_v49 = vand.u32 2147483647, %v7697_v40  ;;  %v7750_v2 = vmul.f32 %v869_v51, %v867_v31  ;;  %v7752_v0 = vmul.f32 %v973_v20, %v971_v10 }
 0x124   : > { %12690 = vst [vmem:[#allocation16_spill] sm:$0xff] %v7742_v43  ;;  %v1172_v34 = vshll.u32 %v7576_v28, %v1170_v9  ;;  %v1527_v60 = vsel %vm1526_vm10, %v1525_v19, 0  ;;  %v7755_v48 = vshrl.u32 %v591_v30, 5  ;;  %v1177_v37 = vshll.u32 %v1176_v22, 23 }
 0x125   : > { %v7757_v54 = vmul.f32 %v1077_v18, %v1075_v25  ;;  %v451_v12 = vmul.f32 %v7159_v27, %v7599_v41  ;;  %v6259_v46 = vmin.u32 %v1373_v32, %v7726_v7  ;;  %v7764_v45 = vshrl.u32 %v1264_v15, 30  ;;  %v7794_v15 = vpop.permute.xlu1 %419 }
 0x126   : > { %v7761_v26 = vor.u32 %v1173_v1, %v1172_v34  ;;  %v1414_v5 = vand.u32 2139095040, %v7742_v43  ;;  %v452_v28 = vmul.f32 %v7159_v27, %v7632_v44  ;;  %v1522_v9 = vand.u32 8388607, %v12440_v49  ;;  %v7782_v44 = vld [vmem:[%s12408_s2] ss:$0 sm:$0xff] }
 0x127   : > { %12691 = vst [vmem:[#allocation17_spill] sm:$0xff] %v7764_v45  ;;  %v1529_v13 = vand.u32 31, %v1527_v60  ;;  %v557_v17 = vmul.f32 %v7171_v33, %v521_v6  ;;  %v7774_v16 = vsub.s32 32, %v7747_v3  ;;  %v558_v36 = vmul.f32 %v7171_v33, %v525_v59 }
 0x128   : > { %v1178_v14 = vor.u32 4788187, %v1177_v37  ;;  %v473_v50 = vadd.f32 %v7782_v44, %v451_v12  ;;  %v1181_v51 = vcvt.s32.f32 %v7761_v26  ;;  %v1375_v10 = vclz %v6259_v46 }
 0x129   : > { %v7785_v31 = vsub.s32 32, %v1529_v13  ;;  %v1266_v19 = vshll.u32 %v7764_v45, 30  ;;  %v1415_v20 = vshrl.u32 %v1414_v5, 23  ;;  %v474_v25 = vadd.f32 %v7782_v44, %v452_v28 }
 0x12a   : > { %v1523_v1 = vor.u32 8388608, %v1522_v9  ;;  %v7790_v22 = vshrl.u32 %v1527_v60, 5  ;;  %v7792_v32 = vadd.f32 %v557_v17, %v473_v50  ;;  %v1532_v18 = vshll.u32 %v12686_v62, %v1529_v13 }
 0x12b   : > { %v12693_v34 = vmov 2475754826   ;;  %v12694_v12 = vmov 2131351028   ;;  %v12695_v5 = vmov 2102212464   ;;  %v7809_v17 = vsub.s32 %v7728_v47, %v1266_v19 }
 0x12c   : > { %12692 = vst [vmem:[#allocation18_spill] sm:$0xff] %v7792_v32  ;;  %v1533_v6 = vshrl.u32 %v12693_v34, %v7785_v31  ;;  %v1535_v37 = vshll.u32 %v12693_v34, %v1529_v13  ;;  %v1538_v26 = vshll.u32 %v12694_v12, %v1529_v13  ;;  %v1536_v46 = vshrl.u32 %v12694_v12, %v7785_v31 }
 0x12d   : > { %v1539_v60 = vshrl.u32 %v12695_v5, %v7785_v31  ;;  %v1541_v59 = vshll.u32 %v12695_v5, %v1529_v13  ;;  %v12696_v28 = vmov 920167782   ;;  %v12697_v30 = vmov 1326507024  }
 0x12e   : > { %v1542_v9 = vshrl.u32 %v12696_v28, %v7785_v31  ;;  %v1534_v50 = vor.u32 %v1533_v6, %v1532_v18  ;;  %v1544_v49 = vshll.u32 %v12696_v28, %v1529_v13  ;;  %v1545_v39 = vshrl.u32 %v12697_v30, %v7785_v31 }
 0x12f   : > { %vm789_vm11 = vcmp.lt.s32.totalorder %v7177_v38, 0  ;;  %vm893_vm12 = vcmp.lt.s32.totalorder %v7187_v53, 0  ;;  %v1179_v41 = vand.u32 2147483647, %v1178_v14  ;;  %v1537_v40 = vor.u32 %v1536_v46, %v1535_v37  ;;  %v7825_v14 = vpop.permute.xlu1 %429 }
 0x130   : > { %v1540_v43 = vor.u32 %v1539_v60, %v1538_v26  ;;  %v1543_v29 = vor.u32 %v1542_v9, %v1541_v59  ;;  %vm997_vm13 = vcmp.lt.s32.totalorder %v7211_v23, 0  ;;  %v6260_v45 = vadd.s32 4294967294, %v1375_v10 }
 0x131   : > { %v6262_v4 = vadd.s32 4294967169, %v1415_v20  ;;  %v1546_v47 = vor.u32 %v1545_v39, %v1544_v49  ;;  %vm1547_vm14 = vcmp.lt.s32.totalorder %v7790_v22, 1  ;;  %v7818_v19 = vadd.f32 %v558_v36, %v474_v25  ;;  %v529_v36 = vpop.permute.xlu0 %528 }
 0x132   : > { %vm1550_vm15 = vcmp.lt.s32.totalorder %v7790_v22, 4  ;;  %v1555_v13 = vsel %vm1547_vm14, %v1534_v50, %v1537_v40  ;;  %v7823_v18 = vshll.u32 %v1523_v1, 8  ;;  %v1269_v6 = vsub.s32 0, %v7809_v17 }
 0x133   : > { %12698 = vst [vmem:[#allocation19_spill] sm:$0xff] %v7818_v19  ;;  %vm1549_vm0 = vcmp.lt.s32.totalorder %v7790_v22, 3  ;;  %v1556_v49 = vsel %vm1550_vm15, %v1543_v29, 920167782  ;;  %v1622_v39 = vand.u32 2139095040, %v7792_v32  ;;  %vm1548_vm1 = vcmp.lt.s32.totalorder %v7790_v22, 2 }
 0x134   : > { %v1557_v10 = vsel %vm1549_vm0, %v1540_v43, %v1556_v49  ;;  %v1559_v20 = vsel %vm1547_vm14, %v1537_v40, %v1540_v43  ;;  %v1560_v25 = vsel %vm1550_vm15, %v1546_v47, 1326507024  ;;  %v1182_v1 = vmul.f32 %v1181_v51, %v1179_v41 }
 0x135   : > { %vm6261_vm2 = vcmp.lt.s32.totalorder %v6260_v45, 0  ;;  %v1558_v37 = vsel %vm1548_vm1, %v1555_v13, %v1557_v10  ;;  %v1561_v26 = vsel %vm1549_vm0, %v1543_v29, %v1560_v25  ;;  %v1421_v46 = vadd.s32 1, %v6262_v4  ;;  %v7861_v10 = vpop.permute.xlu1 %434 }
 0x136   : > { %v1562_v60 = vsel %vm1548_vm1, %v1559_v20, %v1561_v26  ;;  %v7846_v59 = vmul.u32.u64.low %v7823_v18, %v1558_v37  ;;  %v7847_v9 = vmul.u32.u64.high %v7823_v18, %v1558_v37, %v7846_v59  ;;  %vm1101_vm3 = vcmp.lt.s32.totalorder %v7319_v8, 0 }
 0x137   : > { %v7852_v41 = vmul.u32.u64.low %v7823_v18, %v1562_v60  ;;  %v7853_v51 = vmul.u32.u64.high %v7823_v18, %v1562_v60, %v7852_v41  ;;  %v1623_v47 = vshrl.u32 %v1622_v39, 23  ;;  %v7855_v13 = vsel %vm6261_vm2, 0, %v6260_v45 }
 0x138   : > { %v6255_v29 = vmin.u32 %v1269_v6, %v7809_v17  ;;  %v1726_v4 = vand.u32 2139095040, %v7818_v19  ;;  %v1552_v49 = vsel %vm1550_vm15, %v1540_v43, 2102212464  ;;  %v12699_v20 = vxor.u32 2147483648, %v7750_v2  ;;  %v541_v41 = vpop.permute.xlu0 %540 }
 0x139   : > { %v12701_v45 = vxor.u32 2147483648, %v7752_v0  ;;  %v1531_v39 = vshrl.u32 %v12686_v62, %v7785_v31  ;;  %v6270_v43 = vadd.s32 4294967169, %v1623_v47  ;;  %v12703_v37 = vxor.u32 2147483648, %v7757_v54 }
 0x13a   : > { %v7868_v25 = vsel %vm789_vm11, %v12699_v20, %v7750_v2  ;;  %v1183_v2 = vxor.u32 2147483648, %v1182_v1  ;;  %v1363_v60 = vadd.s32 %v7563_v11, %v7571_v56  ;;  %vm1422_vm4 = vcmp.gt.s32.totalorder %v1421_v46, 0 }
 0x13b   : > { %12700 = vst [vmem:[#allocation20_spill] sm:$0xff] %v7868_v25  ;;  %v7875_v6 = vsel %vm893_vm12, %v12701_v45, %v7752_v0  ;;  %v7884_v26 = vsel %vm997_vm13, %v12703_v37, %v7757_v54  ;;  %v1379_v0 = vsub.s32 32, %v7855_v13  ;;  %v1551_v20 = vsel %vm1547_vm14, %v1531_v39, %v1534_v50 }
 0x13c   : > { %12702 = vst [vmem:[#allocation21_spill] sm:$0xff] %v7875_v6  ;;  %12704 = vst [vmem:[#allocation22_spill] sm:$0xff] %v7884_v26  ;;  %v1553_v31 = vsel %vm1549_vm0, %v1537_v40, %v1552_v49  ;;  %v1629_v47 = vadd.s32 1, %v6270_v43  ;;  %v1383_v45 = vsub.s32 4294967266, %v7855_v13  ;;  %v1271_v19 = vclz %v6255_v29  ;;  %v533_v49 = vpop.permute.xlu1 %532 }
 0x13d   : > { %v7895_v54 = vmul.f32 %v7171_v33, %v529_v36  ;;  %v1727_v37 = vshrl.u32 %v1726_v4, 23  ;;  %v7897_v26 = vsel %vm1422_vm4, %v1421_v46, 0  ;;  %v7900_v56 = vmul.f32 %v7171_v33, %v541_v41 }
 0x13e   : > { %v12453_v11 = vand.u32 2147483647, %v7792_v32  ;;  %vm1630_vm5 = vcmp.gt.s32.totalorder %v1629_v47, 0  ;;  %v7905_v50 = vsel %vm1101_vm3, %v1183_v2, %v1182_v1  ;;  %v1554_v40 = vsel %vm1548_vm1, %v1551_v20, %v1553_v31 }
 0x13f   : > { %12705 = vst [vmem:[#allocation23_spill] sm:$0xff] %v7905_v50  ;;  %v1573_v29 = vadd.s32 1, %v7847_v9  ;;  %v1631_v36 = vsel %vm1630_vm5, %v1629_v47, 0  ;;  %v1381_v4 = vshrl.u32 %v1363_v60, %v1379_v0  ;;  %vm1572_vm6 = vc.u32 %v7853_v51, %v7846_v59 }
 0x140   : > { %v1633_v46 = vand.u32 31, %v1631_v36  ;;  %v453_v39 = vmul.f32 %v7159_v27, %v7794_v15  ;;  %v1384_v43 = vadd.s32 127, %v1383_v45  ;;  %v6256_v41 = vadd.s32 4294967294, %v1271_v19 }
 0x141   : > { %v7915_v1 = vand.u32 31, %v7897_v26  ;;  %v6274_v2 = vadd.s32 4294967169, %v1727_v37  ;;  %v1570_v22 = vmul.u32 %v7823_v18, %v1554_v40  ;;  %v1626_v20 = vand.u32 8388607, %v12453_v11 }
 0x142   : > { %v1634_v31 = vsub.s32 32, %v1633_v46  ;;  %v560_v60 = vmul.f32 %v7171_v33, %v533_v49  ;;  %v1574_v0 = vsel %vm1572_vm6, %v1573_v29, %v7847_v9  ;;  %v7922_v47 = vshrl.u32 %v1631_v36, 5 }
 0x143   : > { %12706 = vst [vmem:[#allocation24_spill] sm:$0xff] %v7915_v1  ;;  %v1636_v15 = vshll.u32 %v12686_v62, %v1633_v46  ;;  %v1639_v19 = vshll.u32 %v12693_v34, %v1633_v46  ;;  %v1642_v18 = vshll.u32 %v12694_v12, %v1633_v46  ;;  %v1645_v40 = vshll.u32 %v12695_v5, %v1633_v46 }
 0x144   : > { %v1637_v45 = vshrl.u32 %v12693_v34, %v1634_v31  ;;  %v1640_v37 = vshrl.u32 %v12694_v12, %v1634_v31  ;;  %v1643_v11 = vshrl.u32 %v12695_v5, %v1634_v31  ;;  %v1646_v49 = vshrl.u32 %v12696_v28, %v1634_v31 }
 0x145   : > { %v1648_v9 = vshll.u32 %v12696_v28, %v1633_v46  ;;  %v1649_v29 = vshrl.u32 %v12697_v30, %v1634_v31  ;;  %v7934_v36 = vadd.s32 %v1574_v0, %v1570_v22  ;;  %v1627_v32 = vor.u32 8388608, %v1626_v20 }
 0x146   : > { %v1638_v50 = vor.u32 %v1637_v45, %v1636_v15  ;;  %v1641_v8 = vor.u32 %v1640_v37, %v1639_v19  ;;  %v1644_v23 = vor.u32 %v1643_v11, %v1642_v18  ;;  %v1647_v6 = vor.u32 %v1646_v49, %v1645_v40 }
 0x147   : > { %v1650_v53 = vor.u32 %v1649_v29, %v1648_v9  ;;  %vm1651_vm7 = vcmp.lt.s32.totalorder %v7922_v47, 1  ;;  %v1733_v25 = vadd.s32 1, %v6274_v2  ;;  %vm1654_vm8 = vcmp.lt.s32.totalorder %v7922_v47, 4 }
 0x148   : > { %v1659_v38 = vsel %vm1651_vm7, %v1638_v50, %v1641_v8  ;;  %v7941_v46 = vadd.f32 %v560_v60, %v7684_v63  ;;  %vm1653_vm9 = vcmp.lt.s32.totalorder %v7922_v47, 3  ;;  %v1660_v22 = vsel %vm1654_vm8, %v1647_v6, 920167782 }
 0x149   : > { %v1663_v11 = vsel %vm1651_vm7, %v1641_v8, %v1644_v23  ;;  %v1664_v20 = vsel %vm1654_vm8, %v1650_v53, 1326507024  ;;  %vm6257_vm10 = vcmp.lt.s32.totalorder %v6256_v41, 0  ;;  %vm1652_vm14 = vcmp.lt.s32.totalorder %v7922_v47, 2 }
 0x14a   : > { %12707 = vst [vmem:[#allocation25_spill] sm:$0xff] %v7941_v46  ;;  %v1661_v2 = vsel %vm1653_vm9, %v1644_v23, %v1660_v22  ;;  %v1665_v63 = vsel %vm1653_vm9, %v1647_v6, %v1664_v20  ;;  %v1576_v60 = vadd.s32 536870912, %v7934_v36  ;;  %v7960_v19 = vshll.u32 %v1627_v32, 8 }
 0x14b   : > { %v1662_v0 = vsel %vm1652_vm14, %v1659_v38, %v1661_v2  ;;  %v1666_v15 = vsel %vm1652_vm14, %v1663_v11, %v1665_v63  ;;  %v1380_v53 = vshll.u32 %v7726_v7, %v7855_v13  ;;  %v1385_v45 = vshll.u32 %v1384_v43, 23  ;;  %v537_v11 = vpop.permute.xlu1 %536 }
 0x14c   : > { %vm1734_vm15 = vcmp.gt.s32.totalorder %v1733_v25, 0  ;;  %v1934_v37 = vand.u32 2139095040, %v7941_v46  ;;  %v7966_v18 = vmul.u32.u64.low %v7960_v19, %v1666_v15  ;;  %v7967_v6 = vmul.u32.u64.high %v7960_v19, %v1666_v15, %v7966_v18 }
 0x14d   : > { %v7970_v40 = vmul.u32.u64.low %v7960_v19, %v1662_v0  ;;  %v7971_v49 = vmul.u32.u64.high %v7960_v19, %v1662_v0, %v7970_v40  ;;  %v1259_v38 = vadd.s32 %v7673_v58, %v7668_v57  ;;  %v1274_v32 = vsel %vm6257_vm10, 0, %v6256_v41 }
 0x14e   : > { %v7977_v9 = vsub.s32 32, %v7915_v1  ;;  %v475_v7 = vadd.f32 %v7782_v44, %v453_v39  ;;  %v1382_v13 = vor.u32 %v1381_v4, %v1380_v53  ;;  %v7981_v43 = vshrl.u32 %v7897_v26, 5 }
 0x14f   : > { %v7983_v29 = vshrl.u32 %v1576_v60, 30  ;;  %v455_v22 = vmul.f32 %v7159_v27, %v7825_v14  ;;  %v1386_v20 = vor.u32 4788187, %v1385_v45  ;;  %v1437_v57 = vshll.u32 %v12695_v5, %v7915_v1 }
 0x150   : > { %12708 = vst [vmem:[#allocation26_spill] sm:$0xff] %v7977_v9  ;;  %v1735_v58 = vsel %vm1734_vm15, %v1733_v25, 0  ;;  %v1656_v41 = vsel %vm1654_vm8, %v1644_v23, 2102212464  ;;  %v1275_v2 = vsub.s32 32, %v1274_v32  ;;  %v1279_v39 = vsub.s32 4294967266, %v1274_v32 }
 0x151   : > { %12709 = vst [vmem:[#allocation27_spill] sm:$0xff] %v7983_v29  ;;  %v1635_v4 = vshrl.u32 %v12686_v62, %v1634_v31  ;;  %v1935_v26 = vshrl.u32 %v1934_v37, 23  ;;  %v1438_v63 = vshrl.u32 %v12696_v28, %v7977_v9  ;;  %v7996_v14 = vshll.u32 %v12696_v28, %v7915_v1 }
 0x152   : > { %v7999_v60 = vadd.f32 %v7895_v54, %v475_v7  ;;  %v561_v25 = vmul.f32 %v7171_v33, %v537_v11  ;;  %v8004_v23 = vshrl.u32 %v12697_v30, %v7977_v9  ;;  %vm1446_vm0 = vcmp.lt.s32.totalorder %v7981_v43, 4 }
 0x153   : > { %v1578_v31 = vshll.u32 %v7983_v29, 30  ;;  %v1655_v0 = vsel %vm1651_vm7, %v1635_v4, %v1638_v50  ;;  %v1657_v15 = vsel %vm1653_vm9, %v1641_v8, %v1656_v41  ;;  %v1387_v53 = vand.u32 2147483647, %v1386_v20 }
 0x154   : > { %12710 = vst [vmem:[#allocation28_spill] sm:$0xff] %v7999_v60  ;;  %v8012_v45 = vand.u32 31, %v1735_v58  ;;  %v1677_v54 = vadd.s32 1, %v7971_v49  ;;  %v477_v33 = vadd.f32 %v7782_v44, %v455_v22  ;;  %v1277_v37 = vshrl.u32 %v1259_v38, %v1275_v2 }
 0x155   : > { %v1280_v18 = vadd.s32 127, %v1279_v39  ;;  %vm1676_vm1 = vc.u32 %v7967_v6, %v7970_v40  ;;  %v6282_v7 = vadd.s32 4294967169, %v1935_v26  ;;  %v1389_v11 = vcvt.s32.f32 %v1382_v13 }
 0x156   : > { %v1658_v50 = vsel %vm1652_vm14, %v1655_v0, %v1657_v15  ;;  %v1830_v4 = vand.u32 2139095040, %v7999_v60  ;;  %v8021_v8 = vadd.f32 %v561_v25, %v477_v33  ;;  %v1276_v20 = vshll.u32 %v7809_v17, %v1274_v32 }
 0x157   : > { %v8024_v41 = vor.u32 %v1438_v63, %v1437_v57  ;;  %v8027_v22 = vsub.s32 %v7934_v36, %v1578_v31  ;;  %v1941_v38 = vadd.s32 1, %v6282_v7  ;;  %v8029_v2 = vmul.f32 %v1389_v11, %v1387_v53 }
 0x158   : > { %12711 = vst [vmem:[#allocation29_spill] sm:$0xff] %v8021_v8  ;;  %v8033_v39 = vshrl.u32 %v1735_v58, 5  ;;  %v1678_v47 = vsel %vm1676_vm1, %v1677_v54, %v7971_v49  ;;  %v1278_v26 = vor.u32 %v1277_v37, %v1276_v20  ;;  %v1281_v25 = vshll.u32 %v1280_v18, 23 }
 0x159   : > { %12712 = vst [vmem:[#allocation30_spill] sm:$0xff] %v8024_v41  ;;  %v8037_v0 = vsub.s32 32, %v8012_v45  ;;  %v1674_v17 = vmul.u32 %v7960_v19, %v1658_v50  ;;  %v1831_v32 = vshrl.u32 %v1830_v4, 23  ;;  %v456_v36 = vmul.f32 %v7159_v27, %v7861_v10 }
 0x15a   : > { %12713 = vst [vmem:[#allocation31_spill] sm:$0xff] %v8033_v39  ;;  %vm1942_vm2 = vcmp.gt.s32.totalorder %v1941_v38, 0  ;;  %v2038_v57 = vand.u32 2139095040, %v8021_v8  ;;  %v1581_v63 = vsub.s32 0, %v8027_v22  ;;  %v12464_v49 = vand.u32 2147483647, %v7941_v46 }
 0x15b   : > { %12714 = vst [vmem:[#allocation32_spill] sm:$0xff] %v8037_v0  ;;  %v8044_v58 = vadd.s32 %v1678_v47, %v1674_v17  ;;  %v1943_v31 = vsel %vm1942_vm2, %v1941_v38, 0  ;;  %v8051_v19 = vsel %vm1446_vm0, %v8024_v41, 920167782  ;;  %v8055_v27 = vshll.u32 %v12695_v5, %v8012_v45 }
 0x15c   : > { %12715 = vst [vmem:[#allocation33_spill] sm:$0xff] %v8051_v19  ;;  %v1945_v10 = vand.u32 31, %v1943_v31  ;;  %v1282_v53 = vor.u32 4788187, %v1281_v25  ;;  %v1285_v54 = vcvt.s32.f32 %v1278_v26  ;;  %v8059_v33 = vshrl.u32 %v12696_v28, %v8037_v0 }
 0x15d   : > { %v8063_v37 = vshrl.u32 %v12697_v30, %v8037_v0  ;;  %v6278_v18 = vadd.s32 4294967169, %v1831_v32  ;;  %v478_v7 = vadd.f32 %v7782_v44, %v456_v36  ;;  %v2039_v50 = vshrl.u32 %v2038_v57, 23 }
 0x15e   : > { %v1946_v11 = vsub.s32 32, %v1945_v10  ;;  %v6267_v4 = vmin.u32 %v1581_v63, %v8027_v22  ;;  %v1680_v20 = vadd.s32 536870912, %v8044_v58  ;;  %v1938_v38 = vand.u32 8388607, %v12464_v49 }
 0x15f   : > { %v8070_v47 = vshrl.u32 %v1943_v31, 5  ;;  %v1948_v26 = vshll.u32 %v12686_v62, %v1945_v10  ;;  %v1951_v17 = vshll.u32 %v12693_v34, %v1945_v10  ;;  %v1954_v32 = vshll.u32 %v12694_v12, %v1945_v10 }
 0x160   : > { %v1949_v25 = vshrl.u32 %v12693_v34, %v1946_v11  ;;  %v1952_v44 = vshrl.u32 %v12694_v12, %v1946_v11  ;;  %v1955_v36 = vshrl.u32 %v12695_v5, %v1946_v11  ;;  %v1957_v57 = vshll.u32 %v12695_v5, %v1945_v10 }
 0x161   : > { %v1958_v63 = vshrl.u32 %v12696_v28, %v1946_v11  ;;  %v1960_v31 = vshll.u32 %v12696_v28, %v1945_v10  ;;  %v1961_v49 = vshrl.u32 %v12697_v30, %v1946_v11  ;;  %v6286_v13 = vadd.s32 4294967169, %v2039_v50 }
 0x162   : > { %v1950_v15 = vor.u32 %v1949_v25, %v1948_v26  ;;  %v1837_v46 = vadd.s32 1, %v6278_v18  ;;  %v1953_v60 = vor.u32 %v1952_v44, %v1951_v17  ;;  %v1956_v29 = vor.u32 %v1955_v36, %v1954_v32 }
 0x163   : > { %v1959_v0 = vor.u32 %v1958_v63, %v1957_v57  ;;  %v1283_v19 = vand.u32 2147483647, %v1282_v53  ;;  %v8082_v41 = vshrl.u32 %v1680_v20, 30  ;;  %v8085_v1 = vadd.f32 %v7900_v56, %v478_v7 }
 0x164   : > { %v1962_v9 = vor.u32 %v1961_v49, %v1960_v31  ;;  %v1583_v55 = vclz %v6267_v4  ;;  %v1939_v42 = vor.u32 8388608, %v1938_v38  ;;  %vm1963_vm4 = vcmp.lt.s32.totalorder %v8070_v47, 1 }
 0x165   : > { %12716 = vst [vmem:[#allocation34_spill] sm:$0xff] %v8082_v41  ;;  %12717 = vst [vmem:[#allocation35_spill] sm:$0xff] %v8085_v1  ;;  %vm1966_vm5 = vcmp.lt.s32.totalorder %v8070_v47, 4  ;;  %vm1965_vm6 = vcmp.lt.s32.totalorder %v8070_v47, 3  ;;  %v1971_v10 = vsel %vm1963_vm4, %v1950_v15, %v1953_v60  ;;  %v2045_v18 = vadd.s32 1, %v6286_v13 }
 0x166   : > { %v1972_v53 = vsel %vm1966_vm5, %v1959_v0, 920167782  ;;  %vm1309_vm7 = vcmp.lt.s32.totalorder %v7339_v35, 0  ;;  %vm1838_vm8 = vcmp.gt.s32.totalorder %v1837_v46, 0  ;;  %v1975_v49 = vsel %vm1963_vm4, %v1953_v60, %v1956_v29 }
 0x167   : > { %v1973_v56 = vsel %vm1965_vm6, %v1956_v29, %v1972_v53  ;;  %v1976_v7 = vsel %vm1966_vm5, %v1962_v9, 1326507024  ;;  %v1286_v50 = vmul.f32 %v1285_v54, %v1283_v19  ;;  %v1682_v4 = vshll.u32 %v8082_v41, 30 }
 0x168   : > { %v2142_v20 = vand.u32 2139095040, %v8085_v1  ;;  %vm1964_vm9 = vcmp.lt.s32.totalorder %v8070_v47, 2  ;;  %v1977_v38 = vsel %vm1965_vm6, %v1959_v0, %v1976_v7  ;;  %v1979_v26 = vshll.u32 %v1939_v42, 8 }
 0x169   : > { %v1974_v13 = vsel %vm1964_vm9, %v1971_v10, %v1973_v56  ;;  %vm2046_vm10 = vcmp.gt.s32.totalorder %v2045_v18, 0  ;;  %vm1205_vm14 = vcmp.lt.s32.totalorder %v7432_v24, 0  ;;  %v6268_v25 = vadd.s32 4294967294, %v1583_v55 }
 0x16a   : > { %v1839_v17 = vsel %vm1838_vm8, %v1837_v46, 0  ;;  %v1978_v9 = vsel %vm1964_vm9, %v1975_v49, %v1977_v38  ;;  %v2047_v19 = vsel %vm2046_vm10, %v2045_v18, 0  ;;  %v1752_v0 = vshll.u32 %v12696_v28, %v8012_v45 }
 0x16b   : > { %v8111_v54 = vmul.u32.u64.low %v1979_v26, %v1978_v9  ;;  %v8112_v32 = vmul.u32.u64.high %v1979_v26, %v1978_v9, %v8111_v54  ;;  %v8114_v44 = vmul.u32.u64.low %v1979_v26, %v1974_v13  ;;  %v8115_v36 = vmul.u32.u64.high %v1979_v26, %v1974_v13, %v8114_v44 }
 0x16c   : > { %v8121_v42 = vsub.s32 %v8044_v58, %v1682_v4  ;;  %v2143_v57 = vshrl.u32 %v2142_v20, 23  ;;  %v1968_v55 = vsel %vm1966_vm5, %v1956_v29, 2102212464  ;;  %v12718_v46 = vor.u32 %v8004_v23, %v7996_v14 }
 0x16d   : > { %v8134_v31 = vor.u32 %v8059_v33, %v8055_v27  ;;  %v1947_v10 = vshrl.u32 %v12686_v62, %v1946_v11  ;;  %v12481_v58 = vand.u32 2147483647, %v8021_v8  ;;  %v1754_v53 = vor.u32 %v8063_v37, %v1752_v0 }
 0x16e   : > { %v8130_v63 = vsel %vm1446_vm0, %v12718_v46, 1326507024  ;;  %vm6269_vm15 = vcmp.lt.s32.totalorder %v6268_v25, 0  ;;  %v8139_v18 = vand.u32 31, %v1839_v17  ;;  %v2049_v29 = vand.u32 31, %v2047_v19 }
 0x16f   : > { %12719 = vst [vmem:[#allocation36_spill] sm:$0xff] %v8134_v31  ;;  %v1287_v56 = vxor.u32 2147483648, %v1286_v50  ;;  %vm12496_vm1 = vcmp.lt.s32.totalorder %v8033_v39, 4  ;;  %v1967_v14 = vsel %vm1963_vm4, %v1947_v10, %v1950_v15  ;;  %v1969_v23 = vsel %vm1965_vm6, %v1953_v60, %v1968_v55 }
 0x170   : > { %12720 = vst [vmem:[#allocation37_spill] sm:$0xff] %v8139_v18  ;;  %v12721_v27 = vxor.u32 2147483648, %v8029_v2  ;;  %v1685_v37 = vsub.s32 0, %v8121_v42  ;;  %v6290_v11 = vadd.s32 4294967169, %v2143_v57  ;;  %v1989_v49 = vadd.s32 1, %v8115_v36 }
 0x171   : > { %v8158_v7 = vsel %vm12496_vm1, %v8134_v31, 920167782  ;;  %v8160_v15 = vsel %vm6269_vm15, 0, %v6268_v25  ;;  %vm1988_vm2 = vc.u32 %v8112_v32, %v8114_v44  ;;  %v2042_v60 = vand.u32 8388607, %v12481_v58 }
 0x172   : > { %v8151_v33 = vsel %vm1309_vm7, %v12721_v27, %v8029_v2  ;;  %12722 = vst [vmem:[#allocation38_spill] sm:$0xff] %v8158_v7  ;;  %v8168_v2 = vsel %vm12496_vm1, %v1754_v53, 1326507024  ;;  %v8171_v4 = vsub.s32 32, %v8139_v18  ;;  %v1970_v20 = vsel %vm1964_vm9, %v1967_v14, %v1969_v23 }
 0x173   : > { %12723 = vst [vmem:[#allocation39_spill] sm:$0xff] %v8168_v2  ;;  %v8175_v13 = vsub.s32 32, %v2049_v29  ;;  %v8179_v38 = vsel %vm1205_vm14, %v1287_v56, %v1286_v50  ;;  %v1571_v25 = vadd.s32 %v7846_v59, %v7853_v51  ;;  %v8183_v9 = vshrl.u32 %v1839_v17, 5 }
 0x174   : > { %12724 = vst [vmem:[#allocation40_spill] sm:$0xff] %v8171_v4  ;;  %v12482_v54 = vand.u32 2147483647, %v7500_v52  ;;  %v1587_v0 = vsub.s32 32, %v8160_v15  ;;  %v8188_v57 = vmin.u32 %v1685_v37, %v8121_v42  ;;  %v8190_v47 = vadd.s32 1, %v6290_v11 }
 0x175   : > { %v1990_v55 = vsel %vm1988_vm2, %v1989_v49, %v8115_v36  ;;  %v8195_v50 = vshll.u32 %v12695_v5, %v8139_v18  ;;  %v8199_v59 = vshll.u32 %v12696_v28, %v8139_v18  ;;  %v1986_v51 = vmul.u32 %v1979_v26, %v1970_v20 }
 0x176   : > { %v2043_v17 = vor.u32 8388608, %v2042_v60  ;;  %v8206_v53 = vshrl.u32 %v12696_v28, %v8171_v4  ;;  %v2053_v36 = vshrl.u32 %v12693_v34, %v8175_v13  ;;  %v8212_v56 = vshrl.u32 %v12697_v30, %v8171_v4 }
 0x177   : > { %v8214_v14 = vadd.s32 %v1990_v55, %v1986_v51  ;;  %v2056_v26 = vshrl.u32 %v12694_v12, %v8175_v13  ;;  %v2062_v23 = vshrl.u32 %v12696_v28, %v8175_v13  ;;  %v8220_v27 = vshrl.u32 %v1571_v25, %v1587_v0 }
 0x178   : > { %v8223_v11 = vshrl.u32 %v2047_v19, 5  ;;  %v2052_v49 = vshll.u32 %v12686_v62, %v2049_v29  ;;  %v2055_v60 = vshll.u32 %v12693_v34, %v2049_v29  ;;  %v2061_v20 = vshll.u32 %v12695_v5, %v2049_v29 }
 0x179   : > { %v8228_v55 = vshll.u32 %v2043_v17, 8  ;;  %v586_v51 = vand.u32 8388607, %v12482_v54  ;;  %v2058_v25 = vshll.u32 %v12694_v12, %v2049_v29  ;;  %v2059_v0 = vshrl.u32 %v12695_v5, %v8175_v13 }
 0x17a   : > { %v8232_v58 = vor.u32 %v2053_v36, %v2052_v49  ;;  %v2065_v19 = vshrl.u32 %v12697_v30, %v8175_v13  ;;  %v1992_v46 = vadd.s32 536870912, %v8214_v14  ;;  %v8240_v37 = vor.u32 %v2056_v26, %v2055_v60 }
 0x17b   : > { %v2063_v10 = vor.u32 %v2062_v23, %v2061_v20  ;;  %v596_v17 = vshll.u32 %v12686_v62, %v7747_v3  ;;  %v2064_v54 = vshll.u32 %v12696_v28, %v2049_v29  ;;  %v597_v36 = vshrl.u32 %v12693_v34, %v7774_v16 }
 0x17c   : > { %v599_v49 = vshll.u32 %v12693_v34, %v7747_v3  ;;  %v600_v8 = vshrl.u32 %v12694_v12, %v7774_v16  ;;  %v602_v1 = vshll.u32 %v12694_v12, %v7747_v3  ;;  %v603_v26 = vshrl.u32 %v12695_v5, %v7774_v16 }
 0x17d   : > { %v605_v23 = vshll.u32 %v12695_v5, %v7747_v3  ;;  %v606_v29 = vshrl.u32 %v12696_v28, %v7774_v16  ;;  %v2060_v60 = vor.u32 %v2059_v0, %v2058_v25  ;;  %v2066_v20 = vor.u32 %v2065_v19, %v2064_v54 }
 0x17e   : > { %vm2067_vm4 = vcmp.lt.s32.totalorder %v8223_v11, 1  ;;  %vm2070_vm5 = vcmp.lt.s32.totalorder %v8223_v11, 4  ;;  %v8261_v18 = vshrl.u32 %v1992_v46, 30  ;;  %v598_v41 = vor.u32 %v597_v36, %v596_v17 }
 0x17f   : > { %v2076_v4 = vsel %vm2070_vm5, %v2063_v10, 920167782  ;;  %v607_v31 = vor.u32 %v606_v29, %v605_v23  ;;  %v601_v2 = vor.u32 %v600_v8, %v599_v49  ;;  %v604_v7 = vor.u32 %v603_v26, %v602_v1 }
 0x180   : > { %12725 = vst [vmem:[#allocation41_spill] sm:$0xff] %v8261_v18  ;;  %v608_v39 = vshll.u32 %v12696_v28, %v7747_v3  ;;  %v609_v25 = vshrl.u32 %v12697_v30, %v7774_v16  ;;  %vm2069_vm6 = vcmp.lt.s32.totalorder %v8223_v11, 3  ;;  %v2075_v54 = vsel %vm2067_vm4, %v8232_v58, %v8240_v37 }
 0x181   : > { %vm611_vm8 = vcmp.lt.s32.totalorder %v7755_v48, 1  ;;  %vm613_vm9 = vcmp.lt.s32.totalorder %v7755_v48, 3  ;;  %vm2150_vm10 = vcmp.gt.s32.totalorder %v8190_v47, 0  ;;  %v2077_v1 = vsel %vm2069_vm6, %v2060_v60, %v2076_v4 }
 0x182   : > { %v2080_v3 = vsel %vm2070_vm5, %v2066_v20, 1326507024  ;;  %v610_v8 = vor.u32 %v609_v25, %v608_v39  ;;  %vm614_vm15 = vcmp.lt.s32.totalorder %v7755_v48, 4  ;;  %v1994_v46 = vshll.u32 %v8261_v18, 30 }
 0x183   : > { %vm2068_vm2 = vcmp.lt.s32.totalorder %v8223_v11, 2  ;;  %v587_v0 = vor.u32 8388608, %v586_v51  ;;  %v620_v19 = vsel %vm614_vm15, %v607_v31, 920167782  ;;  %v2079_v17 = vsel %vm2067_vm4, %v8240_v37, %v2060_v60 }
 0x184   : > { %vm612_vm1 = vcmp.lt.s32.totalorder %v7755_v48, 2  ;;  %v619_v4 = vsel %vm611_vm8, %v598_v41, %v601_v2  ;;  %v621_v39 = vsel %vm613_vm9, %v604_v7, %v620_v19  ;;  %v2078_v36 = vsel %vm2068_vm2, %v2075_v54, %v2077_v1 }
 0x185   : > { %v2081_v51 = vsel %vm2069_vm6, %v2063_v10, %v2080_v3  ;;  %v595_v49 = vshrl.u32 %v12686_v62, %v7774_v16  ;;  %v623_v26 = vsel %vm611_vm8, %v601_v2, %v604_v7  ;;  %v2051_v23 = vshrl.u32 %v12686_v62, %v8175_v13 }
 0x186   : > { %v2072_v29 = vsel %vm2070_vm5, %v2060_v60, 2102212464  ;;  %v616_v20 = vsel %vm614_vm15, %v604_v7, 2102212464  ;;  %v624_v25 = vsel %vm614_vm15, %v610_v8, 1326507024  ;;  %v8311_v10 = vsub.s32 %v8214_v14, %v1994_v46 }
 0x187   : > { %v622_v16 = vsel %vm612_vm1, %v619_v4, %v621_v39  ;;  %v625_v54 = vsel %vm613_vm9, %v607_v31, %v624_v25  ;;  %v627_v1 = vshll.u32 %v587_v0, 8  ;;  %v2082_v13 = vsel %vm2068_vm2, %v2079_v17, %v2081_v51 }
 0x188   : > { %v8320_v60 = vmul.u32.u64.low %v8228_v55, %v2078_v36  ;;  %v8321_v3 = vmul.u32.u64.high %v8228_v55, %v2078_v36, %v8320_v60  ;;  %v626_v7 = vsel %vm612_vm1, %v623_v26, %v625_v54  ;;  %v615_v14 = vsel %vm611_vm8, %v595_v49, %v598_v41 }
 0x189   : > { %v617_v8 = vsel %vm613_vm9, %v601_v2, %v616_v20  ;;  %v8330_v46 = vmul.u32.u64.low %v627_v1, %v626_v7  ;;  %v8331_v31 = vmul.u32.u64.high %v627_v1, %v626_v7, %v8330_v46  ;;  %v12727_v0 = vsub.s32 4294967266, %v8160_v15 }
 0x18a   : > { %12726 = vst [vmem:[#allocation42_spill] sm:$0xff] %v8320_v60  ;;  %v8337_v17 = vor.u32 %v8206_v53, %v8195_v50  ;;  %v8339_v4 = vmul.u32.u64.low %v627_v1, %v622_v16  ;;  %v8340_v39 = vmul.u32.u64.high %v627_v1, %v622_v16, %v8339_v4  ;;  %v12729_v36 = vclz %v8188_v57 }
 0x18b   : > { %v1592_v19 = vadd.s32 127, %v12727_v0  ;;  %v1858_v2 = vor.u32 %v8212_v56, %v8199_v59  ;;  %v2071_v51 = vsel %vm2067_vm4, %v2051_v23, %v8232_v58  ;;  %v2073_v49 = vsel %vm2069_vm6, %v8240_v37, %v2072_v29 }
 0x18c   : > { %12728 = vst [vmem:[#allocation43_spill] sm:$0xff] %v8337_v17  ;;  %v6272_v41 = vadd.s32 4294967294, %v12729_v36  ;;  %v1997_v50 = vsub.s32 0, %v8311_v10  ;;  %v8355_v53 = vmul.u32.u64.low %v8228_v55, %v2082_v13  ;;  %v8356_v26 = vmul.u32.u64.high %v8228_v55, %v2082_v13, %v8355_v53  ;;  %v12733_v13 = vld [vmem:[#allocation15_spill] sm:$0xff] }
 0x18d   : > { %v618_v57 = vsel %vm612_vm1, %v615_v14, %v617_v8  ;;  %v8362_v59 = vadd.s32 %v7970_v40, %v7967_v6  ;;  %vm1862_vm5 = vcmp.lt.s32.totalorder %v8183_v9, 4  ;;  %v8368_v58 = vsel %vm2150_vm10, %v8190_v47, 0 }
 0x18e   : > { %12730 = vst [vmem:[#allocation44_spill] sm:$0xff] %v8356_v26  ;;  %vm636_vm4 = vc.u32 %v8331_v31, %v8339_v4  ;;  %v12731_v56 = vshll.u32 %v8027_v22, %v8160_v15  ;;  %v1593_v37 = vshll.u32 %v1592_v19, 23  ;;  %v8381_v6 = vsel %vm1862_vm5, %v8337_v17, 920167782 }
 0x18f   : > { %v637_v40 = vadd.s32 1, %v8340_v39  ;;  %vm6273_vm1 = vcmp.lt.s32.totalorder %v6272_v41, 0  ;;  %v8386_v47 = vsel %vm1862_vm5, %v1858_v2, 1326507024  ;;  %v2074_v23 = vsel %vm2068_vm2, %v2071_v51, %v2073_v49 }
 0x190   : > { %v8376_v48 = vor.u32 %v8220_v27, %v12731_v56  ;;  %12732 = vst [vmem:[#allocation45_spill] sm:$0xff] %v8386_v47  ;;  %v634_v22 = vmul.u32 %v627_v1, %v618_v57  ;;  %v6283_v15 = vmin.u32 %v1997_v50, %v8311_v10  ;;  %v2093_v27 = vadd.s32 1, %v8321_v3 }
 0x191   : > { %v638_v29 = vsel %vm636_vm4, %v637_v40, %v8340_v39  ;;  %v12497_v20 = vand.u32 2147483647, %v7391_v21  ;;  %v701_v16 = vshrl.u32 %v12693_v34, %v7745_v61  ;;  %v704_v54 = vshrl.u32 %v12694_v12, %v7745_v61 }
 0x192   : > { %v639_v25 = vadd.s32 %v638_v29, %v634_v22  ;;  %v707_v11 = vshrl.u32 %v12695_v5, %v7745_v61  ;;  %v709_v1 = vshll.u32 %v12695_v5, %v12733_v13  ;;  %v710_v7 = vshrl.u32 %v12696_v28, %v7745_v61 }
 0x193   : > { %v712_v14 = vshll.u32 %v12696_v28, %v12733_v13  ;;  %v713_v8 = vshrl.u32 %v12697_v30, %v7745_v61  ;;  %v700_v0 = vshll.u32 %v12686_v62, %v12733_v13  ;;  %v703_v19 = vshll.u32 %v12693_v34, %v12733_v13 }
 0x194   : > { %v640_v46 = vadd.s32 536870912, %v639_v25  ;;  %v706_v39 = vshll.u32 %v12694_v12, %v12733_v13  ;;  %vm2092_vm6 = vc.u32 %v8356_v26, %v8320_v60  ;;  %v690_v36 = vand.u32 8388607, %v12497_v20 }
 0x195   : > { %v711_v2 = vor.u32 %v710_v7, %v709_v1  ;;  %v714_v51 = vor.u32 %v713_v8, %v712_v14  ;;  %v702_v50 = vor.u32 %v701_v16, %v700_v0  ;;  %v705_v53 = vor.u32 %v704_v54, %v703_v19  ;;  %v12734_v7 = vld [vmem:[#allocation12_spill] sm:$0xff] }
 0x196   : > { %v8418_v49 = vshrl.u32 %v640_v46, 30  ;;  %v708_v57 = vor.u32 %v707_v11, %v706_v39  ;;  %v8420_v56 = vor.u32 4788187, %v1593_v37  ;;  %v8423_v40 = vsel %vm6273_vm1, 0, %v6272_v41 }
 0x197   : > { %v8426_v22 = vand.u32 31, %v8368_v58  ;;  %v2090_v29 = vmul.u32 %v8228_v55, %v2074_v23  ;;  %v1999_v13 = vclz %v6283_v15  ;;  %v2094_v20 = vsel %vm2092_vm6, %v2093_v27, %v8321_v3 }
 0x198   : > { %v642_v1 = vshll.u32 %v8418_v49, 30  ;;  %vm718_vm8 = vcmp.lt.s32.totalorder %v12734_v7, 4  ;;  %v691_v16 = vor.u32 8388608, %v690_v36  ;;  %vm715_vm9 = vcmp.lt.s32.totalorder %v12734_v7, 1 }
 0x199   : > { %v724_v37 = vsel %vm718_vm8, %v711_v2, 920167782  ;;  %v728_v54 = vsel %vm718_vm8, %v714_v51, 1326507024  ;;  %vm717_vm10 = vcmp.lt.s32.totalorder %v12734_v7, 3  ;;  %v723_v41 = vsel %vm715_vm9, %v702_v50, %v705_v53 }
 0x19a   : > { %v8433_v11 = vsub.s32 %v639_v25, %v642_v1  ;;  %v727_v55 = vsel %vm715_vm9, %v705_v53, %v708_v57  ;;  %v1695_v3 = vsub.s32 4294967266, %v8423_v40  ;;  %v720_v23 = vsel %vm718_vm8, %v708_v57, 2102212464 }
 0x19b   : > { %v725_v15 = vsel %vm717_vm10, %v708_v57, %v724_v37  ;;  %v729_v27 = vsel %vm717_vm10, %v711_v2, %v728_v54  ;;  %v8445_v14 = vadd.s32 %v2094_v20, %v2090_v29  ;;  %v699_v8 = vshrl.u32 %v12686_v62, %v7745_v61 }
 0x19c   : > { %v645_v25 = vsub.s32 0, %v8433_v11  ;;  %vm716_vm15 = vcmp.lt.s32.totalorder %v12734_v7, 2  ;;  %v6284_v46 = vadd.s32 4294967294, %v1999_v13  ;;  %v731_v39 = vshll.u32 %v691_v16, 8  ;;  %v12741_v7 = vld [vmem:[#allocation20_spill] sm:$0xff] }
 0x19d   : > { %v726_v0 = vsel %vm716_vm15, %v723_v41, %v725_v15  ;;  %v730_v19 = vsel %vm716_vm15, %v727_v55, %v729_v27  ;;  %v1691_v36 = vsub.s32 32, %v8423_v40  ;;  %v719_v2 = vsel %vm715_vm9, %v699_v8, %v702_v50  ;;  %v12736_v27 = vld [vmem:[#allocation4_spill] sm:$0xff] }
 0x19e   : > { %v6231_v20 = vmin.u32 %v645_v25, %v8433_v11  ;;  %v721_v61 = vsel %vm717_vm10, %v705_v53, %v720_v23  ;;  %v8461_v51 = vmul.u32.u64.low %v731_v39, %v730_v19  ;;  %v8462_v57 = vmul.u32.u64.high %v731_v39, %v730_v19, %v8461_v51  ;;  %v12740_v8 = vld [vmem:[#allocation8_spill] sm:$0xff] }
 0x19f   : > { %v8464_v29 = vmul.u32.u64.low %v731_v39, %v726_v0  ;;  %v8465_v13 = vmul.u32.u64.high %v731_v39, %v726_v0, %v8464_v29  ;;  %v1696_v16 = vadd.s32 127, %v1695_v3  ;;  %v8470_v37 = vshrl.u32 %v8368_v58, 5 }
 0x1a0   : > { %v647_v54 = vclz %v6231_v20  ;;  %v8473_v41 = vsub.s32 32, %v8426_v22  ;;  %vm6285_vm2 = vcmp.lt.s32.totalorder %v6284_v46, 0  ;;  %v2096_v50 = vadd.s32 536870912, %v8445_v14 }
 0x1a1   : > { %12735 = vst [vmem:[#allocation15_spill] sm:$0xff] %v8470_v37  ;;  %v722_v53 = vsel %vm716_vm15, %v719_v2, %v721_v61  ;;  %v1693_v23 = vshrl.u32 %v8362_v59, %v1691_v36  ;;  %v12737_v3 = vand.u32 2147483647, %v12736_v27  ;;  %vm740_vm1 = vc.u32 %v8462_v57, %v8464_v29 }
 0x1a2   : > { %v6232_v15 = vadd.s32 4294967294, %v647_v54  ;;  %v741_v25 = vadd.s32 1, %v8465_v13  ;;  %v873_v0 = vsub.s32 4, %v12740_v8  ;;  %v1697_v59 = vshll.u32 %v1696_v16, 23 }
 0x1a3   : > { %vm8482_vm4 = vcmp.le.f32.partialorder %v12737_v3, 0.7853982  ;;  %v8494_v36 = vsel %vm6285_vm2, 0, %v6284_v46  ;;  %v738_v20 = vmul.u32 %v731_v39, %v722_v53  ;;  %v8496_v2 = vshrl.u32 %v2096_v50, 30 }
 0x1a4   : > { %v875_v19 = vsel %vm8482_vm4, %v12736_v27, %v12741_v7  ;;  %vm6233_vm6 = vcmp.lt.s32.totalorder %v6232_v15, 0  ;;  %v635_v61 = vadd.s32 %v8339_v4, %v8331_v31  ;;  %v742_v54 = vsel %vm740_vm1, %v741_v25, %v8465_v13 }
 0x1a5   : > { %12742 = vst [vmem:[#allocation12_spill] sm:$0xff] %v8496_v2  ;;  %v650_v51 = vsel %vm6233_vm6, 0, %v6232_v15  ;;  %v743_v55 = vadd.s32 %v742_v54, %v738_v20  ;;  %6853 = vcosq.f32 %v875_v19  ;;  %v2007_v60 = vsub.s32 4294967266, %v8494_v36  ;;  %v12747_v54 = vld [vmem:[#allocation5_spill] sm:$0xff] }
 0x1a6   : > { %v651_v3 = vsub.s32 32, %v650_v51  ;;  %v655_v1 = vsub.s32 4294967266, %v650_v51  ;;  %v665_v16 = vsub.s32 4, %v8418_v49  ;;  %v874_v46 = vsel %vm789_vm11, %v873_v0, %v12740_v8 }
 0x1a7   : > { %6855 = vsinq.f32 %v875_v19  ;;  %v652_v39 = vshll.u32 %v8433_v11, %v650_v51  ;;  %v744_v4 = vadd.s32 536870912, %v743_v55  ;;  %v1692_v13 = vshll.u32 %v8121_v42, %v8423_v40  ;;  %v12746_v19 = vld [vmem:[#allocation9_spill] sm:$0xff] }
 0x1a8   : > { %v653_v50 = vshrl.u32 %v635_v61, %v651_v3  ;;  %v656_v31 = vadd.s32 127, %v655_v1  ;;  %v8509_v53 = vor.u32 4788187, %v1697_v59  ;;  %v12743_v15 = vand.u32 2147483647, %v7500_v52 }
 0x1a9   : > { %vm581_vm9 = vcmp.lt.s32.totalorder %v7500_v52, 0  ;;  %v745_v7 = vshrl.u32 %v744_v4, 30  ;;  %v876_v11 = vsel %vm8482_vm4, 0, %v874_v46  ;;  %v8520_v1 = vadd.s32 127, %v2007_v60 }
 0x1aa   : > { %vm8513_vm8 = vcmp.le.f32.partialorder %v12743_v15, 0.7853982  ;;  %v654_v8 = vor.u32 %v653_v50, %v652_v39  ;;  %v657_v0 = vshll.u32 %v656_v31, 23  ;;  %v2098_v42 = vshll.u32 %v8496_v2, 30  ;;  %v12752_v15 = vld [vmem:[#allocation10_spill] sm:$0xff] }
 0x1ab   : > { %v666_v40 = vsel %vm581_vm9, %v665_v16, %v8418_v49  ;;  %v977_v59 = vsub.s32 4, %v12746_v19  ;;  %v8527_v20 = vor.u32 %v1693_v23, %v1692_v13  ;;  %v746_v51 = vshll.u32 %v745_v7, 30  ;;  %v12751_v49 = vld [vmem:[#allocation21_spill] sm:$0xff] }
 0x1ac   : > { %v658_v61 = vor.u32 4788187, %v657_v0  ;;  %v12748_v3 = vand.u32 2147483647, %v12747_v54  ;;  %v8537_v60 = vadd.s32 %v8114_v44, %v8112_v32  ;;  %v880_v46 = vadd.s32 3, %v876_v11 }
 0x1ad   : > { %v661_v50 = vcvt.s32.f32 %v654_v8  ;;  %v668_v31 = vsel %vm8513_vm8, 0, %v666_v40  ;;  %v8546_v4 = vsub.s32 %v743_v55, %v746_v51  ;;  %v8550_v32 = vsub.s32 %v8445_v14, %v2098_v42 }
 0x1ae   : > { %vm8531_vm11 = vcmp.le.f32.partialorder %v12748_v3, 0.7853982  ;;  %v659_v16 = vand.u32 2147483647, %v658_v61  ;;  %v978_v44 = vsel %vm893_vm12, %v977_v59, %v12746_v19  ;;  %v1081_v0 = vsub.s32 4, %v12752_v15 }
 0x1af   : > { %v979_v23 = vsel %vm8531_vm11, %v12747_v54, %v12751_v49  ;;  %v6854_v11 = vpop.eup %6853  ;;  %v749_v8 = vsub.s32 0, %v8546_v4  ;;  %v769_v61 = vsub.s32 4, %v745_v7  ;;  %v672_v55 = vadd.s32 3, %v668_v31  ;;  %v12753_v49 = vld [vmem:[#allocation6_spill] sm:$0xff] }
 0x1b0   : > { %v662_v3 = vmul.f32 %v661_v50, %v659_v16  ;;  %6857 = vcosq.f32 %v979_v23  ;;  %v881_v51 = vand.u32 3, %v880_v46  ;;  %v12754_v13 = vand.u32 2147483647, %v12753_v49  ;;  %v12760_v50 = vld [vmem:[#allocation22_spill] sm:$0xff] }
 0x1b1   : > { %v6856_v40 = vpop.eup %6855  ;;  %6859 = vsinq.f32 %v979_v23  ;;  %v12757_v19 = vand.u32 2147483647, %v7391_v21  ;;  %v6235_v16 = vmin.u32 %v749_v8, %v8546_v4  ;;  %vm685_vm15 = vcmp.lt.s32.totalorder %v7391_v21, 0 }
 0x1b2   : > { %vm8559_vm10 = vcmp.le.f32.partialorder %v12754_v13, 0.7853982  ;;  %v663_v42 = vxor.u32 2147483648, %v662_v3  ;;  %v887_v23 = vxor.u32 2147483648, %v6854_v11  ;;  %v980_v31 = vsel %vm8531_vm11, 0, %v978_v44 }
 0x1b3   : > { %vm8565_vm12 = vcmp.le.f32.partialorder %v12757_v19, 0.7853982  ;;  %v1083_v46 = vsel %vm8559_vm10, %v12753_v49, %v12760_v50  ;;  %v1082_v13 = vsel %vm997_vm13, %v1081_v0, %v12752_v15  ;;  %v751_v58 = vclz %v6235_v16 }
 0x1b4   : > { %v664_v19 = vsel %vm581_vm9, %v663_v42, %v662_v3  ;;  %v770_v8 = vsel %vm685_vm15, %v769_v61, %v745_v7  ;;  %v884_v2 = vxor.u32 2147483648, %v6856_v40  ;;  %v8587_v26 = vand.u32 3, %v672_v55  ;;  %v12761_v3 = vld [vmem:[#allocation11_spill] sm:$0xff] }
 0x1b5   : > { %v667_v50 = vsel %vm8513_vm8, %v7500_v52, %v664_v19  ;;  %vm883_vm2 = vcmp.eq.s32.totalorder %v881_v51, 0  ;;  %6861 = vcosq.f32 %v1083_v46  ;;  %v6236_v39 = vadd.s32 4294967294, %v751_v58  ;;  %v12762_v55 = vld [vmem:[#allocation7_spill] sm:$0xff] }
 0x1b6   : > { %vm886_vm4 = vcmp.eq.s32.totalorder %v881_v51, 2  ;;  %v1084_v44 = vsel %vm8559_vm10, 0, %v1082_v13  ;;  %6863 = vsinq.f32 %v1083_v46  ;;  %v772_v15 = vsel %vm8565_vm12, 0, %v770_v8  ;;  %v12766_v46 = vld [vmem:[#allocation23_spill] sm:$0xff] }
 0x1b7   : > { %v888_v0 = vsel %vm886_vm4, %v887_v23, %v6856_v40  ;;  %v984_v7 = vadd.s32 3, %v980_v31  ;;  %v1185_v61 = vsub.s32 4, %v12761_v3  ;;  %6865 = vcosq.f32 %v667_v50 }
 0x1b8   : > { %vm6237_vm13 = vcmp.lt.s32.totalorder %v6236_v39, 0  ;;  %v885_v25 = vsel %vm883_vm2, %v6854_v11, %v884_v2  ;;  %v12763_v42 = vand.u32 2147483647, %v12762_v55  ;;  %6867 = vsinq.f32 %v667_v50 }
 0x1b9   : > { %v754_v58 = vsel %vm6237_vm13, 0, %v6236_v39  ;;  %v1088_v14 = vadd.s32 3, %v1084_v44  ;;  %v739_v31 = vadd.s32 %v8464_v29, %v8462_v57  ;;  %vm882_vm6 = vcmp.lt.s32.totalorder %v881_v51, 2  ;;  %v12767_v57 = vld [vmem:[#allocation17_spill] sm:$0xff] }
 0x1ba   : > { %vm8596_vm1 = vcmp.le.f32.partialorder %v12763_v42, 0.7853982  ;;  %v6858_v23 = vpop.eup %6857  ;;  %v755_v13 = vsub.s32 32, %v754_v58  ;;  %v759_v2 = vsub.s32 4294967266, %v754_v58  ;;  %v776_v19 = vadd.s32 3, %v772_v15 }
 0x1bb   : > { %v1187_v40 = vsel %vm8596_vm1, %v12762_v55, %v12766_v46  ;;  %v6860_v11 = vpop.eup %6859  ;;  %v985_v8 = vand.u32 3, %v984_v7  ;;  %v1186_v50 = vsel %vm1101_vm3, %v1185_v61, %v12761_v3  ;;  %v756_v39 = vshll.u32 %v8546_v4, %v754_v58 }
 0x1bc   : > { %6869 = vcosq.f32 %v1187_v40  ;;  %v757_v44 = vshrl.u32 %v739_v31, %v755_v13  ;;  %v760_v42 = vadd.s32 127, %v759_v2  ;;  %v889_v46 = vsel %vm882_vm6, %v885_v25, %v888_v0 }
 0x1bd   : > { %v991_v18 = vxor.u32 2147483648, %v6858_v23  ;;  %v8610_v37 = vand.u32 3, %v1088_v14  ;;  %6871 = vsinq.f32 %v1187_v40  ;;  %v1289_v29 = vsub.s32 4, %v12767_v57 }
 0x1be   : > { %v758_v51 = vor.u32 %v757_v44, %v756_v39  ;;  %v761_v17 = vshll.u32 %v760_v42, 23  ;;  %v988_v15 = vxor.u32 2147483648, %v6860_v11  ;;  %v1188_v7 = vsel %vm8596_vm1, 0, %v1186_v50 }
 0x1bf   : > { %v6862_v47 = vpop.eup %6861  ;;  %v2101_v3 = vsub.s32 0, %v8550_v32  ;;  %vm879_vm3 = vweird.f32 %v12736_v27  ;;  %vm986_vm8 = vcmp.lt.s32.totalorder %v985_v8, 2  ;;  %vm987_vm9 = vcmp.eq.s32.totalorder %v985_v8, 0 }
 0x1c0   : > { %v6864_v4 = vpop.eup %6863  ;;  %v762_v0 = vor.u32 4788187, %v761_v17  ;;  %v8617_v61 = vand.u32 3, %v776_v19  ;;  %v8619_v25 = vsel %vm879_vm3, nan, %v889_v46  ;;  %vm983_vm11 = vweird.f32 %v12747_v54 }
 0x1c1   : > { %vm990_vm10 = vcmp.eq.s32.totalorder %v985_v8, 2  ;;  %vm675_vm2 = vcmp.eq.s32.totalorder %v8587_v26, 0  ;;  %vm678_vm4 = vcmp.eq.s32.totalorder %v8587_v26, 2  ;;  %v1192_v58 = vadd.s32 3, %v1188_v7  ;;  %v6866_v40 = vpop.eup %6865 }
 0x1c2   : > { %v992_v16 = vsel %vm990_vm10, %v991_v18, %v6860_v11  ;;  %v12768_v14 = vand.u32 2147483647, %v7432_v24  ;;  %v1290_v17 = vsel %vm1205_vm14, %v1289_v29, %v12767_v57  ;;  %v763_v31 = vand.u32 2147483647, %v762_v0  ;;  %v6868_v11 = vpop.eup %6867 }
 0x1c3   : > { %v765_v13 = vcvt.s32.f32 %v758_v51  ;;  %v989_v2 = vsel %vm987_vm9, %v6858_v23, %v988_v15  ;;  %vm1090_vm1 = vcmp.lt.s32.totalorder %v8610_v37, 2  ;;  %vm1091_vm6 = vcmp.eq.s32.totalorder %v8610_v37, 0 }
 0x1c4   : > { %vm8626_vm13 = vcmp.le.f32.partialorder %v12768_v14, 0.7853982  ;;  %v1092_v19 = vxor.u32 2147483648, %v6864_v4  ;;  %vm1094_vm3 = vcmp.eq.s32.totalorder %v8610_v37, 2  ;;  %v1095_v50 = vxor.u32 2147483648, %v6862_v47 }
 0x1c5   : > { %v1291_v18 = vsel %vm8626_vm13, %v7432_v24, %v8179_v38  ;;  %vm674_vm14 = vcmp.lt.s32.totalorder %v8587_v26, 2  ;;  %v766_v39 = vmul.f32 %v765_v13, %v763_v31  ;;  %v1292_v23 = vsel %vm8626_vm13, 0, %v1290_v17  ;;  %v12774_v38 = vld [vmem:[#allocation14_spill] sm:$0xff] }
 0x1c6   : > { %v12771_v44 = vand.u32 2147483647, %v7339_v35  ;;  %v1393_v46 = vsub.s32 4, %v12774_v38  ;;  %v6870_v57 = vpop.eup %6869  ;;  %v993_v29 = vsel %vm986_vm8, %v989_v2, %v992_v16  ;;  %vm1087_vm10 = vweird.f32 %v12753_v49 }
 0x1c7   : > { %v1193_v51 = vand.u32 3, %v1192_v58  ;;  %6873 = vcosq.f32 %v1291_v18  ;;  %v676_v7 = vxor.u32 2147483648, %v6868_v11  ;;  %v679_v0 = vxor.u32 2147483648, %v6866_v40  ;;  %v6872_v27 = vpop.eup %6871 }
 0x1c8   : > { %vm8646_vm9 = vcmp.le.f32.partialorder %v12771_v44, 0.7853982  ;;  %v767_v14 = vxor.u32 2147483648, %v766_v39  ;;  %6875 = vsinq.f32 %v1291_v18  ;;  %vm671_vm13 = vweird.f32 %v7500_v52 }
 0x1c9   : > { %v1395_v15 = vsel %vm8646_vm9, %v7339_v35, %v8151_v33  ;;  %v1093_v8 = vsel %vm1091_vm6, %v6862_v47, %v1092_v19  ;;  %v1096_v16 = vsel %vm1094_vm3, %v1095_v50, %v6864_v4  ;;  %v1296_v58 = vadd.s32 3, %v1292_v23  ;;  %v12775_v4 = vld [vmem:[#allocation16_spill] sm:$0xff] }
 0x1ca   : > { %v1394_v17 = vsel %vm1309_vm7, %v1393_v46, %v12774_v38  ;;  %v768_v33 = vsel %vm685_vm15, %v767_v14, %v766_v39  ;;  %v1196_v31 = vxor.u32 2147483648, %v6872_v27  ;;  %v1199_v13 = vxor.u32 2147483648, %v6870_v57  ;;  %v12776_v38 = vld [vmem:[#allocation26_spill] sm:$0xff] }
 0x1cb   : > { %6877 = vcosq.f32 %v1395_v15  ;;  %v771_v2 = vsel %vm8565_vm12, %v7391_v21, %v768_v33  ;;  %v8672_v47 = vsel %vm983_vm11, nan, %v993_v29  ;;  %v12506_v18 = vand.u32 2147483647, %v12775_v4  ;;  %v12777_v29 = vld [vmem:[#allocation24_spill] sm:$0xff] }
 0x1cc   : > { %6879 = vsinq.f32 %v1395_v15  ;;  %v677_v19 = vsel %vm675_vm2, %v6866_v40, %v676_v7  ;;  %v680_v50 = vsel %vm678_vm4, %v679_v0, %v6868_v11  ;;  %v1396_v39 = vsel %vm8646_vm9, 0, %v1394_v17 }
 0x1cd   : > { %6881 = vcosq.f32 %v771_v2  ;;  %v1097_v59 = vsel %vm1090_vm1, %v1093_v8, %v1096_v16  ;;  %vm1195_vm7 = vcmp.eq.s32.totalorder %v1193_v51, 0  ;;  %vm1198_vm12 = vcmp.eq.s32.totalorder %v1193_v51, 2 }
 0x1ce   : > { %6883 = vsinq.f32 %v771_v2  ;;  %v1197_v54 = vsel %vm1195_vm7, %v6870_v57, %v1196_v31  ;;  %v1200_v23 = vsel %vm1198_vm12, %v1199_v13, %v6872_v27  ;;  %v8683_v44 = vand.u32 3, %v1296_v58 }
 0x1cf   : > { %v1429_v40 = vshrl.u32 %v12693_v34, %v12776_v38  ;;  %v681_v11 = vsel %vm674_vm14, %v677_v19, %v680_v50  ;;  %v1400_v46 = vadd.s32 3, %v1396_v39  ;;  %v1418_v42 = vand.u32 8388607, %v12506_v18 }
 0x1d0   : > { %v1428_v37 = vshll.u32 %v12686_v62, %v12777_v29  ;;  %vm782_vm15 = vcmp.eq.s32.totalorder %v8617_v61, 2  ;;  %v2244_v57 = vpack.c.bf16 %v8672_v47, %v8619_v25  ;;  %v8698_v15 = vsel %vm1087_vm10, nan, %v1097_v59 }
 0x1d1   : > { %vm1191_vm8 = vweird.f32 %v12762_v55  ;;  %vm1194_vm11 = vcmp.lt.s32.totalorder %v1193_v51, 2  ;;  %v6874_v26 = vpop.eup %6873  ;;  %vm779_vm2 = vcmp.eq.s32.totalorder %v8617_v61, 0  ;;  %v1431_v14 = vshll.u32 %v12693_v34, %v12777_v29 }
 0x1d2   : > { %v1201_v7 = vsel %vm1194_vm11, %v1197_v54, %v1200_v23  ;;  %v1430_v0 = vor.u32 %v1429_v40, %v1428_v37  ;;  %v1432_v27 = vshrl.u32 %v12694_v12, %v12776_v38  ;;  %v6876_v8 = vpop.eup %6875  ;;  %v682_v49 = vsel %vm671_vm13, nan, %v681_v11  ;;  %v12778_v54 = vld [vmem:[#allocation30_spill] sm:$0xff]  ;;  %v12779_v40 = vld [vmem:[#allocation33_spill] sm:$0xff] }
 0x1d3   : > { %vm778_vm4 = vcmp.lt.s32.totalorder %v8617_v61, 2  ;;  %vm1299_vm1 = vcmp.eq.s32.totalorder %v8683_v44, 0  ;;  %v1434_v51 = vshll.u32 %v12694_v12, %v12777_v29  ;;  %v1435_v16 = vshrl.u32 %v12695_v5, %v12776_v38 }
 0x1d4   : > { %vm775_vm6 = vweird.f32 %v7391_v21  ;;  %v8715_v58 = vand.u32 3, %v1400_v46  ;;  %v1419_v17 = vor.u32 8388608, %v1418_v42  ;;  %v1427_v33 = vshrl.u32 %v12686_v62, %v12776_v38 }
 0x1d5   : > { %v1433_v52 = vor.u32 %v1432_v27, %v1431_v14  ;;  %v6878_v31 = vpop.eup %6877  ;;  %v1202_v13 = vsel %vm1191_vm8, nan, %v1201_v7  ;;  %v1436_v2 = vor.u32 %v1435_v16, %v1434_v51  ;;  %vm1443_vm3 = vcmp.lt.s32.totalorder %v7981_v43, 1 }
 0x1d6   : > { %vm1445_vm14 = vcmp.lt.s32.totalorder %v7981_v43, 3  ;;  %v6880_v19 = vpop.eup %6879  ;;  %vm1298_vm9 = vcmp.lt.s32.totalorder %v8683_v44, 2  ;;  %v1300_v50 = vxor.u32 2147483648, %v6876_v8  ;;  %v1303_v39 = vxor.u32 2147483648, %v6874_v26 }
 0x1d7   : > { %v1451_v59 = vsel %vm1443_vm3, %v1430_v0, %v1433_v52  ;;  %v1457_v23 = vsel %vm1445_vm14, %v12778_v54, %v8130_v63  ;;  %v6882_v55 = vpop.eup %6881  ;;  %vm1444_vm10 = vcmp.lt.s32.totalorder %v7981_v43, 2  ;;  %v1448_v38 = vsel %vm1446_vm0, %v1436_v2, 2102212464 }
 0x1d8   : > { %v1453_v11 = vsel %vm1445_vm14, %v1436_v2, %v12779_v40  ;;  %v1455_v46 = vsel %vm1443_vm3, %v1433_v52, %v1436_v2  ;;  %v6884_v42 = vpop.eup %6883  ;;  %v783_v29 = vxor.u32 2147483648, %v6882_v55  ;;  %v1407_v37 = vxor.u32 2147483648, %v6878_v31 }
 0x1d9   : > { %v1454_v7 = vsel %vm1444_vm10, %v1451_v59, %v1453_v11  ;;  %v1459_v63 = vshll.u32 %v1419_v17, 8  ;;  %v780_v14 = vxor.u32 2147483648, %v6884_v42  ;;  %v1404_v27 = vxor.u32 2147483648, %v6880_v19 }
 0x1da   : > { %v1447_v51 = vsel %vm1443_vm3, %v1427_v33, %v1430_v0  ;;  %v1458_v16 = vsel %vm1444_vm10, %v1455_v46, %v1457_v23  ;;  %v784_v54 = vsel %vm782_vm15, %v783_v29, %v6884_v42  ;;  %v1449_v2 = vsel %vm1445_vm14, %v1433_v52, %v1448_v38 }
 0x1db   : > { %v8748_v40 = vmul.u32.u64.low %v1459_v63, %v1458_v16  ;;  %v8749_v18 = vmul.u32.u64.high %v1459_v63, %v1458_v16, %v8748_v40  ;;  %v781_v17 = vsel %vm779_vm2, %v6882_v55, %v780_v14  ;;  %vm1302_vm0 = vcmp.eq.s32.totalorder %v8683_v44, 2  ;;  %v12784_v44 = vld [vmem:[#allocation18_spill] sm:$0xff] }
 0x1dc   : > { %v8754_v59 = vmul.u32.u64.low %v1459_v63, %v1454_v7  ;;  %v8755_v11 = vmul.u32.u64.high %v1459_v63, %v1454_v7, %v8754_v59  ;;  %v785_v0 = vsel %vm778_vm4, %v781_v17, %v784_v54  ;;  %v2245_v33 = vpack.c.bf16 %v1202_v13, %v8698_v15 }
 0x1dd   : > { %v1301_v52 = vsel %vm1299_vm1, %v6874_v26, %v1300_v50  ;;  %v1304_v23 = vsel %vm1302_vm0, %v1303_v39, %v6876_v8  ;;  %v786_v38 = vsel %vm775_vm6, nan, %v785_v0  ;;  %vm1403_vm13 = vcmp.eq.s32.totalorder %v8715_v58, 0  ;;  %v12783_v50 = vld [vmem:[#allocation13_spill] sm:$0xff] }
 0x1de   : > { %vm1406_vm7 = vcmp.eq.s32.totalorder %v8715_v58, 2  ;;  %v1450_v55 = vsel %vm1444_vm10, %v1447_v51, %v1449_v2  ;;  %v2243_v46 = vpack.c.bf16 %v786_v38, %v682_v49  ;;  %v1405_v42 = vsel %vm1403_vm13, %v6878_v31, %v1404_v27  ;;  %v12787_v27 = vld [vmem:[#allocation32_spill] sm:$0xff] }
 0x1df   : > { %v1408_v61 = vsel %vm1406_vm7, %v1407_v37, %v6880_v19  ;;  %vm1468_vm12 = vc.u32 %v8749_v18, %v8754_v59  ;;  %v1699_v15 = vand.u32 2147483647, %v8509_v53  ;;  %v6287_v21 = vmin.u32 %v2101_v3, %v8550_v32 }
 0x1e0   : > { %v1305_v26 = vsel %vm1298_vm9, %v1301_v52, %v1304_v23  ;;  %v1469_v8 = vadd.s32 1, %v8755_v11  ;;  %v12780_v43 = vand.u32 2147483647, %v8420_v56  ;;  %v12781_v49 = vcvt.s32.f32 %v8376_v48  ;;  %6515 = vmatprep.mubr.bf16.mxu0 %v2243_v46 }
 0x1e1   : > { %v12782_v13 = vsub.s32 32, %v8494_v36  ;;  %vm1402_vm15 = vcmp.lt.s32.totalorder %v8715_v58, 2  ;;  %v1466_v53 = vmul.u32 %v1459_v63, %v1450_v55  ;;  %vm1517_vm8 = vcmp.lt.s32.totalorder %v12783_v50, 0  ;;  %6516 = vmatmul.mubr.bf16.vlgmr.msra.gmra.mrb[0].mxu0 %v2244_v57  ;;  %v12786_v63 = vld [vmem:[#allocation19_spill] sm:$0xff] }
 0x1e2   : > { %v1598_v31 = vmul.f32 %v12781_v49, %v12780_v43  ;;  %v1701_v3 = vcvt.s32.f32 %v8527_v20  ;;  %vm1295_vm11 = vweird.f32 %v7432_v24  ;;  %v1409_v48 = vsel %vm1402_vm15, %v1405_v42, %v1408_v61  ;;  %6519 = vmatprep.mubr.bf16.mxu0 %v2245_v33  ;;  %v12788_v49 = vld [vmem:[#allocation27_spill] sm:$0xff] }
 0x1e3   : > { %v2005_v19 = vshrl.u32 %v8537_v60, %v12782_v13  ;;  %v1470_v56 = vsel %vm1468_vm12, %v1469_v8, %v8755_v11  ;;  %vm1621_vm2 = vcmp.lt.s32.totalorder %v12784_v44, 0  ;;  %v2004_v60 = vshll.u32 %v8311_v10, %v8494_v36 }
 0x1e4   : > { %v12785_v58 = vshll.u32 %v8520_v1, 23  ;;  %v1306_v29 = vsel %vm1295_vm11, nan, %v1305_v26  ;;  %v1471_v20 = vadd.s32 %v1470_v56, %v1466_v53  ;;  %v1702_v37 = vmul.f32 %v1701_v3, %v1699_v15 }
 0x1e5   : > { %v2165_v25 = vshll.u32 %v12695_v5, %v8426_v22  ;;  %v2103_v47 = vclz %v6287_v21  ;;  %vm1399_vm4 = vweird.f32 %v7339_v35  ;;  %v2006_v24 = vor.u32 %v2005_v19, %v2004_v60 }
 0x1e6   : > { %v2010_v39 = vor.u32 4788187, %v12785_v58  ;;  %v1410_v57 = vsel %vm1399_vm4, nan, %v1409_v48  ;;  %v1472_v7 = vadd.s32 536870912, %v1471_v20  ;;  %v1723_v14 = vand.u32 2147483647, %v12786_v63 }
 0x1e7   : > { %v2166_v10 = vshrl.u32 %v12696_v28, %v8473_v41  ;;  %v8806_v36 = vshll.u32 %v12696_v28, %v8426_v22  ;;  %v2246_v1 = vpack.c.bf16 %v1410_v57, %v1306_v29  ;;  %v1741_v51 = vshrl.u32 %v12693_v34, %v12787_v27  ;;  %v12793_v58 = vld [vmem:[#allocation38_spill] sm:$0xff] }
 0x1e8   : > { %v1599_v16 = vxor.u32 2147483648, %v1598_v31  ;;  %v2011_v54 = vand.u32 2147483647, %v2010_v39  ;;  %v8810_v2 = vshrl.u32 %v1472_v7, 30  ;;  %v1744_v35 = vshrl.u32 %v12694_v12, %v12787_v27 }
 0x1e9   : > { %v1703_v40 = vxor.u32 2147483648, %v1702_v37  ;;  %v6288_v17 = vadd.s32 4294967294, %v2103_v47  ;;  %v1740_v11 = vshll.u32 %v12686_v62, %v8012_v45  ;;  %v1743_v0 = vshll.u32 %v12693_v34, %v8012_v45  ;;  %6520 = vmatmul.mubr.bf16.gmra.mrb[4].mxu0 %v2246_v1 }
 0x1ea   : > { %v8820_v33 = vshrl.u32 %v12697_v30, %v8473_v41  ;;  %v2013_v52 = vcvt.s32.f32 %v2006_v24  ;;  %v1474_v23 = vshll.u32 %v8810_v2, 30  ;;  %v1730_v38 = vand.u32 8388607, %v1723_v14 }
 0x1eb   : > { %v1742_v55 = vor.u32 %v1741_v51, %v1740_v11  ;;  %v1745_v46 = vor.u32 %v1744_v35, %v1743_v0  ;;  %v1746_v42 = vshll.u32 %v12694_v12, %v8012_v45  ;;  %v1747_v61 = vshrl.u32 %v12695_v5, %v12787_v27  ;;  %v12799_v35 = vld [vmem:[#allocation36_spill] sm:$0xff] }
 0x1ec   : > { %v1600_v15 = vsel %vm1517_vm8, %v1599_v16, %v1598_v31  ;;  %v8831_v21 = vor.u32 %v2166_v10, %v2165_v25  ;;  %v8833_v26 = vmul.f32 %v2013_v52, %v2011_v54  ;;  %v8835_v8 = vsub.s32 %v1471_v20, %v1474_v23  ;;  %v12792_v31 = vld [vmem:[#allocation31_spill] sm:$0xff] }
 0x1ed   : > { %v1704_v43 = vsel %vm1621_vm2, %v1703_v40, %v1702_v37  ;;  %vm6289_vm1 = vcmp.lt.s32.totalorder %v6288_v17, 0  ;;  %v1601_v13 = vsub.s32 4, %v12788_v49  ;;  %v1748_v19 = vor.u32 %v1747_v61, %v1746_v42  ;;  %v12798_v54 = vld [vmem:[#allocation39_spill] sm:$0xff] }
 0x1ee   : > { %v1477_v45 = vsub.s32 0, %v8835_v8  ;;  %v12789_v53 = vand.u32 2147483647, %v12783_v50  ;;  %vm1755_vm3 = vcmp.lt.s32.totalorder %v12792_v31, 1  ;;  %vm1757_vm14 = vcmp.lt.s32.totalorder %v12792_v31, 3 }
 0x1ef   : > { %v1731_v56 = vor.u32 8388608, %v1730_v38  ;;  %v1763_v60 = vsel %vm1755_vm3, %v1742_v55, %v1745_v46  ;;  %v1765_v39 = vsel %vm1757_vm14, %v1748_v19, %v12793_v58  ;;  %v2015_v29 = vxor.u32 2147483648, %v8833_v26 }
 0x1f0   : > { %vm8843_vm6 = vcmp.le.f32.partialorder %v12789_v53, 0.7853982  ;;  %v8858_v20 = vsel %vm6289_vm1, 0, %v6288_v17  ;;  %v6263_v37 = vmin.u32 %v1477_v45, %v8835_v8  ;;  %vm12794_vm9 = vcmp.lt.s32.totalorder %v12792_v31, 4  ;;  %v12802_v45 = vld [vmem:[#allocation40_spill] sm:$0xff] }
 0x1f1   : > { %v1603_v48 = vsel %vm8843_vm6, %v12783_v50, %v1600_v15  ;;  %v1760_v25 = vsel %vm12794_vm9, %v1748_v19, 2102212464  ;;  %v1602_v47 = vsel %vm1517_vm8, %v1601_v13, %v12788_v49  ;;  %v1739_v24 = vshrl.u32 %v12686_v62, %v12787_v27  ;;  %v12801_v13 = vld [vmem:[#allocation34_spill] sm:$0xff] }
 0x1f2   : > { %vm1756_vm10 = vcmp.lt.s32.totalorder %v12792_v31, 2  ;;  %v1767_v57 = vsel %vm1755_vm3, %v1745_v46, %v1748_v19  ;;  %v1479_v7 = vclz %v6263_v37  ;;  %6885 = vcosq.f32 %v1603_v48 }
 0x1f3   : > { %v12795_v10 = vand.u32 2147483647, %v12784_v44  ;;  %v1766_v51 = vsel %vm1756_vm10, %v1763_v60, %v1765_v39  ;;  %v1759_v16 = vsel %vm1755_vm3, %v1739_v24, %v1742_v55  ;;  %v1761_v27 = vsel %vm1757_vm14, %v1745_v46, %v1760_v25 }
 0x1f4   : > { %v1769_v40 = vsel %vm1757_vm14, %v12799_v35, %v12798_v54  ;;  %v1771_v17 = vshll.u32 %v1731_v56, 8  ;;  %v1467_v11 = vadd.s32 %v8754_v59, %v8749_v18  ;;  %v6264_v0 = vadd.s32 4294967294, %v1479_v7  ;;  %v12800_v18 = vld [vmem:[#allocation28_spill] sm:$0xff] }
 0x1f5   : > { %vm8873_vm0 = vcmp.le.f32.partialorder %v12795_v10, 0.7853982  ;;  %v1604_v52 = vsel %vm8843_vm6, 0, %v1602_v47  ;;  %v1770_v23 = vsel %vm1756_vm10, %v1767_v57, %v1769_v40  ;;  %6887 = vsinq.f32 %v1603_v48  ;;  %v12803_v48 = vld [vmem:[#allocation37_spill] sm:$0xff] }
 0x1f6   : > { %v8893_v38 = vmul.u32.u64.low %v1771_v17, %v1770_v23  ;;  %v8894_v55 = vmul.u32.u64.high %v1771_v17, %v1770_v23, %v8893_v38  ;;  %v8896_v46 = vmul.u32.u64.low %v1771_v17, %v1766_v51  ;;  %v8897_v42 = vmul.u32.u64.high %v1771_v17, %v1766_v51, %v8896_v46 }
 0x1f7   : > { %vm6265_vm13 = vcmp.lt.s32.totalorder %v6264_v0, 0  ;;  %v1762_v61 = vsel %vm1756_vm10, %v1759_v16, %v1761_v27  ;;  %v1827_v59 = vand.u32 2147483647, %v12800_v18  ;;  %v8903_v49 = vadd.s32 3, %v1604_v52 }
 0x1f8   : > { %v1482_v15 = vsel %vm6265_vm13, 0, %v6264_v0  ;;  %v1705_v19 = vsub.s32 4, %v12801_v13  ;;  %v1845_v53 = vshrl.u32 %v12693_v34, %v12802_v45  ;;  %v1707_v60 = vsel %vm8873_vm0, %v12784_v44, %v1704_v43 }
 0x1f9   : > { %v1483_v3 = vsub.s32 32, %v1482_v15  ;;  %v1487_v56 = vsub.s32 4294967266, %v1482_v15  ;;  %v1844_v31 = vshll.u32 %v12686_v62, %v12803_v48  ;;  %v1778_v58 = vmul.u32 %v1771_v17, %v1762_v61 }
 0x1fa   : > { %vm1780_vm7 = vc.u32 %v8894_v55, %v8896_v46  ;;  %v1781_v39 = vadd.s32 1, %v8897_v42  ;;  %v1834_v37 = vand.u32 8388607, %v1827_v59  ;;  %v1484_v25 = vshll.u32 %v8835_v8, %v1482_v15 }
 0x1fb   : > { %v1485_v47 = vshrl.u32 %v1467_v11, %v1483_v3  ;;  %v1488_v24 = vadd.s32 127, %v1487_v56  ;;  %v1846_v57 = vor.u32 %v1845_v53, %v1844_v31  ;;  %v1847_v43 = vshll.u32 %v12693_v34, %v12803_v48  ;;  %v12805_v56 = vld [vmem:[#allocation43_spill] sm:$0xff] }
 0x1fc   : > { %v1782_v7 = vsel %vm1780_vm7, %v1781_v39, %v8897_v42  ;;  %v1848_v10 = vshrl.u32 %v12694_v12, %v12802_v45  ;;  %v1850_v51 = vshll.u32 %v12694_v12, %v12803_v48  ;;  %v8926_v16 = vpop.eup %6885  ;;  %vm1413_vm12 = vcmp.lt.s32.totalorder %v12775_v4, 0 }
 0x1fd   : > { %v1486_v27 = vor.u32 %v1485_v47, %v1484_v25  ;;  %v1489_v8 = vshll.u32 %v1488_v24, 23  ;;  %v1783_v54 = vadd.s32 %v1782_v7, %v1778_v58  ;;  %v1851_v35 = vshrl.u32 %v12695_v5, %v12802_v45 }
 0x1fe   : > { %v1497_v40 = vsub.s32 4, %v8810_v2  ;;  %v1706_v17 = vsel %vm1621_vm2, %v1705_v19, %v12801_v13  ;;  %v1835_v11 = vor.u32 8388608, %v1834_v37  ;;  %v1849_v0 = vor.u32 %v1848_v10, %v1847_v43  ;;  %v12804_v19 = vld [vmem:[#allocation45_spill] sm:$0xff] }
 0x1ff   : > { %v1490_v52 = vor.u32 4788187, %v1489_v8  ;;  %v1784_v23 = vadd.s32 536870912, %v1783_v54  ;;  %v1852_v38 = vor.u32 %v1851_v35, %v1850_v51  ;;  %vm1859_vm15 = vcmp.lt.s32.totalorder %v8183_v9, 1  ;;  %v6888_v15 = vpop.eup %6887  ;;  %v12806_v10 = vld [vmem:[#allocation25_spill] sm:$0xff] }
 0x200   : > { %v1493_v42 = vcvt.s32.f32 %v1486_v27  ;;  %vm1860_vm8 = vcmp.lt.s32.totalorder %v8183_v9, 2  ;;  %vm1861_vm11 = vcmp.lt.s32.totalorder %v8183_v9, 3  ;;  %v1867_v61 = vsel %vm1859_vm15, %v1846_v57, %v1849_v0 }
 0x201   : > { %v1491_v53 = vand.u32 2147483647, %v1490_v52  ;;  %v8940_v3 = vshrl.u32 %v1784_v23, 30  ;;  %v1869_v13 = vsel %vm1861_vm11, %v1852_v38, %v8381_v6  ;;  %v1873_v48 = vsel %vm1861_vm11, %v12805_v56, %v12804_v19  ;;  %v12810_v19 = vld [vmem:[#allocation15_spill] sm:$0xff] }
 0x202   : > { %v1864_v31 = vsel %vm1862_vm5, %v1852_v38, 2102212464  ;;  %v1870_v58 = vsel %vm1860_vm8, %v1867_v61, %v1869_v13  ;;  %v1871_v39 = vsel %vm1859_vm15, %v1849_v0, %v1852_v38  ;;  %v1875_v37 = vshll.u32 %v1835_v11, 8 }
 0x203   : > { %v1494_v25 = vmul.f32 %v1493_v42, %v1491_v53  ;;  %6889 = vcosq.f32 %v1707_v60  ;;  %v1786_v47 = vshll.u32 %v8940_v3, 30  ;;  %v1843_v6 = vshrl.u32 %v12686_v62, %v12802_v45 }
 0x204   : > { %6891 = vsinq.f32 %v1707_v60  ;;  %v1874_v24 = vsel %vm1860_vm8, %v1871_v39, %v1873_v48  ;;  %v8960_v7 = vmul.u32.u64.low %v1875_v37, %v1870_v58  ;;  %v8961_v43 = vmul.u32.u64.high %v1875_v37, %v1870_v58, %v8960_v7 }
 0x205   : > { %vm1933_vm5 = vcmp.lt.s32.totalorder %v12806_v10, 0  ;;  %v1495_v51 = vxor.u32 2147483648, %v1494_v25  ;;  %v8965_v27 = vsub.s32 %v1783_v54, %v1786_v47  ;;  %v1863_v8 = vsel %vm1859_vm15, %v1843_v6, %v1846_v57 }
 0x206   : > { %v1865_v35 = vsel %vm1861_vm11, %v1849_v0, %v1864_v31  ;;  %v12807_v45 = vand.u32 2147483647, %v12775_v4  ;;  %v1498_v11 = vsel %vm1413_vm12, %v1497_v40, %v8810_v2  ;;  %v1609_v57 = vand.u32 3, %v8903_v49 }
 0x207   : > { %v8980_v52 = vmul.u32.u64.low %v1875_v37, %v1874_v24  ;;  %v8981_v23 = vmul.u32.u64.high %v1875_v37, %v1874_v24, %v8980_v52  ;;  %v1496_v54 = vsel %vm1413_vm12, %v1495_v51, %v1494_v25  ;;  %v1708_v0 = vsel %vm8873_vm0, 0, %v1706_v17 }
 0x208   : > { %vm8973_vm2 = vcmp.le.f32.partialorder %v12807_v45, 0.7853982  ;;  %v1789_v38 = vsub.s32 0, %v8965_v27  ;;  %v1615_v61 = vxor.u32 2147483648, %v8926_v16  ;;  %v1866_v2 = vsel %vm1860_vm8, %v1863_v8, %v1865_v35 }
 0x209   : > { %v1499_v42 = vsel %vm8973_vm2, %v12775_v4, %v1496_v54  ;;  %v1885_v40 = vadd.s32 1, %v8961_v43  ;;  %v1500_v53 = vsel %vm8973_vm2, 0, %v1498_v11  ;;  %v1612_v49 = vxor.u32 2147483648, %v6888_v15 }
 0x20a   : > { %6893 = vcosq.f32 %v1499_v42  ;;  %v6275_v1 = vmin.u32 %v1789_v38, %v8965_v27  ;;  %v2111_v17 = vsub.s32 4294967266, %v8858_v20  ;;  %v1712_v13 = vadd.s32 3, %v1708_v0 }
 0x20b   : > { %6895 = vsinq.f32 %v1499_v42  ;;  %vm1884_vm4 = vc.u32 %v8981_v23, %v8960_v7  ;;  %v2170_v9 = vor.u32 %v8820_v33, %v8806_v36  ;;  %vm2174_vm1 = vcmp.lt.s32.totalorder %v12810_v19, 4 }
 0x20c   : > { %v1791_v56 = vclz %v6275_v1  ;;  %v1882_v48 = vmul.u32 %v1875_v37, %v1866_v2  ;;  %v1504_v31 = vadd.s32 3, %v1500_v53  ;;  %vm1611_vm6 = vcmp.eq.s32.totalorder %v1609_v57, 0 }
 0x20d   : > { %vm1614_vm3 = vcmp.eq.s32.totalorder %v1609_v57, 2  ;;  %v1886_v58 = vsel %vm1884_vm4, %v1885_v40, %v8961_v43  ;;  %v6890_v39 = vpop.eup %6889  ;;  %v1613_v25 = vsel %vm1611_vm6, %v8926_v16, %v1612_v49  ;;  %v9010_v8 = vsel %vm2174_vm1, %v8831_v21, 920167782 }
 0x20e   : > { %v1616_v47 = vsel %vm1614_vm3, %v1615_v61, %v6888_v15  ;;  %v6276_v6 = vadd.s32 4294967294, %v1791_v56  ;;  %v1887_v24 = vadd.s32 %v1886_v58, %v1882_v48  ;;  %v6892_v51 = vpop.eup %6891  ;;  %v2016_v37 = vsel %vm1933_vm5, %v2015_v29, %v8833_v26 }
 0x20f   : > { %v9017_v35 = vadd.s32 127, %v2111_v17  ;;  %v1713_v43 = vand.u32 3, %v1712_v13  ;;  %vm1607_vm14 = vweird.f32 %v12783_v50  ;;  %vm1610_vm9 = vcmp.lt.s32.totalorder %v1609_v57, 2 }
 0x210   : > { %vm6277_vm10 = vcmp.lt.s32.totalorder %v6276_v6, 0  ;;  %v1888_v16 = vadd.s32 536870912, %v1887_v24  ;;  %vm1503_vm0 = vweird.f32 %v12775_v4  ;;  %v1505_v15 = vand.u32 3, %v1504_v31 }
 0x211   : > { %v1617_v45 = vsel %vm1610_vm9, %v1613_v25, %v1616_v47  ;;  %vm1725_vm13 = vcmp.lt.s32.totalorder %v12786_v63, 0  ;;  %v1794_v60 = vsel %vm6277_vm10, 0, %v6276_v6  ;;  %v1779_v11 = vadd.s32 %v8896_v46, %v8894_v55 }
 0x212   : > { %v1795_v52 = vsub.s32 32, %v1794_v60  ;;  %v1799_v26 = vsub.s32 4294967266, %v1794_v60  ;;  %v9024_v29 = vshrl.u32 %v1888_v16, 30  ;;  %vm1715_vm7 = vcmp.eq.s32.totalorder %v1713_v43, 0 }
 0x213   : > { %v1716_v54 = vxor.u32 2147483648, %v6892_v51  ;;  %vm1718_vm12 = vcmp.eq.s32.totalorder %v1713_v43, 2  ;;  %v1719_v57 = vxor.u32 2147483648, %v6890_v39  ;;  %v1796_v38 = vshll.u32 %v8965_v27, %v1794_v60 }
 0x214   : > { %v6894_v0 = vpop.eup %6893  ;;  %v1797_v42 = vshrl.u32 %v1779_v11, %v1795_v52  ;;  %v1800_v61 = vadd.s32 127, %v1799_v26  ;;  %v1890_v2 = vshll.u32 %v9024_v29, 30  ;;  %vm1510_vm15 = vcmp.eq.s32.totalorder %v1505_v15, 2 }
 0x215   : > { %v6896_v40 = vpop.eup %6895  ;;  %v1511_v53 = vxor.u32 2147483648, %v6894_v0  ;;  %v1618_v55 = vsel %vm1607_vm14, nan, %v1617_v45  ;;  %v1809_v46 = vsub.s32 4, %v8940_v3  ;;  %vm1507_vm8 = vcmp.eq.s32.totalorder %v1505_v15, 0 }
 0x216   : > { %v1508_v49 = vxor.u32 2147483648, %v6896_v40  ;;  %v1798_v1 = vor.u32 %v1797_v42, %v1796_v38  ;;  %v1801_v17 = vshll.u32 %v1800_v61, 23  ;;  %v1891_v13 = vsub.s32 %v1887_v24, %v1890_v2 }
 0x217   : > { %v1512_v56 = vsel %vm1510_vm15, %v1511_v53, %v6896_v40  ;;  %v1717_v27 = vsel %vm1715_vm7, %v6890_v39, %v1716_v54  ;;  %v1720_v48 = vsel %vm1718_vm12, %v1719_v57, %v6892_v51  ;;  %vm1506_vm11 = vcmp.lt.s32.totalorder %v1505_v15, 2 }
 0x218   : > { %v1509_v31 = vsel %vm1507_vm8, %v6894_v0, %v1508_v49  ;;  %v1802_v58 = vor.u32 4788187, %v1801_v17  ;;  %v1893_v25 = vsub.s32 0, %v1891_v13  ;;  %vm1714_vm2 = vcmp.lt.s32.totalorder %v1713_v43, 2  ;;  %v12817_v0 = vld [vmem:[#allocation35_spill] sm:$0xff] }
 0x219   : > { %v1513_v47 = vsel %vm1506_vm11, %v1509_v31, %v1512_v56  ;;  %vm9035_vm4 = vcmp.le.f32.partialorder %v1723_v14, 0.7853982  ;;  %v1810_v6 = vsel %vm1725_vm13, %v1809_v46, %v8940_v3  ;;  %v1805_v51 = vcvt.s32.f32 %v1798_v1  ;;  %v12816_v14 = vld [vmem:[#allocation41_spill] sm:$0xff] }
 0x21a   : > { %v1514_v39 = vsel %vm1503_vm0, nan, %v1513_v47  ;;  %v1803_v24 = vand.u32 2147483647, %v1802_v58  ;;  %v6279_v16 = vmin.u32 %v1893_v25, %v1891_v13  ;;  %v1721_v45 = vsel %vm1714_vm2, %v1717_v27, %v1720_v48 }
 0x21b   : > { %v2247_v15 = vpack.c.bf16 %v1618_v55, %v1514_v39  ;;  %v12813_v43 = vand.u32 2147483647, %v12806_v10  ;;  %v2017_v11 = vsub.s32 4, %v12816_v14  ;;  %v1812_v3 = vsel %vm9035_vm4, 0, %v1810_v6 }
 0x21c   : > { %v1806_v52 = vmul.f32 %v1805_v51, %v1803_v24  ;;  %v1895_v26 = vclz %v6279_v16  ;;  %v2184_v54 = vsel %vm2174_vm1, %v2170_v9, 1326507024  ;;  %v2107_v57 = vsub.s32 32, %v8858_v20 }
 0x21d   : > { %vm9046_vm6 = vcmp.le.f32.partialorder %v12813_v43, 0.7853982  ;;  %6523 = vmatprep.mubr.bf16.mxu0 %v2247_v15  ;;  %v2139_v38 = vand.u32 2147483647, %v12817_v0  ;;  %v2113_v42 = vshll.u32 %v9017_v35, 23  ;;  %vm1711_vm3 = vweird.f32 %v12784_v44 }
 0x21e   : > { %v2019_v4 = vsel %vm9046_vm6, %v12806_v10, %v2016_v37  ;;  %v1807_v61 = vxor.u32 2147483648, %v1806_v52  ;;  %v6280_v2 = vadd.s32 4294967294, %v1895_v26  ;;  %v9065_v40 = vsel %vm1711_vm3, nan, %v1721_v45 }
 0x21f   : > { %v1816_v37 = vadd.s32 3, %v1812_v3  ;;  %v9070_v36 = vsel %vm1933_vm5, %v2017_v11, %v12816_v14  ;;  %6897 = vcosq.f32 %v2019_v4  ;;  %v1883_v9 = vadd.s32 %v8960_v7, %v8981_v23 }
 0x220   : > { %v1808_v33 = vsel %vm1725_vm13, %v1807_v61, %v1806_v52  ;;  %vm6281_vm14 = vcmp.lt.s32.totalorder %v6280_v2, 0  ;;  %v2157_v44 = vshrl.u32 %v12693_v34, %v8473_v41  ;;  %v2146_v46 = vand.u32 8388607, %v2139_v38 }
 0x221   : > { %v1811_v53 = vsel %vm9035_vm4, %v12786_v63, %v1808_v33  ;;  %v1898_v55 = vsel %vm6281_vm14, 0, %v6280_v2  ;;  %v2156_v49 = vshll.u32 %v12686_v62, %v8426_v22  ;;  %v2159_v7 = vshll.u32 %v12693_v34, %v8426_v22 }
 0x222   : > { %6899 = vcosq.f32 %v1811_v53  ;;  %v1899_v1 = vsub.s32 32, %v1898_v55  ;;  %v1903_v17 = vsub.s32 4294967266, %v1898_v55  ;;  %v1900_v23 = vshll.u32 %v1891_v13, %v1898_v55 }
 0x223   : > { %6901 = vsinq.f32 %v1811_v53  ;;  %v2158_v56 = vor.u32 %v2157_v44, %v2156_v49  ;;  %v2160_v27 = vshrl.u32 %v12694_v12, %v8473_v41  ;;  %v2162_v58 = vshll.u32 %v12694_v12, %v8426_v22 }
 0x224   : > { %v1901_v48 = vshrl.u32 %v1883_v9, %v1899_v1  ;;  %v1904_v31 = vadd.s32 127, %v1903_v17  ;;  %v2163_v25 = vshrl.u32 %v12695_v5, %v8473_v41  ;;  %v1817_v47 = vand.u32 3, %v1816_v37 }
 0x225   : > { %v2147_v50 = vor.u32 8388608, %v2146_v46  ;;  %v2161_v6 = vor.u32 %v2160_v27, %v2159_v7  ;;  %vm2171_vm5 = vcmp.lt.s32.totalorder %v12810_v19, 1  ;;  %vm2173_vm9 = vcmp.lt.s32.totalorder %v12810_v19, 3 }
 0x226   : > { %v1902_v39 = vor.u32 %v1901_v48, %v1900_v23  ;;  %v1905_v24 = vshll.u32 %v1904_v31, 23  ;;  %v2164_v13 = vor.u32 %v2163_v25, %v2162_v58  ;;  %6903 = vsinq.f32 %v2019_v4 }
 0x227   : > { %v2155_v51 = vshrl.u32 %v12686_v62, %v8473_v41  ;;  %v2179_v22 = vsel %vm2171_vm5, %v2158_v56, %v2161_v6  ;;  %v2185_v16 = vsel %vm2173_vm9, %v8831_v21, %v2184_v54  ;;  %vm2172_vm10 = vcmp.lt.s32.totalorder %v12810_v19, 2 }
 0x228   : > { %v1906_v15 = vor.u32 4788187, %v1905_v24  ;;  %v2176_v45 = vsel %vm2174_vm1, %v2164_v13, 2102212464  ;;  %v2181_v43 = vsel %vm2173_vm9, %v2164_v13, %v9010_v8  ;;  %v2183_v21 = vsel %vm2171_vm5, %v2161_v6, %v2164_v13 }
 0x229   : > { %v9108_v14 = vpop.eup %6897  ;;  %v2175_v41 = vsel %vm2171_vm5, %v2155_v51, %v2158_v56  ;;  %v2182_v11 = vsel %vm2172_vm10, %v2179_v22, %v2181_v43  ;;  %v2187_v52 = vshll.u32 %v2147_v50, 8  ;;  %v1909_v26 = vcvt.s32.f32 %v1902_v39  ;;  %v12821_v50 = vld [vmem:[#allocation42_spill] sm:$0xff] }
 0x22a   : > { %v1907_v3 = vand.u32 2147483647, %v1906_v15  ;;  %v2177_v4 = vsel %vm2173_vm9, %v2161_v6, %v2176_v45  ;;  %v2186_v8 = vsel %vm2172_vm10, %v2183_v21, %v2185_v16  ;;  %vm1815_vm1 = vweird.f32 %v12786_v63 }
 0x22b   : > { %v9120_v54 = vmul.u32.u64.low %v2187_v52, %v2186_v8  ;;  %v9121_v61 = vmul.u32.u64.high %v2187_v52, %v2186_v8, %v9120_v54  ;;  %v9123_v2 = vmul.u32.u64.low %v2187_v52, %v2182_v11  ;;  %v9124_v37 = vmul.u32.u64.high %v2187_v52, %v2182_v11, %v9123_v2 }
 0x22c   : > { %v6900_v33 = vpop.eup %6899  ;;  %vm1829_vm0 = vcmp.lt.s32.totalorder %v12800_v18, 0  ;;  %v1910_v9 = vmul.f32 %v1909_v26, %v1907_v3  ;;  %v1913_v44 = vsub.s32 4, %v9024_v29  ;;  %vm9132_vm13 = vcmp.le.f32.partialorder %v1827_v59, 0.7853982 }
 0x22d   : > { %v6902_v53 = vpop.eup %6901  ;;  %v1823_v55 = vxor.u32 2147483648, %v6900_v33  ;;  %v2020_v49 = vsel %vm9046_vm6, 0, %v9070_v36  ;;  %v2178_v1 = vsel %vm2172_vm10, %v2175_v41, %v2177_v4  ;;  %vm1818_vm7 = vcmp.lt.s32.totalorder %v1817_v47, 2 }
 0x22e   : > { %v1820_v17 = vxor.u32 2147483648, %v6902_v53  ;;  %vm1822_vm12 = vcmp.eq.s32.totalorder %v1817_v47, 2  ;;  %v1911_v7 = vxor.u32 2147483648, %v1910_v9  ;;  %vm1819_vm15 = vcmp.eq.s32.totalorder %v1817_v47, 0  ;;  %v12820_v47 = vld [vmem:[#allocation44_spill] sm:$0xff] }
 0x22f   : > { %v1824_v23 = vsel %vm1822_vm12, %v1823_v55, %v6902_v53  ;;  %vm2196_vm8 = vc.u32 %v9121_v61, %v9123_v2  ;;  %v2197_v59 = vadd.s32 1, %v9124_v37  ;;  %v1914_v19 = vsel %vm1829_vm0, %v1913_v44, %v9024_v29 }
 0x230   : > { %v1821_v56 = vsel %vm1819_vm15, %v6900_v33, %v1820_v17  ;;  %v1912_v27 = vsel %vm1829_vm0, %v1911_v7, %v1910_v9  ;;  %v2194_v60 = vmul.u32 %v2187_v52, %v2178_v1  ;;  %v6904_v36 = vpop.eup %6903  ;;  %v2024_v58 = vadd.s32 3, %v2020_v49 }
 0x231   : > { %v1825_v48 = vsel %vm1818_vm7, %v1821_v56, %v1824_v23  ;;  %v1915_v31 = vsel %vm9132_vm13, %v12800_v18, %v1912_v27  ;;  %v2198_v25 = vsel %vm2196_vm8, %v2197_v59, %v9124_v37  ;;  %v2091_v6 = vadd.s32 %v12821_v50, %v12820_v47  ;;  %v12822_v23 = vld [vmem:[#allocation29_spill] sm:$0xff]  ;;  %v12826_v50 = vld [vmem:[#allocation12_spill] sm:$0xff] }
 0x232   : > { %v1826_v39 = vsel %vm1815_vm1, nan, %v1825_v48  ;;  %6905 = vcosq.f32 %v1915_v31  ;;  %v2199_v24 = vadd.s32 %v2198_v25, %v2194_v60  ;;  %v1916_v13 = vsel %vm9132_vm13, 0, %v1914_v19 }
 0x233   : > { %v2248_v29 = vpack.c.bf16 %v1826_v39, %v9065_v40  ;;  %6907 = vsinq.f32 %v1915_v31  ;;  %v2109_v51 = vshrl.u32 %v2091_v6, %v2107_v57  ;;  %v2108_v16 = vshll.u32 %v8550_v32, %v8858_v20 }
 0x234   : > { %v2200_v22 = vadd.s32 536870912, %v2199_v24  ;;  %v2114_v15 = vor.u32 4788187, %v2113_v42  ;;  %v2025_v63 = vand.u32 3, %v2024_v58  ;;  %v1920_v45 = vadd.s32 3, %v1916_v13 }
 0x235   : > { %6524 = vmatmul.mubr.bf16.gmra.mrb[8].mxu0 %v2248_v29  ;;  %v2028_v43 = vxor.u32 2147483648, %v6904_v36  ;;  %v2031_v40 = vxor.u32 2147483648, %v9108_v14  ;;  %v2110_v11 = vor.u32 %v2109_v51, %v2108_v16  ;;  %vm2023_vm14 = vweird.f32 %v12806_v10 }
 0x236   : > { %v9167_v41 = vshrl.u32 %v2200_v22, 30  ;;  %v2115_v52 = vand.u32 2147483647, %v2114_v15  ;;  %vm2027_vm11 = vcmp.eq.s32.totalorder %v2025_v63, 0  ;;  %vm2030_vm2 = vcmp.eq.s32.totalorder %v2025_v63, 2 }
 0x237   : > { %v1921_v57 = vand.u32 3, %v1920_v45  ;;  %v2029_v32 = vsel %vm2027_vm11, %v9108_v14, %v2028_v43  ;;  %v2032_v20 = vsel %vm2030_vm2, %v2031_v40, %v6904_v36  ;;  %v2117_v3 = vcvt.s32.f32 %v2110_v11 }
 0x238   : > { %v2202_v21 = vshll.u32 %v9167_v41, 30  ;;  %vm2026_vm4 = vcmp.lt.s32.totalorder %v2025_v63, 2  ;;  %vm1919_vm9 = vweird.f32 %v12800_v18  ;;  %vm2037_vm1 = vcmp.lt.s32.totalorder %v12822_v23, 0 }
 0x239   : > { %v2033_v54 = vsel %vm2026_vm4, %v2029_v32, %v2032_v20  ;;  %v2118_v37 = vmul.f32 %v2117_v3, %v2115_v52  ;;  %vm1926_vm6 = vcmp.eq.s32.totalorder %v1921_v57, 2  ;;  %vm1923_vm3 = vcmp.eq.s32.totalorder %v1921_v57, 0 }
 0x23a   : > { %v2203_v35 = vsub.s32 %v2199_v24, %v2202_v21  ;;  %vm1922_vm5 = vcmp.lt.s32.totalorder %v1921_v57, 2  ;;  %v2034_v14 = vsel %vm2023_vm14, nan, %v2033_v54  ;;  %v2195_v10 = vadd.s32 %v9123_v2, %v9121_v61 }
 0x23b   : > { %v2119_v49 = vxor.u32 2147483648, %v2118_v37  ;;  %v12823_v18 = vand.u32 2147483647, %v12822_v23  ;;  %v2121_v6 = vsub.s32 4, %v12826_v50  ;;  %v2225_v13 = vsub.s32 4, %v9167_v41 }
 0x23c   : > { %v6906_v42 = vpop.eup %6905  ;;  %v2205_v26 = vsub.s32 0, %v2203_v35  ;;  %vm2141_vm13 = vcmp.lt.s32.totalorder %v12817_v0, 0  ;;  %vm2140_vm7 = vcmp.le.f32.partialorder %v2139_v38, 0.7853982  ;;  %vm2127_vm2 = vweird.f32 %v12822_v23 }
 0x23d   : > { %v6908_v4 = vpop.eup %6907  ;;  %v1927_v8 = vxor.u32 2147483648, %v6906_v42  ;;  %v2120_v56 = vsel %vm2037_vm1, %v2119_v49, %v2118_v37  ;;  %vm9180_vm0 = vcmp.le.f32.partialorder %v12823_v18, 0.7853982  ;;  %v2122_v24 = vsel %vm2037_vm1, %v2121_v6, %v12826_v50 }
 0x23e   : > { %v1924_v33 = vxor.u32 2147483648, %v6908_v4  ;;  %v6291_v9 = vmin.u32 %v2205_v26, %v2203_v35  ;;  %v2123_v58 = vsel %vm9180_vm0, %v12822_v23, %v2120_v56  ;;  %v2124_v51 = vsel %vm9180_vm0, 0, %v2122_v24 }
 0x23f   : > { %v1928_v44 = vsel %vm1926_vm6, %v1927_v8, %v6908_v4  ;;  %6909 = vcosq.f32 %v2123_v58  ;;  %v2226_v15 = vsel %vm2141_vm13, %v2225_v13, %v9167_v41  ;;  %v2128_v63 = vadd.s32 3, %v2124_v51 }
 0x240   : > { %v1925_v53 = vsel %vm1923_vm3, %v6906_v42, %v1924_v33  ;;  %v2207_v55 = vclz %v6291_v9  ;;  %6911 = vsinq.f32 %v2123_v58  ;;  %v2228_v11 = vsel %vm2140_vm7, 0, %v2226_v15 }
 0x241   : > { %v1929_v46 = vsel %vm1922_vm5, %v1925_v53, %v1928_v44  ;;  %v2129_v21 = vand.u32 3, %v2128_v63  ;;  %v2232_v32 = vadd.s32 3, %v2228_v11  ;;  %vm2231_vm3 = vweird.f32 %v12817_v0  ;;  %v9204_v53 = vld [vmem:[%s12410_s4] ss:$0 sm:$0xff] }
 0x242   : > { %v1930_v1 = vsel %vm1919_vm9, nan, %v1929_v46  ;;  %v6292_v17 = vadd.s32 4294967294, %v2207_v55 }
 0x243   : > { %v2249_v7 = vpack.c.bf16 %v2034_v14, %v1930_v1  ;;  %vm2131_vm12 = vcmp.eq.s32.totalorder %v2129_v21, 0  ;;  %vm2134_vm15 = vcmp.eq.s32.totalorder %v2129_v21, 2  ;;  %v2233_v38 = vand.u32 3, %v2232_v32 }
 0x244   : > { %vm6293_vm10 = vcmp.lt.s32.totalorder %v6292_v17, 0  ;;  %vm2130_vm8 = vcmp.lt.s32.totalorder %v2129_v21, 2 }
 0x245   : > { %6527 = vmatprep.mubr.bf16.mxu0 %v2249_v7  ;;  %v2210_v59 = vsel %vm6293_vm10, 0, %v6292_v17  ;;  %vm2238_vm11 = vcmp.eq.s32.totalorder %v2233_v38, 2  ;;  %vm2235_vm4 = vcmp.eq.s32.totalorder %v2233_v38, 0  ;;  %vm2234_vm6 = vcmp.lt.s32.totalorder %v2233_v38, 2 }
 0x246   : > { %v2211_v27 = vsub.s32 32, %v2210_v59  ;;  %v2215_v19 = vsub.s32 4294967266, %v2210_v59  ;;  %v2212_v36 = vshll.u32 %v2203_v35, %v2210_v59 }
 0x248   : > { %v2213_v48 = vshrl.u32 %v2195_v10, %v2211_v27  ;;  %v2216_v31 = vadd.s32 127, %v2215_v19 }
 0x249   : > { %v6910_v43 = vpop.eup %6909 }
 0x24a   : > { %v2214_v25 = vor.u32 %v2213_v48, %v2212_v36  ;;  %v2217_v47 = vshll.u32 %v2216_v31, 23  ;;  %v6912_v40 = vpop.eup %6911  ;;  %v2135_v57 = vxor.u32 2147483648, %v6910_v43 }
 0x24b   : > { %v2132_v52 = vxor.u32 2147483648, %v6912_v40 }
 0x24c   : > { %v2218_v61 = vor.u32 4788187, %v2217_v47  ;;  %v2221_v39 = vcvt.s32.f32 %v2214_v25  ;;  %v2136_v35 = vsel %vm2134_vm15, %v2135_v57, %v6912_v40 }
 0x24d   : > { %v2133_v20 = vsel %vm2131_vm12, %v6910_v43, %v2132_v52 }
 0x24e   : > { %v2219_v2 = vand.u32 2147483647, %v2218_v61  ;;  %v2137_v3 = vsel %vm2130_vm8, %v2133_v20, %v2136_v35 }
 0x24f   : > { %v2138_v54 = vsel %vm2127_vm2, nan, %v2137_v3 }
 0x250   : > { %v2222_v29 = vmul.f32 %v2221_v39, %v2219_v2 }
 0x252   : > { %v2223_v22 = vxor.u32 2147483648, %v2222_v29 }
 0x254   : > { %v2224_v16 = vsel %vm2141_vm13, %v2223_v22, %v2222_v29 }
 0x255   : > { %v2227_v45 = vsel %vm2140_vm7, %v12817_v0, %v2224_v16 }
 0x256   : > { %6913 = vcosq.f32 %v2227_v45 }
 0x257   : > { %6915 = vsinq.f32 %v2227_v45 }
 0x260   : > { %v6914_v42 = vpop.eup %6913 }
 0x261   : > { %v6916_v41 = vpop.eup %6915  ;;  %v2239_v26 = vxor.u32 2147483648, %v6914_v42 }
 0x262   : > { %v2236_v4 = vxor.u32 2147483648, %v6916_v41 }
 0x263   : > { %v2240_v8 = vsel %vm2238_vm11, %v2239_v26, %v6916_v41 }
 0x264   : > { %v2237_v37 = vsel %vm2235_vm4, %v6914_v42, %v2236_v4 }
 0x265   : > { %v2241_v33 = vsel %vm2234_vm6, %v2237_v37, %v2240_v8 }
 0x266   : > { %v2242_v9 = vsel %vm2231_vm3, nan, %v2241_v33 }
 0x267   : > { %v2250_v44 = vpack.c.bf16 %v2242_v9, %v2138_v54 }
 0x269   : > { %6528 = vmatmul.mubr.bf16.gmra.mrb[12].mxu0 %v2250_v44 }
 0x2b4   : > { %v6517_v14 = vpop.f32.mrb[0].mxu0 }
 0x2b5   : > { %v9207_v55 = vadd.f32 %v6517_v14, %v9204_v53  ;;  %v2372_v46 = vpop.f32.mrb[1].mxu0 }
 0x2b6   : > { %v6518_v49 = vpop.f32.mrb[2].mxu0  ;;  %v9211_v17 = vadd.f32 %v9204_v53, %v2372_v46 }
 0x2b7   : > { %12827 = vst [vmem:[#allocation4_spill] sm:$0xff] %v9207_v55  ;;  %v2646_v1 = vand.u32 2139095040, %v9207_v55  ;;  %v9214_v0 = vadd.f32 %v6518_v49, %v9204_v53  ;;  %v9216_v7 = vpop.f32.mrb[3].mxu0  ;;  %v12510_v23 = vand.u32 2147483647, %v9207_v55 }
 0x2b8   : > { %v2438_v27 = vand.u32 2139095040, %v9211_v17 }
 0x2b9   : > { %12828 = vst [vmem:[#allocation8_spill] sm:$0xff] %v9214_v0  ;;  %v2647_v59 = vshrl.u32 %v2646_v1, 23  ;;  %v2750_v56 = vand.u32 2139095040, %v9214_v0  ;;  %v2650_v19 = vand.u32 8388607, %v12510_v23 }
 0x2ba   : > { %v2439_v31 = vshrl.u32 %v2438_v27, 23  ;;  %v12509_v58 = vand.u32 2147483647, %v9214_v0 }
 0x2bb   : > { %v6311_v10 = vadd.s32 4294967169, %v2647_v59  ;;  %v2751_v18 = vshrl.u32 %v2750_v56, 23  ;;  %v2651_v50 = vor.u32 8388608, %v2650_v19 }
 0x2bc   : > { %v6521_v36 = vpop.f32.mrb[4].mxu0  ;;  %v6303_v24 = vadd.s32 4294967169, %v2439_v31  ;;  %v2754_v29 = vand.u32 8388607, %v12509_v58 }
 0x2bd   : > { %v2653_v60 = vadd.s32 1, %v6311_v10  ;;  %v9223_v48 = vpop.f32.mrb[5].mxu0  ;;  %v6315_v25 = vadd.s32 4294967169, %v2751_v18  ;;  %v2691_v15 = vshll.u32 %v2651_v50, 8  ;;  %v9258_v50 = vadd.f32 %v6521_v36, %v9204_v53 }
 0x2be   : > { %v9226_v47 = vpop.f32.mrb[6].mxu0  ;;  %v2445_v49 = vadd.s32 1, %v6303_v24  ;;  %v2755_v1 = vor.u32 8388608, %v2754_v29 }
 0x2bf   : > { %vm2654_vm14 = vcmp.gt.s32.totalorder %v2653_v60, 0  ;;  %v9228_v61 = vpop.f32.mrb[7].mxu0  ;;  %v2757_v13 = vadd.s32 1, %v6315_v25  ;;  %v9255_v25 = vadd.f32 %v9204_v53, %v9216_v7  ;;  %12830 = vst [vmem:[#allocation9_spill] sm:$0xff] %v9258_v50 }
 0x2c0   : > { %v2655_v6 = vsel %vm2654_vm14, %v2653_v60, 0  ;;  %v9251_v31 = vshll.u32 %v2755_v1, 8  ;;  %vm2446_vm7 = vcmp.gt.s32.totalorder %v2445_v49, 0 }
 0x2c1   : > { %v2657_v2 = vand.u32 31, %v2655_v6  ;;  %v2656_v51 = vshrl.u32 %v2655_v6, 5  ;;  %vm2758_vm5 = vcmp.gt.s32.totalorder %v2757_v13, 0  ;;  %12829 = vst [vmem:[#allocation20_spill] sm:$0xff] %v9255_v25 }
 0x2c2   : > { %v2759_v18 = vsel %vm2758_vm5, %v2757_v13, 0 }
 0x2c3   : > { %v2658_v39 = vsub.s32 32, %v2657_v2  ;;  %v2660_v22 = vshll.u32 %v12686_v62, %v2657_v2  ;;  %v2663_v16 = vshll.u32 %v12693_v34, %v2657_v2  ;;  %v2666_v43 = vshll.u32 %v12694_v12, %v2657_v2 }
 0x2c4   : > { %v2669_v11 = vshll.u32 %v12695_v5, %v2657_v2  ;;  %v2672_v52 = vshll.u32 %v12696_v28, %v2657_v2  ;;  %vm2675_vm9 = vcmp.lt.s32.totalorder %v2656_v51, 1  ;;  %vm2678_vm10 = vcmp.lt.s32.totalorder %v2656_v51, 4 }
 0x2c5   : > { %v2661_v63 = vshrl.u32 %v12693_v34, %v2658_v39  ;;  %v2664_v45 = vshrl.u32 %v12694_v12, %v2658_v39  ;;  %v2667_v40 = vshrl.u32 %v12695_v5, %v2658_v39  ;;  %v2670_v21 = vshrl.u32 %v12696_v28, %v2658_v39 }
 0x2c6   : > { %v2673_v57 = vshrl.u32 %v12697_v30, %v2658_v39  ;;  %v2659_v41 = vshrl.u32 %v12686_v62, %v2658_v39  ;;  %vm2676_vm1 = vcmp.lt.s32.totalorder %v2656_v51, 2  ;;  %vm2677_vm0 = vcmp.lt.s32.totalorder %v2656_v51, 3 }
 0x2c7   : > { %v2662_v32 = vor.u32 %v2661_v63, %v2660_v22  ;;  %v2665_v20 = vor.u32 %v2664_v45, %v2663_v16  ;;  %v2668_v35 = vor.u32 %v2667_v40, %v2666_v43  ;;  %v2671_v38 = vor.u32 %v2670_v21, %v2669_v11 }
 0x2c8   : > { %v2674_v42 = vor.u32 %v2673_v57, %v2672_v52  ;;  %v2761_v60 = vand.u32 31, %v2759_v18  ;;  %v2760_v24 = vshrl.u32 %v2759_v18, 5 }
 0x2c9   : > { %v2680_v3 = vsel %vm2678_vm10, %v2668_v35, 2102212464  ;;  %v2683_v26 = vsel %vm2675_vm9, %v2662_v32, %v2665_v20  ;;  %v2687_v4 = vsel %vm2675_vm9, %v2665_v20, %v2668_v35  ;;  %v2684_v8 = vsel %vm2678_vm10, %v2671_v38, 920167782 }
 0x2ca   : > { %v2688_v54 = vsel %vm2678_vm10, %v2674_v42, 1326507024  ;;  %v2679_v37 = vsel %vm2675_vm9, %v2659_v41, %v2662_v32  ;;  %v2681_v33 = vsel %vm2677_vm0, %v2665_v20, %v2680_v3  ;;  %v2685_v9 = vsel %vm2677_vm0, %v2668_v35, %v2684_v8 }
 0x2cb   : > { %v2689_v44 = vsel %vm2677_vm0, %v2671_v38, %v2688_v54  ;;  %v2686_v14 = vsel %vm2676_vm1, %v2683_v26, %v2685_v9  ;;  %v2682_v19 = vsel %vm2676_vm1, %v2679_v37, %v2681_v33  ;;  %v2762_v39 = vsub.s32 32, %v2761_v60 }
 0x2cc   : > { %v2690_v46 = vsel %vm2676_vm1, %v2687_v4, %v2689_v44  ;;  %v9246_v10 = vmul.u32.u64.low %v2691_v15, %v2686_v14  ;;  %v9247_v27 = vmul.u32.u64.high %v2691_v15, %v2686_v14, %v9246_v10  ;;  %v2698_v6 = vmul.u32 %v2691_v15, %v2682_v19 }
 0x2cd   : > { %v9243_v59 = vmul.u32.u64.low %v2691_v15, %v2690_v46  ;;  %v9244_v56 = vmul.u32.u64.high %v2691_v15, %v2690_v46, %v9243_v59  ;;  %v2764_v29 = vshll.u32 %v12686_v62, %v2761_v60  ;;  %v2767_v13 = vshll.u32 %v12693_v34, %v2761_v60 }
 0x2ce   : > { %v2701_v2 = vadd.s32 1, %v9247_v27  ;;  %v2770_v51 = vshll.u32 %v12694_v12, %v2761_v60  ;;  %v2765_v36 = vshrl.u32 %v12693_v34, %v2762_v39  ;;  %v2768_v22 = vshrl.u32 %v12694_v12, %v2762_v39 }
 0x2cf   : > { %vm2700_vm13 = vc.u32 %v9244_v56, %v9246_v10  ;;  %v2773_v16 = vshll.u32 %v12695_v5, %v2761_v60  ;;  %v2763_v63 = vshrl.u32 %v12686_v62, %v2762_v39  ;;  %v2771_v45 = vshrl.u32 %v12695_v5, %v2762_v39 }
 0x2d0   : > { %v2702_v7 = vsel %vm2700_vm13, %v2701_v2, %v9247_v27  ;;  %v2774_v43 = vshrl.u32 %v12696_v28, %v2762_v39  ;;  %v2766_v40 = vor.u32 %v2765_v36, %v2764_v29  ;;  %v2769_v11 = vor.u32 %v2768_v22, %v2767_v13 }
 0x2d1   : > { %v2703_v15 = vadd.s32 %v2702_v7, %v2698_v6  ;;  %v2776_v21 = vshll.u32 %v12696_v28, %v2761_v60  ;;  %v2777_v52 = vshrl.u32 %v12697_v30, %v2762_v39  ;;  %v2772_v32 = vor.u32 %v2771_v45, %v2770_v51 }
 0x2d2   : > { %v2775_v20 = vor.u32 %v2774_v43, %v2773_v16  ;;  %vm2779_vm12 = vcmp.lt.s32.totalorder %v2760_v24, 1  ;;  %vm2780_vm15 = vcmp.lt.s32.totalorder %v2760_v24, 2  ;;  %vm2781_vm8 = vcmp.lt.s32.totalorder %v2760_v24, 3 }
 0x2d3   : > { %v2704_v57 = vadd.s32 536870912, %v2703_v15  ;;  %v2778_v35 = vor.u32 %v2777_v52, %v2776_v21  ;;  %vm2782_vm11 = vcmp.lt.s32.totalorder %v2760_v24, 4  ;;  %v2787_v41 = vsel %vm2779_vm12, %v2766_v40, %v2769_v11 }
 0x2d4   : > { %v2784_v42 = vsel %vm2782_vm11, %v2772_v32, 2102212464  ;;  %v2788_v3 = vsel %vm2782_vm11, %v2775_v20, 920167782  ;;  %v2783_v26 = vsel %vm2779_vm12, %v2763_v63, %v2766_v40  ;;  %v2791_v8 = vsel %vm2779_vm12, %v2769_v11, %v2772_v32 }
 0x2d5   : > { %v9275_v38 = vshrl.u32 %v2704_v57, 30  ;;  %v2789_v4 = vsel %vm2781_vm8, %v2772_v32, %v2788_v3  ;;  %v2792_v54 = vsel %vm2782_vm11, %v2778_v35, 1326507024  ;;  %v2785_v33 = vsel %vm2781_vm8, %v2769_v11, %v2784_v42 }
 0x2d6   : > { %v2790_v9 = vsel %vm2780_vm15, %v2787_v41, %v2789_v4  ;;  %v2793_v44 = vsel %vm2781_vm8, %v2775_v20, %v2792_v54  ;;  %v2447_v27 = vsel %vm2446_vm7, %v2445_v49, 0  ;;  %v2786_v60 = vsel %vm2780_vm15, %v2783_v26, %v2785_v33 }
 0x2d7   : > { %12831 = vst [vmem:[#allocation5_spill] sm:$0xff] %v9275_v38  ;;  %v2706_v37 = vshll.u32 %v9275_v38, 30  ;;  %v2794_v14 = vsel %vm2780_vm15, %v2791_v8, %v2793_v44  ;;  %v9281_v46 = vmul.u32.u64.low %v9251_v31, %v2790_v9  ;;  %v9282_v1 = vmul.u32.u64.high %v9251_v31, %v2790_v9, %v9281_v46 }
 0x2d8   : > { %v9289_v19 = vmul.u32.u64.low %v9251_v31, %v2794_v14  ;;  %v9290_v18 = vmul.u32.u64.high %v9251_v31, %v2794_v14, %v9289_v19  ;;  %v2542_v2 = vand.u32 2139095040, %v9255_v25  ;;  %v3062_v39 = vand.u32 2139095040, %v9258_v50 }
 0x2d9   : > { %v9285_v59 = vsub.s32 %v2703_v15, %v2706_v37  ;;  %v9296_v29 = vand.u32 31, %v2447_v27  ;;  %v2805_v13 = vadd.s32 1, %v9282_v1  ;;  %v2802_v49 = vmul.u32 %v9251_v31, %v2786_v60 }
 0x2da   : > { %vm2804_vm2 = vc.u32 %v9290_v18, %v9281_v46  ;;  %v3063_v7 = vshrl.u32 %v3062_v39, 23  ;;  %v9306_v36 = vadd.f32 %v9204_v53, %v9223_v48  ;;  %v2543_v15 = vshrl.u32 %v2542_v2, 23 }
 0x2db   : > { %v2709_v6 = vsub.s32 0, %v9285_v59  ;;  %v2806_v24 = vsel %vm2804_vm2, %v2805_v13, %v9282_v1  ;;  %v9309_v63 = vsub.s32 32, %v9296_v29  ;;  %v12508_v31 = vand.u32 2147483647, %v9258_v50 }
 0x2dc   : > { %12832 = vst [vmem:[#allocation21_spill] sm:$0xff] %v9306_v36  ;;  %v2807_v16 = vadd.s32 %v2806_v24, %v2802_v49  ;;  %v6327_v45 = vadd.s32 4294967169, %v3063_v7  ;;  %v2854_v21 = vand.u32 2139095040, %v9306_v36  ;;  %v6307_v57 = vadd.s32 4294967169, %v2543_v15 }
 0x2dd   : > { %v6312_v51 = vmin.u32 %v2709_v6, %v9285_v59  ;;  %v2462_v32 = vshrl.u32 %v12696_v28, %v9309_v63  ;;  %v3066_v35 = vand.u32 8388607, %v12508_v31  ;;  %v12507_v42 = vand.u32 2147483647, %v9306_v36 }
 0x2de   : > { %v2808_v40 = vadd.s32 536870912, %v2807_v16  ;;  %v3069_v11 = vadd.s32 1, %v6327_v45  ;;  %v2461_v3 = vshll.u32 %v12695_v5, %v9296_v29  ;;  %v2855_v4 = vshrl.u32 %v2854_v21, 23 }
 0x2df   : > { %v2711_v22 = vclz %v6312_v51  ;;  %v9326_v8 = vshrl.u32 %v2447_v27, 5  ;;  %v9330_v37 = vadd.s32 1, %v6307_v57  ;;  %v9336_v9 = vshll.u32 %v12696_v28, %v9296_v29 }
 0x2e0   : > { %v9313_v52 = vshrl.u32 %v2808_v40, 30  ;;  %vm3070_vm6 = vcmp.gt.s32.totalorder %v3069_v11, 0  ;;  %v9332_v33 = vor.u32 %v2462_v32, %v2461_v3  ;;  %v9340_v44 = vshrl.u32 %v12697_v30, %v9309_v63 }
 0x2e1   : > { %v6313_v43 = vadd.s32 4294967294, %v2711_v22  ;;  %v3071_v26 = vsel %vm3070_vm6, %v3069_v11, 0  ;;  %v2699_v1 = vadd.s32 %v9246_v10, %v9244_v56  ;;  %v3067_v19 = vor.u32 8388608, %v3066_v35 }
 0x2e2   : > { %12833 = vst [vmem:[#allocation10_spill] sm:$0xff] %v9313_v52  ;;  %v2810_v20 = vshll.u32 %v9313_v52, 30  ;;  %12834 = vst [vmem:[#allocation6_spill] sm:$0xff] %v9332_v33  ;;  %v3073_v14 = vand.u32 31, %v3071_v26  ;;  %v9347_v60 = vand.u32 8388607, %v12507_v42 }
 0x2e3   : > { %vm6314_vm4 = vcmp.lt.s32.totalorder %v6313_v43, 0  ;;  %v6319_v13 = vadd.s32 4294967169, %v2855_v4  ;;  %v3072_v49 = vshrl.u32 %v3071_v26, 5  ;;  %vm2470_vm3 = vcmp.lt.s32.totalorder %v9326_v8, 4 }
 0x2e4   : > { %v9315_v48 = vsel %vm6314_vm4, 0, %v6313_v43  ;;  %v9328_v54 = vsub.s32 %v2807_v16, %v2810_v20  ;;  %v3074_v39 = vsub.s32 32, %v3073_v14  ;;  %v3076_v24 = vshll.u32 %v12686_v62, %v3073_v14 }
 0x2e5   : > { %v2719_v41 = vsub.s32 4294967266, %v9315_v48  ;;  %v2715_v6 = vsub.s32 32, %v9315_v48  ;;  %v3079_v7 = vshll.u32 %v12693_v34, %v3073_v14  ;;  %v3082_v22 = vshll.u32 %v12694_v12, %v3073_v14 }
 0x2e6   : > { %v2813_v27 = vsub.s32 0, %v9328_v54  ;;  %v3077_v56 = vshrl.u32 %v12693_v34, %v3074_v39  ;;  %v3080_v10 = vshrl.u32 %v12694_v12, %v3074_v39  ;;  %v3083_v16 = vshrl.u32 %v12695_v5, %v3074_v39 }
 0x2e7   : > { %v2720_v2 = vadd.s32 127, %v2719_v41  ;;  %v3085_v45 = vshll.u32 %v12695_v5, %v3073_v14  ;;  %v3086_v43 = vshrl.u32 %v12696_v28, %v3074_v39  ;;  %v3088_v40 = vshll.u32 %v12696_v28, %v3073_v14 }
 0x2e8   : > { %v6316_v51 = vmin.u32 %v2813_v27, %v9328_v54  ;;  %v3078_v11 = vor.u32 %v3077_v56, %v3076_v24  ;;  %v3081_v21 = vor.u32 %v3080_v10, %v3079_v7  ;;  %v3084_v57 = vor.u32 %v3083_v16, %v3082_v22 }
 0x2e9   : > { %v3089_v32 = vshrl.u32 %v12697_v30, %v3074_v39  ;;  %v3087_v35 = vor.u32 %v3086_v43, %v3085_v45  ;;  %v3107_v41 = vshll.u32 %v3067_v19, 8  ;;  %v2861_v3 = vadd.s32 1, %v6319_v13 }
 0x2ea   : > { %v2815_v15 = vclz %v6316_v51  ;;  %v2716_v26 = vshll.u32 %v9285_v59, %v9315_v48  ;;  %v2859_v27 = vor.u32 8388608, %v9347_v60  ;;  %v9367_v14 = vadd.f32 %v9226_v47, %v9204_v53 }
 0x2eb   : > { %v3090_v4 = vor.u32 %v3089_v32, %v3088_v40  ;;  %v2717_v51 = vshrl.u32 %v2699_v1, %v2715_v6  ;;  %vm3091_vm5 = vcmp.lt.s32.totalorder %v3072_v49, 1  ;;  %vm3094_vm9 = vcmp.lt.s32.totalorder %v3072_v49, 4 }
 0x2ec   : > { %v6317_v20 = vadd.s32 4294967294, %v2815_v15  ;;  %12835 = vst [vmem:[#allocation22_spill] sm:$0xff] %v9367_v14  ;;  %v2721_v24 = vshll.u32 %v2720_v2, 23  ;;  %v3096_v7 = vsel %vm3094_vm9, %v3084_v57, 2102212464  ;;  %v3099_v56 = vsel %vm3091_vm5, %v3078_v11, %v3081_v21 }
 0x2ed   : > { %v3100_v10 = vsel %vm3094_vm9, %v3087_v35, 920167782  ;;  %v3075_v19 = vshrl.u32 %v12686_v62, %v3074_v39  ;;  %vm3092_vm10 = vcmp.lt.s32.totalorder %v3072_v49, 2  ;;  %vm3093_vm1 = vcmp.lt.s32.totalorder %v3072_v49, 3 }
 0x2ee   : > { %vm6318_vm14 = vcmp.lt.s32.totalorder %v6317_v20, 0  ;;  %vm2862_vm0 = vcmp.gt.s32.totalorder %v2861_v3, 0  ;;  %v3101_v48 = vsel %vm3093_vm1, %v3084_v57, %v3100_v10  ;;  %v3103_v60 = vsel %vm3091_vm5, %v3081_v21, %v3084_v57 }
 0x2ef   : > { %v9370_v59 = vsel %vm6318_vm14, 0, %v6317_v20  ;;  %v3104_v13 = vsel %vm3094_vm9, %v3090_v4, 1326507024  ;;  %v2718_v47 = vor.u32 %v2717_v51, %v2716_v26  ;;  %v3095_v22 = vsel %vm3091_vm5, %v3075_v19, %v3078_v11 }
 0x2f0   : > { %v3097_v1 = vsel %vm3093_vm1, %v3081_v21, %v3096_v7  ;;  %v3102_v6 = vsel %vm3092_vm10, %v3099_v56, %v3101_v48  ;;  %v2722_v16 = vor.u32 4788187, %v2721_v24  ;;  %v3105_v2 = vsel %vm3093_vm1, %v3087_v35, %v3104_v13 }
 0x2f1   : > { %v9373_v15 = vmul.u32.u64.low %v3107_v41, %v3102_v6  ;;  %v9374_v45 = vmul.u32.u64.high %v3107_v41, %v3102_v6, %v9373_v15  ;;  %v2466_v39 = vor.u32 %v9340_v44, %v9336_v9  ;;  %v9382_v43 = vsel %vm2470_vm3, %v9332_v33, 920167782 }
 0x2f2   : > { %12836 = vst [vmem:[#allocation11_spill] sm:$0xff] %v9382_v43  ;;  %v2823_v40 = vsub.s32 4294967266, %v9370_v59  ;;  %v3106_v11 = vsel %vm3092_vm10, %v3103_v60, %v3105_v2  ;;  %v3098_v21 = vsel %vm3092_vm10, %v3095_v22, %v3097_v1  ;;  %v2863_v20 = vsel %vm2862_vm0, %v2861_v3, 0 }
 0x2f3   : > { %v9387_v57 = vmul.u32.u64.low %v3107_v41, %v3106_v11  ;;  %v9388_v32 = vmul.u32.u64.high %v3107_v41, %v3106_v11, %v9387_v57  ;;  %v2803_v35 = vadd.s32 %v9281_v46, %v9290_v18  ;;  %v2865_v26 = vand.u32 31, %v2863_v20 }
 0x2f4   : > { %v9393_v4 = vshll.u32 %v2859_v27, 8  ;;  %v12511_v51 = vand.u32 2147483647, %v9367_v14  ;;  %v2723_v24 = vand.u32 2147483647, %v2722_v16  ;;  %v2725_v7 = vcvt.s32.f32 %v2718_v47 }
 0x2f5   : > { %v3117_v56 = vadd.s32 1, %v9374_v45  ;;  %v3166_v49 = vand.u32 2139095040, %v9367_v14  ;;  %v2819_v10 = vsub.s32 32, %v9370_v59  ;;  %v9399_v19 = vadd.s32 127, %v2823_v40 }
 0x2f6   : > { %v3114_v48 = vmul.u32 %v3107_v41, %v3098_v21  ;;  %v2866_v3 = vsub.s32 32, %v2865_v26  ;;  %vm3116_vm13 = vc.u32 %v9388_v32, %v9373_v15  ;;  %v2864_v46 = vshrl.u32 %v2863_v20, 5 }
 0x2f7   : > { %v2868_v18 = vshll.u32 %v12686_v62, %v2865_v26  ;;  %v2871_v27 = vshll.u32 %v12693_v34, %v2865_v26  ;;  %vm2550_vm7 = vcmp.gt.s32.totalorder %v9330_v37, 0  ;;  %v3118_v60 = vsel %vm3116_vm13, %v3117_v56, %v9374_v45 }
 0x2f8   : > { %v2869_v13 = vshrl.u32 %v12693_v34, %v2866_v3  ;;  %v2874_v47 = vshll.u32 %v12694_v12, %v2865_v26  ;;  %v2877_v22 = vshll.u32 %v12695_v5, %v2865_v26  ;;  %v3119_v41 = vadd.s32 %v3118_v60, %v3114_v48 }
 0x2f9   : > { %v2872_v1 = vshrl.u32 %v12694_v12, %v2866_v3  ;;  %v2875_v6 = vshrl.u32 %v12695_v5, %v2866_v3  ;;  %v2878_v16 = vshrl.u32 %v12696_v28, %v2866_v3  ;;  %v2880_v40 = vshll.u32 %v12696_v28, %v2865_v26 }
 0x2fa   : > { %v2870_v2 = vor.u32 %v2869_v13, %v2868_v18  ;;  %v2881_v11 = vshrl.u32 %v12697_v30, %v2866_v3  ;;  %v3167_v21 = vshrl.u32 %v3166_v49, 23  ;;  %v3120_v45 = vadd.s32 536870912, %v3119_v41 }
 0x2fb   : > { %v2873_v57 = vor.u32 %v2872_v1, %v2871_v27  ;;  %v2876_v20 = vor.u32 %v2875_v6, %v2874_v47  ;;  %v2879_v56 = vor.u32 %v2878_v16, %v2877_v22  ;;  %v2726_v42 = vmul.f32 %v2725_v7, %v2723_v24 }
 0x2fc   : > { %v2820_v48 = vshll.u32 %v9328_v54, %v9370_v59  ;;  %v2821_v60 = vshrl.u32 %v2803_v35, %v2819_v10  ;;  %v2882_v31 = vor.u32 %v2881_v11, %v2880_v40  ;;  %v2825_v23 = vshll.u32 %v9399_v19, 23 }
 0x2fd   : > { %v9420_v18 = vshrl.u32 %v3120_v45, 30  ;;  %vm2883_vm12 = vcmp.lt.s32.totalorder %v2864_v46, 1  ;;  %vm2886_vm15 = vcmp.lt.s32.totalorder %v2864_v46, 4  ;;  %v2867_v49 = vshrl.u32 %v12686_v62, %v2866_v3 }
 0x2fe   : > { %v2888_v27 = vsel %vm2886_vm15, %v2876_v20, 2102212464  ;;  %v2891_v24 = vsel %vm2883_vm12, %v2870_v2, %v2873_v57  ;;  %v6331_v7 = vadd.s32 4294967169, %v3167_v21  ;;  %vm12580_vm8 = vcmp.lt.s32.totalorder %v9207_v55, 0 }
 0x2ff   : > { %12837 = vst [vmem:[#allocation7_spill] sm:$0xff] %v9420_v18  ;;  %v3122_v59 = vshll.u32 %v9420_v18, 30  ;;  %vm2884_vm11 = vcmp.lt.s32.totalorder %v2864_v46, 2  ;;  %vm2885_vm2 = vcmp.lt.s32.totalorder %v2864_v46, 3  ;;  %v2892_v35 = vsel %vm2886_vm15, %v2879_v56, 920167782 }
 0x300   : > { %v2887_v19 = vsel %vm2883_vm12, %v2867_v49, %v2870_v2  ;;  %v2893_v3 = vsel %vm2885_vm2, %v2876_v20, %v2892_v35  ;;  %v2895_v13 = vsel %vm2883_vm12, %v2873_v57, %v2876_v20  ;;  %v2896_v47 = vsel %vm2886_vm15, %v2882_v31, 1326507024 }
 0x301   : > { %v9437_v22 = vsub.s32 %v3119_v41, %v3122_v59  ;;  %v2889_v1 = vsel %vm2885_vm2, %v2873_v57, %v2888_v27  ;;  %v2894_v6 = vsel %vm2884_vm11, %v2891_v24, %v2893_v3  ;;  %v2897_v16 = vsel %vm2885_vm2, %v2879_v56, %v2896_v47 }
 0x302   : > { %v2898_v40 = vsel %vm2884_vm11, %v2895_v13, %v2897_v16  ;;  %v9442_v11 = vmul.u32.u64.low %v9393_v4, %v2894_v6  ;;  %v9443_v21 = vmul.u32.u64.high %v9393_v4, %v2894_v6, %v9442_v11  ;;  %v3173_v45 = vadd.s32 1, %v6331_v7 }
 0x303   : > { %v9449_v2 = vsel %vm2550_vm7, %v9330_v37, 0  ;;  %v3125_v31 = vsub.s32 0, %v9437_v22  ;;  %v9453_v41 = vmul.u32.u64.low %v9393_v4, %v2898_v40  ;;  %v9454_v57 = vmul.u32.u64.high %v9393_v4, %v2898_v40, %v9453_v41 }
 0x304   : > { %v2727_v20 = vxor.u32 2147483648, %v2726_v42  ;;  %v2822_v56 = vor.u32 %v2821_v60, %v2820_v48  ;;  %v2890_v49 = vsel %vm2884_vm11, %v2887_v19, %v2889_v1  ;;  %vm3174_vm4 = vcmp.gt.s32.totalorder %v3173_v45, 0 }
 0x305   : > { %v6328_v27 = vmin.u32 %v3125_v31, %v9437_v22  ;;  %v3170_v24 = vand.u32 8388607, %v12511_v51  ;;  %v3175_v7 = vsel %vm3174_vm4, %v3173_v45, 0  ;;  %v9462_v37 = vadd.f32 %v9204_v53, %v9228_v61 }
 0x306   : > { %v9469_v59 = vsel %vm2470_vm3, %v2466_v39, 1326507024  ;;  %v2826_v46 = vor.u32 4788187, %v2825_v23  ;;  %v2909_v48 = vadd.s32 1, %v9443_v21  ;;  %v3177_v60 = vand.u32 31, %v3175_v7 }
 0x307   : > { %12838 = vst [vmem:[#allocation23_spill] sm:$0xff] %v9469_v59  ;;  %v9473_v35 = vand.u32 31, %v9449_v2  ;;  %v3127_v19 = vclz %v6328_v27  ;;  %v2906_v3 = vmul.u32 %v9393_v4, %v2890_v49  ;;  %vm2908_vm6 = vc.u32 %v9454_v57, %v9442_v11 }
 0x308   : > { %v9417_v58 = vpop.f32.mrb[8].mxu0  ;;  %v9480_v61 = vsel %vm12580_vm8, %v2727_v20, %v2726_v42  ;;  %v2829_v9 = vcvt.s32.f32 %v2822_v56  ;;  %v2910_v44 = vsel %vm2908_vm6, %v2909_v48, %v9443_v21  ;;  %v3178_v23 = vsub.s32 32, %v3177_v60 }
 0x309   : > { %v9422_v26 = vpop.f32.mrb[9].mxu0  ;;  %12839 = vst [vmem:[#allocation17_spill] sm:$0xff] %v9473_v35  ;;  %v6329_v39 = vadd.s32 4294967294, %v3127_v19  ;;  %v2911_v13 = vadd.s32 %v2910_v44, %v2906_v3  ;;  %v3171_v47 = vor.u32 8388608, %v3170_v24  ;;  %v2827_v6 = vand.u32 2147483647, %v2826_v46 }
 0x30a   : > { %v9427_v54 = vpop.f32.mrb[10].mxu0  ;;  %v3181_v16 = vshrl.u32 %v12693_v34, %v3178_v23  ;;  %v3184_v4 = vshrl.u32 %v12694_v12, %v3178_v23  ;;  %v3187_v40 = vshrl.u32 %v12695_v5, %v3178_v23  ;;  %v3180_v42 = vshll.u32 %v12686_v62, %v3177_v60 }
 0x30b   : > { %v9432_v10 = vpop.f32.mrb[11].mxu0  ;;  %v2912_v45 = vadd.s32 536870912, %v2911_v13  ;;  %v3183_v31 = vshll.u32 %v12693_v34, %v3177_v60  ;;  %v3190_v21 = vshrl.u32 %v12696_v28, %v3178_v23  ;;  %v3176_v41 = vshrl.u32 %v3175_v7, 5 }
 0x30c   : > { %v3186_v20 = vshll.u32 %v12694_v12, %v3177_v60  ;;  %v3189_v56 = vshll.u32 %v12695_v5, %v3177_v60  ;;  %v2958_v49 = vand.u32 2139095040, %v9462_v37  ;;  %vm6330_vm14 = vcmp.lt.s32.totalorder %v6329_v39, 0 }
 0x30d   : > { %v9493_v27 = vshrl.u32 %v2912_v45, 30  ;;  %v3182_v24 = vor.u32 %v3181_v16, %v3180_v42  ;;  %v3185_v46 = vor.u32 %v3184_v4, %v3183_v31  ;;  %v3192_v3 = vshll.u32 %v12696_v28, %v3177_v60 }
 0x30e   : > { %v3188_v48 = vor.u32 %v3187_v40, %v3186_v20  ;;  %v3191_v19 = vor.u32 %v3190_v21, %v3189_v56  ;;  %v3193_v44 = vshrl.u32 %v12697_v30, %v3178_v23  ;;  %v12841_v51 = vand.u32 2147483647, %v9207_v55 }
 0x30f   : > { %12840 = vst [vmem:[#allocation14_spill] sm:$0xff] %v9493_v27  ;;  %v12842_v7 = vmov 0  ;;  %v2830_v1 = vmul.f32 %v2829_v9, %v2827_v6  ;;  %v2914_v18 = vshll.u32 %v9493_v27, 30  ;;  %v3211_v52 = vshll.u32 %v3171_v47, 8 }
 0x310   : > { %vm9499_vm5 = vcmp.le.f32.partialorder %v12841_v51, 0.7853982  ;;  %v12845_v45 = vand.u32 2147483647, %v9462_v37  ;;  %v3130_v4 = vsel %vm6330_vm14, 0, %v6329_v39  ;;  %v3194_v40 = vor.u32 %v3193_v44, %v3192_v3 }
 0x311   : > { %v12843_v7 = vsel %vm9499_vm5, 4294967295, %v12842_v7  ;;  %vm3195_vm9 = vcmp.lt.s32.totalorder %v3176_v41, 1  ;;  %v2959_v60 = vshrl.u32 %v2958_v49, 23  ;;  %v9508_v42 = vsub.s32 %v2911_v13, %v2914_v18 }
 0x312   : > { %12844 = vst [vmem:[#allocation16_spill] sm:$0xff] %v12843_v7  ;;  %v9506_v16 = vand.u32 8388607, %v12845_v45  ;;  %v3179_v31 = vshrl.u32 %v12686_v62, %v3178_v23  ;;  %vm3198_vm10 = vcmp.lt.s32.totalorder %v3176_v41, 4  ;;  %v3203_v51 = vsel %vm3195_vm9, %v3182_v24, %v3185_v46 }
 0x313   : > { %v3200_v21 = vsel %vm3198_vm10, %v3188_v48, 2102212464  ;;  %v3204_v20 = vsel %vm3198_vm10, %v3191_v19, 920167782  ;;  %v3207_v9 = vsel %vm3195_vm9, %v3185_v46, %v3188_v48  ;;  %v3208_v6 = vsel %vm3198_vm10, %v3194_v40, 1326507024 }
 0x314   : > { %v3135_v56 = vsub.s32 4294967266, %v3130_v4  ;;  %v2917_v47 = vsub.s32 0, %v9508_v42  ;;  %vm3196_vm1 = vcmp.lt.s32.totalorder %v3176_v41, 2  ;;  %vm3197_vm0 = vcmp.lt.s32.totalorder %v3176_v41, 3 }
 0x315   : > { %vm12578_vm13 = vcmp.lt.s32.totalorder %v9214_v0, 0  ;;  %v3199_v39 = vsel %vm3195_vm9, %v3179_v31, %v3182_v24  ;;  %v3205_v3 = vsel %vm3197_vm0, %v3188_v48, %v3204_v20  ;;  %v3209_v49 = vsel %vm3197_vm0, %v3191_v19, %v3208_v6 }
 0x316   : > { %v6323_v18 = vadd.s32 4294967169, %v2959_v60  ;;  %v6320_v13 = vmin.u32 %v2917_v47, %v9508_v42  ;;  %v3201_v23 = vsel %vm3197_vm0, %v3185_v46, %v3200_v21  ;;  %v3206_v44 = vsel %vm3196_vm1, %v3203_v51, %v3205_v3 }
 0x317   : > { %v3210_v45 = vsel %vm3196_vm1, %v3207_v9, %v3209_v49  ;;  %v9519_v38 = vmul.u32.u64.low %v3211_v52, %v3206_v44  ;;  %v9520_v25 = vmul.u32.u64.high %v3211_v52, %v3206_v44, %v9519_v38  ;;  %v3131_v33 = vsub.s32 32, %v3130_v4 }
 0x318   : > { %v9516_v27 = vmul.u32.u64.low %v3211_v52, %v3210_v45  ;;  %v9517_v40 = vmul.u32.u64.high %v3211_v52, %v3210_v45, %v9516_v27  ;;  %v3136_v59 = vadd.s32 127, %v3135_v56  ;;  %v2919_v24 = vclz %v6320_v13 }
 0x319   : > { %v2965_v48 = vadd.s32 1, %v6323_v18  ;;  %v9527_v46 = vsel %vm9499_vm5, %v9207_v55, %v9480_v61  ;;  %v9530_v19 = vshrl.u32 %v9449_v2, 5  ;;  %v9533_v60 = vsub.s32 32, %v9473_v35 }
 0x31a   : > { %v3115_v27 = vadd.s32 %v9373_v15, %v9388_v32  ;;  %v2831_v31 = vxor.u32 2147483648, %v2830_v1  ;;  %v6321_v51 = vadd.s32 4294967294, %v2919_v24  ;;  %v3202_v21 = vsel %vm3196_vm1, %v3199_v39, %v3201_v23 }
 0x31b   : > { %12846 = vst [vmem:[#allocation26_spill] sm:$0xff] %v9533_v60  ;;  %vm2966_vm7 = vcmp.gt.s32.totalorder %v2965_v48, 0  ;;  %vm3220_vm12 = vc.u32 %v9517_v40, %v9519_v38  ;;  %v3221_v61 = vadd.s32 1, %v9520_v25  ;;  %v2963_v20 = vor.u32 8388608, %v9506_v16 }
 0x31c   : > { %v2967_v2 = vsel %vm2966_vm7, %v2965_v48, 0  ;;  %v3133_v9 = vshrl.u32 %v3115_v27, %v3131_v33  ;;  %v3137_v6 = vshll.u32 %v3136_v59, 23  ;;  %vm6322_vm15 = vcmp.lt.s32.totalorder %v6321_v51, 0 }
 0x31d   : > { %v2969_v56 = vand.u32 31, %v2967_v2  ;;  %v9544_v15 = vshll.u32 %v12695_v5, %v9473_v35  ;;  %v9546_v32 = vsel %vm6322_vm15, 0, %v6321_v51  ;;  %v3218_v41 = vmul.u32 %v3211_v52, %v3202_v21 }
 0x31e   : > { %v3222_v47 = vsel %vm3220_vm12, %v3221_v61, %v9520_v25  ;;  %6917 = vcosq.f32 %v9527_v46  ;;  %v9552_v39 = vsel %vm12578_vm13, %v2831_v31, %v2830_v1  ;;  %v9556_v33 = vshll.u32 %v12696_v28, %v9473_v35 }
 0x31f   : > { %v3132_v59 = vshll.u32 %v9437_v22, %v3130_v4  ;;  %v2907_v16 = vadd.s32 %v9442_v11, %v9454_v57  ;;  %v3223_v3 = vadd.s32 %v3222_v47, %v3218_v41  ;;  %v2970_v49 = vsub.s32 32, %v2969_v56 }
 0x320   : > { %12847 = vst [vmem:[#allocation24_spill] sm:$0xff] %v9556_v33  ;;  %v9563_v25 = vadd.f32 %v9417_v58, %v9204_v53  ;;  %v9567_v18 = vor.u32 4788187, %v3137_v6  ;;  %v2927_v1 = vsub.s32 4294967266, %v9546_v32  ;;  %v9570_v13 = vshll.u32 %v2963_v20, 8 }
 0x321   : > { %v9565_v52 = vor.u32 %v3133_v9, %v3132_v59  ;;  %v3224_v23 = vadd.s32 536870912, %v3223_v3  ;;  %v2968_v44 = vshrl.u32 %v2967_v2, 5  ;;  %v2973_v22 = vshrl.u32 %v12693_v34, %v2970_v49 }
 0x322   : > { %12848 = vst [vmem:[#allocation30_spill] sm:$0xff] %v9563_v25  ;;  %v2976_v11 = vshrl.u32 %v12694_v12, %v2970_v49  ;;  %v2972_v57 = vshll.u32 %v12686_v62, %v2969_v56  ;;  %v2975_v4 = vshll.u32 %v12693_v34, %v2969_v56  ;;  %v2978_v58 = vshll.u32 %v12694_v12, %v2969_v56 }
 0x323   : > { %v2979_v45 = vshrl.u32 %v12695_v5, %v2970_v49  ;;  %v9578_v24 = vshrl.u32 %v3224_v23, 30  ;;  %v2981_v48 = vshll.u32 %v12695_v5, %v2969_v56  ;;  %v2982_v27 = vshrl.u32 %v12696_v28, %v2970_v49 }
 0x324   : > { %v2928_v51 = vadd.s32 127, %v2927_v1  ;;  %v2974_v21 = vor.u32 %v2973_v22, %v2972_v57  ;;  %v2977_v61 = vor.u32 %v2976_v11, %v2975_v4  ;;  %v2984_v6 = vshll.u32 %v12696_v28, %v2969_v56 }
 0x325   : > { %12849 = vst [vmem:[#allocation33_spill] sm:$0xff] %v9578_v24  ;;  %v2980_v20 = vor.u32 %v2979_v45, %v2978_v58  ;;  %v3226_v2 = vshll.u32 %v9578_v24, 30  ;;  %v2983_v9 = vor.u32 %v2982_v27, %v2981_v48  ;;  %v2985_v41 = vshrl.u32 %v12697_v30, %v2970_v49 }
 0x326   : > { %v2923_v47 = vsub.s32 32, %v9546_v32  ;;  %v2971_v59 = vshrl.u32 %v12686_v62, %v2970_v49  ;;  %vm2990_vm11 = vcmp.lt.s32.totalorder %v2968_v44, 4  ;;  %v3478_v23 = vand.u32 2139095040, %v9563_v25 }
 0x327   : > { %v12850_v31 = vand.u32 2147483647, %v9214_v0  ;;  %v12851_v1 = vmov 0  ;;  %v9595_v22 = vsub.s32 %v3223_v3, %v3226_v2  ;;  %v2986_v11 = vor.u32 %v2985_v41, %v2984_v6 }
 0x328   : > { %vm2987_vm4 = vcmp.lt.s32.totalorder %v2968_v44, 1  ;;  %v2992_v56 = vsel %vm2990_vm11, %v2980_v20, 2102212464  ;;  %v9598_v57 = vpop.eup %6917  ;;  %v2929_v4 = vshll.u32 %v2928_v51, 23  ;;  %vm2989_vm6 = vcmp.lt.s32.totalorder %v2968_v44, 3 }
 0x329   : > { %vm9591_vm2 = vcmp.le.f32.partialorder %v12850_v31, 0.7853982  ;;  %12854 = vst [vmem:[#allocation18_spill] sm:$0xff] %v9598_v57  ;;  %v2995_v49 = vsel %vm2987_vm4, %v2974_v21, %v2977_v61  ;;  %v2996_v58 = vsel %vm2990_vm11, %v2983_v9, 920167782  ;;  %v3229_v45 = vsub.s32 0, %v9595_v22 }
 0x32a   : > { %v12852_v1 = vsel %vm9591_vm2, 4294967295, %v12851_v1  ;;  %vm2988_vm14 = vcmp.lt.s32.totalorder %v2968_v44, 2  ;;  %v2997_v48 = vsel %vm2989_vm6, %v2980_v20, %v2996_v58  ;;  %v2999_v27 = vsel %vm2987_vm4, %v2977_v61, %v2980_v20 }
 0x32b   : > { %12853 = vst [vmem:[#allocation13_spill] sm:$0xff] %v12852_v1  ;;  %v2991_v31 = vsel %vm2987_vm4, %v2971_v59, %v2974_v21  ;;  %v2993_v24 = vsel %vm2989_vm6, %v2977_v61, %v2992_v56  ;;  %v2998_v3 = vsel %vm2988_vm14, %v2995_v49, %v2997_v48  ;;  %v3000_v2 = vsel %vm2990_vm11, %v2986_v11, 1326507024 }
 0x32c   : > { %v6332_v6 = vmin.u32 %v3229_v45, %v9595_v22  ;;  %v3001_v41 = vsel %vm2989_vm6, %v2983_v9, %v3000_v2  ;;  %v9606_v51 = vmul.u32.u64.low %v9570_v13, %v2998_v3  ;;  %v9607_v57 = vmul.u32.u64.high %v9570_v13, %v2998_v3, %v9606_v51 }
 0x32d   : > { %v2925_v7 = vshrl.u32 %v2907_v16, %v2923_v47  ;;  %v3002_v55 = vsel %vm2988_vm14, %v2999_v27, %v3001_v41  ;;  %v3479_v35 = vshrl.u32 %v3478_v23, 23  ;;  %v9613_v21 = vadd.f32 %v9204_v53, %v9422_v26 }
 0x32e   : > { %v3139_v61 = vand.u32 2147483647, %v9567_v18  ;;  %v3231_v20 = vclz %v6332_v6  ;;  %v9617_v59 = vmul.u32.u64.low %v9570_v13, %v3002_v55  ;;  %v9618_v11 = vmul.u32.u64.high %v9570_v13, %v3002_v55, %v9617_v59 }
 0x32f   : > { %v2924_v9 = vshll.u32 %v9508_v42, %v9546_v32  ;;  %v2930_v56 = vor.u32 4788187, %v2929_v4  ;;  %v2994_v16 = vsel %vm2988_vm14, %v2991_v31, %v2993_v24  ;;  %v6343_v47 = vadd.s32 4294967169, %v3479_v35 }
 0x330   : > { %v3141_v23 = vcvt.s32.f32 %v9565_v52  ;;  %v6333_v49 = vadd.s32 4294967294, %v3231_v20  ;;  %v3013_v53 = vadd.s32 1, %v9607_v57  ;;  %v12855_v26 = vand.u32 2147483647, %v9563_v25 }
 0x331   : > { %v9631_v55 = vsel %vm9591_vm2, %v9214_v0, %v9552_v39  ;;  %v2926_v58 = vor.u32 %v2925_v7, %v2924_v9  ;;  %v3485_v42 = vadd.s32 1, %v6343_v47  ;;  %v3270_v32 = vand.u32 2139095040, %v9613_v21 }
 0x332   : > { %v3482_v18 = vand.u32 8388607, %v12855_v26  ;;  %v9634_v44 = vmul.f32 %v3141_v23, %v3139_v61  ;;  %vm6334_vm9 = vcmp.lt.s32.totalorder %v6333_v49, 0  ;;  %v3010_v35 = vmul.u32 %v9570_v13, %v2994_v16 }
 0x333   : > { %vm3012_vm10 = vc.u32 %v9618_v11, %v9606_v51  ;;  %v2931_v24 = vand.u32 2147483647, %v2930_v56  ;;  %v9641_v4 = vsel %vm6334_vm9, 0, %v6333_v49  ;;  %vm3486_vm1 = vcmp.gt.s32.totalorder %v3485_v42, 0 }
 0x334   : > { %v3014_v39 = vsel %vm3012_vm10, %v3013_v53, %v9607_v57  ;;  %v3239_v45 = vsub.s32 4294967266, %v9641_v4  ;;  %v3483_v27 = vor.u32 8388608, %v3482_v18  ;;  %v12531_v31 = vand.u32 2147483647, %v9613_v21 }
 0x335   : > { %v3015_v48 = vadd.s32 %v3014_v39, %v3010_v35  ;;  %6919 = vsinq.f32 %v9527_v46  ;;  %v2933_v3 = vcvt.s32.f32 %v2926_v58  ;;  %v3487_v2 = vsel %vm3486_vm1, %v3485_v42, 0 }
 0x336   : > { %v3271_v6 = vshrl.u32 %v3270_v32, 23  ;;  %6921 = vcosq.f32 %v9631_v55  ;;  %v9656_v57 = vshrl.u32 %v12696_v28, %v9533_v60  ;;  %v3240_v61 = vadd.s32 127, %v3239_v45 }
 0x337   : > { %v3016_v20 = vadd.s32 536870912, %v3015_v48  ;;  %v9659_v9 = vmul.f32 %v2933_v3, %v2931_v24  ;;  %v3219_v46 = vadd.s32 %v9519_v38, %v9517_v40  ;;  %v3489_v56 = vand.u32 31, %v3487_v2 }
 0x338   : > { %v3235_v16 = vsub.s32 32, %v9641_v4  ;;  %v9666_v23 = vshll.u32 %v3483_v27, 8  ;;  %v9670_v49 = vand.u32 8388607, %v12531_v31  ;;  %v3236_v53 = vshll.u32 %v9595_v22, %v9641_v4 }
 0x339   : > { %v9664_v47 = vshrl.u32 %v3016_v20, 30  ;;  %v9674_v26 = vshrl.u32 %v3487_v2, 5  ;;  %v3490_v18 = vsub.s32 32, %v3489_v56  ;;  %v6335_v58 = vadd.s32 4294967169, %v3271_v6 }
 0x33a   : > { %v3241_v42 = vshll.u32 %v3240_v61, 23  ;;  %v3492_v40 = vshll.u32 %v12686_v62, %v3489_v56  ;;  %v3495_v32 = vshll.u32 %v12693_v34, %v3489_v56  ;;  %v3498_v39 = vshll.u32 %v12694_v12, %v3489_v56 }
 0x33b   : > { %12856 = vst [vmem:[#allocation19_spill] sm:$0xff] %v9664_v47  ;;  %v3018_v38 = vshll.u32 %v9664_v47, 30  ;;  %v3493_v35 = vshrl.u32 %v12693_v34, %v3490_v18  ;;  %v3496_v24 = vshrl.u32 %v12694_v12, %v3490_v18  ;;  %v3499_v45 = vshrl.u32 %v12695_v5, %v3490_v18 }
 0x33c   : > { %v9639_v52 = vpop.f32.mrb[12].mxu0  ;;  %v3501_v4 = vshll.u32 %v12695_v5, %v3489_v56  ;;  %v3502_v27 = vshrl.u32 %v12696_v28, %v3490_v18  ;;  %v3504_v3 = vshll.u32 %v12696_v28, %v3489_v56  ;;  %v3505_v20 = vshrl.u32 %v12697_v30, %v3490_v18 }
 0x33d   : > { %v9644_v7 = vpop.f32.mrb[13].mxu0  ;;  %v9683_v22 = vsub.s32 %v3015_v48, %v3018_v38  ;;  %v3494_v2 = vor.u32 %v3493_v35, %v3492_v40  ;;  %v3497_v6 = vor.u32 %v3496_v24, %v3495_v32  ;;  %v3500_v61 = vor.u32 %v3499_v45, %v3498_v39 }
 0x33e   : > { %v9648_v13 = vpop.f32.mrb[14].mxu0  ;;  %v3237_v31 = vshrl.u32 %v3219_v46, %v3235_v16  ;;  %v3503_v47 = vor.u32 %v3502_v27, %v3501_v4  ;;  %v3277_v1 = vadd.s32 1, %v6335_v58  ;;  %vm12563_vm0 = vcmp.lt.s32.totalorder %v9258_v50, 0  ;;  %v6837_v16 = vld [vmem:[%s12411_s5] sm:$0xff]  }
 0x33f   : > { %v9651_v41 = vpop.f32.mrb[15].mxu0  ;;  %v3021_v59 = vsub.s32 0, %v9683_v22  ;;  %v9690_v0 = vpop.eup %6919  ;;  %v3242_v48 = vor.u32 4788187, %v3241_v42  ;;  %v3491_v38 = vshrl.u32 %v12686_v62, %v3490_v18  ;;  %v3506_v43 = vor.u32 %v3505_v20, %v3504_v3  ;;  %6531 = vmatprep.subr.bf16.mxu1 %v6837_v16 }
 0x340   : > { %12857 = vst [vmem:[#allocation32_spill] sm:$0xff] %v9690_v0  ;;  %vm3507_vm7 = vcmp.lt.s32.totalorder %v9674_v26, 1  ;;  %v9695_v56 = vpop.eup %6921  ;;  %vm3509_vm12 = vcmp.lt.s32.totalorder %v9674_v26, 3  ;;  %vm3510_vm15 = vcmp.lt.s32.totalorder %v9674_v26, 4  ;;  %vm3508_vm11 = vcmp.lt.s32.totalorder %v9674_v26, 2  ;;  %6532 = vmatpush3.bf16.msra.mxu1 %v6837_v16  ;;  %v6839_v26 = vld [vmem:[%s12411_s5 + $0x10] sm:$0xff]  }
 0x341   : > { %12858 = vst [vmem:[#allocation27_spill] sm:$0xff] %v9695_v56  ;;  %v6324_v40 = vmin.u32 %v3021_v59, %v9683_v22  ;;  %v3515_v46 = vsel %vm3507_vm7, %v3494_v2, %v3497_v6  ;;  %v3512_v58 = vsel %vm3510_vm15, %v3500_v61, 2102212464  ;;  %v3516_v18 = vsel %vm3510_vm15, %v3503_v47, 920167782 }
 0x342   : > { %v3519_v42 = vsel %vm3507_vm7, %v3497_v6, %v3500_v61  ;;  %v3520_v32 = vsel %vm3510_vm15, %v3506_v43, 1326507024  ;;  %v3517_v59 = vsel %vm3509_vm12, %v3500_v61, %v3516_v18  ;;  %v3275_v24 = vor.u32 8388608, %v9670_v49 }
 0x343   : > { %v3023_v35 = vclz %v6324_v40  ;;  %v3238_v39 = vor.u32 %v3237_v31, %v3236_v53  ;;  %v3511_v45 = vsel %vm3507_vm7, %v3491_v38, %v3494_v2  ;;  %v3518_v4 = vsel %vm3508_vm11, %v3515_v46, %v3517_v59  ;;  %v6838_v31 = vld [vmem:[%s12411_s5 + $0x8] sm:$0xff]  }
 0x344   : > { %v3521_v27 = vsel %vm3509_vm12, %v3503_v47, %v3520_v32  ;;  %v3513_v3 = vsel %vm3509_vm12, %v3497_v6, %v3512_v58  ;;  %vm3278_vm4 = vcmp.gt.s32.totalorder %v3277_v1, 0  ;;  %v3243_v49 = vand.u32 2147483647, %v3242_v48  ;;  %v9736_v6 = vld [vmem:[%s12410_s4] ss:$0 sm:$0xff]  ;;  %6533 = vmatprep.subr.bf16.mxu1 %v6838_v31 }
 0x345   : > { %v6325_v43 = vadd.s32 4294967294, %v3023_v35  ;;  %v3522_v61 = vsel %vm3508_vm11, %v3519_v42, %v3521_v27  ;;  %v3279_v20 = vsel %vm3278_vm4, %v3277_v1, 0  ;;  %v9740_v40 = vadd.f32 %v9736_v6, %v9427_v54  ;;  %6534 = vmatpush3.bf16.msra.mxu1 %v6838_v31 }
 0x346   : > { %v9725_v53 = vmul.u32.u64.low %v9666_v23, %v3522_v61  ;;  %v9726_v2 = vmul.u32.u64.high %v9666_v23, %v3522_v61, %v9725_v53  ;;  %v9729_v47 = vmul.u32.u64.low %v9666_v23, %v3518_v4  ;;  %v9730_v38 = vmul.u32.u64.high %v9666_v23, %v3518_v4, %v9729_v47  ;;  %6535 = vmatprep.subr.bf16.mxu1 %v6839_v26 }
 0x347   : > { %vm6326_vm6 = vcmp.lt.s32.totalorder %v6325_v43, 0  ;;  %12859 = vst [vmem:[#allocation31_spill] sm:$0xff] %v9740_v40  ;;  %v3245_v48 = vcvt.s32.f32 %v3238_v39  ;;  %v3514_v1 = vsel %vm3508_vm11, %v3511_v45, %v3513_v3  ;;  %v3281_v16 = vand.u32 31, %v3279_v20 }
 0x348   : > { %v9742_v46 = vsel %vm6326_vm6, 0, %v6325_v43  ;;  %v12860_v58 = vxor.u32 2147483648, %v9634_v44  ;;  %v3011_v54 = vadd.s32 %v9606_v51, %v9618_v11  ;;  %vm3532_vm14 = vc.u32 %v9726_v2, %v9729_v47 }
 0x349   : > { %v3031_v32 = vsub.s32 4294967266, %v9742_v46  ;;  %v9760_v35 = vmul.f32 %v3245_v48, %v3243_v49  ;;  %v3282_v59 = vsub.s32 32, %v3281_v16  ;;  %v9764_v39 = vshll.u32 %v3275_v24, 8  ;;  %6536 = vmatpush3.bf16.msra.mxu1 %v6839_v26  ;;  %v6840_v49 = vld [vmem:[%s12411_s5 + $0x18] sm:$0xff]  }
 0x34a   : > { %v9751_v18 = vsel %vm12563_vm0, %v12860_v58, %v9634_v44  ;;  %v3530_v45 = vmul.u32 %v9666_v23, %v3514_v1  ;;  %v3533_v4 = vadd.s32 1, %v9730_v38  ;;  %v9768_v51 = vshrl.u32 %v3279_v20, 5  ;;  %6537 = vmatprep.subr.bf16.mxu1 %v6840_v49 }
 0x34b   : > { %v3032_v44 = vadd.s32 127, %v3031_v32  ;;  %v3027_v11 = vsub.s32 32, %v9742_v46  ;;  %v3284_v27 = vshll.u32 %v12686_v62, %v3281_v16  ;;  %v3285_v43 = vshrl.u32 %v12693_v34, %v3282_v59 }
 0x34c   : > { %v3288_v3 = vshrl.u32 %v12694_v12, %v3282_v59  ;;  %v3534_v24 = vsel %vm3532_vm14, %v3533_v4, %v9730_v38  ;;  %v3287_v61 = vshll.u32 %v12693_v34, %v3281_v16  ;;  %v3290_v23 = vshll.u32 %v12694_v12, %v3281_v16 }
 0x34d   : > { %v3291_v31 = vshrl.u32 %v12695_v5, %v3282_v59  ;;  %v12861_v53 = vand.u32 2147483647, %v9258_v50  ;;  %v12862_v20 = vmov 0  ;;  %v3033_v48 = vshll.u32 %v3032_v44, 23  ;;  %6538 = vmatpush3.bf16.msra.mxu1 %v6840_v49 }
 0x34e   : > { %v3535_v1 = vadd.s32 %v3534_v24, %v3530_v45  ;;  %v3286_v58 = vor.u32 %v3285_v43, %v3284_v27  ;;  %v3582_v38 = vand.u32 2139095040, %v9740_v40  ;;  %vm12577_vm10 = vcmp.lt.s32.totalorder %v9306_v36, 0  ;;  %v6841_v43 = vld [vmem:[%s12411_s5 + $0x20] sm:$0xff]  }
 0x34f   : > { %vm9783_vm9 = vcmp.le.f32.partialorder %v12861_v53, 0.7853982  ;;  %v3289_v32 = vor.u32 %v3288_v3, %v3287_v61  ;;  %v3292_v26 = vor.u32 %v3291_v31, %v3290_v23  ;;  %v3293_v4 = vshll.u32 %v12695_v5, %v3281_v16  ;;  %6539 = vmatprep.subr.bf16.mxu1 %v6841_v43 }
 0x350   : > { %v12863_v20 = vsel %vm9783_vm9, 4294967295, %v12862_v20  ;;  %v3294_v42 = vshrl.u32 %v12696_v28, %v3282_v59  ;;  %v3028_v53 = vshll.u32 %v9683_v22, %v9742_v46  ;;  %v3536_v56 = vadd.s32 536870912, %v3535_v1 }
 0x351   : > { %12864 = vst [vmem:[#allocation38_spill] sm:$0xff] %v12863_v20  ;;  %v3296_v0 = vshll.u32 %v12696_v28, %v3281_v16  ;;  %v3297_v44 = vshrl.u32 %v12697_v30, %v3282_v59  ;;  %v3029_v45 = vshrl.u32 %v3011_v54, %v3027_v11  ;;  %vm3299_vm1 = vcmp.lt.s32.totalorder %v9768_v51, 1  ;;  %6540 = vmatpush3.bf16.msra.mxu1 %v6841_v43 }
 0x352   : > { %v3295_v27 = vor.u32 %v3294_v42, %v3293_v4  ;;  %vm3302_vm7 = vcmp.lt.s32.totalorder %v9768_v51, 4  ;;  %v9800_v3 = vshrl.u32 %v3536_v56, 30  ;;  %v3283_v22 = vshrl.u32 %v12686_v62, %v3282_v59  ;;  %v6842_v4 = vld [vmem:[%s12411_s5 + $0x28] sm:$0xff]  }
 0x353   : > { %v3298_v46 = vor.u32 %v3297_v44, %v3296_v0  ;;  %v3304_v16 = vsel %vm3302_vm7, %v3292_v26, 2102212464  ;;  %v12866_v24 = vand.u32 2147483647, %v9306_v36  ;;  %v12867_v42 = vmov 0  ;;  %6541 = vmatprep.subr.bf16.mxu1 %v6842_v4 }
 0x354   : > { %12865 = vst [vmem:[#allocation39_spill] sm:$0xff] %v9800_v3  ;;  %v3034_v54 = vor.u32 4788187, %v3033_v48  ;;  %vm3301_vm15 = vcmp.lt.s32.totalorder %v9768_v51, 3  ;;  %v3307_v11 = vsel %vm3299_vm1, %v3286_v58, %v3289_v32  ;;  %v3308_v56 = vsel %vm3302_vm7, %v3295_v27, 920167782 }
 0x355   : > { %vm9807_vm12 = vcmp.le.f32.partialorder %v12866_v24, 0.7853982  ;;  %vm12560_vm11 = vcmp.lt.s32.totalorder %v9367_v14, 0  ;;  %v3538_v0 = vshll.u32 %v9800_v3, 30  ;;  %vm3300_vm4 = vcmp.lt.s32.totalorder %v9768_v51, 2  ;;  %6542 = vmatpush3.bf16.msra.mxu1 %v6842_v4 }
 0x356   : > { %v12868_v42 = vsel %vm9807_vm12, 4294967295, %v12867_v42  ;;  %v3309_v59 = vsel %vm3301_vm15, %v3292_v26, %v3308_v56  ;;  %v3311_v61 = vsel %vm3299_vm1, %v3289_v32, %v3292_v26  ;;  %v3303_v23 = vsel %vm3299_vm1, %v3283_v22, %v3286_v58 }
 0x357   : > { %12869 = vst [vmem:[#allocation36_spill] sm:$0xff] %v12868_v42  ;;  %v3305_v31 = vsel %vm3301_vm15, %v3289_v32, %v3304_v16  ;;  %v3310_v49 = vsel %vm3300_vm4, %v3307_v11, %v3309_v59  ;;  %v3312_v48 = vsel %vm3302_vm7, %v3298_v46, 1326507024  ;;  %v9834_v44 = vsub.s32 %v3535_v1, %v3538_v0  ;;  %v6843_v0 = vld [vmem:[%s12411_s5 + $0x30] sm:$0xff]  }
 0x358   : > { %v3313_v26 = vsel %vm3301_vm15, %v3295_v27, %v3312_v48  ;;  %v9839_v58 = vmul.u32.u64.low %v9764_v39, %v3310_v49  ;;  %v9840_v43 = vmul.u32.u64.high %v9764_v39, %v3310_v49, %v9839_v58  ;;  %v3147_v32 = vsel %vm9783_vm9, %v9258_v50, %v9751_v18  ;;  %6543 = vmatprep.subr.bf16.mxu1 %v6843_v0 }
 0x359   : > { %v3030_v22 = vor.u32 %v3029_v45, %v3028_v53  ;;  %v3314_v46 = vsel %vm3300_vm4, %v3311_v61, %v3313_v26  ;;  %v3583_v16 = vshrl.u32 %v3582_v38, 23  ;;  %v12870_v1 = vxor.u32 2147483648, %v9659_v9  ;;  %6544 = vmatpush3.bf16.msra.mxu1 %v6843_v0  ;;  %v6844_v26 = vld [vmem:[%s12411_s5 + $0x38] sm:$0xff]  }
 0x35a   : > { %v3541_v24 = vsub.s32 0, %v9834_v44  ;;  %v9856_v11 = vmul.u32.u64.low %v9764_v39, %v3314_v46  ;;  %v9857_v56 = vmul.u32.u64.high %v9764_v39, %v3314_v46, %v9856_v11  ;;  %v3247_v18 = vxor.u32 2147483648, %v9760_v35  ;;  %6545 = vmatprep.subr.bf16.mxu1 %v6844_v26 }
 0x35b   : > { %v2936_v27 = vsel %vm12577_vm10, %v12870_v1, %v9659_v9  ;;  %v3035_v53 = vand.u32 2147483647, %v3034_v54  ;;  %v3306_v38 = vsel %vm3300_vm4, %v3303_v23, %v3305_v31  ;;  %v6347_v45 = vadd.s32 4294967169, %v3583_v16 }
 0x35c   : > { %6923 = vsinq.f32 %v9631_v55  ;;  %v6344_v9 = vmin.u32 %v3541_v24, %v9834_v44  ;;  %v3325_v59 = vadd.s32 1, %v9840_v43  ;;  %v12539_v61 = vand.u32 2147483647, %v9740_v40 }
 0x35d   : > { %6925 = vcosq.f32 %v3147_v32  ;;  %v3037_v49 = vcvt.s32.f32 %v3030_v22  ;;  %v3589_v48 = vadd.s32 1, %v6347_v45  ;;  %v9871_v51 = vadd.f32 %v9736_v6, %v9432_v10  ;;  %6546 = vmatpush3.bf16.msra.mxu1 %v6844_v26 }
 0x35e   : > { %v9876_v54 = vsel %vm9807_vm12, %v9306_v36, %v2936_v27  ;;  %v3543_v55 = vclz %v6344_v9  ;;  %v3322_v23 = vmul.u32 %v9764_v39, %v3306_v38  ;;  %vm3324_vm6 = vc.u32 %v9857_v56, %v9839_v58 }
 0x35f   : > { %12871 = vst [vmem:[#allocation28_spill] sm:$0xff] %v9871_v51  ;;  %v3248_v31 = vsel %vm12560_vm11, %v3247_v18, %v9760_v35  ;;  %v9884_v4 = vmul.f32 %v3037_v49, %v3035_v53  ;;  %v3326_v10 = vsel %vm3324_vm6, %v3325_v59, %v9840_v43  ;;  %vm3590_vm14 = vcmp.gt.s32.totalorder %v3589_v48, 0 }
 0x360   : > { %v6345_v22 = vadd.s32 4294967294, %v3543_v55  ;;  %v3327_v46 = vadd.s32 %v3326_v10, %v3322_v23  ;;  %v3586_v39 = vand.u32 8388607, %v12539_v61  ;;  %v3591_v16 = vsel %vm3590_vm14, %v3589_v48, 0 }
 0x361   : > { %v9894_v1 = vshrl.u32 %v12697_v30, %v9533_v60  ;;  %6927 = vsinq.f32 %v3147_v32  ;;  %v3593_v35 = vand.u32 31, %v3591_v16  ;;  %v3374_v27 = vand.u32 2139095040, %v9871_v51 }
 0x362   : > { %v9899_v43 = vor.u32 %v9656_v57, %v9544_v15  ;;  %6929 = vcosq.f32 %v9876_v54  ;;  %v12872_v24 = vand.u32 2147483647, %v9367_v14  ;;  %v12873_v11 = vmov 0 }
 0x363   : > { %v3328_v18 = vadd.s32 536870912, %v3327_v46  ;;  %v3531_v15 = vadd.s32 %v9729_v47, %v9726_v2  ;;  %v3594_v57 = vsub.s32 32, %v3593_v35  ;;  %vm6346_vm7 = vcmp.lt.s32.totalorder %v6345_v22, 0 }
 0x364   : > { %vm9904_vm1 = vcmp.le.f32.partialorder %v12872_v24, 0.7853982  ;;  %v3587_v45 = vor.u32 8388608, %v3586_v39  ;;  %v9920_v0 = vadd.f32 %v9736_v6, %v9639_v52  ;;  %v3592_v9 = vshrl.u32 %v3591_v16, 5 }
 0x365   : > { %v12874_v11 = vsel %vm9904_vm1, 4294967295, %v12873_v11  ;;  %v9911_v32 = vsel %vm9904_vm1, %v9367_v14, %v3248_v31  ;;  %v9916_v38 = vshrl.u32 %v3328_v18, 30  ;;  %v3597_v59 = vshrl.u32 %v12693_v34, %v3594_v57 }
 0x366   : > { %12875 = vst [vmem:[#allocation34_spill] sm:$0xff] %v12874_v11  ;;  %v3600_v49 = vshrl.u32 %v12694_v12, %v3594_v57  ;;  %v3375_v48 = vshrl.u32 %v3374_v27, 23  ;;  %v9924_v55 = vpop.eup %6923  ;;  %v3596_v2 = vshll.u32 %v12686_v62, %v3593_v35  ;;  %v3599_v47 = vshll.u32 %v12693_v34, %v3593_v35 }
 0x367   : > { %12876 = vst [vmem:[#allocation40_spill] sm:$0xff] %v9916_v38  ;;  %12877 = vst [vmem:[#allocation37_spill] sm:$0xff] %v9924_v55  ;;  %v3330_v23 = vshll.u32 %v9916_v38, 30  ;;  %v3603_v31 = vshrl.u32 %v12695_v5, %v3594_v57  ;;  %v9930_v10 = vpop.eup %6925  ;;  %v3546_v52 = vsel %vm6346_vm7, 0, %v6345_v22  ;;  %v3602_v26 = vshll.u32 %v12694_v12, %v3593_v35 }
 0x368   : > { %12878 = vst [vmem:[#allocation45_spill] sm:$0xff] %v9930_v10  ;;  %v3605_v39 = vshll.u32 %v12695_v5, %v3593_v35  ;;  %v3606_v16 = vshrl.u32 %v12696_v28, %v3594_v57  ;;  %v3598_v24 = vor.u32 %v3597_v59, %v3596_v2  ;;  %v3601_v18 = vor.u32 %v3600_v49, %v3599_v47 }
 0x369   : > { %v9935_v27 = vsub.s32 %v3327_v46, %v3330_v23  ;;  %v9937_v61 = vshll.u32 %v3587_v45, 8  ;;  %v3604_v53 = vor.u32 %v3603_v31, %v3602_v26  ;;  %v3608_v38 = vshll.u32 %v12696_v28, %v3593_v35 }
 0x36a   : > { %v3607_v3 = vor.u32 %v3606_v16, %v3605_v39  ;;  %v3609_v11 = vshrl.u32 %v12697_v30, %v3594_v57  ;;  %v3547_v10 = vsub.s32 32, %v3546_v52  ;;  %v6339_v20 = vadd.s32 4294967169, %v3375_v48 }
 0x36b   : > { %v3333_v22 = vsub.s32 0, %v9935_v27  ;;  %v9943_v50 = vpop.eup %6927  ;;  %v3551_v46 = vsub.s32 4294967266, %v3546_v52  ;;  %v3595_v59 = vshrl.u32 %v12686_v62, %v3594_v57  ;;  %vm3611_vm15 = vcmp.lt.s32.totalorder %v3592_v9, 1 }
 0x36c   : > { %12879 = vst [vmem:[#allocation43_spill] sm:$0xff] %v9943_v50  ;;  %v3610_v49 = vor.u32 %v3609_v11, %v3608_v38  ;;  %v9946_v45 = vpop.eup %6929  ;;  %vm3613_vm4 = vcmp.lt.s32.totalorder %v3592_v9, 3  ;;  %vm3614_vm6 = vcmp.lt.s32.totalorder %v3592_v9, 4  ;;  %v3619_v35 = vsel %vm3611_vm15, %v3598_v24, %v3601_v18 }
 0x36d   : > { %12880 = vst [vmem:[#allocation25_spill] sm:$0xff] %v9946_v45  ;;  %v6336_v23 = vmin.u32 %v3333_v22, %v9935_v27  ;;  %v3616_v2 = vsel %vm3614_vm6, %v3604_v53, 2102212464  ;;  %v3620_v47 = vsel %vm3614_vm6, %v3607_v3, 920167782  ;;  %v3623_v31 = vsel %vm3611_vm15, %v3601_v18, %v3604_v53 }
 0x36e   : > { %v3624_v48 = vsel %vm3614_vm6, %v3610_v49, 1326507024  ;;  %v3549_v26 = vshrl.u32 %v3531_v15, %v3547_v10  ;;  %vm3612_vm14 = vcmp.lt.s32.totalorder %v3592_v9, 2  ;;  %v3621_v57 = vsel %vm3613_vm4, %v3604_v53, %v3620_v47 }
 0x36f   : > { %v3335_v39 = vclz %v6336_v23  ;;  %v3552_v11 = vadd.s32 127, %v3551_v46  ;;  %v3622_v38 = vsel %vm3612_vm14, %v3619_v35, %v3621_v57  ;;  %v3625_v16 = vsel %vm3613_vm4, %v3607_v3, %v3624_v48 }
 0x370   : > { %v3381_v22 = vadd.s32 1, %v6339_v20  ;;  %v3615_v50 = vsel %vm3611_vm15, %v3595_v59, %v3598_v24  ;;  %v3617_v45 = vsel %vm3613_vm4, %v3601_v18, %v3616_v2  ;;  %v3626_v55 = vsel %vm3612_vm14, %v3623_v31, %v3625_v16 }
 0x371   : > { %v6337_v14 = vadd.s32 4294967294, %v3335_v39  ;;  %v9958_v49 = vmul.u32.u64.low %v9937_v61, %v3626_v55  ;;  %v9959_v15 = vmul.u32.u64.high %v9937_v61, %v3626_v55, %v9958_v49  ;;  %v3548_v46 = vshll.u32 %v9834_v44, %v3546_v52 }
 0x372   : > { %v9962_v10 = vmul.u32.u64.low %v9937_v61, %v3622_v38  ;;  %v9963_v53 = vmul.u32.u64.high %v9937_v61, %v3622_v38, %v9962_v10  ;;  %v12881_v20 = vand.u32 2147483647, %v9871_v51  ;;  %vm3382_vm15 = vcmp.gt.s32.totalorder %v3381_v22, 0 }
 0x373   : > { %vm6338_vm7 = vcmp.lt.s32.totalorder %v6337_v14, 0  ;;  %v3553_v24 = vshll.u32 %v3552_v11, 23  ;;  %v3618_v59 = vsel %vm3612_vm14, %v3615_v50, %v3617_v45  ;;  %v3383_v23 = vsel %vm3382_vm15, %v3381_v22, 0 }
 0x374   : > { %v3378_v3 = vand.u32 8388607, %v12881_v20  ;;  %v9969_v18 = vsel %vm6338_vm7, 0, %v6337_v14  ;;  %6931 = vsinq.f32 %v9876_v54  ;;  %vm12569_vm4 = vcmp.lt.s32.totalorder %v9462_v37, 0 }
 0x375   : > { %v9976_v35 = vor.u32 %v3549_v26, %v3548_v46  ;;  %6933 = vcosq.f32 %v9911_v32  ;;  %v3343_v44 = vsub.s32 4294967266, %v9969_v18  ;;  %vm3636_vm6 = vc.u32 %v9959_v15, %v9962_v10 }
 0x376   : > { %v3637_v14 = vadd.s32 1, %v9963_v53  ;;  %v12882_v50 = vxor.u32 2147483648, %v9884_v4  ;;  %v3323_v54 = vadd.s32 %v9839_v58, %v9857_v56  ;;  %v3634_v52 = vmul.u32 %v9937_v61, %v3618_v59 }
 0x377   : > { %v3385_v45 = vand.u32 31, %v3383_v23  ;;  %v9993_v2 = vor.u32 4788187, %v3553_v24  ;;  %v3379_v31 = vor.u32 8388608, %v3378_v3  ;;  %v3557_v26 = vcvt.s32.f32 %v9976_v35 }
 0x378   : > { %v9988_v9 = vsel %vm12569_vm4, %v12882_v50, %v9884_v4  ;;  %v3638_v47 = vsel %vm3636_vm6, %v3637_v14, %v9963_v53  ;;  %v3894_v4 = vand.u32 2139095040, %v9920_v0  ;;  %v3339_v11 = vsub.s32 32, %v9969_v18 }
 0x379   : > { %v3639_v39 = vadd.s32 %v3638_v47, %v3634_v52  ;;  %v3386_v57 = vsub.s32 32, %v3385_v45  ;;  %v3344_v38 = vadd.s32 127, %v3343_v44  ;;  %v3384_v58 = vshrl.u32 %v3383_v23, 5 }
 0x37a   : > { %v3388_v56 = vshll.u32 %v12686_v62, %v3385_v45  ;;  %v3391_v16 = vshll.u32 %v12693_v34, %v3385_v45  ;;  %v3394_v22 = vshll.u32 %v12694_v12, %v3385_v45  ;;  %v3397_v49 = vshll.u32 %v12695_v5, %v3385_v45 }
 0x37b   : > { %v3640_v61 = vadd.s32 536870912, %v3639_v39  ;;  %v3389_v53 = vshrl.u32 %v12693_v34, %v3386_v57  ;;  %v3392_v46 = vshrl.u32 %v12694_v12, %v3386_v57  ;;  %v3395_v20 = vshrl.u32 %v12695_v5, %v3386_v57 }
 0x37c   : > { %v3398_v3 = vshrl.u32 %v12696_v28, %v3386_v57  ;;  %v3555_v24 = vand.u32 2147483647, %v9993_v2  ;;  %v3400_v23 = vshll.u32 %v12696_v28, %v3385_v45  ;;  %v3401_v35 = vshrl.u32 %v12697_v30, %v3386_v57 }
 0x37d   : > { %v10009_v59 = vshrl.u32 %v3640_v61, 30  ;;  %v3390_v44 = vor.u32 %v3389_v53, %v3388_v56  ;;  %v3393_v14 = vor.u32 %v3392_v46, %v3391_v16  ;;  %v3396_v50 = vor.u32 %v3395_v20, %v3394_v22 }
 0x37e   : > { %v3399_v52 = vor.u32 %v3398_v3, %v3397_v49  ;;  %v10013_v47 = vpop.eup %6931  ;;  %v3340_v55 = vshll.u32 %v9935_v27, %v9969_v18  ;;  %v3402_v42 = vor.u32 %v3401_v35, %v3400_v23  ;;  %v3419_v36 = vshll.u32 %v3379_v31, 8 }
 0x37f   : > { %12883 = vst [vmem:[#allocation15_spill] sm:$0xff] %v10009_v59  ;;  %v3642_v48 = vshll.u32 %v10009_v59, 30  ;;  %v10018_v2 = vpop.eup %6933  ;;  %v3341_v61 = vshrl.u32 %v3323_v54, %v3339_v11  ;;  %v3345_v60 = vshll.u32 %v3344_v38, 23  ;;  %vm3403_vm14 = vcmp.lt.s32.totalorder %v3384_v58, 1 }
 0x380   : > { %12884 = vst [vmem:[#allocation41_spill] sm:$0xff] %v10018_v2  ;;  %v3895_v45 = vshrl.u32 %v3894_v4, 23  ;;  %vm3406_vm7 = vcmp.lt.s32.totalorder %v3384_v58, 4  ;;  %v3411_v56 = vsel %vm3403_vm14, %v3390_v44, %v3393_v14  ;;  %v12885_v16 = vand.u32 2147483647, %v9920_v0 }
 0x381   : > { %v10020_v33 = vsub.s32 %v3639_v39, %v3642_v48  ;;  %vm3405_vm15 = vcmp.lt.s32.totalorder %v3384_v58, 3  ;;  %v3412_v27 = vsel %vm3406_vm7, %v3399_v52, 920167782  ;;  %v3415_v18 = vsel %vm3403_vm14, %v3393_v14, %v3396_v50 }
 0x382   : > { %v3898_v22 = vand.u32 8388607, %v12885_v16  ;;  %v3416_v49 = vsel %vm3406_vm7, %v3402_v42, 1326507024  ;;  %vm3404_vm6 = vcmp.lt.s32.totalorder %v3384_v58, 2  ;;  %v3413_v11 = vsel %vm3405_vm15, %v3396_v50, %v3412_v27 }
 0x383   : > { %v3645_v31 = vsub.s32 0, %v10020_v33  ;;  %v3408_v54 = vsel %vm3406_vm7, %v3396_v50, 2102212464  ;;  %v3346_v4 = vor.u32 4788187, %v3345_v60  ;;  %v3387_v48 = vshrl.u32 %v12686_v62, %v3386_v57 }
 0x384   : > { %v3414_v39 = vsel %vm3404_vm6, %v3411_v56, %v3413_v11  ;;  %v3417_v38 = vsel %vm3405_vm15, %v3399_v52, %v3416_v49  ;;  %v3342_v53 = vor.u32 %v3341_v61, %v3340_v55  ;;  %v6359_v3 = vadd.s32 4294967169, %v3895_v45  ;;  %v12973_v52 = vld [vmem:[#allocation7_spill] sm:$0xff] }
 0x385   : > { %v6348_v46 = vmin.u32 %v3645_v31, %v10020_v33  ;;  %v3418_v20 = vsel %vm3404_vm6, %v3415_v18, %v3417_v38  ;;  %v3407_v42 = vsel %vm3403_vm14, %v3387_v48, %v3390_v44  ;;  %v3409_v23 = vsel %vm3405_vm15, %v3393_v14, %v3408_v54 }
 0x386   : > { %v10035_v35 = vmul.u32.u64.low %v3419_v36, %v3418_v20  ;;  %v10036_v16 = vmul.u32.u64.high %v3419_v36, %v3418_v20, %v10035_v35  ;;  %v10038_v50 = vmul.u32.u64.low %v3419_v36, %v3414_v39  ;;  %v10039_v57 = vmul.u32.u64.high %v3419_v36, %v3414_v39, %v10038_v50 }
 0x387   : > { %v3647_v60 = vclz %v6348_v46  ;;  %v3901_v56 = vadd.s32 1, %v6359_v3  ;;  %6935 = vsinq.f32 %v9911_v32  ;;  %v12886_v55 = vand.u32 2147483647, %v9462_v37 }
 0x388   : > { %v10049_v44 = vmul.f32 %v3557_v26, %v3555_v24  ;;  %v3347_v14 = vand.u32 2147483647, %v3346_v4  ;;  %v3410_v45 = vsel %vm3404_vm6, %v3407_v42, %v3409_v23  ;;  %v3899_v27 = vor.u32 8388608, %v3898_v22 }
 0x389   : > { %vm10045_vm7 = vcmp.le.f32.partialorder %v12886_v55, 0.7853982  ;;  %v6349_v61 = vadd.s32 4294967294, %v3647_v60  ;;  %vm3902_vm14 = vcmp.gt.s32.totalorder %v3901_v56, 0  ;;  %vm3428_vm15 = vc.u32 %v10036_v16, %v10038_v50 }
 0x38a   : > { %v10056_v18 = vsel %vm10045_vm7, %v9462_v37, %v9988_v9  ;;  %v3903_v32 = vsel %vm3902_vm14, %v3901_v56, 0  ;;  %v10062_v26 = vadd.f32 %v9736_v6, %v9644_v7  ;;  %v3349_v24 = vcvt.s32.f32 %v3342_v53 }
 0x38b   : > { %vm6350_vm11 = vcmp.lt.s32.totalorder %v6349_v61, 0  ;;  %v3429_v58 = vadd.s32 1, %v10039_v57  ;;  %v3905_v22 = vand.u32 31, %v3903_v32  ;;  %v3635_v31 = vadd.s32 %v9962_v10, %v9959_v15 }
 0x38c   : > { %v10068_v9 = vsel %vm6350_vm11, 0, %v6349_v61  ;;  %v3426_v54 = vmul.u32 %v3419_v36, %v3410_v45  ;;  %v10070_v11 = vmul.f32 %v3349_v24, %v3347_v14  ;;  %v10074_v48 = vshll.u32 %v3899_v27, 8 }
 0x38d   : > { %v3655_v4 = vsub.s32 4294967266, %v10068_v9  ;;  %v3430_v7 = vsel %vm3428_vm15, %v3429_v58, %v10039_v57  ;;  %v3906_v38 = vsub.s32 32, %v3905_v22  ;;  %v12564_v53 = vand.u32 2147483647, %v10062_v26 }
 0x38e   : > { %v3431_v39 = vadd.s32 %v3430_v7, %v3426_v54  ;;  %v3686_v46 = vand.u32 2139095040, %v10062_v26  ;;  %v3651_v20 = vsub.s32 32, %v10068_v9  ;;  %v3904_v10 = vshrl.u32 %v3903_v32, 5 }
 0x38f   : > { %v3656_v15 = vadd.s32 127, %v3655_v4  ;;  %v3908_v36 = vshll.u32 %v12686_v62, %v3905_v22  ;;  %v3909_v42 = vshrl.u32 %v12693_v34, %v3906_v38  ;;  %v3911_v23 = vshll.u32 %v12693_v34, %v3905_v22 }
 0x390   : > { %v3432_v3 = vadd.s32 536870912, %v3431_v39  ;;  %v3912_v35 = vshrl.u32 %v12694_v12, %v3906_v38  ;;  %v3914_v60 = vshll.u32 %v12694_v12, %v3905_v22  ;;  %v3915_v57 = vshrl.u32 %v12695_v5, %v3906_v38 }
 0x391   : > { %v3917_v56 = vshll.u32 %v12695_v5, %v3905_v22  ;;  %v3918_v55 = vshrl.u32 %v12696_v28, %v3906_v38  ;;  %v10087_v14 = vpop.eup %6935  ;;  %v3910_v45 = vor.u32 %v3909_v42, %v3908_v36  ;;  %v3687_v32 = vshrl.u32 %v3686_v46, 23 }
 0x392   : > { %12889 = vst [vmem:[#allocation35_spill] sm:$0xff] %v10087_v14  ;;  %v10089_v61 = vshrl.u32 %v3432_v3, 30  ;;  %v3913_v27 = vor.u32 %v3912_v35, %v3911_v23  ;;  %v3657_v24 = vshll.u32 %v3656_v15, 23  ;;  %v3916_v58 = vor.u32 %v3915_v57, %v3914_v60 }
 0x393   : > { %v3919_v54 = vor.u32 %v3918_v55, %v3917_v56  ;;  %v3690_v4 = vand.u32 8388607, %v12564_v53  ;;  %vm12568_vm11 = vcmp.lt.s32.totalorder %v9563_v25, 0  ;;  %v3652_v7 = vshll.u32 %v10020_v33, %v10068_v9 }
 0x394   : > { %12890 = vst [vmem:[#allocation44_spill] sm:$0xff] %v10089_v61  ;;  %v3434_v49 = vshll.u32 %v10089_v61, 30  ;;  %v3920_v59 = vshll.u32 %v12696_v28, %v3905_v22  ;;  %v3921_v3 = vshrl.u32 %v12697_v30, %v3906_v38  ;;  %v3653_v36 = vshrl.u32 %v3635_v31, %v3651_v20 }
 0x395   : > { %v3907_v46 = vshrl.u32 %v12686_v62, %v3906_v38  ;;  %vm3923_vm6 = vcmp.lt.s32.totalorder %v3904_v10, 1  ;;  %vm3926_vm14 = vcmp.lt.s32.totalorder %v3904_v10, 4  ;;  %v3658_v60 = vor.u32 4788187, %v3657_v24 }
 0x396   : > { %v10100_v15 = vsub.s32 %v3431_v39, %v3434_v49  ;;  %v3922_v42 = vor.u32 %v3921_v3, %v3920_v59  ;;  %v3928_v23 = vsel %vm3926_vm14, %v3916_v58, 2102212464  ;;  %v3931_v35 = vsel %vm3923_vm6, %v3910_v45, %v3913_v27 }
 0x397   : > { %vm3925_vm15 = vcmp.lt.s32.totalorder %v3904_v10, 3  ;;  %v3932_v57 = vsel %vm3926_vm14, %v3919_v54, 920167782  ;;  %v3935_v33 = vsel %vm3923_vm6, %v3913_v27, %v3916_v58  ;;  %vm3924_vm0 = vcmp.lt.s32.totalorder %v3904_v10, 2 }
 0x398   : > { %v3437_v9 = vsub.s32 0, %v10100_v15  ;;  %v3933_v22 = vsel %vm3925_vm15, %v3916_v58, %v3932_v57  ;;  %v3936_v56 = vsel %vm3926_vm14, %v3922_v42, 1326507024  ;;  %v3927_v55 = vsel %vm3923_vm6, %v3907_v46, %v3910_v45 }
 0x399   : > { %v3929_v31 = vsel %vm3925_vm15, %v3913_v27, %v3928_v23  ;;  %v3934_v38 = vsel %vm3924_vm0, %v3931_v35, %v3933_v22  ;;  %v3937_v20 = vsel %vm3925_vm15, %v3919_v54, %v3936_v56  ;;  %v6351_v58 = vadd.s32 4294967169, %v3687_v32 }
 0x39a   : > { %v6340_v49 = vmin.u32 %v3437_v9, %v10100_v15  ;;  %v3938_v59 = vsel %vm3924_vm0, %v3935_v33, %v3937_v20  ;;  %v10107_v39 = vmul.u32.u64.low %v10074_v48, %v3934_v38  ;;  %v10108_v24 = vmul.u32.u64.high %v10074_v48, %v3934_v38, %v10107_v39 }
 0x39b   : > { %v10112_v3 = vmul.u32.u64.low %v10074_v48, %v3938_v59  ;;  %v10113_v53 = vmul.u32.u64.high %v10074_v48, %v3938_v59, %v10112_v3  ;;  %v10117_v45 = vadd.f32 %v9736_v6, %v9648_v13  ;;  %6937 = vcosq.f32 %v10056_v18 }
 0x39c   : > { %v3654_v27 = vor.u32 %v3653_v36, %v3652_v7  ;;  %v3439_v54 = vclz %v6340_v49  ;;  %v3930_v46 = vsel %vm3924_vm0, %v3927_v55, %v3929_v31  ;;  %v12891_v42 = vxor.u32 2147483648, %v10049_v44 }
 0x39d   : > { %v3427_v32 = vadd.s32 %v10038_v50, %v10036_v16  ;;  %v3693_v13 = vadd.s32 1, %v6351_v58  ;;  %v3659_v57 = vand.u32 2147483647, %v3658_v60  ;;  %v3949_v7 = vadd.s32 1, %v10108_v24 }
 0x39e   : > { %v10126_v23 = vsel %vm12568_vm11, %v12891_v42, %v10049_v44  ;;  %v6341_v33 = vadd.s32 4294967294, %v3439_v54  ;;  %v3691_v36 = vor.u32 8388608, %v3690_v4  ;;  %v3946_v10 = vmul.u32 %v10074_v48, %v3930_v46 }
 0x39f   : > { %vm3948_vm0 = vc.u32 %v10113_v53, %v10107_v39  ;;  %vm3694_vm6 = vcmp.gt.s32.totalorder %v3693_v13, 0  ;;  %v3998_v44 = vand.u32 2139095040, %v10117_v45  ;;  %v3661_v9 = vcvt.s32.f32 %v3654_v27 }
 0x3a0   : > { %vm6342_vm14 = vcmp.lt.s32.totalorder %v6341_v33, 0  ;;  %v3950_v22 = vsel %vm3948_vm0, %v3949_v7, %v10108_v24  ;;  %v3695_v56 = vsel %vm3694_vm6, %v3693_v13, 0  ;;  %v10140_v38 = vshll.u32 %v3691_v36, 8 }
 0x3a1   : > { %v3442_v16 = vsel %vm6342_vm14, 0, %v6341_v33  ;;  %v3951_v50 = vadd.s32 %v3950_v22, %v3946_v10  ;;  %v3697_v60 = vand.u32 31, %v3695_v56  ;;  %v10138_v31 = vmul.f32 %v3661_v9, %v3659_v57 }
 0x3a2   : > { %v3443_v4 = vsub.s32 32, %v3442_v16  ;;  %v3447_v48 = vsub.s32 4294967266, %v3442_v16  ;;  %v3696_v49 = vshrl.u32 %v3695_v56, 5  ;;  %v3999_v3 = vshrl.u32 %v3998_v44, 23 }
 0x3a3   : > { %v3952_v20 = vadd.s32 536870912, %v3951_v50  ;;  %v3698_v59 = vsub.s32 32, %v3697_v60  ;;  %v3700_v24 = vshll.u32 %v12686_v62, %v3697_v60  ;;  %v3703_v54 = vshll.u32 %v12693_v34, %v3697_v60 }
 0x3a4   : > { %v3445_v58 = vshrl.u32 %v3427_v32, %v3443_v4  ;;  %v3448_v27 = vadd.s32 127, %v3447_v48  ;;  %v3706_v57 = vshll.u32 %v12694_v12, %v3697_v60  ;;  %v3709_v32 = vshll.u32 %v12695_v5, %v3697_v60 }
 0x3a5   : > { %v10144_v46 = vshrl.u32 %v3952_v20, 30  ;;  %v3701_v42 = vshrl.u32 %v12693_v34, %v3698_v59  ;;  %v3704_v13 = vshrl.u32 %v12694_v12, %v3698_v59  ;;  %v10149_v33 = vpop.eup %6937  ;;  %v3707_v36 = vshrl.u32 %v12695_v5, %v3698_v59 }
 0x3a6   : > { %v3449_v7 = vshll.u32 %v3448_v27, 23  ;;  %v3710_v10 = vshrl.u32 %v12696_v28, %v3698_v59  ;;  %v3444_v44 = vshll.u32 %v10100_v15, %v3442_v16  ;;  %v12893_v4 = vand.u32 2147483647, %v9563_v25 }
 0x3a7   : > { %12892 = vst [vmem:[#allocation42_spill] sm:$0xff] %v10144_v46  ;;  %v3954_v9 = vshll.u32 %v10144_v46, 30  ;;  %v3702_v22 = vor.u32 %v3701_v42, %v3700_v24  ;;  %v3705_v56 = vor.u32 %v3704_v13, %v3703_v54  ;;  %v12894_v48 = vmov 0 }
 0x3a8   : > { %vm10158_vm15 = vcmp.le.f32.partialorder %v12893_v4, 0.7853982  ;;  %v3699_v20 = vshrl.u32 %v12686_v62, %v3698_v59  ;;  %v3708_v27 = vor.u32 %v3707_v36, %v3706_v57  ;;  %v3711_v35 = vor.u32 %v3710_v10, %v3709_v32 }
 0x3a9   : > { %v12895_v48 = vsel %vm10158_vm15, 4294967295, %v12894_v48  ;;  %v6363_v55 = vadd.s32 4294967169, %v3999_v3  ;;  %vm12576_vm0 = vcmp.lt.s32.totalorder %v9613_v21, 0  ;;  %v3446_v61 = vor.u32 %v3445_v58, %v3444_v44 }
 0x3aa   : > { %12896 = vst [vmem:[#allocation29_spill] sm:$0xff] %v12895_v48  ;;  %v10164_v2 = vsub.s32 %v3951_v50, %v3954_v9  ;;  %v3712_v15 = vshll.u32 %v12696_v28, %v3697_v60  ;;  %v3713_v16 = vshrl.u32 %v12697_v30, %v3698_v59  ;;  %v3450_v24 = vor.u32 4788187, %v3449_v7 }
 0x3ab   : > { %vm3715_vm6 = vcmp.lt.s32.totalorder %v3696_v49, 1  ;;  %vm3716_vm14 = vcmp.lt.s32.totalorder %v3696_v49, 2  ;;  %vm3718_vm11 = vcmp.lt.s32.totalorder %v3696_v49, 4  ;;  %vm3717_vm4 = vcmp.lt.s32.totalorder %v3696_v49, 3 }
 0x3ac   : > { %v3957_v54 = vsub.s32 0, %v10164_v2  ;;  %v3714_v42 = vor.u32 %v3713_v16, %v3712_v15  ;;  %v3720_v13 = vsel %vm3718_vm11, %v3708_v27, 2102212464  ;;  %v3723_v57 = vsel %vm3715_vm6, %v3702_v22, %v3705_v56 }
 0x3ad   : > { %v3719_v3 = vsel %vm3715_vm6, %v3699_v20, %v3702_v22  ;;  %v3724_v36 = vsel %vm3718_vm11, %v3711_v35, 920167782  ;;  %v3727_v32 = vsel %vm3715_vm6, %v3705_v56, %v3708_v27  ;;  %v3721_v58 = vsel %vm3717_vm4, %v3705_v56, %v3720_v13 }
 0x3ae   : > { %v6360_v50 = vmin.u32 %v3957_v54, %v10164_v2  ;;  %v3725_v10 = vsel %vm3717_vm4, %v3708_v27, %v3724_v36  ;;  %v3728_v60 = vsel %vm3718_vm11, %v3714_v42, 1326507024  ;;  %v3451_v44 = vand.u32 2147483647, %v3450_v24 }
 0x3af   : > { %v3726_v59 = vsel %vm3716_vm14, %v3723_v57, %v3725_v10  ;;  %v3729_v7 = vsel %vm3717_vm4, %v3711_v35, %v3728_v60  ;;  %v12897_v9 = vand.u32 2147483647, %v10117_v45  ;;  %v3453_v20 = vcvt.s32.f32 %v3446_v61 }
 0x3b0   : > { %v3959_v46 = vclz %v6360_v50  ;;  %v3730_v15 = vsel %vm3716_vm14, %v3727_v32, %v3729_v7  ;;  %v10175_v16 = vmul.u32.u64.low %v10140_v38, %v3726_v59  ;;  %v10176_v22 = vmul.u32.u64.high %v10140_v38, %v3726_v59, %v10175_v16 }
 0x3b1   : > { %v4002_v4 = vand.u32 8388607, %v12897_v9  ;;  %v3722_v56 = vsel %vm3716_vm14, %v3719_v3, %v3721_v58  ;;  %v10181_v27 = vmul.u32.u64.low %v10140_v38, %v3730_v15  ;;  %v10182_v24 = vmul.u32.u64.high %v10140_v38, %v3730_v15, %v10181_v27 }
 0x3b2   : > { %6939 = vsinq.f32 %v10056_v18  ;;  %v3563_v35 = vsel %vm10158_vm15, %v9563_v25, %v10126_v23  ;;  %v6361_v54 = vadd.s32 4294967294, %v3959_v46  ;;  %v4005_v42 = vadd.s32 1, %v6363_v55 }
 0x3b3   : > { %v12898_v13 = vxor.u32 2147483648, %v10070_v11  ;;  %v3663_v49 = vxor.u32 2147483648, %v10138_v31  ;;  %v10195_v57 = vmul.f32 %v3453_v20, %v3451_v44  ;;  %v10199_v18 = vadd.f32 %v9736_v6, %v9651_v41 }
 0x3b4   : > { %vm6362_vm4 = vcmp.lt.s32.totalorder %v6361_v54, 0  ;;  %v3738_v3 = vmul.u32 %v10140_v38, %v3722_v56  ;;  %v3741_v23 = vadd.s32 1, %v10176_v22  ;;  %vm4006_vm11 = vcmp.gt.s32.totalorder %v4005_v42, 0 }
 0x3b5   : > { %v3352_v61 = vsel %vm12576_vm0, %v12898_v13, %v10070_v11  ;;  %v10203_v55 = vsel %vm6362_vm4, 0, %v6361_v54  ;;  %vm3740_vm6 = vc.u32 %v10182_v24, %v10175_v16  ;;  %v4003_v11 = vor.u32 8388608, %v4002_v4 }
 0x3b6   : > { %v4007_v46 = vsel %vm4006_vm11, %v4005_v42, 0  ;;  %6941 = vcosq.f32 %v3563_v35  ;;  %v12899_v36 = vand.u32 2147483647, %v9613_v21  ;;  %v3967_v41 = vsub.s32 4294967266, %v10203_v55 }
 0x3b7   : > { %v3742_v6 = vsel %vm3740_vm6, %v3741_v23, %v10176_v22  ;;  %6943 = vsinq.f32 %v3563_v35  ;;  %vm12575_vm4 = vcmp.lt.s32.totalorder %v9740_v40, 0  ;;  %v4009_v50 = vand.u32 31, %v4007_v46 }
 0x3b8   : > { %vm10209_vm14 = vcmp.le.f32.partialorder %v12899_v36, 0.7853982  ;;  %v3743_v38 = vadd.s32 %v3742_v6, %v3738_v3  ;;  %v10224_v10 = vsel %vm12575_vm4, %v3663_v49, %v10138_v31  ;;  %v3947_v44 = vadd.s32 %v10107_v39, %v10113_v53 }
 0x3b9   : > { %v10219_v58 = vsel %vm10209_vm14, %v9613_v21, %v3352_v61  ;;  %v4010_v7 = vsub.s32 32, %v4009_v50  ;;  %v10229_v9 = vshll.u32 %v4003_v11, 8  ;;  %v3963_v15 = vsub.s32 32, %v10203_v55 }
 0x3ba   : > { %v3744_v59 = vadd.s32 536870912, %v3743_v38  ;;  %v3968_v22 = vadd.s32 127, %v3967_v41  ;;  %v4008_v20 = vshrl.u32 %v4007_v46, 5  ;;  %v4012_v56 = vshll.u32 %v12686_v62, %v4009_v50 }
 0x3bb   : > { %v4013_v31 = vshrl.u32 %v12693_v34, %v4010_v7  ;;  %v4015_v35 = vshll.u32 %v12693_v34, %v4009_v50  ;;  %v4016_v53 = vshrl.u32 %v12694_v12, %v4010_v7  ;;  %v4018_v54 = vshll.u32 %v12694_v12, %v4009_v50 }
 0x3bc   : > { %v10234_v27 = vshrl.u32 %v3744_v59, 30  ;;  %v10239_v39 = vpop.eup %6939  ;;  %v4019_v42 = vshrl.u32 %v12695_v5, %v4010_v7  ;;  %v4021_v13 = vshll.u32 %v12695_v5, %v4009_v50  ;;  %v4022_v61 = vshrl.u32 %v12696_v28, %v4010_v7 }
 0x3bd   : > { %v4014_v3 = vor.u32 %v4013_v31, %v4012_v56  ;;  %v4017_v23 = vor.u32 %v4016_v53, %v4015_v35  ;;  %v3790_v11 = vand.u32 2139095040, %v10199_v18  ;;  %v4024_v41 = vshll.u32 %v12696_v28, %v4009_v50 }
 0x3be   : > { %12902 = vst [vmem:[#allocation12_spill] sm:$0xff] %v10234_v27  ;;  %v3746_v49 = vshll.u32 %v10234_v27, 30  ;;  %v4020_v46 = vor.u32 %v4019_v42, %v4018_v54  ;;  %v4023_v36 = vor.u32 %v4022_v61, %v4021_v13  ;;  %v4025_v6 = vshrl.u32 %v12697_v30, %v4010_v7 }
 0x3bf   : > { %v12903_v59 = vand.u32 2147483647, %v9740_v40  ;;  %v12904_v60 = vmov 0  ;;  %v3965_v4 = vshrl.u32 %v3947_v44, %v3963_v15  ;;  %v3969_v48 = vshll.u32 %v3968_v22, 23 }
 0x3c0   : > { %v10255_v25 = vsub.s32 %v3743_v38, %v3746_v49  ;;  %v4011_v56 = vshrl.u32 %v12686_v62, %v4010_v7  ;;  %v10258_v31 = vpop.eup %6941  ;;  %v4026_v35 = vor.u32 %v4025_v6, %v4024_v41  ;;  %vm4027_vm6 = vcmp.lt.s32.totalorder %v4008_v20, 1 }
 0x3c1   : > { %vm10251_vm11 = vcmp.le.f32.partialorder %v12903_v59, 0.7853982  ;;  %12907 = vst [vmem:[#allocation47_spill] sm:$0xff] %v10258_v31  ;;  %vm4029_vm4 = vcmp.lt.s32.totalorder %v4008_v20, 3  ;;  %vm4030_vm0 = vcmp.lt.s32.totalorder %v4008_v20, 4  ;;  %v10260_v50 = vpop.eup %6943  ;;  %v4035_v42 = vsel %vm4027_vm6, %v4014_v3, %v4017_v23 }
 0x3c2   : > { %v12905_v60 = vsel %vm10251_vm11, 4294967295, %v12904_v60  ;;  %12908 = vst [vmem:[#allocation48_spill] sm:$0xff] %v10260_v50  ;;  %v3749_v53 = vsub.s32 0, %v10255_v25  ;;  %v4032_v54 = vsel %vm4030_vm0, %v4020_v46, 2102212464  ;;  %vm4028_vm10 = vcmp.lt.s32.totalorder %v4008_v20, 2 }
 0x3c3   : > { %12906 = vst [vmem:[#allocation46_spill] sm:$0xff] %v12905_v60  ;;  %v4036_v13 = vsel %vm4030_vm0, %v4023_v36, 920167782  ;;  %v4039_v38 = vsel %vm4027_vm6, %v4017_v23, %v4020_v46  ;;  %v3791_v15 = vshrl.u32 %v3790_v11, 23  ;;  %v4031_v22 = vsel %vm4027_vm6, %v4011_v56, %v4014_v3 }
 0x3c4   : > { %v4037_v44 = vsel %vm4029_vm4, %v4020_v46, %v4036_v13  ;;  %v6352_v7 = vmin.u32 %v3749_v53, %v10255_v25  ;;  %v4040_v49 = vsel %vm4030_vm0, %v4026_v35, 1326507024  ;;  %vm12601_vm13 = vcmp.lt.s32.totalorder %v9530_v19, 4 }
 0x3c5   : > { %v4038_v61 = vsel %vm4028_vm10, %v4035_v42, %v4037_v44  ;;  %v4033_v41 = vsel %vm4029_vm4, %v4017_v23, %v4032_v54  ;;  %v4041_v6 = vsel %vm4029_vm4, %v4023_v36, %v4040_v49  ;;  %v3964_v11 = vshll.u32 %v10164_v2, %v10203_v55 }
 0x3c6   : > { %v10270_v59 = vmul.u32.u64.low %v10229_v9, %v4038_v61  ;;  %v10271_v31 = vmul.u32.u64.high %v10229_v9, %v4038_v61, %v10270_v59  ;;  %v3970_v46 = vor.u32 4788187, %v3969_v48  ;;  %v3751_v53 = vclz %v6352_v7 }
 0x3c7   : > { %v4042_v3 = vsel %vm4028_vm10, %v4039_v38, %v4041_v6  ;;  %v6355_v42 = vadd.s32 4294967169, %v3791_v15  ;;  %v12909_v23 = vand.u32 2147483647, %v10199_v18  ;;  %6945 = vcosq.f32 %v10219_v58 }
 0x3c8   : > { %v10278_v56 = vmul.u32.u64.low %v10229_v9, %v4042_v3  ;;  %v10279_v35 = vmul.u32.u64.high %v10229_v9, %v4042_v3, %v10278_v56  ;;  %vm12592_vm0 = vcmp.lt.s32.totalorder %v9871_v51, 0  ;;  %v6353_v54 = vadd.s32 4294967294, %v3751_v53 }
 0x3c9   : > { %v3794_v36 = vand.u32 8388607, %v12909_v23  ;;  %v4034_v13 = vsel %vm4028_vm10, %v4031_v22, %v4033_v41  ;;  %v3667_v2 = vsel %vm10251_vm11, %v9740_v40, %v10224_v10  ;;  %v3966_v48 = vor.u32 %v3965_v4, %v3964_v11 }
 0x3ca   : > { %v4053_v55 = vadd.s32 1, %v10271_v31  ;;  %v3797_v44 = vadd.s32 1, %v6355_v42  ;;  %6947 = vsinq.f32 %v10219_v58  ;;  %v12910_v38 = vxor.u32 2147483648, %v10195_v57 }
 0x3cb   : > { %v3971_v7 = vand.u32 2147483647, %v3970_v46  ;;  %vm6354_vm4 = vcmp.lt.s32.totalorder %v6353_v54, 0  ;;  %v4050_v20 = vmul.u32 %v10229_v9, %v4034_v13  ;;  %vm4052_vm10 = vc.u32 %v10279_v35, %v10270_v59 }
 0x3cc   : > { %v3456_v15 = vsel %vm12592_vm0, %v12910_v38, %v10195_v57  ;;  %v3795_v10 = vor.u32 8388608, %v3794_v36  ;;  %vm3798_vm6 = vcmp.gt.s32.totalorder %v3797_v44, 0  ;;  %6949 = vcosq.f32 %v3667_v2 }
 0x3cd   : > { %v12911_v4 = vand.u32 2147483647, %v9871_v51  ;;  %v12912_v58 = vmov 0  ;;  %v4054_v22 = vsel %vm4052_vm10, %v4053_v55, %v10271_v31  ;;  %v12581_v57 = vand.u32 2147483647, %v9211_v17 }
 0x3ce   : > { %v3973_v61 = vcvt.s32.f32 %v3966_v48  ;;  %v10308_v49 = vsel %vm6354_vm4, 0, %v6353_v54  ;;  %v4055_v9 = vadd.s32 %v4054_v22, %v4050_v20  ;;  %v3799_v41 = vsel %vm3798_vm6, %v3797_v44, 0 }
 0x3cf   : > { %vm10302_vm8 = vcmp.le.f32.partialorder %v12911_v4, 0.7853982  ;;  %v10313_v6 = vsel %vm12601_vm13, %v9899_v43, 920167782  ;;  %6951 = vsinq.f32 %v3667_v2  ;;  %v3801_v46 = vand.u32 31, %v3799_v41 }
 0x3d0   : > { %v12913_v58 = vsel %vm10302_vm8, 4294967295, %v12912_v58  ;;  %v10318_v11 = vsel %vm10302_vm8, %v9871_v51, %v3456_v15  ;;  %v10320_v31 = vmul.f32 %v3973_v61, %v3971_v7  ;;  %v3739_v53 = vadd.s32 %v10175_v16, %v10182_v24 }
 0x3d1   : > { %12914 = vst [vmem:[#allocation49_spill] sm:$0xff] %v12913_v58  ;;  %v4056_v3 = vadd.s32 536870912, %v4055_v9  ;;  %v10324_v56 = vshll.u32 %v3795_v10, 8  ;;  %v3755_v42 = vsub.s32 32, %v10308_v49  ;;  %v3802_v36 = vsub.s32 32, %v3801_v46  ;;  %v10337_v24 = vpop.eup %6945 }
 0x3d2   : > { %v10331_v54 = vand.u32 8388607, %v12581_v57  ;;  %v3759_v13 = vsub.s32 4294967266, %v10308_v49  ;;  %v3800_v48 = vshrl.u32 %v3799_v41, 5  ;;  %v3804_v16 = vshll.u32 %v12686_v62, %v3801_v46  ;;  %12916 = vst [vmem:[#allocation51_spill] sm:$0xff] %v10337_v24 }
 0x3d3   : > { %v10334_v2 = vshrl.u32 %v4056_v3, 30  ;;  %v3805_v55 = vshrl.u32 %v12693_v34, %v3802_v36  ;;  %v3807_v44 = vshll.u32 %v12693_v34, %v3801_v46  ;;  %v3810_v38 = vshll.u32 %v12694_v12, %v3801_v46 }
 0x3d4   : > { %v3813_v15 = vshll.u32 %v12695_v5, %v3801_v46  ;;  %v3808_v20 = vshrl.u32 %v12694_v12, %v3802_v36  ;;  %v3811_v10 = vshrl.u32 %v12695_v5, %v3802_v36  ;;  %v3814_v4 = vshrl.u32 %v12696_v28, %v3802_v36  ;;  %v10347_v22 = vpop.eup %6947 }
 0x3d5   : > { %12915 = vst [vmem:[#allocation50_spill] sm:$0xff] %v10334_v2  ;;  %v4058_v7 = vshll.u32 %v10334_v2, 30  ;;  %12917 = vst [vmem:[#allocation52_spill] sm:$0xff] %v10347_v22  ;;  %v3806_v61 = vor.u32 %v3805_v55, %v3804_v16  ;;  %v3816_v41 = vshll.u32 %v12696_v28, %v3801_v46  ;;  %v3817_v3 = vshrl.u32 %v12697_v30, %v3802_v36 }
 0x3d6   : > { %v2452_v57 = vshll.u32 %v12686_v62, %v9296_v29  ;;  %v3809_v50 = vor.u32 %v3808_v20, %v3807_v44  ;;  %v3812_v2 = vor.u32 %v3811_v10, %v3810_v38  ;;  %v3815_v60 = vor.u32 %v3814_v4, %v3813_v15  ;;  %v10355_v27 = vpop.eup %6949 }
 0x3d7   : > { %v10353_v23 = vsub.s32 %v4055_v9, %v4058_v7  ;;  %12918 = vst [vmem:[#allocation53_spill] sm:$0xff] %v10355_v27  ;;  %v3760_v40 = vadd.s32 127, %v3759_v13  ;;  %v3818_v24 = vor.u32 %v3817_v3, %v3816_v41  ;;  %v2453_v22 = vshrl.u32 %v12693_v34, %v9309_v63 }
 0x3d8   : > { %v2456_v46 = vshrl.u32 %v12694_v12, %v9309_v63  ;;  %v3803_v55 = vshrl.u32 %v12686_v62, %v3802_v36  ;;  %vm3819_vm4 = vcmp.lt.s32.totalorder %v3800_v48, 1  ;;  %vm3822_vm10 = vcmp.lt.s32.totalorder %v3800_v48, 4 }
 0x3d9   : > { %v4061_v16 = vsub.s32 0, %v10353_v23  ;;  %v10363_v9 = vpop.eup %6951  ;;  %vm3821_vm6 = vcmp.lt.s32.totalorder %v3800_v48, 3  ;;  %v3824_v44 = vsel %vm3822_vm10, %v3812_v2, 2102212464  ;;  %v3827_v38 = vsel %vm3819_vm4, %v3806_v61, %v3809_v50 }
 0x3da   : > { %12919 = vst [vmem:[#allocation54_spill] sm:$0xff] %v10363_v9  ;;  %v3828_v15 = vsel %vm3822_vm10, %v3815_v60, 920167782  ;;  %vm3820_vm0 = vcmp.lt.s32.totalorder %v3800_v48, 2  ;;  %v3831_v20 = vsel %vm3819_vm4, %v3809_v50, %v3812_v2  ;;  %v3823_v10 = vsel %vm3819_vm4, %v3803_v55, %v3806_v61 }
 0x3db   : > { %v6364_v13 = vmin.u32 %v4061_v16, %v10353_v23  ;;  %v3829_v7 = vsel %vm3821_vm6, %v3812_v2, %v3828_v15  ;;  %v3825_v4 = vsel %vm3821_vm6, %v3809_v50, %v3824_v44  ;;  %v3832_v3 = vsel %vm3822_vm10, %v3818_v24, 1326507024 }
 0x3dc   : > { %v3830_v41 = vsel %vm3820_vm0, %v3827_v38, %v3829_v7  ;;  %v3757_v30 = vshrl.u32 %v3739_v53, %v3755_v42  ;;  %v3833_v36 = vsel %vm3821_vm6, %v3815_v60, %v3832_v3  ;;  %v2455_v27 = vshll.u32 %v12693_v34, %v9296_v29 }
 0x3dd   : > { %v4063_v28 = vclz %v6364_v13  ;;  %v3761_v9 = vshll.u32 %v3760_v40, 23  ;;  %v3834_v58 = vsel %vm3820_vm0, %v3831_v20, %v3833_v36  ;;  %v3826_v16 = vsel %vm3820_vm0, %v3823_v10, %v3825_v4  ;;  %v12922_v10 = vld [vmem:[#allocation23_spill] sm:$0xff]  ;;  %v12923_v4 = vld [vmem:[#allocation6_spill] sm:$0xff] }
 0x3de   : > { %v10369_v51 = vmul.u32.u64.low %v10324_v56, %v3830_v41  ;;  %v10370_v14 = vmul.u32.u64.high %v10324_v56, %v3830_v41, %v10369_v51  ;;  %v10374_v2 = vmul.u32.u64.low %v10324_v56, %v3834_v58  ;;  %v10375_v50 = vmul.u32.u64.high %v10324_v56, %v3834_v58, %v10374_v2 }
 0x3df   : > { %v6365_v48 = vadd.s32 4294967294, %v4063_v28  ;;  %v2454_v24 = vor.u32 %v2453_v22, %v2452_v57  ;;  %v2457_v53 = vor.u32 %v2456_v46, %v2455_v27  ;;  %v2458_v60 = vshll.u32 %v12694_v12, %v9296_v29 }
 0x3e0   : > { %v2459_v40 = vshrl.u32 %v12695_v5, %v9309_v63  ;;  %v3975_v42 = vxor.u32 2147483648, %v10320_v31  ;;  %v2443_v61 = vor.u32 8388608, %v10331_v54  ;;  %v2451_v28 = vshrl.u32 %v12686_v62, %v9309_v63 }
 0x3e1   : > { %vm6366_vm4 = vcmp.lt.s32.totalorder %v6365_v48, 0  ;;  %vm12602_vm0 = vcmp.lt.s32.totalorder %v9920_v0, 0  ;;  %v12920_v58 = vshll.u32 %v10255_v25, %v10308_v49  ;;  %v3845_v29 = vadd.s32 1, %v10370_v14  ;;  %v12921_v25 = vld [vmem:[#allocation11_spill] sm:$0xff] }
 0x3e2   : > { %v4066_v57 = vsel %vm6366_vm4, 0, %v6365_v48  ;;  %v2460_v22 = vor.u32 %v2459_v40, %v2458_v60  ;;  %v3762_v46 = vor.u32 4788187, %v3761_v9  ;;  %v3842_v55 = vmul.u32 %v10324_v56, %v3826_v16 }
 0x3e3   : > { %v3758_v27 = vor.u32 %v3757_v30, %v12920_v58  ;;  %vm2467_vm10 = vcmp.lt.s32.totalorder %v9326_v8, 1  ;;  %vm2469_vm6 = vcmp.lt.s32.totalorder %v9326_v8, 3  ;;  %vm3844_vm13 = vc.u32 %v10375_v50, %v10369_v51  ;;  %v12925_v58 = vld [vmem:[#allocation24_spill] sm:$0xff] }
 0x3e4   : > { %v2472_v63 = vsel %vm2470_vm3, %v2460_v22, 2102212464  ;;  %v2475_v54 = vsel %vm2467_vm10, %v2454_v24, %v2457_v53  ;;  %v2477_v30 = vsel %vm2469_vm6, %v2460_v22, %v12921_v25  ;;  %v4051_v49 = vadd.s32 %v10270_v59, %v10279_v35 }
 0x3e5   : > { %v4071_v44 = vsub.s32 4294967266, %v4066_v57  ;;  %v3846_v9 = vsel %vm3844_vm13, %v3845_v29, %v10370_v14  ;;  %vm2468_vm4 = vcmp.lt.s32.totalorder %v9326_v8, 2  ;;  %v2471_v38 = vsel %vm2467_vm10, %v2451_v28, %v2454_v24 }
 0x3e6   : > { %v3847_v56 = vadd.s32 %v3846_v9, %v3842_v55  ;;  %v2473_v15 = vsel %vm2469_vm6, %v2457_v53, %v2472_v63  ;;  %v2479_v13 = vsel %vm2467_vm10, %v2457_v53, %v2460_v22  ;;  %v3765_v7 = vcvt.s32.f32 %v3758_v27  ;;  %v12924_v53 = vld [vmem:[#allocation20_spill] sm:$0xff] }
 0x3e7   : > { %v2478_v20 = vsel %vm2468_vm4, %v2475_v54, %v2477_v30  ;;  %v2481_v41 = vsel %vm2469_vm6, %v12923_v4, %v12922_v10  ;;  %v2483_v3 = vshll.u32 %v2443_v61, 8  ;;  %v3763_v36 = vand.u32 2147483647, %v3762_v46 }
 0x3e8   : > { %v4067_v48 = vsub.s32 32, %v4066_v57  ;;  %v3848_v16 = vadd.s32 536870912, %v3847_v56  ;;  %v2482_v2 = vsel %vm2468_vm4, %v2479_v13, %v2481_v41  ;;  %v4072_v59 = vadd.s32 127, %v4071_v44 }
 0x3e9   : > { %v2474_v35 = vsel %vm2468_vm4, %v2471_v38, %v2473_v15  ;;  %v10404_v60 = vmul.u32.u64.low %v2483_v3, %v2482_v2  ;;  %v10405_v14 = vmul.u32.u64.high %v2483_v3, %v2482_v2, %v10404_v60  ;;  %v2539_v28 = vand.u32 2147483647, %v12924_v53 }
 0x3ea   : > { %v10407_v8 = vshrl.u32 %v3848_v16, 30  ;;  %v10409_v24 = vmul.u32.u64.low %v2483_v3, %v2478_v20  ;;  %v10410_v40 = vmul.u32.u64.high %v2483_v3, %v2478_v20, %v10409_v24  ;;  %v12926_v61 = vor.u32 %v9894_v1, %v12925_v58  ;;  %v12931_v1 = vld [vmem:[#allocation26_spill] sm:$0xff] }
 0x3eb   : > { %vm12927_vm3 = vcmp.lt.s32.totalorder %v9530_v19, 4  ;;  %6953 = vcosq.f32 %v10318_v11  ;;  %v12928_v29 = vand.u32 2147483647, %v9920_v0  ;;  %v12929_v22 = vmov 0 }
 0x3ec   : > { %v2584_v27 = vsel %vm12927_vm3, %v12926_v61, 1326507024  ;;  %v3976_v46 = vsel %vm12602_vm0, %v3975_v42, %v10320_v31  ;;  %v3766_v55 = vmul.f32 %v3765_v7, %v3763_v36  ;;  %v4069_v63 = vshrl.u32 %v4051_v49, %v4067_v48  ;;  %v12932_v42 = vld [vmem:[#allocation17_spill] sm:$0xff] }
 0x3ed   : > { %vm10422_vm13 = vcmp.le.f32.partialorder %v12928_v29, 0.7853982  ;;  %v3850_v54 = vshll.u32 %v10407_v8, 30  ;;  %v2557_v25 = vshrl.u32 %v12693_v34, %v12931_v1  ;;  %v4068_v30 = vshll.u32 %v10353_v23, %v4066_v57 }
 0x3ee   : > { %v12930_v22 = vsel %vm10422_vm13, 4294967295, %v12929_v22  ;;  %v4073_v44 = vshll.u32 %v4072_v59, 23  ;;  %v2490_v9 = vmul.u32 %v2483_v3, %v2474_v35  ;;  %vm2492_vm10 = vc.u32 %v10405_v14, %v10409_v24 }
 0x3ef   : > { %v10435_v38 = vsub.s32 %v3847_v56, %v3850_v54  ;;  %v2493_v15 = vadd.s32 1, %v10410_v40  ;;  %v2546_v31 = vand.u32 8388607, %v2539_v28  ;;  %v2556_v49 = vshll.u32 %v12686_v62, %v12932_v42 }
 0x3f0   : > { %v2559_v13 = vshll.u32 %v12693_v34, %v12932_v42  ;;  %v2560_v23 = vshrl.u32 %v12694_v12, %v12931_v1  ;;  %v2562_v57 = vshll.u32 %v12694_v12, %v12932_v42  ;;  %v2563_v56 = vshrl.u32 %v12695_v5, %v12931_v1 }
 0x3f1   : > { %v4070_v7 = vor.u32 %v4069_v63, %v4068_v30  ;;  %v3853_v20 = vsub.s32 0, %v10435_v38  ;;  %v2494_v10 = vsel %vm2492_vm10, %v2493_v15, %v10410_v40  ;;  %v2558_v4 = vor.u32 %v2557_v25, %v2556_v49 }
 0x3f2   : > { %v4074_v41 = vor.u32 4788187, %v4073_v44  ;;  %v2495_v3 = vadd.s32 %v2494_v10, %v2490_v9  ;;  %v2561_v36 = vor.u32 %v2560_v23, %v2559_v13  ;;  %v2564_v48 = vor.u32 %v2563_v56, %v2562_v57  ;;  %v12937_v57 = vld [vmem:[#allocation5_spill] sm:$0xff] }
 0x3f3   : > { %6955 = vsinq.f32 %v10318_v11  ;;  %v3979_v16 = vsel %vm10422_vm13, %v9920_v0, %v3976_v46  ;;  %v6356_v2 = vmin.u32 %v3853_v20, %v10435_v38  ;;  %v2547_v59 = vor.u32 8388608, %v2546_v31 }
 0x3f4   : > { %v3767_v35 = vxor.u32 2147483648, %v3766_v55  ;;  %v2496_v60 = vadd.s32 536870912, %v2495_v3  ;;  %vm12603_vm4 = vcmp.lt.s32.totalorder %v9530_v19, 1  ;;  %vm12604_vm3 = vcmp.lt.s32.totalorder %v9530_v19, 3 }
 0x3f5   : > { %v4077_v40 = vcvt.s32.f32 %v4070_v7  ;;  %v3855_v58 = vclz %v6356_v2  ;;  %v2579_v61 = vsel %vm12603_vm4, %v2558_v4, %v2561_v36  ;;  %v2581_v11 = vsel %vm12604_vm3, %v2564_v48, %v10313_v6  ;;  %v10465_v29 = vpop.eup %6953 }
 0x3f6   : > { %v12933_v46 = vand.u32 2147483647, %v10062_v26  ;;  %v12934_v63 = vmov 0  ;;  %v4075_v54 = vand.u32 2147483647, %v4074_v41  ;;  %v10473_v25 = vshrl.u32 %v2496_v60, 30 }
 0x3f7   : > { %v2555_v30 = vshrl.u32 %v12686_v62, %v12931_v1  ;;  %v2583_v44 = vsel %vm12603_vm4, %v2561_v36, %v2564_v48  ;;  %v6357_v9 = vadd.s32 4294967294, %v3855_v58  ;;  %vm12605_vm0 = vcmp.lt.s32.totalorder %v9530_v19, 2 }
 0x3f8   : > { %vm10469_vm10 = vcmp.le.f32.partialorder %v12933_v46, 0.7853982  ;;  %v2585_v6 = vsel %vm12604_vm3, %v9899_v43, %v2584_v27  ;;  %v2587_v15 = vshll.u32 %v2547_v59, 8  ;;  %v2498_v31 = vshll.u32 %v10473_v25, 30 }
 0x3f9   : > { %v12935_v63 = vsel %vm10469_vm10, 4294967295, %v12934_v63  ;;  %vm12936_vm6 = vcmp.lt.s32.totalorder %v9530_v19, 4  ;;  %v2582_v49 = vsel %vm12605_vm0, %v2579_v61, %v2581_v11  ;;  %v2586_v1 = vsel %vm12605_vm0, %v2583_v44, %v2585_v6 }
 0x3fa   : > { %v2576_v42 = vsel %vm12936_vm6, %v2564_v48, 2102212464  ;;  %vm6358_vm4 = vcmp.lt.s32.totalorder %v6357_v9, 0  ;;  %v10490_v13 = vmul.u32.u64.low %v2587_v15, %v2586_v1  ;;  %v10491_v23 = vmul.u32.u64.high %v2587_v15, %v2586_v1, %v10490_v13 }
 0x3fb   : > { %v2729_v56 = vsub.s32 4, %v12937_v57  ;;  %vm12938_vm3 = vcmp.lt.s32.totalorder %v10062_v26, 0  ;;  %v3843_v27 = vadd.s32 %v10369_v51, %v10375_v50  ;;  %v3858_v7 = vsel %vm6358_vm4, 0, %v6357_v9 }
 0x3fc   : > { %v3768_v43 = vsel %vm12938_vm3, %v3767_v35, %v3766_v55  ;;  %v10498_v20 = vsub.s32 %v2495_v3, %v2498_v31  ;;  %v4078_v10 = vmul.f32 %v4077_v40, %v4075_v54  ;;  %v3859_v41 = vsub.s32 32, %v3858_v7  ;;  %v12941_v3 = vld [vmem:[#allocation4_spill] sm:$0xff] }
 0x3fd   : > { %v3863_v48 = vsub.s32 4294967266, %v3858_v7  ;;  %vm12939_vm6 = vcmp.lt.s32.totalorder %v9530_v19, 1  ;;  %vm12940_vm0 = vcmp.lt.s32.totalorder %v9530_v19, 3  ;;  %v10509_v55 = vpop.eup %6955  ;;  %6957 = vcosq.f32 %v3979_v16 }
 0x3fe   : > { %v2575_v2 = vsel %vm12939_vm6, %v2555_v30, %v2558_v4  ;;  %v2501_v59 = vsub.s32 0, %v10498_v20  ;;  %v2577_v60 = vsel %vm12940_vm0, %v2561_v36, %v2576_v42  ;;  %v3861_v51 = vshrl.u32 %v3843_v27, %v3859_v41 }
 0x3ff   : > { %v10505_v58 = vmul.u32.u64.low %v2587_v15, %v2582_v49  ;;  %v10506_v61 = vmul.u32.u64.high %v2587_v15, %v2582_v49, %v10505_v58  ;;  %v3864_v50 = vadd.s32 127, %v3863_v48  ;;  %vm12942_vm4 = vcmp.lt.s32.totalorder %v12941_v3, 0 }
 0x400   : > { %v2730_v35 = vsel %vm12942_vm4, %v2729_v56, %v12937_v57  ;;  %6959 = vsinq.f32 %v3979_v16  ;;  %v12943_v4 = vand.u32 2147483647, %v10117_v45  ;;  %v12944_v40 = vmov 0 }
 0x401   : > { %v6304_v36 = vmin.u32 %v2501_v59, %v10498_v20  ;;  %v3771_v11 = vsel %vm10469_vm10, %v10062_v26, %v3768_v43  ;;  %v3860_v46 = vshll.u32 %v10435_v38, %v3858_v7  ;;  %v3865_v54 = vshll.u32 %v3864_v50, 23 }
 0x402   : > { %vm10516_vm3 = vcmp.le.f32.partialorder %v12943_v4, 0.7853982  ;;  %vm12946_vm6 = vcmp.lt.s32.totalorder %v9530_v19, 2  ;;  %v4079_v30 = vxor.u32 2147483648, %v4078_v10  ;;  %vm2596_vm4 = vc.u32 %v10491_v23, %v10505_v58  ;;  %v12948_v19 = vld [vmem:[#allocation10_spill] sm:$0xff] }
 0x403   : > { %v12945_v40 = vsel %vm10516_vm3, 4294967295, %v12944_v40  ;;  %v2578_v16 = vsel %vm12946_vm6, %v2575_v2, %v2577_v60  ;;  %v2503_v44 = vclz %v6304_v36  ;;  %v2732_v6 = vsel %vm9499_vm5, 0, %v2730_v35 }
 0x404   : > { %v3862_v31 = vor.u32 %v3861_v51, %v3860_v46  ;;  %v3866_v42 = vor.u32 4788187, %v3865_v54  ;;  %v2521_v49 = vsub.s32 4, %v10473_v25  ;;  %v2597_v1 = vadd.s32 1, %v10506_v61 }
 0x405   : > { %vm12607_vm0 = vcmp.lt.s32.totalorder %v9211_v17, 0  ;;  %v6305_v38 = vadd.s32 4294967294, %v2503_v44  ;;  %v2594_v13 = vmul.u32 %v2587_v15, %v2578_v16  ;;  %v2833_v57 = vsub.s32 4, %v12948_v19 }
 0x406   : > { %v3867_v56 = vand.u32 2147483647, %v3866_v42  ;;  %v12949_v43 = vand.u32 2147483647, %v9211_v17  ;;  %v2598_v7 = vsel %vm2596_vm4, %v2597_v1, %v10506_v61  ;;  %v2736_v41 = vadd.s32 3, %v2732_v6  ;;  %v12953_v61 = vld [vmem:[#allocation8_spill] sm:$0xff] }
 0x407   : > { %6961 = vcosq.f32 %v3771_v11  ;;  %vm12952_vm5 = vcmp.lt.s32.totalorder %v10117_v45, 0  ;;  %vm6306_vm13 = vcmp.lt.s32.totalorder %v6305_v38, 0  ;;  %v2599_v2 = vadd.s32 %v2598_v7, %v2594_v13  ;;  %v10553_v46 = vpop.eup %6957  ;;  %v12955_v6 = vld [vmem:[#allocation32_spill] sm:$0xff]  ;;  %v12956_v42 = vld [vmem:[#allocation18_spill] sm:$0xff] }
 0x408   : > { %vm10538_vm6 = vcmp.le.f32.partialorder %v12949_v43, 0.7853982  ;;  %v4080_v48 = vsel %vm12952_vm5, %v4079_v30, %v4078_v10  ;;  %v3869_v59 = vcvt.s32.f32 %v3862_v31  ;;  %v2491_v15 = vadd.s32 %v10409_v24, %v10405_v14 }
 0x409   : > { %v2506_v60 = vsel %vm6306_vm13, 0, %v6305_v38  ;;  %v2522_v51 = vsel %vm12607_vm0, %v2521_v49, %v10473_v25  ;;  %v2600_v4 = vadd.s32 536870912, %v2599_v2  ;;  %vm12954_vm4 = vcmp.lt.s32.totalorder %v12953_v61, 0 }
 0x40a   : > { %v2507_v50 = vsub.s32 32, %v2506_v60  ;;  %v2511_v35 = vsub.s32 4294967266, %v2506_v60  ;;  %v2834_v36 = vsel %vm12954_vm4, %v2833_v57, %v12948_v19  ;;  %6963 = vsinq.f32 %v3771_v11  ;;  %v10558_v54 = vpop.eup %6959  ;;  %v12958_v57 = vld [vmem:[#allocation14_spill] sm:$0xff] }
 0x40b   : > { %v4083_v10 = vsel %vm10516_vm3, %v10117_v45, %v4080_v48  ;;  %v3870_v14 = vmul.f32 %v3869_v59, %v3867_v56  ;;  %v2737_v24 = vand.u32 3, %v2736_v41  ;;  %v2508_v25 = vshll.u32 %v10498_v20, %v2506_v60 }
 0x40c   : > { %v2509_v16 = vshrl.u32 %v2491_v15, %v2507_v50  ;;  %v2512_v30 = vadd.s32 127, %v2511_v35  ;;  %v2601_v44 = vshrl.u32 %v2600_v4, 30  ;;  %v2524_v9 = vsel %vm10538_vm6, 0, %v2522_v51 }
 0x40d   : > { %v2740_v31 = vxor.u32 2147483648, %v12955_v6  ;;  %v2743_v11 = vxor.u32 2147483648, %v12956_v42  ;;  %v2836_v1 = vsel %vm9591_vm2, 0, %v2834_v36  ;;  %v2937_v56 = vsub.s32 4, %v12958_v57 }
 0x40e   : > { %v2510_v38 = vor.u32 %v2509_v16, %v2508_v25  ;;  %v2513_v13 = vshll.u32 %v2512_v30, 23  ;;  %v2602_v19 = vshll.u32 %v2601_v44, 30  ;;  %6965 = vcosq.f32 %v4083_v10  ;;  %v12964_v25 = vld [vmem:[#allocation21_spill] sm:$0xff] }
 0x40f   : > { %v12959_v20 = vand.u32 2147483647, %v10199_v18  ;;  %v12960_v43 = vmov 0  ;;  %v3871_v7 = vxor.u32 2147483648, %v3870_v14  ;;  %vm2739_vm4 = vcmp.eq.s32.totalorder %v2737_v24, 0 }
 0x410   : > { %v2514_v41 = vor.u32 4788187, %v2513_v13  ;;  %v10575_v48 = vsub.s32 %v2599_v2, %v2602_v19  ;;  %vm2742_vm2 = vcmp.eq.s32.totalorder %v2737_v24, 2  ;;  %v2528_v59 = vadd.s32 3, %v2524_v9 }
 0x411   : > { %vm10570_vm13 = vcmp.le.f32.partialorder %v12959_v20, 0.7853982  ;;  %v2741_v15 = vsel %vm2739_vm4, %v12956_v42, %v2740_v31  ;;  %v2744_v60 = vsel %vm2742_vm2, %v2743_v11, %v12955_v6  ;;  %v2840_v51 = vadd.s32 3, %v2836_v1  ;;  %v10579_v50 = vpop.eup %6961  ;;  %v12969_v20 = vld [vmem:[#allocation27_spill] sm:$0xff] }
 0x412   : > { %v12961_v43 = vsel %vm10570_vm13, 4294967295, %v12960_v43  ;;  %v2515_v35 = vand.u32 2147483647, %v2514_v41  ;;  %v2517_v4 = vcvt.s32.f32 %v2510_v38  ;;  %vm10583_vm0 = vcmp.le.f32.partialorder %v2539_v28, 0.7853982 }
 0x413   : > { %v2605_v2 = vsub.s32 0, %v10575_v48  ;;  %vm12965_vm5 = vcmp.lt.s32.totalorder %v12964_v25, 0  ;;  %6967 = vsinq.f32 %v4083_v10  ;;  %vm12966_vm4 = vcmp.lt.s32.totalorder %v10199_v18, 0 }
 0x414   : > { %v2938_v16 = vsel %vm12965_vm5, %v2937_v56, %v12958_v57  ;;  %v3872_v30 = vsel %vm12966_vm4, %v3871_v7, %v3870_v14  ;;  %vm2541_vm2 = vcmp.lt.s32.totalorder %v12924_v53, 0  ;;  %vm2738_vm3 = vcmp.lt.s32.totalorder %v2737_v24, 2  ;;  %v10595_v42 = vpop.eup %6963  ;;  %v12968_v57 = vld [vmem:[#allocation37_spill] sm:$0xff] }
 0x415   : > { %v2518_v9 = vmul.f32 %v2517_v4, %v2515_v35  ;;  %v6308_v6 = vmin.u32 %v2605_v2, %v10575_v48  ;;  %v2625_v28 = vsub.s32 4, %v2601_v44  ;;  %v2745_v31 = vsel %vm2738_vm3, %v2741_v15, %v2744_v60 }
 0x416   : > { %v10597_v11 = vand.u32 3, %v2528_v59  ;;  %vm2735_vm10 = vweird.f32 %v12941_v3  ;;  %v2841_v49 = vand.u32 3, %v2840_v51  ;;  %v2940_v10 = vsel %vm9807_vm12, 0, %v2938_v16  ;;  %v12970_v3 = vld [vmem:[#allocation19_spill] sm:$0xff] }
 0x417   : > { %v3875_v14 = vsel %vm10570_vm13, %v10199_v18, %v3872_v30  ;;  %v2519_v24 = vxor.u32 2147483648, %v2518_v9  ;;  %v2595_v38 = vadd.s32 %v10505_v58, %v10491_v23  ;;  %v2607_v13 = vclz %v6308_v6 }
 0x418   : > { %v10607_v19 = vsel %vm2735_vm10, nan, %v2745_v31  ;;  %v2844_v56 = vxor.u32 2147483648, %v12968_v57  ;;  %v2847_v7 = vxor.u32 2147483648, %v12969_v20  ;;  %v3041_v41 = vsub.s32 4, %v12970_v3  ;;  %v10616_v35 = vpop.eup %6965 }
 0x419   : > { %vm12971_vm3 = vcmp.lt.s32.totalorder %v9211_v17, 0  ;;  %v6309_v15 = vadd.s32 4294967294, %v2607_v13  ;;  %v2626_v60 = vsel %vm2541_vm2, %v2625_v28, %v2601_v44  ;;  %v2944_v51 = vadd.s32 3, %v2940_v10 }
 0x41a   : > { %v2520_v59 = vsel %vm12971_vm3, %v2519_v24, %v2518_v9  ;;  %6969 = vcosq.f32 %v3875_v14  ;;  %vm2842_vm12 = vcmp.lt.s32.totalorder %v2841_v49, 2  ;;  %vm12972_vm10 = vcmp.lt.s32.totalorder %v9462_v37, 0 }
 0x41b   : > { %v2523_v23 = vsel %vm10538_vm6, %v9211_v17, %v2520_v59  ;;  %v3042_v58 = vsel %vm12972_vm10, %v3041_v41, %v12970_v3  ;;  %vm6310_vm5 = vcmp.lt.s32.totalorder %v6309_v15, 0  ;;  %vm2839_vm4 = vweird.f32 %v12953_v61  ;;  %v12974_v41 = vld [vmem:[#allocation25_spill] sm:$0xff] }
 0x41c   : > { %vm2843_vm3 = vcmp.eq.s32.totalorder %v2841_v49, 0  ;;  %vm2846_vm13 = vcmp.eq.s32.totalorder %v2841_v49, 2  ;;  %v3044_v44 = vsel %vm10045_vm7, 0, %v3042_v58  ;;  %v2610_v4 = vsel %vm6310_vm5, 0, %v6309_v15  ;;  %v12977_v59 = vld [vmem:[#allocation33_spill] sm:$0xff] }
 0x41d   : > { %v2628_v2 = vsel %vm10583_vm0, 0, %v2626_v60  ;;  %v2845_v27 = vsel %vm2843_vm3, %v12969_v20, %v2844_v56  ;;  %v2848_v16 = vsel %vm2846_vm13, %v2847_v7, %v12968_v57  ;;  %6971 = vcosq.f32 %v2523_v23  ;;  %v10631_v28 = vpop.eup %6967  ;;  %v12975_v20 = vld [vmem:[#allocation9_spill] sm:$0xff] }
 0x41e   : > { %v2611_v30 = vsub.s32 32, %v2610_v4  ;;  %v2615_v9 = vsub.s32 4294967266, %v2610_v4  ;;  %v2945_v6 = vand.u32 3, %v2944_v51  ;;  %6973 = vsinq.f32 %v2523_v23 }
 0x41f   : > { %v2948_v31 = vxor.u32 2147483648, %v10013_v47  ;;  %v3048_v1 = vadd.s32 3, %v3044_v44  ;;  %v3145_v10 = vsub.s32 4, %v12973_v52  ;;  %v2612_v24 = vshll.u32 %v10575_v48, %v2610_v4 }
 0x420   : > { %v2613_v13 = vshrl.u32 %v2595_v38, %v2611_v30  ;;  %v2616_v3 = vadd.s32 127, %v2615_v9  ;;  %v2951_v56 = vxor.u32 2147483648, %v12974_v41  ;;  %6975 = vsinq.f32 %v3875_v14  ;;  %v12979_v9 = vld [vmem:[#allocation22_spill] sm:$0xff] }
 0x421   : > { %v2849_v57 = vsel %vm2842_vm12, %v2845_v27, %v2848_v16  ;;  %vm12976_vm7 = vcmp.lt.s32.totalorder %v12975_v20, 0  ;;  %v3249_v15 = vsub.s32 4, %v12977_v59  ;;  %vm2947_vm6 = vcmp.eq.s32.totalorder %v2945_v6, 0 }
 0x422   : > { %v3146_v7 = vsel %vm12976_vm7, %v3145_v10, %v12973_v52  ;;  %v2614_v60 = vor.u32 %v2613_v13, %v2612_v24  ;;  %v2617_v51 = vshll.u32 %v2616_v3, 23  ;;  %v2632_v48 = vadd.s32 3, %v2628_v2 }
 0x423   : > { %v3148_v58 = vsel %vm9783_vm9, 0, %v3146_v7  ;;  %v2949_v38 = vsel %vm2947_vm6, %v12974_v41, %v2948_v31  ;;  %vm2950_vm13 = vcmp.eq.s32.totalorder %v2945_v6, 2  ;;  %v3049_v44 = vand.u32 3, %v3048_v1 }
 0x424   : > { %v2618_v14 = vor.u32 4788187, %v2617_v51  ;;  %v2952_v49 = vsel %vm2950_vm13, %v2951_v56, %v10013_v47  ;;  %v3052_v4 = vxor.u32 2147483648, %v10239_v39  ;;  %v3055_v27 = vxor.u32 2147483648, %v10149_v33  ;;  %v10648_v16 = vpop.eup %6969  ;;  %v12987_v47 = vld [vmem:[#allocation41_spill] sm:$0xff] }
 0x425   : > { %v10652_v30 = vsel %vm2839_vm4, nan, %v2849_v57  ;;  %vm2943_vm9 = vweird.f32 %v12964_v25  ;;  %v3152_v2 = vadd.s32 3, %v3148_v58  ;;  %vm12980_vm12 = vcmp.lt.s32.totalorder %v12979_v9, 0  ;;  %v12983_v58 = vld [vmem:[#allocation43_spill] sm:$0xff] }
 0x426   : > { %v3250_v31 = vsel %vm12980_vm12, %v3249_v15, %v12977_v59  ;;  %v2619_v1 = vand.u32 2147483647, %v2618_v14  ;;  %v2621_v52 = vcvt.s32.f32 %v2614_v60  ;;  %vm2946_vm10 = vcmp.lt.s32.totalorder %v2945_v6, 2  ;;  %v12982_v15 = vld [vmem:[#allocation40_spill] sm:$0xff]  ;;  %v12984_v14 = vld [vmem:[#allocation45_spill] sm:$0xff] }
 0x427   : > { %v3252_v10 = vsel %vm9904_vm1, 0, %v3250_v31  ;;  %vm2531_vm5 = vcmp.eq.s32.totalorder %v10597_v11, 0  ;;  %vm2534_vm3 = vcmp.eq.s32.totalorder %v10597_v11, 2  ;;  %v10662_v61 = vand.u32 3, %v2632_v48  ;;  %v6972_v13 = vpop.eup %6971 }
 0x428   : > { %v2953_v24 = vsel %vm2946_vm10, %v2949_v38, %v2952_v49  ;;  %vm3051_vm4 = vcmp.eq.s32.totalorder %v3049_v44, 0  ;;  %vm3054_vm7 = vcmp.eq.s32.totalorder %v3049_v44, 2  ;;  %v2622_v3 = vmul.f32 %v2621_v52, %v2619_v1  ;;  %v6974_v57 = vpop.eup %6973  ;;  %v12986_v1 = vld [vmem:[#allocation35_spill] sm:$0xff] }
 0x429   : > { %v4100_v41 = vpack.c.bf16 %v10652_v30, %v10607_v19  ;;  %v3053_v56 = vsel %vm3051_vm4, %v10149_v33, %v3052_v4  ;;  %v3056_v6 = vsel %vm3054_vm7, %v3055_v27, %v10239_v39  ;;  %vm3047_vm1 = vweird.f32 %v9462_v37 }
 0x42a   : > { %v3153_v7 = vand.u32 3, %v3152_v2  ;;  %v3256_v59 = vadd.s32 3, %v3252_v10  ;;  %v3353_v60 = vsub.s32 4, %v12982_v15  ;;  %v2623_v51 = vxor.u32 2147483648, %v2622_v3  ;;  %v10675_v38 = vpop.eup %6975 }
 0x42b   : > { %v10672_v23 = vsel %vm2943_vm9, nan, %v2953_v24  ;;  %vm3050_vm6 = vcmp.lt.s32.totalorder %v3049_v44, 2  ;;  %v3156_v48 = vxor.u32 2147483648, %v12983_v58  ;;  %vm2530_vm13 = vcmp.lt.s32.totalorder %v10597_v11, 2 }
 0x42c   : > { %v2535_v33 = vxor.u32 2147483648, %v6972_v13  ;;  %v3057_v39 = vsel %vm3050_vm6, %v3053_v56, %v3056_v6  ;;  %v3159_v49 = vxor.u32 2147483648, %v12984_v14  ;;  %vm12985_vm12 = vcmp.lt.s32.totalorder %v9613_v21, 0  ;;  %v12988_v56 = vld [vmem:[#allocation44_spill] sm:$0xff] }
 0x42d   : > { %v3354_v4 = vsel %vm12985_vm12, %v3353_v60, %v12982_v15  ;;  %v2532_v27 = vxor.u32 2147483648, %v6974_v57  ;;  %v2624_v25 = vsel %vm2541_vm2, %v2623_v51, %v2622_v3  ;;  %v3257_v2 = vand.u32 3, %v3256_v59  ;;  %v12989_v51 = vld [vmem:[#allocation28_spill] sm:$0xff] }
 0x42e   : > { %v3356_v44 = vsel %vm10209_vm14, 0, %v3354_v4  ;;  %v2627_v31 = vsel %vm10583_vm0, %v12924_v53, %v2624_v25  ;;  %vm3155_vm9 = vcmp.eq.s32.totalorder %v3153_v7, 0  ;;  %v3260_v52 = vxor.u32 2147483648, %v12986_v1  ;;  %v12993_v25 = vld [vmem:[#allocation30_spill] sm:$0xff] }
 0x42f   : > { %v3263_v10 = vxor.u32 2147483648, %v12987_v47  ;;  %vm2527_vm10 = vweird.f32 %v9211_v17  ;;  %6977 = vcosq.f32 %v2627_v31  ;;  %vm3154_vm4 = vcmp.lt.s32.totalorder %v3153_v7, 2 }
 0x430   : > { %v3157_v24 = vsel %vm3155_vm9, %v12984_v14, %v3156_v48  ;;  %vm3158_vm2 = vcmp.eq.s32.totalorder %v3153_v7, 2  ;;  %6979 = vsinq.f32 %v2627_v31  ;;  %v3360_v3 = vadd.s32 3, %v3356_v44 }
 0x431   : > { %v3160_v32 = vsel %vm3158_vm2, %v3159_v49, %v12983_v58  ;;  %v3457_v6 = vsub.s32 4, %v12988_v56  ;;  %v2533_v36 = vsel %vm2531_vm5, %v6972_v13, %v2532_v27  ;;  %v2536_v59 = vsel %vm2534_vm3, %v2535_v33, %v6974_v57  ;;  %v12991_v58 = vld [vmem:[#allocation39_spill] sm:$0xff] }
 0x432   : > { %vm3259_vm14 = vcmp.eq.s32.totalorder %v3257_v2, 0  ;;  %vm3262_vm0 = vcmp.eq.s32.totalorder %v3257_v2, 2  ;;  %vm12990_vm7 = vcmp.lt.s32.totalorder %v12989_v51, 0  ;;  %v3561_v14 = vsub.s32 4, %v12991_v58 }
 0x433   : > { %v3261_v15 = vsel %vm3259_vm14, %v12987_v47, %v3260_v52  ;;  %v3264_v60 = vsel %vm3262_vm0, %v3263_v10, %v12986_v1  ;;  %v3458_v48 = vsel %vm12990_vm7, %v3457_v6, %v12988_v56  ;;  %vm2638_vm6 = vcmp.eq.s32.totalorder %v10662_v61, 2  ;;  %v12996_v10 = vld [vmem:[#allocation52_spill] sm:$0xff] }
 0x434   : > { %v10708_v13 = vsel %vm3047_vm1, nan, %v3057_v39  ;;  %vm3151_vm5 = vweird.f32 %v12975_v20  ;;  %v3161_v57 = vsel %vm3154_vm4, %v3157_v24, %v3160_v32  ;;  %v3460_v49 = vsel %vm10302_vm8, 0, %v3458_v48  ;;  %v12997_v24 = vld [vmem:[#allocation51_spill] sm:$0xff] }
 0x435   : > { %vm2635_vm3 = vcmp.eq.s32.totalorder %v10662_v61, 0  ;;  %vm3258_vm12 = vcmp.lt.s32.totalorder %v3257_v2, 2  ;;  %v3361_v4 = vand.u32 3, %v3360_v3  ;;  %v3464_v27 = vadd.s32 3, %v3460_v49  ;;  %v12998_v3 = vld [vmem:[#allocation15_spill] sm:$0xff] }
 0x436   : > { %vm12994_vm9 = vcmp.lt.s32.totalorder %v12993_v25, 0  ;;  %v2537_v37 = vsel %vm2530_vm13, %v2533_v36, %v2536_v59  ;;  %vm2634_vm1 = vcmp.lt.s32.totalorder %v10662_v61, 2  ;;  %vm3255_vm2 = vweird.f32 %v12979_v9  ;;  %v12999_v20 = vld [vmem:[#allocation31_spill] sm:$0xff] }
 0x437   : > { %v3562_v44 = vsel %vm12994_vm9, %v3561_v14, %v12991_v58  ;;  %v3265_v7 = vsel %vm3258_vm12, %v3261_v15, %v3264_v60  ;;  %vm2631_vm8 = vweird.f32 %v12924_v53  ;;  %v4101_v2 = vpack.c.bf16 %v10708_v13, %v10672_v23  ;;  %v13001_v60 = vld [vmem:[#allocation12_spill] sm:$0xff]  ;;  %v13008_v53 = vld [vmem:[#allocation53_spill] sm:$0xff] }
 0x438   : > { %v3564_v31 = vsel %vm10158_vm15, 0, %v3562_v44  ;;  %v3465_v1 = vand.u32 3, %v3464_v27  ;;  %v3468_v52 = vxor.u32 2147483648, %v10509_v55  ;;  %v3471_v47 = vxor.u32 2147483648, %v10465_v29 }
 0x439   : > { %v10731_v11 = vsel %vm3151_vm5, nan, %v3161_v57  ;;  %v3364_v9 = vxor.u32 2147483648, %v12996_v10  ;;  %v3367_v32 = vxor.u32 2147483648, %v12997_v24  ;;  %v3665_v56 = vsub.s32 4, %v12998_v3  ;;  %v6978_v59 = vpop.eup %6977 }
 0x43a   : > { %v2538_v6 = vsel %vm2527_vm10, nan, %v2537_v37  ;;  %v10738_v36 = vsel %vm3255_vm2, nan, %v3265_v7  ;;  %vm3363_vm15 = vcmp.eq.s32.totalorder %v3361_v4, 0  ;;  %v3568_v23 = vadd.s32 3, %v3564_v31  ;;  %v6980_v58 = vpop.eup %6979 }
 0x43b   : > { %vm3359_vm13 = vweird.f32 %v9613_v21  ;;  %vm3467_vm4 = vcmp.eq.s32.totalorder %v3465_v1, 0  ;;  %vm3470_vm14 = vcmp.eq.s32.totalorder %v3465_v1, 2  ;;  %vm13000_vm0 = vcmp.lt.s32.totalorder %v12999_v20, 0 }
 0x43c   : > { %v3666_v15 = vsel %vm13000_vm0, %v3665_v56, %v12998_v3  ;;  %v3769_v48 = vsub.s32 4, %v13001_v60  ;;  %v2639_v14 = vxor.u32 2147483648, %v6978_v59  ;;  %vm3366_vm7 = vcmp.eq.s32.totalorder %v3361_v4, 2 }
 0x43d   : > { %v3469_v17 = vsel %vm3467_vm4, %v10465_v29, %v3468_v52  ;;  %v3472_v13 = vsel %vm3470_vm14, %v3471_v47, %v10509_v55  ;;  %v2636_v57 = vxor.u32 2147483648, %v6980_v58  ;;  %v3365_v33 = vsel %vm3363_vm15, %v12997_v24, %v3364_v9  ;;  %v13004_v47 = vld [vmem:[#allocation48_spill] sm:$0xff] }
 0x43e   : > { %v3368_v49 = vsel %vm3366_vm7, %v3367_v32, %v12996_v10  ;;  %vm3463_vm10 = vweird.f32 %v12989_v51  ;;  %v2640_v27 = vsel %vm2638_vm6, %v2639_v14, %v6980_v58  ;;  %vm3466_vm5 = vcmp.lt.s32.totalorder %v3465_v1, 2 }
 0x43f   : > { %v10752_v44 = vand.u32 3, %v3568_v23  ;;  %v3668_v7 = vsel %vm10251_vm11, 0, %v3666_v15  ;;  %v2637_v29 = vsel %vm2635_vm3, %v6978_v59, %v2636_v57  ;;  %v3473_v55 = vsel %vm3466_vm5, %v3469_v17, %v3472_v13  ;;  %v13006_v59 = vld [vmem:[#allocation47_spill] sm:$0xff]  ;;  %v13007_v15 = vld [vmem:[#allocation54_spill] sm:$0xff] }
 0x440   : > { %v3672_v39 = vadd.s32 3, %v3668_v7  ;;  %vm13003_vm12 = vcmp.lt.s32.totalorder %v10062_v26, 0  ;;  %v2641_v52 = vsel %vm2634_vm1, %v2637_v29, %v2640_v27  ;;  %vm3362_vm9 = vcmp.lt.s32.totalorder %v3361_v4, 2  ;;  %v13011_v57 = vld [vmem:[#allocation42_spill] sm:$0xff] }
 0x441   : > { %v3770_v31 = vsel %vm13003_vm12, %v3769_v48, %v13001_v60  ;;  %v3572_v1 = vxor.u32 2147483648, %v13004_v47  ;;  %vm13005_vm6 = vnez %v12935_v63  ;;  %v2642_v9 = vsel %vm2631_vm8, nan, %v2641_v52 }
 0x442   : > { %v3772_v10 = vsel %vm13005_vm6, 0, %v3770_v31  ;;  %v4102_v24 = vpack.c.bf16 %v10738_v36, %v10731_v11  ;;  %v3369_v32 = vsel %vm3362_vm9, %v3365_v33, %v3368_v49  ;;  %v4099_v56 = vpack.c.bf16 %v2642_v9, %v2538_v6  ;;  %v13012_v49 = vld [vmem:[#allocation50_spill] sm:$0xff] }
 0x443   : > { %v3776_v3 = vadd.s32 3, %v3772_v10  ;;  %v3474_v23 = vsel %vm3463_vm10, nan, %v3473_v55  ;;  %v3673_v61 = vand.u32 3, %v3672_v39  ;;  %v3873_v4 = vsub.s32 4, %v10407_v8 }
 0x444   : > { %vm3571_vm11 = vcmp.eq.s32.totalorder %v10752_v44, 0  ;;  %v3575_v63 = vxor.u32 2147483648, %v13006_v59  ;;  %v3676_v60 = vxor.u32 2147483648, %v13007_v15  ;;  %v3679_v48 = vxor.u32 2147483648, %v13008_v53  ;;  %6547 = vmatprep.mubr.bf16.mxu1 %v4099_v56 }
 0x445   : > { %v3370_v11 = vsel %vm3359_vm13, nan, %v3369_v32  ;;  %vm3570_vm3 = vcmp.lt.s32.totalorder %v10752_v44, 2  ;;  %v3573_v51 = vsel %vm3571_vm11, %v13006_v59, %v3572_v1  ;;  %vm13009_vm1 = vcmp.lt.s32.totalorder %v10199_v18, 0  ;;  %6548 = vmatmul.mubr.bf16.vlgmr.msra.gmra.mrb[0].mxu1 %v4100_v41 }
 0x446   : > { %v3874_v6 = vsel %vm13009_vm1, %v3873_v4, %v10407_v8  ;;  %v4103_v36 = vpack.c.bf16 %v3474_v23, %v3370_v11  ;;  %vm3574_vm2 = vcmp.eq.s32.totalorder %v10752_v44, 2  ;;  %vm3671_vm8 = vweird.f32 %v12999_v20  ;;  %6551 = vmatprep.mubr.bf16.mxu1 %v4101_v2 }
 0x447   : > { %v3777_v58 = vand.u32 3, %v3776_v3  ;;  %v3780_v21 = vxor.u32 2147483648, %v10595_v42  ;;  %vm3675_vm15 = vcmp.eq.s32.totalorder %v3673_v61, 0  ;;  %vm3678_vm13 = vcmp.eq.s32.totalorder %v3673_v61, 2 }
 0x448   : > { %v3783_v14 = vxor.u32 2147483648, %v10579_v50  ;;  %vm13010_vm4 = vnez %v12961_v43  ;;  %v3576_v17 = vsel %vm3574_vm2, %v3575_v63, %v13004_v47  ;;  %v3677_v19 = vsel %vm3675_vm15, %v13008_v53, %v3676_v60 }
 0x449   : > { %v3876_v8 = vsel %vm13010_vm4, 0, %v3874_v6  ;;  %v3680_v30 = vsel %vm3678_vm13, %v3679_v48, %v13007_v15  ;;  %vm3567_vm14 = vweird.f32 %v12993_v25  ;;  %vm3674_vm0 = vcmp.lt.s32.totalorder %v3673_v61, 2 }
 0x44a   : > { %v3880_v41 = vadd.s32 3, %v3876_v8  ;;  %v3884_v13 = vxor.u32 2147483648, %v10675_v38  ;;  %v3887_v2 = vxor.u32 2147483648, %v10648_v16  ;;  %v3977_v33 = vsub.s32 4, %v13011_v57 }
 0x44b   : > { %vm3779_vm7 = vcmp.eq.s32.totalorder %v3777_v58, 0  ;;  %vm3782_vm10 = vcmp.eq.s32.totalorder %v3777_v58, 2  ;;  %v4081_v27 = vsub.s32 4, %v13012_v49  ;;  %v3681_v37 = vsel %vm3674_vm0, %v3677_v19, %v3680_v30 }
 0x44c   : > { %v3881_v43 = vand.u32 3, %v3880_v41  ;;  %v3781_v7 = vsel %vm3779_vm7, %v10579_v50, %v3780_v21  ;;  %v3784_v29 = vsel %vm3782_vm10, %v3783_v14, %v10595_v42  ;;  %vm13013_vm5 = vcmp.lt.s32.totalorder %v9920_v0, 0 }
 0x44d   : > { %v3978_v55 = vsel %vm13013_vm5, %v3977_v33, %v13011_v57  ;;  %vm13014_vm11 = vnez %v12930_v22  ;;  %vm13015_vm1 = vcmp.lt.s32.totalorder %v10117_v45, 0  ;;  %6552 = vmatmul.mubr.bf16.gmra.mrb[4].mxu1 %v4102_v24  ;;  %v3577_v42 = vsel %vm3570_vm3, %v3573_v51, %v3576_v17 }
 0x44e   : > { %vm3882_vm12 = vcmp.lt.s32.totalorder %v3881_v43, 2  ;;  %vm3883_vm9 = vcmp.eq.s32.totalorder %v3881_v43, 0  ;;  %vm3886_vm6 = vcmp.eq.s32.totalorder %v3881_v43, 2  ;;  %v3980_v39 = vsel %vm13014_vm11, 0, %v3978_v55  ;;  %6555 = vmatprep.mubr.bf16.mxu1 %v4103_v36 }
 0x44f   : > { %v3885_v31 = vsel %vm3883_vm9, %v10648_v16, %v3884_v13  ;;  %v3888_v52 = vsel %vm3886_vm6, %v3887_v2, %v10675_v38  ;;  %v3984_v47 = vadd.s32 3, %v3980_v39  ;;  %v4082_v50 = vsel %vm13015_vm1, %v4081_v27, %v13012_v49 }
 0x450   : > { %vm3778_vm2 = vcmp.lt.s32.totalorder %v3777_v58, 2  ;;  %v3889_v1 = vsel %vm3882_vm12, %v3885_v31, %v3888_v52  ;;  %vm13016_vm15 = vnez %v12945_v40  ;;  %v3682_v22 = vsel %vm3671_vm8, nan, %v3681_v37 }
 0x451   : > { %v4084_v10 = vsel %vm13016_vm15, 0, %v4082_v50  ;;  %v3785_v16 = vsel %vm3778_vm2, %v3781_v7, %v3784_v29  ;;  %vm3879_vm13 = vweird.f32 %v10199_v18  ;;  %v3985_v32 = vand.u32 3, %v3984_v47 }
 0x452   : > { %v4088_v38 = vadd.s32 3, %v4084_v10  ;;  %v3890_v9 = vsel %vm3879_vm13, nan, %v3889_v1  ;;  %v4092_v24 = vxor.u32 2147483648, %v10631_v28  ;;  %v4095_v44 = vxor.u32 2147483648, %v10616_v35 }
 0x453   : > { %vm3775_vm3 = vweird.f32 %v10062_v26  ;;  %v3988_v3 = vxor.u32 2147483648, %v10558_v54  ;;  %v3991_v40 = vxor.u32 2147483648, %v10553_v46  ;;  %v3578_v20 = vsel %vm3567_vm14, nan, %v3577_v42 }
 0x454   : > { %v4089_v56 = vand.u32 3, %v4088_v38  ;;  %v3786_v23 = vsel %vm3775_vm3, nan, %v3785_v16  ;;  %v4104_v61 = vpack.c.bf16 %v3682_v22, %v3578_v20  ;;  %vm3987_vm0 = vcmp.eq.s32.totalorder %v3985_v32, 0 }
 0x455   : > { %v4105_v18 = vpack.c.bf16 %v3890_v9, %v3786_v23  ;;  %vm3990_vm7 = vcmp.eq.s32.totalorder %v3985_v32, 2  ;;  %v3989_v26 = vsel %vm3987_vm0, %v10553_v46, %v3988_v3  ;;  %vm3986_vm14 = vcmp.lt.s32.totalorder %v3985_v32, 2  ;;  %v10836_v46 = vld [vmem:[%s12412_s6] ss:$0 sm:$0xff] }
 0x456   : > { %vm4091_vm8 = vcmp.eq.s32.totalorder %v4089_v56, 0  ;;  %vm4094_vm4 = vcmp.eq.s32.totalorder %v4089_v56, 2  ;;  %v3992_v63 = vsel %vm3990_vm7, %v3991_v40, %v10558_v54  ;;  %vm4090_vm10 = vcmp.lt.s32.totalorder %v4089_v56, 2  ;;  %6556 = vmatmul.mubr.bf16.gmra.mrb[8].mxu1 %v4104_v61 }
 0x457   : > { %v4093_v4 = vsel %vm4091_vm8, %v10616_v35, %v4092_v24  ;;  %v4096_v59 = vsel %vm4094_vm4, %v4095_v44, %v10631_v28  ;;  %6559 = vmatprep.mubr.bf16.mxu1 %v4105_v18  ;;  %v3993_v25 = vsel %vm3986_vm14, %v3989_v26, %v3992_v63  ;;  %vm4087_vm5 = vweird.f32 %v10117_v45 }
 0x458   : > { %v4097_v15 = vsel %vm4090_vm10, %v4093_v4, %v4096_v59  ;;  %vm3983_vm12 = vweird.f32 %v9920_v0  ;;  %v13018_v56 = vmov 920167782   ;;  %v13019_v26 = vmov 1326507024  }
 0x459   : > { %v4098_v60 = vsel %vm4087_vm5, nan, %v4097_v15  ;;  %v3994_v53 = vsel %vm3983_vm12, nan, %v3993_v25 }
 0x45a   : > { %v4106_v48 = vpack.c.bf16 %v4098_v60, %v3994_v53 }
 0x45e   : > { %6560 = vmatmul.mubr.bf16.gmra.mrb[12].mxu1 %v4106_v48 }
 0x518   : > { %v6549_v54 = vpop.f32.mrb[0].mxu1 }
 0x519   : > { %v10839_v35 = vadd.f32 %v6549_v54, %v10836_v46  ;;  %v4228_v28 = vpop.f32.mrb[1].mxu1 }
 0x51a   : > { %v10842_v11 = vadd.f32 %v10836_v46, %v4228_v28  ;;  %v6550_v45 = vpop.f32.mrb[2].mxu1 }
 0x51b   : > { %v4499_v51 = vand.u32 2147483647, %v10839_v35  ;;  %v4502_v0 = vand.u32 2139095040, %v10839_v35  ;;  %v4231_v6 = vpop.f32.mrb[3].mxu1  ;;  %v10849_v21 = vadd.f32 %v6550_v45, %v10836_v46 }
 0x51c   : > { %v4291_v36 = vand.u32 2147483647, %v10842_v11  ;;  %v4294_v58 = vand.u32 2139095040, %v10842_v11  ;;  %v10866_v42 = vadd.f32 %v10836_v46, %v4231_v6 }
 0x51d   : > { %13017 = vst [vmem:[#allocation11_spill] sm:$0xff] %v10849_v21  ;;  %v4503_v14 = vshrl.u32 %v4502_v0, 23  ;;  %v4506_v8 = vand.u32 8388607, %v4499_v51  ;;  %v4606_v41 = vand.u32 2139095040, %v10849_v21 }
 0x51e   : > { %v4295_v17 = vshrl.u32 %v4294_v58, 23  ;;  %v4298_v19 = vand.u32 8388607, %v4291_v36  ;;  %v4603_v7 = vand.u32 2147483647, %v10849_v21 }
 0x51f   : > { %v6384_v30 = vadd.s32 4294967169, %v4503_v14  ;;  %v4607_v33 = vshrl.u32 %v4606_v41, 23  ;;  %v4507_v49 = vor.u32 8388608, %v4506_v8 }
 0x520   : > { %v6376_v13 = vadd.s32 4294967169, %v4295_v17  ;;  %v10856_v2 = vpop.f32.mrb[4].mxu1  ;;  %v4299_v27 = vor.u32 8388608, %v4298_v19  ;;  %v10874_v22 = vand.u32 8388607, %v4603_v7 }
 0x521   : > { %v4509_v57 = vadd.s32 1, %v6384_v30  ;;  %v10858_v43 = vpop.f32.mrb[5].mxu1  ;;  %v6388_v29 = vadd.s32 4294967169, %v4607_v33  ;;  %v10868_v1 = vshll.u32 %v4507_v49, 8 }
 0x522   : > { %v4301_v37 = vadd.s32 1, %v6376_v13  ;;  %v10861_v55 = vpop.f32.mrb[6].mxu1  ;;  %v10870_v10 = vshll.u32 %v4299_v27, 8 }
 0x523   : > { %vm4510_vm9 = vcmp.gt.s32.totalorder %v4509_v57, 0  ;;  %v10863_v31 = vpop.f32.mrb[7].mxu1  ;;  %v10876_v16 = vadd.s32 1, %v6388_v29 }
 0x524   : > { %v4511_v39 = vsel %vm4510_vm9, %v4509_v57, 0  ;;  %vm4302_vm6 = vcmp.gt.s32.totalorder %v4301_v37, 0 }
 0x525   : > { %v4512_v52 = vshrl.u32 %v4511_v39, 5  ;;  %v4513_v47 = vand.u32 31, %v4511_v39  ;;  %v4303_v50 = vsel %vm4302_vm6, %v4301_v37, 0  ;;  %vm4614_vm7 = vcmp.gt.s32.totalorder %v10876_v16, 0 }
 0x526   : > { %v10879_v32 = vshrl.u32 %v4303_v50, 5  ;;  %v4305_v24 = vand.u32 31, %v4303_v50 }
 0x527   : > { %v4514_v38 = vsub.s32 32, %v4513_v47  ;;  %v4516_v9 = vshll.u32 %v12686_v62, %v4513_v47  ;;  %v4519_v44 = vshll.u32 %v12693_v34, %v4513_v47  ;;  %v4522_v3 = vshll.u32 %v12694_v12, %v4513_v47 }
 0x528   : > { %v4525_v40 = vshll.u32 %v12695_v5, %v4513_v47  ;;  %v4528_v20 = vshll.u32 %v13018_v56, %v4513_v47  ;;  %vm4531_vm11 = vcmp.lt.s32.totalorder %v4512_v52, 1  ;;  %vm4532_vm1 = vcmp.lt.s32.totalorder %v4512_v52, 2 }
 0x529   : > { %v4517_v23 = vshrl.u32 %v12693_v34, %v4514_v38  ;;  %v4520_v61 = vshrl.u32 %v12694_v12, %v4514_v38  ;;  %v4523_v18 = vshrl.u32 %v12695_v5, %v4514_v38  ;;  %v4515_v4 = vshrl.u32 %v12686_v62, %v4514_v38 }
 0x52a   : > { %v4526_v59 = vshrl.u32 %v13018_v56, %v4514_v38  ;;  %v4529_v63 = vshrl.u32 %v13019_v26, %v4514_v38  ;;  %v4306_v53 = vsub.s32 32, %v4305_v24  ;;  %vm4533_vm2 = vcmp.lt.s32.totalorder %v4512_v52, 3 }
 0x52b   : > { %v4518_v15 = vor.u32 %v4517_v23, %v4516_v9  ;;  %v4521_v25 = vor.u32 %v4520_v61, %v4519_v44  ;;  %v4524_v60 = vor.u32 %v4523_v18, %v4522_v3  ;;  %vm4534_vm15 = vcmp.lt.s32.totalorder %v4512_v52, 4 }
 0x52c   : > { %v4527_v48 = vor.u32 %v4526_v59, %v4525_v40  ;;  %v4530_v54 = vor.u32 %v4529_v63, %v4528_v20  ;;  %v4308_v17 = vshll.u32 %v12686_v62, %v4305_v24  ;;  %v4309_v41 = vshrl.u32 %v12693_v34, %v4306_v53 }
 0x52d   : > { %v4535_v28 = vsel %vm4531_vm11, %v4515_v4, %v4518_v15  ;;  %v4536_v45 = vsel %vm4534_vm15, %v4524_v60, 2102212464  ;;  %v4539_v0 = vsel %vm4531_vm11, %v4518_v15, %v4521_v25  ;;  %v4543_v6 = vsel %vm4531_vm11, %v4521_v25, %v4524_v60 }
 0x52e   : > { %v4537_v58 = vsel %vm4533_vm2, %v4521_v25, %v4536_v45  ;;  %v4540_v14 = vsel %vm4534_vm15, %v4527_v48, 920167782  ;;  %v4544_v8 = vsel %vm4534_vm15, %v4530_v54, 1326507024  ;;  %v4311_v13 = vshll.u32 %v12693_v34, %v4305_v24 }
 0x52f   : > { %v4541_v19 = vsel %vm4533_vm2, %v4524_v60, %v4540_v14  ;;  %v4545_v30 = vsel %vm4533_vm2, %v4527_v48, %v4544_v8  ;;  %v4538_v57 = vsel %vm4532_vm1, %v4535_v28, %v4537_v58  ;;  %v4312_v27 = vshrl.u32 %v12694_v12, %v4306_v53 }
 0x530   : > { %v4542_v33 = vsel %vm4532_vm1, %v4539_v0, %v4541_v19  ;;  %v4546_v49 = vsel %vm4532_vm1, %v4543_v6, %v4545_v30  ;;  %v4310_v50 = vor.u32 %v4309_v41, %v4308_v17  ;;  %v4314_v9 = vshll.u32 %v12694_v12, %v4305_v24  ;;  %v10936_v19 = vpop.f32.mrb[8].mxu1 }
 0x531   : > { %v10902_v37 = vmul.u32.u64.low %v10868_v1, %v4546_v49  ;;  %v10903_v29 = vmul.u32.u64.high %v10868_v1, %v4546_v49, %v10902_v37  ;;  %v10906_v39 = vmul.u32.u64.low %v10868_v1, %v4542_v33  ;;  %v10907_v47 = vmul.u32.u64.high %v10868_v1, %v4542_v33, %v10906_v39  ;;  %v10944_v33 = vpop.f32.mrb[9].mxu1 }
 0x532   : > { %v4313_v38 = vor.u32 %v4312_v27, %v4311_v13  ;;  %v4315_v44 = vshrl.u32 %v12695_v5, %v4306_v53  ;;  %v4307_v52 = vshrl.u32 %v12686_v62, %v4306_v53  ;;  %v4317_v3 = vshll.u32 %v12695_v5, %v4305_v24 }
 0x533   : > { %v4318_v40 = vshrl.u32 %v13018_v56, %v4306_v53  ;;  %v4321_v20 = vshrl.u32 %v13019_v26, %v4306_v53  ;;  %v4554_v23 = vmul.u32 %v10868_v1, %v4538_v57  ;;  %v4320_v18 = vshll.u32 %v13018_v56, %v4305_v24 }
 0x534   : > { %v4316_v61 = vor.u32 %v4315_v44, %v4314_v9  ;;  %vm4323_vm13 = vcmp.lt.s32.totalorder %v10879_v32, 1  ;;  %vm4556_vm3 = vc.u32 %v10903_v29, %v10906_v39  ;;  %v4557_v4 = vadd.s32 1, %v10907_v47 }
 0x535   : > { %v4319_v59 = vor.u32 %v4318_v40, %v4317_v3  ;;  %vm4324_vm8 = vcmp.lt.s32.totalorder %v10879_v32, 2  ;;  %v4322_v63 = vor.u32 %v4321_v20, %v4320_v18  ;;  %vm4325_vm4 = vcmp.lt.s32.totalorder %v10879_v32, 3 }
 0x536   : > { %vm4326_vm0 = vcmp.lt.s32.totalorder %v10879_v32, 4  ;;  %v4331_v15 = vsel %vm4323_vm13, %v4310_v50, %v4313_v38  ;;  %v4558_v1 = vsel %vm4556_vm3, %v4557_v4, %v10907_v47  ;;  %v4335_v60 = vsel %vm4323_vm13, %v4313_v38, %v4316_v61 }
 0x537   : > { %v4328_v25 = vsel %vm4326_vm0, %v4316_v61, 2102212464  ;;  %v4332_v24 = vsel %vm4326_vm0, %v4319_v59, 920167782  ;;  %v4559_v53 = vadd.s32 %v4558_v1, %v4554_v23  ;;  %v4327_v48 = vsel %vm4323_vm13, %v4307_v52, %v4310_v50 }
 0x538   : > { %v4333_v54 = vsel %vm4325_vm4, %v4316_v61, %v4332_v24  ;;  %v4336_v28 = vsel %vm4326_vm0, %v4322_v63, 1326507024  ;;  %v4329_v45 = vsel %vm4325_vm4, %v4313_v38, %v4328_v25  ;;  %v4611_v13 = vor.u32 8388608, %v10874_v22 }
 0x539   : > { %v4334_v0 = vsel %vm4324_vm8, %v4331_v15, %v4333_v54  ;;  %v4337_v6 = vsel %vm4325_vm4, %v4319_v59, %v4336_v28  ;;  %v4560_v58 = vadd.s32 536870912, %v4559_v53  ;;  %v4615_v57 = vsel %vm4614_vm7, %v10876_v16, 0 }
 0x53a   : > { %v4338_v14 = vsel %vm4324_vm8, %v4335_v60, %v4337_v6  ;;  %v10932_v8 = vmul.u32.u64.low %v10870_v10, %v4334_v0  ;;  %v10933_v17 = vmul.u32.u64.high %v10870_v10, %v4334_v0, %v10932_v8  ;;  %v4330_v27 = vsel %vm4324_vm8, %v4327_v48, %v4329_v45 }
 0x53b   : > { %v10939_v30 = vmul.u32.u64.low %v10870_v10, %v4338_v14  ;;  %v10940_v41 = vmul.u32.u64.high %v10870_v10, %v4338_v14, %v10939_v30  ;;  %v10946_v49 = vshrl.u32 %v4560_v58, 30  ;;  %v4617_v37 = vand.u32 31, %v4615_v57 }
 0x53c   : > { %v4398_v47 = vand.u32 2139095040, %v10866_v42  ;;  %v4349_v38 = vadd.s32 1, %v10933_v17  ;;  %v4346_v44 = vmul.u32 %v10870_v10, %v4330_v27  ;;  %v10956_v22 = vshll.u32 %v4611_v13, 8 }
 0x53d   : > { %v4562_v50 = vshll.u32 %v10946_v49, 30  ;;  %v4618_v9 = vsub.s32 32, %v4617_v37  ;;  %vm4348_vm10 = vc.u32 %v10940_v41, %v10932_v8  ;;  %v4620_v52 = vshll.u32 %v12686_v62, %v4617_v37 }
 0x53e   : > { %v4350_v32 = vsel %vm4348_vm10, %v4349_v38, %v10933_v17  ;;  %v4399_v3 = vshrl.u32 %v4398_v47, 23  ;;  %v4623_v23 = vshll.u32 %v12693_v34, %v4617_v37  ;;  %v4616_v18 = vshrl.u32 %v4615_v57, 5 }
 0x53f   : > { %v10958_v16 = vsub.s32 %v4559_v53, %v4562_v50  ;;  %v4351_v40 = vadd.s32 %v4350_v32, %v4346_v44  ;;  %v4621_v20 = vshrl.u32 %v12693_v34, %v4618_v9  ;;  %v4624_v61 = vshrl.u32 %v12694_v12, %v4618_v9 }
 0x540   : > { %v4626_v4 = vshll.u32 %v12694_v12, %v4617_v37  ;;  %v4627_v59 = vshrl.u32 %v12695_v5, %v4618_v9  ;;  %v4555_v63 = vadd.s32 %v10906_v39, %v10903_v29  ;;  %v4629_v53 = vshll.u32 %v12695_v5, %v4617_v37 }
 0x541   : > { %v4565_v10 = vsub.s32 0, %v10958_v16  ;;  %v4352_v15 = vadd.s32 536870912, %v4351_v40  ;;  %v4622_v1 = vor.u32 %v4621_v20, %v4620_v52  ;;  %v4625_v25 = vor.u32 %v4624_v61, %v4623_v23 }
 0x542   : > { %v4628_v60 = vor.u32 %v4627_v59, %v4626_v4  ;;  %v4630_v48 = vshrl.u32 %v13018_v56, %v4618_v9  ;;  %v4632_v28 = vshll.u32 %v13018_v56, %v4617_v37  ;;  %v4633_v45 = vshrl.u32 %v13019_v26, %v4618_v9 }
 0x543   : > { %v6385_v24 = vmin.u32 %v4565_v10, %v10958_v16  ;;  %v10973_v54 = vshrl.u32 %v4352_v15, 30  ;;  %v6380_v0 = vadd.s32 4294967169, %v4399_v3  ;;  %v4619_v29 = vshrl.u32 %v12686_v62, %v4618_v9 }
 0x544   : > { %v4631_v39 = vor.u32 %v4630_v48, %v4629_v53  ;;  %vm4635_vm14 = vcmp.lt.s32.totalorder %v4616_v18, 1  ;;  %v4634_v14 = vor.u32 %v4633_v45, %v4632_v28  ;;  %vm4637_vm5 = vcmp.lt.s32.totalorder %v4616_v18, 3 }
 0x545   : > { %v4567_v6 = vclz %v6385_v24  ;;  %v4354_v58 = vshll.u32 %v10973_v54, 30  ;;  %vm4638_vm12 = vcmp.lt.s32.totalorder %v4616_v18, 4  ;;  %v4643_v13 = vsel %vm4635_vm14, %v4622_v1, %v4625_v25 }
 0x546   : > { %v4640_v30 = vsel %vm4638_vm12, %v4628_v60, 2102212464  ;;  %v4644_v57 = vsel %vm4638_vm12, %v4631_v39, 920167782  ;;  %vm4636_vm9 = vcmp.lt.s32.totalorder %v4616_v18, 2  ;;  %v4647_v47 = vsel %vm4635_vm14, %v4625_v25, %v4628_v60 }
 0x547   : > { %v6386_v17 = vadd.s32 4294967294, %v4567_v6  ;;  %v10979_v27 = vsub.s32 %v4351_v40, %v4354_v58  ;;  %v4645_v37 = vsel %vm4637_vm5, %v4628_v60, %v4644_v57  ;;  %v4639_v50 = vsel %vm4635_vm14, %v4619_v29, %v4622_v1 }
 0x548   : > { %v4641_v38 = vsel %vm4637_vm5, %v4625_v25, %v4640_v30  ;;  %v4648_v9 = vsel %vm4638_vm12, %v4634_v14, 1326507024  ;;  %v4646_v52 = vsel %vm4636_vm9, %v4643_v13, %v4645_v37  ;;  %v4405_v15 = vadd.s32 1, %v6380_v0 }
 0x549   : > { %vm6387_vm6 = vcmp.lt.s32.totalorder %v6386_v17, 0  ;;  %v4357_v32 = vsub.s32 0, %v10979_v27  ;;  %v4649_v3 = vsel %vm4637_vm5, %v4631_v39, %v4648_v9  ;;  %v4642_v45 = vsel %vm4636_vm9, %v4639_v50, %v4641_v38 }
 0x54a   : > { %v4570_v44 = vsel %vm6387_vm6, 0, %v6386_v17  ;;  %v4650_v61 = vsel %vm4636_vm9, %v4647_v47, %v4649_v3  ;;  %v10994_v24 = vmul.u32.u64.low %v10956_v22, %v4646_v52  ;;  %v10995_v60 = vmul.u32.u64.high %v10956_v22, %v4646_v52, %v10994_v24  ;;  %v11006_v17 = vpop.f32.mrb[10].mxu1 }
 0x54b   : > { %v4571_v20 = vsub.s32 32, %v4570_v44  ;;  %v4572_v40 = vshll.u32 %v10958_v16, %v4570_v44  ;;  %v4575_v23 = vsub.s32 4294967266, %v4570_v44  ;;  %v6377_v10 = vmin.u32 %v4357_v32, %v10979_v27 }
 0x54c   : > { %v10990_v4 = vmul.u32.u64.low %v10956_v22, %v4650_v61  ;;  %v10991_v59 = vmul.u32.u64.high %v10956_v22, %v4650_v61, %v10990_v4  ;;  %v12613_v16 = vand.u32 2147483647, %v10866_v42  ;;  %vm4406_vm11 = vcmp.gt.s32.totalorder %v4405_v15, 0 }
 0x54d   : > { %v4573_v1 = vshrl.u32 %v4555_v63, %v4571_v20  ;;  %v4576_v25 = vadd.s32 127, %v4575_v23  ;;  %v4359_v53 = vclz %v6377_v10  ;;  %v4407_v6 = vsel %vm4406_vm11, %v4405_v15, 0 }
 0x54e   : > { %vm4660_vm1 = vc.u32 %v10991_v59, %v10994_v24  ;;  %v4661_v0 = vadd.s32 1, %v10995_v60  ;;  %v4409_v39 = vand.u32 31, %v4407_v6  ;;  %v4658_v58 = vmul.u32 %v10956_v22, %v4642_v45 }
 0x54f   : > { %v4574_v48 = vor.u32 %v4573_v1, %v4572_v40  ;;  %v4577_v28 = vshll.u32 %v4576_v25, 23  ;;  %v6378_v29 = vadd.s32 4294967294, %v4359_v53  ;;  %v4402_v14 = vand.u32 8388607, %v12613_v16 }
 0x550   : > { %v4662_v13 = vsel %vm4660_vm1, %v4661_v0, %v10995_v60  ;;  %v4410_v57 = vsub.s32 32, %v4409_v39  ;;  %vm11011_vm15 = vcmp.le.f32.partialorder %v4499_v51, 0.7853982  ;;  %vm4501_vm13 = vcmp.lt.s32.totalorder %v10839_v35, 0 }
 0x551   : > { %v4578_v63 = vor.u32 4788187, %v4577_v28  ;;  %vm6379_vm2 = vcmp.lt.s32.totalorder %v6378_v29, 0  ;;  %v4581_v18 = vcvt.s32.f32 %v4574_v48  ;;  %v4663_v37 = vadd.s32 %v4662_v13, %v4658_v58 }
 0x552   : > { %v11016_v50 = vsel %vm6379_vm2, 0, %v6378_v29  ;;  %v4403_v9 = vor.u32 8388608, %v4402_v14  ;;  %v11020_v44 = vadd.f32 %v10856_v2, %v10836_v46  ;;  %v11024_v32 = vadd.f32 %v10836_v46, %v10858_v43 }
 0x553   : > { %v4579_v30 = vand.u32 2147483647, %v4578_v63  ;;  %v4664_v38 = vadd.s32 536870912, %v4663_v37  ;;  %v4585_v51 = vsub.s32 4, %v10946_v49  ;;  %v4413_v3 = vshrl.u32 %v12693_v34, %v4410_v57 }
 0x554   : > { %13022 = vst [vmem:[#allocation23_spill] sm:$0xff] %v11020_v44  ;;  %13023 = vst [vmem:[#allocation6_spill] sm:$0xff] %v11024_v32  ;;  %v4416_v20 = vshrl.u32 %v12694_v12, %v4410_v57  ;;  %v4367_v40 = vsub.s32 4294967266, %v11016_v50  ;;  %v4408_v61 = vshrl.u32 %v4407_v6, 5  ;;  %v4419_v10 = vshrl.u32 %v12695_v5, %v4410_v57 }
 0x555   : > { %v4582_v22 = vmul.f32 %v4581_v18, %v4579_v30  ;;  %v11030_v23 = vshrl.u32 %v4664_v38, 30  ;;  %v4412_v43 = vshll.u32 %v12686_v62, %v4409_v39  ;;  %v4415_v4 = vshll.u32 %v12693_v34, %v4409_v39 }
 0x556   : > { %v4422_v15 = vshrl.u32 %v13018_v56, %v4410_v57  ;;  %v4418_v60 = vshll.u32 %v12694_v12, %v4409_v39  ;;  %v4421_v53 = vshll.u32 %v12695_v5, %v4409_v39  ;;  %v4586_v48 = vsel %vm4501_vm13, %v4585_v51, %v10946_v49 }
 0x557   : > { %v4583_v52 = vxor.u32 2147483648, %v4582_v22  ;;  %v4666_v25 = vshll.u32 %v11030_v23, 30  ;;  %v4347_v28 = vadd.s32 %v10932_v8, %v10940_v41  ;;  %v4414_v45 = vor.u32 %v4413_v3, %v4412_v43 }
 0x558   : > { %v4417_v6 = vor.u32 %v4416_v20, %v4415_v4  ;;  %v4420_v63 = vor.u32 %v4419_v10, %v4418_v60  ;;  %v4423_v0 = vor.u32 %v4422_v15, %v4421_v53  ;;  %v4443_v58 = vshll.u32 %v4403_v9, 8 }
 0x559   : > { %v4584_v2 = vsel %vm4501_vm13, %v4583_v52, %v4582_v22  ;;  %v11051_v29 = vsub.s32 %v4663_v37, %v4666_v25  ;;  %v4368_v14 = vadd.s32 127, %v4367_v40  ;;  %v4424_v30 = vshll.u32 %v13018_v56, %v4409_v39 }
 0x55a   : > { %v11041_v1 = vsel %vm11011_vm15, %v10839_v35, %v4584_v2  ;;  %v4425_v18 = vshrl.u32 %v13019_v26, %v4410_v57  ;;  %v12612_v13 = vand.u32 2147483647, %v11020_v44  ;;  %vm4427_vm3 = vcmp.lt.s32.totalorder %v4408_v61, 1 }
 0x55b   : > { %v4669_v22 = vsub.s32 0, %v11051_v29  ;;  %vm4428_vm8 = vcmp.lt.s32.totalorder %v4408_v61, 2  ;;  %vm4429_vm4 = vcmp.lt.s32.totalorder %v4408_v61, 3  ;;  %v4363_v8 = vsub.s32 32, %v11016_v50 }
 0x55c   : > { %v4426_v41 = vor.u32 %v4425_v18, %v4424_v30  ;;  %vm4430_vm0 = vcmp.lt.s32.totalorder %v4408_v61, 4  ;;  %v4435_v49 = vsel %vm4427_vm3, %v4414_v45, %v4417_v6  ;;  %v4411_v38 = vshrl.u32 %v12686_v62, %v4410_v57 }
 0x55d   : > { %v6389_v37 = vmin.u32 %v4669_v22, %v11051_v29  ;;  %v4432_v39 = vsel %vm4430_vm0, %v4420_v63, 2102212464  ;;  %v4436_v9 = vsel %vm4430_vm0, %v4423_v0, 920167782  ;;  %v4369_v52 = vshll.u32 %v4368_v14, 23 }
 0x55e   : > { %v4437_v51 = vsel %vm4429_vm4, %v4420_v63, %v4436_v9  ;;  %v4439_v3 = vsel %vm4427_vm3, %v4417_v6, %v4420_v63  ;;  %v4440_v20 = vsel %vm4430_vm0, %v4426_v41, 1326507024  ;;  %v4431_v10 = vsel %vm4427_vm3, %v4411_v38, %v4414_v45 }
 0x55f   : > { %v4671_v40 = vclz %v6389_v37  ;;  %v4438_v2 = vsel %vm4428_vm8, %v4435_v49, %v4437_v51  ;;  %v4441_v43 = vsel %vm4429_vm4, %v4423_v0, %v4440_v20  ;;  %v4433_v4 = vsel %vm4429_vm4, %v4417_v6, %v4432_v39  ;;  %v11083_v49 = vpop.f32.mrb[11].mxu1 }
 0x560   : > { %v4442_v15 = vsel %vm4428_vm8, %v4439_v3, %v4441_v43  ;;  %v11068_v57 = vmul.u32.u64.low %v4443_v58, %v4438_v2  ;;  %v11069_v25 = vmul.u32.u64.high %v4443_v58, %v4438_v2, %v11068_v57  ;;  %v4365_v60 = vshrl.u32 %v4347_v28, %v4363_v8 }
 0x561   : > { %v6390_v53 = vadd.s32 4294967294, %v4671_v40  ;;  %v11072_v14 = vmul.u32.u64.low %v4443_v58, %v4442_v15  ;;  %v11073_v63 = vmul.u32.u64.high %v4443_v58, %v4442_v15, %v11072_v14  ;;  %v4588_v45 = vsel %vm11011_vm15, 0, %v4586_v48 }
 0x562   : > { %v4918_v30 = vand.u32 2139095040, %v11020_v44  ;;  %v4364_v0 = vshll.u32 %v10979_v27, %v11016_v50  ;;  %v4370_v6 = vor.u32 4788187, %v4369_v52  ;;  %v4434_v18 = vsel %vm4428_vm8, %v4431_v10, %v4433_v4 }
 0x563   : > { %vm6391_vm7 = vcmp.lt.s32.totalorder %v6390_v53, 0  ;;  %v4453_v41 = vadd.s32 1, %v11069_v25  ;;  %v4710_v8 = vand.u32 2139095040, %v11024_v32  ;;  %v4922_v47 = vand.u32 8388607, %v12612_v13 }
 0x564   : > { %v4674_v22 = vsel %vm6391_vm7, 0, %v6390_v53  ;;  %v4919_v28 = vshrl.u32 %v4918_v30, 23  ;;  %v4366_v37 = vor.u32 %v4365_v60, %v4364_v0  ;;  %v4450_v38 = vmul.u32 %v4443_v58, %v4434_v18 }
 0x565   : > { %v4679_v48 = vsub.s32 4294967266, %v4674_v22  ;;  %vm4452_vm10 = vc.u32 %v11073_v63, %v11068_v57  ;;  %v4592_v50 = vadd.s32 3, %v4588_v45  ;;  %v4711_v39 = vshrl.u32 %v4710_v8, 23 }
 0x566   : > { %v6400_v27 = vadd.s32 4294967169, %v4919_v28  ;;  %v4454_v61 = vsel %vm4452_vm10, %v4453_v41, %v11069_v25  ;;  %v4371_v9 = vand.u32 2147483647, %v4370_v6  ;;  %v11092_v3 = vadd.f32 %v10861_v55, %v10836_v46 }
 0x567   : > { %v4455_v52 = vadd.s32 %v4454_v61, %v4450_v38  ;;  %v4373_v20 = vcvt.s32.f32 %v4366_v37  ;;  %v4675_v40 = vsub.s32 32, %v4674_v22  ;;  %v4923_v10 = vor.u32 8388608, %v4922_v47 }
 0x568   : > { %v4925_v51 = vadd.s32 1, %v6400_v27  ;;  %13024 = vst [vmem:[#allocation20_spill] sm:$0xff] %v11092_v3  ;;  %v12611_v58 = vand.u32 2147483647, %v11024_v32  ;;  %v4680_v2 = vadd.s32 127, %v4679_v48  ;;  %v6392_v4 = vadd.s32 4294967169, %v4711_v39 }
 0x569   : > { %v4456_v43 = vadd.s32 536870912, %v4455_v52  ;;  %6981 = vcosq.f32 %v11041_v1  ;;  %v11096_v15 = vand.u32 3, %v4592_v50  ;;  %v4659_v25 = vadd.s32 %v10994_v24, %v10991_v59 }
 0x56a   : > { %vm4926_vm14 = vcmp.gt.s32.totalorder %v4925_v51, 0  ;;  %v11100_v53 = vmul.f32 %v4373_v20, %v4371_v9  ;;  %v4689_v55 = vsub.s32 4, %v11030_v23  ;;  %v4676_v30 = vshll.u32 %v11051_v29, %v4674_v22 }
 0x56b   : > { %13025 = vst [vmem:[#allocation24_spill] sm:$0xff] %v11096_v15  ;;  %v4927_v60 = vsel %vm4926_vm14, %v4925_v51, 0  ;;  %v11103_v14 = vshrl.u32 %v4456_v43, 30  ;;  %v4677_v0 = vshrl.u32 %v4659_v25, %v4675_v40  ;;  %v11106_v6 = vshll.u32 %v4923_v10, 8 }
 0x56c   : > { %v4929_v45 = vand.u32 31, %v4927_v60  ;;  %v11110_v18 = vand.u32 8388607, %v12611_v58  ;;  %v4681_v41 = vshll.u32 %v4680_v2, 23  ;;  %v4717_v28 = vadd.s32 1, %v6392_v4 }
 0x56d   : > { %v4458_v59 = vshll.u32 %v11103_v14, 30  ;;  %v4928_v8 = vshrl.u32 %v4927_v60, 5  ;;  %v4678_v51 = vor.u32 %v4677_v0, %v4676_v30  ;;  %6983 = vsinq.f32 %v11041_v1 }
 0x56e   : > { %v4930_v24 = vsub.s32 32, %v4929_v45  ;;  %v4932_v37 = vshll.u32 %v12686_v62, %v4929_v45  ;;  %v4935_v47 = vshll.u32 %v12693_v34, %v4929_v45  ;;  %v4938_v48 = vshll.u32 %v12694_v12, %v4929_v45 }
 0x56f   : > { %v11116_v29 = vsub.s32 %v4455_v52, %v4458_v59  ;;  %v4941_v27 = vshll.u32 %v12695_v5, %v4929_v45  ;;  %v4944_v39 = vshll.u32 %v13018_v56, %v4929_v45  ;;  %v4715_v4 = vor.u32 8388608, %v11110_v18 }
 0x570   : > { %v4933_v22 = vshrl.u32 %v12693_v34, %v4930_v24  ;;  %v4936_v38 = vshrl.u32 %v12694_v12, %v4930_v24  ;;  %v4939_v50 = vshrl.u32 %v12695_v5, %v4930_v24  ;;  %v4942_v61 = vshrl.u32 %v13018_v56, %v4930_v24 }
 0x571   : > { %v4945_v9 = vshrl.u32 %v13019_v26, %v4930_v24  ;;  %v4461_v20 = vsub.s32 0, %v11116_v29  ;;  %v4682_v25 = vor.u32 4788187, %v4681_v41  ;;  %vm4947_vm5 = vcmp.lt.s32.totalorder %v4928_v8, 1 }
 0x572   : > { %v4934_v40 = vor.u32 %v4933_v22, %v4932_v37  ;;  %v4937_v52 = vor.u32 %v4936_v38, %v4935_v47  ;;  %v4940_v10 = vor.u32 %v4939_v50, %v4938_v48  ;;  %v4943_v2 = vor.u32 %v4942_v61, %v4941_v27 }
 0x573   : > { %v4946_v43 = vor.u32 %v4945_v9, %v4944_v39  ;;  %v6381_v60 = vmin.u32 %v4461_v20, %v11116_v29  ;;  %vm4718_vm12 = vcmp.gt.s32.totalorder %v4717_v28, 0  ;;  %v11128_v59 = vpop.eup %6981  ;;  %v4931_v45 = vshrl.u32 %v12686_v62, %v4930_v24 }
 0x574   : > { %13026 = vst [vmem:[#allocation26_spill] sm:$0xff] %v11128_v59  ;;  %vm4948_vm9 = vcmp.lt.s32.totalorder %v4928_v8, 2  ;;  %vm4950_vm6 = vcmp.lt.s32.totalorder %v4928_v8, 4  ;;  %v4955_v30 = vsel %vm4947_vm5, %v4934_v40, %v4937_v52  ;;  %vm4949_vm11 = vcmp.lt.s32.totalorder %v4928_v8, 3 }
 0x575   : > { %v4463_v0 = vclz %v6381_v60  ;;  %v4952_v37 = vsel %vm4950_vm6, %v4940_v10, 2102212464  ;;  %v4956_v47 = vsel %vm4950_vm6, %v4943_v2, 920167782  ;;  %v4951_v48 = vsel %vm4947_vm5, %v4931_v45, %v4934_v40 }
 0x576   : > { %v4957_v22 = vsel %vm4949_vm11, %v4940_v10, %v4956_v47  ;;  %v4959_v38 = vsel %vm4947_vm5, %v4937_v52, %v4940_v10  ;;  %v4960_v18 = vsel %vm4950_vm6, %v4946_v43, 1326507024  ;;  %v4953_v27 = vsel %vm4949_vm11, %v4937_v52, %v4952_v37 }
 0x577   : > { %v6382_v41 = vadd.s32 4294967294, %v4463_v0  ;;  %v4958_v50 = vsel %vm4948_vm9, %v4955_v30, %v4957_v22  ;;  %v4961_v61 = vsel %vm4949_vm11, %v4943_v2, %v4960_v18  ;;  %v4683_v39 = vand.u32 2147483647, %v4682_v25  ;;  %v11173_v58 = vpop.eup %6983 }
 0x578   : > { %v4962_v9 = vsel %vm4948_vm9, %v4959_v38, %v4961_v61  ;;  %v11134_v24 = vmul.u32.u64.low %v11106_v6, %v4958_v50  ;;  %v11135_v20 = vmul.u32.u64.high %v11106_v6, %v4958_v50, %v11134_v24  ;;  %v4719_v10 = vsel %vm4718_vm12, %v4717_v28, 0  ;;  %13028 = vst [vmem:[#allocation5_spill] sm:$0xff] %v11173_v58 }
 0x579   : > { %vm6383_vm1 = vcmp.lt.s32.totalorder %v6382_v41, 0  ;;  %v11139_v60 = vmul.u32.u64.low %v11106_v6, %v4962_v9  ;;  %v11140_v40 = vmul.u32.u64.high %v11106_v6, %v4962_v9, %v11139_v60  ;;  %v4954_v2 = vsel %vm4948_vm9, %v4951_v48, %v4953_v27 }
 0x57a   : > { %v4466_v52 = vsel %vm6383_vm1, 0, %v6382_v41  ;;  %v4721_v43 = vand.u32 31, %v4719_v10  ;;  %v4375_v25 = vxor.u32 2147483648, %v11100_v53  ;;  %v4685_v45 = vcvt.s32.f32 %v4678_v51 }
 0x57b   : > { %v4451_v30 = vadd.s32 %v11068_v57, %v11073_v63  ;;  %v4471_v0 = vsub.s32 4294967266, %v4466_v52  ;;  %v4973_v37 = vadd.s32 1, %v11135_v20  ;;  %v11149_v22 = vshll.u32 %v4715_v4, 8 }
 0x57c   : > { %v4722_v47 = vsub.s32 32, %v4721_v43  ;;  %v12615_v28 = vand.u32 2147483647, %v11092_v3  ;;  %v11152_v38 = vmul.f32 %v4685_v45, %v4683_v39  ;;  %v4970_v1 = vmul.u32 %v11106_v6, %v4954_v2 }
 0x57d   : > { %vm4972_vm2 = vc.u32 %v11140_v40, %v11134_v24  ;;  %v5022_v8 = vand.u32 2139095040, %v11092_v3  ;;  %v4724_v57 = vshll.u32 %v12686_v62, %v4721_v43  ;;  %v4472_v48 = vadd.s32 127, %v4471_v0 }
 0x57e   : > { %v4974_v51 = vsel %vm4972_vm2, %v4973_v37, %v11135_v20  ;;  %v4725_v63 = vshrl.u32 %v12693_v34, %v4722_v47  ;;  %v4728_v4 = vshrl.u32 %v12694_v12, %v4722_v47  ;;  %v4720_v41 = vshrl.u32 %v4719_v10, 5 }
 0x57f   : > { %v4975_v18 = vadd.s32 %v4974_v51, %v4970_v1  ;;  %v4727_v27 = vshll.u32 %v12693_v34, %v4721_v43  ;;  %v4467_v50 = vsub.s32 32, %v4466_v52  ;;  %v4730_v61 = vshll.u32 %v12694_v12, %v4721_v43 }
 0x580   : > { %v4726_v6 = vor.u32 %v4725_v63, %v4724_v57  ;;  %v4731_v39 = vshrl.u32 %v12695_v5, %v4722_v47  ;;  %v4733_v20 = vshll.u32 %v12695_v5, %v4721_v43  ;;  %v4734_v2 = vshrl.u32 %v13018_v56, %v4722_v47 }
 0x581   : > { %v4976_v9 = vadd.s32 536870912, %v4975_v18  ;;  %v4729_v60 = vor.u32 %v4728_v4, %v4727_v27  ;;  %v4736_v37 = vshll.u32 %v13018_v56, %v4721_v43  ;;  %v4737_v0 = vshrl.u32 %v13019_v26, %v4722_v47 }
 0x582   : > { %v4732_v45 = vor.u32 %v4731_v39, %v4730_v61  ;;  %v5023_v10 = vshrl.u32 %v5022_v8, 23  ;;  %vm4605_vm15 = vcmp.lt.s32.totalorder %v10849_v21, 0  ;;  %v4468_v1 = vshll.u32 %v11116_v29, %v4466_v52 }
 0x583   : > { %v4473_v51 = vshll.u32 %v4472_v48, 23  ;;  %v11171_v57 = vshrl.u32 %v4976_v9, 30  ;;  %v4735_v63 = vor.u32 %v4734_v2, %v4733_v20  ;;  %vm12657_vm13 = vcmp.lt.s32.totalorder %v10842_v11, 0 }
 0x584   : > { %v4469_v4 = vshrl.u32 %v4451_v30, %v4467_v50  ;;  %v4723_v27 = vshrl.u32 %v12686_v62, %v4722_v47  ;;  %v4738_v61 = vor.u32 %v4737_v0, %v4736_v37  ;;  %vm4739_vm3 = vcmp.lt.s32.totalorder %v4720_v41, 1 }
 0x585   : > { %13027 = vst [vmem:[#allocation17_spill] sm:$0xff] %v11171_v57  ;;  %v4978_v43 = vshll.u32 %v11171_v57, 30  ;;  %vm4741_vm8 = vcmp.lt.s32.totalorder %v4720_v41, 3  ;;  %vm4742_vm4 = vcmp.lt.s32.totalorder %v4720_v41, 4  ;;  %v4747_v8 = vsel %vm4739_vm3, %v4726_v6, %v4729_v60 }
 0x586   : > { %v4744_v29 = vsel %vm4742_vm4, %v4732_v45, 2102212464  ;;  %v4748_v52 = vsel %vm4742_vm4, %v4735_v63, 920167782  ;;  %v4751_v48 = vsel %vm4739_vm3, %v4729_v60, %v4732_v45  ;;  %v4752_v39 = vsel %vm4742_vm4, %v4738_v61, 1326507024 }
 0x587   : > { %v4474_v9 = vor.u32 4788187, %v4473_v51  ;;  %v11180_v20 = vsub.s32 %v4975_v18, %v4978_v43  ;;  %vm4740_vm0 = vcmp.lt.s32.totalorder %v4720_v41, 2  ;;  %v4749_v30 = vsel %vm4741_vm8, %v4732_v45, %v4748_v52 }
 0x588   : > { %v4470_v47 = vor.u32 %v4469_v4, %v4468_v1  ;;  %v4750_v50 = vsel %vm4740_vm0, %v4747_v8, %v4749_v30  ;;  %v4753_v2 = vsel %vm4741_vm8, %v4735_v63, %v4752_v39  ;;  %v6404_v37 = vadd.s32 4294967169, %v5023_v10  ;;  %v11210_v8 = vpop.f32.mrb[12].mxu1 }
 0x589   : > { %v4981_v0 = vsub.s32 0, %v11180_v20  ;;  %v4743_v13 = vsel %vm4739_vm3, %v4723_v27, %v4726_v6  ;;  %v4745_v16 = vsel %vm4741_vm8, %v4729_v60, %v4744_v29  ;;  %v4754_v61 = vsel %vm4740_vm0, %v4751_v48, %v4753_v2 }
 0x58a   : > { %v4687_v18 = vxor.u32 2147483648, %v11152_v38  ;;  %v11191_v51 = vmul.u32.u64.low %v11149_v22, %v4754_v61  ;;  %v11192_v43 = vmul.u32.u64.high %v11149_v22, %v4754_v61, %v11191_v51  ;;  %v5029_v45 = vadd.s32 1, %v6404_v37 }
 0x58b   : > { %v4475_v1 = vand.u32 2147483647, %v4474_v9  ;;  %v6401_v4 = vmin.u32 %v4981_v0, %v11180_v20  ;;  %v11196_v10 = vmul.u32.u64.low %v11149_v22, %v4750_v50  ;;  %v11197_v63 = vmul.u32.u64.high %v11149_v22, %v4750_v50, %v11196_v10 }
 0x58c   : > { %v11205_v6 = vsel %vm4605_vm15, %v4689_v55, %v11030_v23  ;;  %v4746_v60 = vsel %vm4740_vm0, %v4743_v13, %v4745_v16  ;;  %v5026_v27 = vand.u32 8388607, %v12615_v28  ;;  %vm5030_vm7 = vcmp.gt.s32.totalorder %v5029_v45, 0  ;;  %v11219_v23 = vpop.f32.mrb[13].mxu1 }
 0x58d   : > { %v11217_v29 = vsel %vm12657_vm13, %v4375_v25, %v11100_v53  ;;  %v4477_v52 = vcvt.s32.f32 %v4470_v47  ;;  %v4983_v48 = vclz %v6401_v4  ;;  %v5031_v39 = vsel %vm5030_vm7, %v5029_v45, 0 }
 0x58e   : > { %v11224_v16 = vsel %vm4605_vm15, %v4687_v18, %v11152_v38  ;;  %v4971_v13 = vadd.s32 %v11134_v24, %v11140_v40  ;;  %vm4764_vm10 = vc.u32 %v11192_v43, %v11196_v10  ;;  %v5033_v55 = vand.u32 31, %v5031_v39 }
 0x58f   : > { %v11230_v41 = vmul.f32 %v4477_v52, %v4475_v1  ;;  %v6402_v53 = vadd.s32 4294967294, %v4983_v48  ;;  %v4762_v25 = vmul.u32 %v11149_v22, %v4746_v60  ;;  %v4765_v9 = vadd.s32 1, %v11197_v63 }
 0x590   : > { %v5027_v30 = vor.u32 8388608, %v5026_v27  ;;  %v11234_v47 = vshrl.u32 %v5031_v39, 5  ;;  %v5034_v50 = vsub.s32 32, %v5033_v55  ;;  %v5036_v38 = vshll.u32 %v12686_v62, %v5033_v55 }
 0x591   : > { %vm6403_vm14 = vcmp.lt.s32.totalorder %v6402_v53, 0  ;;  %v4766_v24 = vsel %vm4764_vm10, %v4765_v9, %v11197_v63  ;;  %v5039_v40 = vshll.u32 %v12693_v34, %v5033_v55  ;;  %v5042_v2 = vshll.u32 %v12694_v12, %v5033_v55 }
 0x592   : > { %v4986_v37 = vsel %vm6403_vm14, 0, %v6402_v53  ;;  %v4767_v0 = vadd.s32 %v4766_v24, %v4762_v25  ;;  %v5037_v61 = vshrl.u32 %v12693_v34, %v5034_v50  ;;  %v5045_v22 = vshll.u32 %v12695_v5, %v5033_v55 }
 0x593   : > { %v4987_v18 = vsub.s32 32, %v4986_v37  ;;  %v4991_v51 = vsub.s32 4294967266, %v4986_v37  ;;  %v5040_v45 = vshrl.u32 %v12694_v12, %v5034_v50  ;;  %v5048_v1 = vshll.u32 %v13018_v56, %v5033_v55 }
 0x594   : > { %v4768_v4 = vadd.s32 536870912, %v4767_v0  ;;  %v5038_v60 = vor.u32 %v5037_v61, %v5036_v38  ;;  %v5043_v63 = vshrl.u32 %v12695_v5, %v5034_v50  ;;  %v5046_v27 = vshrl.u32 %v13018_v56, %v5034_v50 }
 0x595   : > { %v4989_v52 = vshrl.u32 %v4971_v13, %v4987_v18  ;;  %v4992_v48 = vadd.s32 127, %v4991_v51  ;;  %v5041_v39 = vor.u32 %v5040_v45, %v5039_v40  ;;  %v5049_v53 = vshrl.u32 %v13019_v26, %v5034_v50 }
 0x596   : > { %vm11249_vm5 = vcmp.le.f32.partialorder %v4603_v7, 0.7853982  ;;  %v11253_v9 = vshrl.u32 %v4768_v4, 30  ;;  %v5044_v55 = vor.u32 %v5043_v63, %v5042_v2  ;;  %v5047_v24 = vor.u32 %v5046_v27, %v5045_v22 }
 0x597   : > { %v11255_v38 = vshll.u32 %v5027_v30, 8  ;;  %vm11259_vm12 = vcmp.le.f32.partialorder %v4291_v36, 0.7853982  ;;  %v4988_v40 = vshll.u32 %v11180_v20, %v4986_v37  ;;  %v4993_v61 = vshll.u32 %v4992_v48, 23 }
 0x598   : > { %13031 = vst [vmem:[#allocation4_spill] sm:$0xff] %v11253_v9  ;;  %v5050_v18 = vor.u32 %v5049_v53, %v5048_v1  ;;  %v11266_v7 = vadd.f32 %v10836_v46, %v10863_v31  ;;  %vm12656_vm9 = vcmp.lt.s32.totalorder %v10866_v42, 0  ;;  %v4770_v2 = vshll.u32 %v11253_v9, 30 }
 0x599   : > { %v5035_v30 = vshrl.u32 %v12686_v62, %v5034_v50  ;;  %vm5051_vm6 = vcmp.lt.s32.totalorder %v11234_v47, 1  ;;  %vm5054_vm11 = vcmp.lt.s32.totalorder %v11234_v47, 4  ;;  %v4990_v36 = vor.u32 %v4989_v52, %v4988_v40 }
 0x59a   : > { %vm5053_vm1 = vcmp.lt.s32.totalorder %v11234_v47, 3  ;;  %v5056_v20 = vsel %vm5054_vm11, %v5044_v55, 2102212464  ;;  %v5059_v37 = vsel %vm5051_vm6, %v5038_v60, %v5041_v39  ;;  %v4994_v22 = vor.u32 4788187, %v4993_v61 }
 0x59b   : > { %v11274_v51 = vsub.s32 %v4767_v0, %v4770_v2  ;;  %v5060_v46 = vsel %vm5054_vm11, %v5047_v24, 920167782  ;;  %v5063_v31 = vsel %vm5051_vm6, %v5041_v39, %v5044_v55  ;;  %vm5052_vm2 = vcmp.lt.s32.totalorder %v11234_v47, 2 }
 0x59c   : > { %v5055_v45 = vsel %vm5051_vm6, %v5035_v30, %v5038_v60  ;;  %v5061_v1 = vsel %vm5053_vm1, %v5044_v55, %v5060_v46  ;;  %v5064_v4 = vsel %vm5054_vm11, %v5050_v18, 1326507024  ;;  %v13034_v50 = vand.u32 2147483647, %v10866_v42 }
 0x59d   : > { %v4773_v27 = vsub.s32 0, %v11274_v51  ;;  %v5057_v52 = vsel %vm5053_vm1, %v5041_v39, %v5056_v20  ;;  %v5062_v0 = vsel %vm5052_vm2, %v5059_v37, %v5061_v1  ;;  %v5065_v48 = vsel %vm5053_vm1, %v5047_v24, %v5064_v4  ;;  %v11308_v37 = vld [vmem:[%s12412_s6] ss:$0 sm:$0xff] }
 0x59e   : > { %vm11279_vm15 = vcmp.le.f32.partialorder %v13034_v50, 0.7853982  ;;  %v4479_v53 = vxor.u32 2147483648, %v11230_v41  ;;  %v5066_v60 = vsel %vm5052_vm2, %v5063_v31, %v5065_v48  ;;  %v4995_v61 = vand.u32 2147483647, %v4994_v22 }
 0x59f   : > { %v11290_v55 = vmul.u32.u64.low %v11255_v38, %v5062_v0  ;;  %v11291_v40 = vmul.u32.u64.high %v11255_v38, %v5062_v0, %v11290_v55  ;;  %v6393_v18 = vmin.u32 %v4773_v27, %v11274_v51  ;;  %v4692_v24 = vsel %vm11249_vm5, 0, %v11205_v6 }
 0x5a0   : > { %v11296_v2 = vmul.u32.u64.low %v11255_v38, %v5066_v60  ;;  %v11297_v39 = vmul.u32.u64.high %v11255_v38, %v5066_v60, %v11296_v2  ;;  %v5058_v30 = vsel %vm5052_vm2, %v5055_v45, %v5057_v52  ;;  %v4814_v20 = vand.u32 2139095040, %v11266_v7 }
 0x5a1   : > { %v11312_v22 = vadd.f32 %v11308_v37, %v10936_v19  ;;  %v4379_v46 = vsel %vm11259_vm12, %v10842_v11, %v11217_v29  ;;  %v4691_v6 = vsel %vm11249_vm5, %v10849_v21, %v11224_v16  ;;  %v4997_v47 = vcvt.s32.f32 %v4990_v36  ;;  %v11331_v16 = vpop.f32.mrb[14].mxu1 }
 0x5a2   : > { %v4775_v31 = vclz %v6393_v18  ;;  %v4480_v45 = vsel %vm12656_vm9, %v4479_v53, %v11230_v41  ;;  %vm12647_vm3 = vcmp.lt.s32.totalorder %v11020_v44, 0  ;;  %v5077_v19 = vadd.s32 1, %v11291_v40 }
 0x5a3   : > { %13037 = vst [vmem:[#allocation16_spill] sm:$0xff] %v11312_v22  ;;  %v12614_v1 = vand.u32 2147483647, %v11266_v7  ;;  %v4815_v4 = vshrl.u32 %v4814_v20, 23  ;;  %v4998_v50 = vmul.f32 %v4997_v47, %v4995_v61  ;;  %v5074_v27 = vmul.u32 %v11255_v38, %v5058_v30 }
 0x5a4   : > { %v6394_v29 = vadd.s32 4294967294, %v4775_v31  ;;  %vm5076_vm8 = vc.u32 %v11297_v39, %v11290_v55  ;;  %6985 = vcosq.f32 %v4379_v46  ;;  %v5334_v36 = vand.u32 2139095040, %v11312_v22 }
 0x5a5   : > { %v5078_v25 = vsel %vm5076_vm8, %v5077_v19, %v11291_v40  ;;  %v6396_v41 = vadd.s32 4294967169, %v4815_v4  ;;  %6987 = vsinq.f32 %v4379_v46  ;;  %v11335_v52 = vadd.s32 3, %v4692_v24 }
 0x5a6   : > { %vm6395_vm4 = vcmp.lt.s32.totalorder %v6394_v29, 0  ;;  %v5079_v0 = vadd.s32 %v5078_v25, %v5074_v27  ;;  %6989 = vcosq.f32 %v4691_v6  ;;  %v11340_v38 = vsel %vm11279_vm15, %v10866_v42, %v4480_v45 }
 0x5a7   : > { %v4778_v48 = vsel %vm6395_vm4, 0, %v6394_v29  ;;  %v4821_v53 = vadd.s32 1, %v6396_v41  ;;  %v4999_v60 = vxor.u32 2147483648, %v4998_v50  ;;  %v4818_v40 = vand.u32 8388607, %v12614_v1 }
 0x5a8   : > { %v4783_v61 = vsub.s32 4294967266, %v4778_v48  ;;  %v5080_v18 = vadd.s32 536870912, %v5079_v0  ;;  %6991 = vsinq.f32 %v4691_v6  ;;  %v4779_v2 = vsub.s32 32, %v4778_v48 }
 0x5a9   : > { %vm4822_vm0 = vcmp.gt.s32.totalorder %v4821_v53, 0  ;;  %v5335_v24 = vshrl.u32 %v5334_v36, 23  ;;  %6993 = vcosq.f32 %v11340_v38  ;;  %v4763_v47 = vadd.s32 %v11196_v10, %v11192_v43 }
 0x5aa   : > { %v4784_v30 = vadd.s32 127, %v4783_v61  ;;  %v11345_v20 = vshrl.u32 %v5080_v18, 30  ;;  %v4823_v46 = vsel %vm4822_vm0, %v4821_v53, 0  ;;  %v11352_v19 = vadd.f32 %v11308_v37, %v10944_v33 }
 0x5ab   : > { %v4825_v31 = vand.u32 31, %v4823_v46  ;;  %v11356_v6 = vsel %vm12647_vm3, %v4999_v60, %v4998_v50  ;;  %v4819_v27 = vor.u32 8388608, %v4818_v40  ;;  %v4780_v25 = vshll.u32 %v11274_v51, %v4778_v48 }
 0x5ac   : > { %13038 = vst [vmem:[#allocation10_spill] sm:$0xff] %v11345_v20  ;;  %v4785_v4 = vshll.u32 %v4784_v30, 23  ;;  %v5082_v29 = vshll.u32 %v11345_v20, 30  ;;  %v4781_v41 = vshrl.u32 %v4763_v47, %v4779_v2  ;;  %v6416_v43 = vadd.s32 4294967169, %v5335_v24 }
 0x5ad   : > { %v4826_v36 = vsub.s32 32, %v4825_v31  ;;  %v11362_v53 = vshrl.u32 %v4823_v46, 5  ;;  %v4828_v33 = vshll.u32 %v12686_v62, %v4825_v31  ;;  %v4831_v61 = vshll.u32 %v12693_v34, %v4825_v31 }
 0x5ae   : > { %v11360_v10 = vsub.s32 %v5079_v0, %v5082_v29  ;;  %v11366_v18 = vpop.eup %6985  ;;  %v4834_v40 = vshll.u32 %v12694_v12, %v4825_v31  ;;  %v4786_v0 = vor.u32 4788187, %v4785_v4  ;;  %v4837_v24 = vshll.u32 %v12695_v5, %v4825_v31 }
 0x5af   : > { %v4829_v50 = vshrl.u32 %v12693_v34, %v4826_v36  ;;  %v4832_v60 = vshrl.u32 %v12694_v12, %v4826_v36  ;;  %v4835_v51 = vshrl.u32 %v12695_v5, %v4826_v36  ;;  %v11372_v48 = vpop.eup %6987  ;;  %v4838_v30 = vshrl.u32 %v13018_v56, %v4826_v36 }
 0x5b0   : > { %v5085_v2 = vsub.s32 0, %v11360_v10  ;;  %v11377_v46 = vpop.eup %6989  ;;  %v4840_v1 = vshll.u32 %v13018_v56, %v4825_v31  ;;  %v4841_v28 = vshrl.u32 %v13019_v26, %v4826_v36  ;;  %v11382_v9 = vshll.u32 %v4819_v27, 8 }
 0x5b1   : > { %13039 = vst [vmem:[#allocation8_spill] sm:$0xff] %v11377_v46  ;;  %v4830_v47 = vor.u32 %v4829_v50, %v4828_v33  ;;  %v4833_v29 = vor.u32 %v4832_v60, %v4831_v61  ;;  %v4836_v20 = vor.u32 %v4835_v51, %v4834_v40  ;;  %v4839_v57 = vor.u32 %v4838_v30, %v4837_v24 }
 0x5b2   : > { %v6405_v45 = vmin.u32 %v5085_v2, %v11360_v10  ;;  %v11384_v4 = vpop.eup %6991  ;;  %v4782_v21 = vor.u32 %v4781_v41, %v4780_v25  ;;  %v4842_v59 = vor.u32 %v4841_v28, %v4840_v1  ;;  %v13040_v58 = vand.u32 2147483647, %v11312_v22 }
 0x5b3   : > { %v5341_v33 = vadd.s32 1, %v6416_v43  ;;  %v11390_v61 = vpop.eup %6993  ;;  %v13041_v31 = vand.u32 2147483647, %v11020_v44  ;;  %v13042_v50 = vmov 0  ;;  %v4827_v27 = vshrl.u32 %v12686_v62, %v4826_v36 }
 0x5b4   : > { %v11388_v15 = vand.u32 8388607, %v13040_v58  ;;  %v5087_v60 = vclz %v6405_v45  ;;  %vm4843_vm10 = vcmp.lt.s32.totalorder %v11362_v53, 1  ;;  %vm4846_vm14 = vcmp.lt.s32.totalorder %v11362_v53, 4 }
 0x5b5   : > { %vm11394_vm7 = vcmp.le.f32.partialorder %v13041_v31, 0.7853982  ;;  %v4787_v28 = vand.u32 2147483647, %v4786_v0  ;;  %vm4845_vm5 = vcmp.lt.s32.totalorder %v11362_v53, 3  ;;  %v4851_v58 = vsel %vm4843_vm10, %v4830_v47, %v4833_v29  ;;  %v11413_v31 = vpop.f32.mrb[15].mxu1 }
 0x5b6   : > { %v13043_v50 = vsel %vm11394_vm7, 4294967295, %v13042_v50  ;;  %v4852_v1 = vsel %vm4846_vm14, %v4839_v57, 920167782  ;;  %v6406_v25 = vadd.s32 4294967294, %v5087_v60  ;;  %v4848_v41 = vsel %vm4846_vm14, %v4836_v20, 2102212464 }
 0x5b7   : > { %13044 = vst [vmem:[#allocation32_spill] sm:$0xff] %v13043_v50  ;;  %v4853_v43 = vsel %vm4845_vm5, %v4836_v20, %v4852_v1  ;;  %v4855_v40 = vsel %vm4843_vm10, %v4833_v29, %v4836_v20  ;;  %v4789_v51 = vcvt.s32.f32 %v4782_v21  ;;  %vm4844_vm6 = vcmp.lt.s32.totalorder %v11362_v53, 2 }
 0x5b8   : > { %v4847_v45 = vsel %vm4843_vm10, %v4827_v27, %v4830_v47  ;;  %v4856_v36 = vsel %vm4846_vm14, %v4842_v59, 1326507024  ;;  %vm6407_vm11 = vcmp.lt.s32.totalorder %v6406_v25, 0  ;;  %v4854_v2 = vsel %vm4844_vm6, %v4851_v58, %v4853_v43 }
 0x5b9   : > { %v4857_v0 = vsel %vm4845_vm5, %v4839_v57, %v4856_v36  ;;  %vm5342_vm1 = vcmp.gt.s32.totalorder %v5341_v33, 0  ;;  %v5090_v24 = vsel %vm6407_vm11, 0, %v6406_v25  ;;  %v4849_v30 = vsel %vm4845_vm5, %v4833_v29, %v4848_v41 }
 0x5ba   : > { %v4858_v20 = vsel %vm4844_vm6, %v4855_v40, %v4857_v0  ;;  %v5343_v21 = vsel %vm5342_vm1, %v5341_v33, 0  ;;  %v4790_v47 = vmul.f32 %v4789_v51, %v4787_v28  ;;  %v5075_v59 = vadd.s32 %v11290_v55, %v11297_v39 }
 0x5bb   : > { %v5091_v60 = vsub.s32 32, %v5090_v24  ;;  %v5095_v27 = vsub.s32 4294967266, %v5090_v24  ;;  %v11418_v58 = vmul.u32.u64.low %v11382_v9, %v4858_v20  ;;  %v11419_v57 = vmul.u32.u64.high %v11382_v9, %v4858_v20, %v11418_v58 }
 0x5bc   : > { %v11422_v1 = vmul.u32.u64.low %v11382_v9, %v4854_v2  ;;  %v11423_v25 = vmul.u32.u64.high %v11382_v9, %v4854_v2, %v11422_v1  ;;  %v4850_v33 = vsel %vm4844_vm6, %v4847_v45, %v4849_v30  ;;  %v5345_v28 = vand.u32 31, %v5343_v21 }
 0x5bd   : > { %v5093_v29 = vshrl.u32 %v5075_v59, %v5091_v60  ;;  %v5096_v41 = vadd.s32 127, %v5095_v27  ;;  %v11432_v55 = vsel %vm11394_vm7, %v11020_v44, %v11356_v6  ;;  %v5092_v39 = vshll.u32 %v11360_v10, %v5090_v24 }
 0x5be   : > { %v5339_v43 = vor.u32 8388608, %v11388_v15  ;;  %v4791_v51 = vxor.u32 2147483648, %v4790_v47  ;;  %v11437_v2 = vshrl.u32 %v5343_v21, 5  ;;  %v5346_v0 = vsub.s32 32, %v5345_v28 }
 0x5bf   : > { %v5097_v36 = vshll.u32 %v5096_v41, 23  ;;  %v5094_v53 = vor.u32 %v5093_v29, %v5092_v39  ;;  %v4866_v45 = vmul.u32 %v11382_v9, %v4850_v33  ;;  %vm4868_vm2 = vc.u32 %v11419_v57, %v11422_v1 }
 0x5c0   : > { %v4869_v6 = vadd.s32 1, %v11423_v25  ;;  %vm12655_vm8 = vcmp.lt.s32.totalorder %v11024_v32, 0  ;;  %v5348_v15 = vshll.u32 %v12686_v62, %v5345_v28  ;;  %v5349_v24 = vshrl.u32 %v12693_v34, %v5346_v0 }
 0x5c1   : > { %v5098_v10 = vor.u32 4788187, %v5097_v36  ;;  %v5351_v30 = vshll.u32 %v12693_v34, %v5345_v28  ;;  %v5352_v21 = vshrl.u32 %v12694_v12, %v5346_v0  ;;  %v5354_v9 = vshll.u32 %v12694_v12, %v5345_v28 }
 0x5c2   : > { %v4870_v20 = vsel %vm4868_vm2, %v4869_v6, %v11423_v25  ;;  %v5355_v59 = vshrl.u32 %v12695_v5, %v5346_v0  ;;  %v5350_v58 = vor.u32 %v5349_v24, %v5348_v15  ;;  %vm5363_vm4 = vcmp.lt.s32.totalorder %v11437_v2, 1 }
 0x5c3   : > { %v5099_v60 = vand.u32 2147483647, %v5098_v10  ;;  %v4871_v27 = vadd.s32 %v4870_v20, %v4866_v45  ;;  %v5353_v29 = vor.u32 %v5352_v21, %v5351_v30  ;;  %v5357_v33 = vshll.u32 %v12695_v5, %v5345_v28 }
 0x5c4   : > { %v5356_v41 = vor.u32 %v5355_v59, %v5354_v9  ;;  %v5358_v39 = vshrl.u32 %v13018_v56, %v5346_v0  ;;  %v5360_v25 = vshll.u32 %v13018_v56, %v5345_v28  ;;  %v5361_v6 = vshrl.u32 %v13019_v26, %v5346_v0 }
 0x5c5   : > { %v4872_v36 = vadd.s32 536870912, %v4871_v27  ;;  %vm5364_vm0 = vcmp.lt.s32.totalorder %v11437_v2, 2  ;;  %v5101_v40 = vcvt.s32.f32 %v5094_v53  ;;  %vm5365_vm10 = vcmp.lt.s32.totalorder %v11437_v2, 3 }
 0x5c6   : > { %v5359_v50 = vor.u32 %v5358_v39, %v5357_v33  ;;  %vm5366_vm14 = vcmp.lt.s32.totalorder %v11437_v2, 4  ;;  %v5347_v10 = vshrl.u32 %v12686_v62, %v5346_v0  ;;  %v5362_v15 = vor.u32 %v5361_v6, %v5360_v25 }
 0x5c7   : > { %v11459_v45 = vshrl.u32 %v4872_v36, 30  ;;  %v5371_v24 = vsel %vm5363_vm4, %v5350_v58, %v5353_v29  ;;  %v5102_v30 = vmul.f32 %v5101_v40, %v5099_v60  ;;  %v5375_v20 = vsel %vm5363_vm4, %v5353_v29, %v5356_v41  ;;  %v6845_v36 = vld [vmem:[%s12413_s7] sm:$0xff]  }
 0x5c8   : > { %v5372_v28 = vsel %vm5366_vm14, %v5359_v50, 920167782  ;;  %v5126_v53 = vand.u32 2139095040, %v11352_v19  ;;  %v5368_v9 = vsel %vm5366_vm14, %v5356_v41, 2102212464  ;;  %v4792_v0 = vsel %vm12655_vm8, %v4791_v51, %v4790_v47  ;;  %6563 = vmatprep.subr.bf16.mxu0 %v6845_v36  ;;  %6595 = vmatprep.subr.bf16.mxu1 %v6845_v36 }
 0x5c9   : > { %13045 = vst [vmem:[#allocation18_spill] sm:$0xff] %v11459_v45  ;;  %v4874_v21 = vshll.u32 %v11459_v45, 30  ;;  %v5373_v59 = vsel %vm5365_vm10, %v5356_v41, %v5372_v28  ;;  %v5376_v33 = vsel %vm5366_vm14, %v5362_v15, 1326507024  ;;  %v5379_v60 = vshll.u32 %v5339_v43, 8  ;;  %6564 = vmatpush3.bf16.msra.mxu0 %v6845_v36  ;;  %6603 = vmatpush3.bf16.msra.mxu1 %v6845_v36 }
 0x5ca   : > { %v5374_v39 = vsel %vm5364_vm0, %v5371_v24, %v5373_v59  ;;  %v5377_v40 = vsel %vm5365_vm10, %v5359_v50, %v5376_v33  ;;  %v5367_v41 = vsel %vm5363_vm4, %v5347_v10, %v5350_v58  ;;  %v5127_v47 = vshrl.u32 %v5126_v53, 23  ;;  %v6846_v53 = vld [vmem:[%s12413_s7 + $0x8] sm:$0xff]  }
 0x5cb   : > { %v11479_v25 = vsub.s32 %v4871_v27, %v4874_v21  ;;  %v5378_v6 = vsel %vm5364_vm0, %v5375_v20, %v5377_v40  ;;  %v5103_v51 = vxor.u32 2147483648, %v5102_v30  ;;  %v5369_v15 = vsel %vm5365_vm10, %v5353_v29, %v5368_v9  ;;  %6565 = vmatprep.subr.bf16.mxu0 %v6846_v53  ;;  %6596 = vmatprep.subr.bf16.mxu1 %v6846_v53 }
 0x5cc   : > { %v11487_v24 = vmul.u32.u64.low %v5379_v60, %v5378_v6  ;;  %v11488_v50 = vmul.u32.u64.high %v5379_v60, %v5378_v6, %v11487_v24  ;;  %v11491_v27 = vmul.u32.u64.low %v5379_v60, %v5374_v39  ;;  %v11492_v28 = vmul.u32.u64.high %v5379_v60, %v5374_v39, %v11491_v27 }
 0x5cd   : > { %v4877_v43 = vsub.s32 0, %v11479_v25  ;;  %v6408_v58 = vadd.s32 4294967169, %v5127_v47  ;;  %v11496_v10 = vand.u32 3, %v11335_v52  ;;  %6995 = vsinq.f32 %v11340_v38  ;;  %6566 = vmatpush3.bf16.msra.mxu0 %v6846_v53  ;;  %6604 = vmatpush3.bf16.msra.mxu1 %v6846_v53  ;;  %v6847_v47 = vld [vmem:[%s12413_s7 + $0x10] sm:$0xff]  }
 0x5ce   : > { %v13047_v29 = vand.u32 2147483647, %v11024_v32  ;;  %v13048_v20 = vmov 0  ;;  %vm12646_vm6 = vcmp.lt.s32.totalorder %v11092_v3, 0  ;;  %6997 = vcosq.f32 %v11432_v55  ;;  %6567 = vmatprep.subr.bf16.mxu0 %v6847_v47  ;;  %6597 = vmatprep.subr.bf16.mxu1 %v6847_v47 }
 0x5cf   : > { %13046 = vst [vmem:[#allocation13_spill] sm:$0xff] %v11496_v10  ;;  %v6397_v21 = vmin.u32 %v4877_v43, %v11479_v25  ;;  %v5370_v52 = vsel %vm5364_vm0, %v5367_v41, %v5369_v15  ;;  %v5133_v38 = vadd.s32 1, %v6408_v58  ;;  %v5104_v59 = vsel %vm12646_vm6, %v5103_v51, %v5102_v30 }
 0x5d0   : > { %vm11501_vm5 = vcmp.le.f32.partialorder %v13047_v29, 0.7853982  ;;  %vm5388_vm11 = vc.u32 %v11488_v50, %v11491_v27  ;;  %v13051_v33 = vand.u32 2147483647, %v11352_v19  ;;  %v5389_v2 = vadd.s32 1, %v11492_v28 }
 0x5d1   : > { %v13049_v20 = vsel %vm11501_vm5, 4294967295, %v13048_v20  ;;  %v4795_v9 = vsel %vm11501_vm5, %v11024_v32, %v4792_v0  ;;  %v4879_v40 = vclz %v6397_v21  ;;  %vm5134_vm1 = vcmp.gt.s32.totalorder %v5133_v38, 0  ;;  %6568 = vmatpush3.bf16.msra.mxu0 %v6847_v47  ;;  %6605 = vmatpush3.bf16.msra.mxu1 %v6847_v47 }
 0x5d2   : > { %13050 = vst [vmem:[#allocation14_spill] sm:$0xff] %v13049_v20  ;;  %v11522_v39 = vand.u32 8388607, %v13051_v33  ;;  %v11527_v36 = vadd.f32 %v11308_v37, %v11006_v17  ;;  %6999 = vsinq.f32 %v11432_v55  ;;  %v13053_v30 = vand.u32 2147483647, %v11092_v3 }
 0x5d3   : > { %v13054_v0 = vmov 0  ;;  %v5386_v41 = vmul.u32 %v5379_v60, %v5370_v52  ;;  %v5135_v6 = vsel %vm5134_vm1, %v5133_v38, 0  ;;  %7001 = vcosq.f32 %v4795_v9 }
 0x5d4   : > { %13052 = vst [vmem:[#allocation21_spill] sm:$0xff] %v11527_v36  ;;  %vm11532_vm2 = vcmp.le.f32.partialorder %v13053_v30, 0.7853982  ;;  %v6398_v51 = vadd.s32 4294967294, %v4879_v40  ;;  %v5390_v17 = vsel %vm5388_vm11, %v5389_v2, %v11492_v28  ;;  %v5137_v55 = vand.u32 31, %v5135_v6 }
 0x5d5   : > { %v13055_v0 = vsel %vm11532_vm2, 4294967295, %v13054_v0  ;;  %7003 = vsinq.f32 %v4795_v9  ;;  %v11546_v15 = vsel %vm11532_vm2, %v11092_v3, %v5104_v59  ;;  %v4867_v60 = vadd.s32 %v11422_v1, %v11419_v57  ;;  %v6848_v57 = vld [vmem:[%s12413_s7 + $0x18] sm:$0xff]  }
 0x5d6   : > { %13056 = vst [vmem:[#allocation36_spill] sm:$0xff] %v13055_v0  ;;  %v5391_v24 = vadd.s32 %v5390_v17, %v5386_v41  ;;  %vm6399_vm4 = vcmp.lt.s32.totalorder %v6398_v51, 0  ;;  %v5131_v43 = vor.u32 8388608, %v11522_v39  ;;  %v5138_v58 = vsub.s32 32, %v5137_v55  ;;  %6569 = vmatprep.subr.bf16.mxu0 %v6848_v57  ;;  %6598 = vmatprep.subr.bf16.mxu1 %v6848_v57 }
 0x5d7   : > { %v4882_v28 = vsel %vm6399_vm4, 0, %v6398_v51  ;;  %v11552_v21 = vshrl.u32 %v5135_v6, 5  ;;  %v5438_v52 = vand.u32 2139095040, %v11527_v36  ;;  %v5140_v9 = vshll.u32 %v12686_v62, %v5137_v55  ;;  %v11560_v33 = vpop.eup %6995  ;;  %6570 = vmatpush3.bf16.msra.mxu0 %v6848_v57  ;;  %6606 = vmatpush3.bf16.msra.mxu1 %v6848_v57 }
 0x5d8   : > { %v5392_v53 = vadd.s32 536870912, %v5391_v24  ;;  %v4883_v1 = vsub.s32 32, %v4882_v28  ;;  %v4887_v38 = vsub.s32 4294967266, %v4882_v28  ;;  %v5143_v59 = vshll.u32 %v12693_v34, %v5137_v55  ;;  %v11567_v41 = vpop.eup %6997 }
 0x5d9   : > { %v5141_v40 = vshrl.u32 %v12693_v34, %v5138_v58  ;;  %v5144_v2 = vshrl.u32 %v12694_v12, %v5138_v58  ;;  %v5147_v30 = vshrl.u32 %v12695_v5, %v5138_v58  ;;  %13057 = vst [vmem:[#allocation37_spill] sm:$0xff] %v11567_v41  ;;  %v5146_v51 = vshll.u32 %v12694_v12, %v5137_v55  ;;  %v6849_v41 = vld [vmem:[%s12413_s7 + $0x20] sm:$0xff]  }
 0x5da   : > { %v11562_v39 = vshrl.u32 %v5392_v53, 30  ;;  %v4885_v6 = vshrl.u32 %v4867_v60, %v4883_v1  ;;  %v4888_v47 = vadd.s32 127, %v4887_v38  ;;  %v5150_v17 = vshrl.u32 %v13018_v56, %v5138_v58  ;;  %6571 = vmatprep.subr.bf16.mxu0 %v6849_v41  ;;  %6599 = vmatprep.subr.bf16.mxu1 %v6849_v41 }
 0x5db   : > { %v4884_v53 = vshll.u32 %v11479_v25, %v4882_v28  ;;  %v5149_v0 = vshll.u32 %v12695_v5, %v5137_v55  ;;  %v5152_v3 = vshll.u32 %v13018_v56, %v5137_v55  ;;  %v5142_v1 = vor.u32 %v5141_v40, %v5140_v9  ;;  %6572 = vmatpush3.bf16.msra.mxu0 %v6849_v41 }
 0x5dc   : > { %v5394_v29 = vshll.u32 %v11562_v39, 30  ;;  %v4889_v60 = vshll.u32 %v4888_v47, 23  ;;  %v5145_v38 = vor.u32 %v5144_v2, %v5143_v59  ;;  %v5148_v44 = vor.u32 %v5147_v30, %v5146_v51  ;;  %v11578_v20 = vpop.eup %6999  ;;  %6607 = vmatpush3.bf16.msra.mxu1 %v6849_v41  ;;  %v6850_v2 = vld [vmem:[%s12413_s7 + $0x28] sm:$0xff]  }
 0x5dd   : > { %13058 = vst [vmem:[#allocation27_spill] sm:$0xff] %v11578_v20  ;;  %7005 = vcosq.f32 %v11546_v15  ;;  %v5151_v25 = vor.u32 %v5150_v17, %v5149_v0  ;;  %v5153_v28 = vshrl.u32 %v13019_v26, %v5138_v58  ;;  %v11584_v55 = vpop.eup %7001  ;;  %v4886_v32 = vor.u32 %v4885_v6, %v4884_v53  ;;  %6573 = vmatprep.subr.bf16.mxu0 %v6850_v2 }
 0x5de   : > { %v11581_v57 = vsub.s32 %v5391_v24, %v5394_v29  ;;  %13059 = vst [vmem:[#allocation19_spill] sm:$0xff] %v11584_v55  ;;  %v4890_v45 = vor.u32 4788187, %v4889_v60  ;;  %v11586_v46 = vshll.u32 %v5131_v43, 8  ;;  %v13060_v9 = vand.u32 2147483647, %v11527_v36  ;;  %6600 = vmatprep.subr.bf16.mxu1 %v6850_v2 }
 0x5df   : > { %v11592_v40 = vpop.eup %7003  ;;  %v5154_v24 = vor.u32 %v5153_v28, %v5152_v3  ;;  %vm5155_vm0 = vcmp.lt.s32.totalorder %v11552_v21, 1  ;;  %v5439_v29 = vshrl.u32 %v5438_v52, 23  ;;  %v5139_v43 = vshrl.u32 %v12686_v62, %v5138_v58  ;;  %6574 = vmatpush3.bf16.msra.mxu0 %v6850_v2 }
 0x5e0   : > { %v11590_v59 = vand.u32 8388607, %v13060_v9  ;;  %13061 = vst [vmem:[#allocation7_spill] sm:$0xff] %v11592_v40  ;;  %v5397_v0 = vsub.s32 0, %v11581_v57  ;;  %vm5157_vm10 = vcmp.lt.s32.totalorder %v11552_v21, 3  ;;  %vm5158_vm14 = vcmp.lt.s32.totalorder %v11552_v21, 4  ;;  %6608 = vmatpush3.bf16.msra.mxu1 %v6850_v2 }
 0x5e1   : > { %v5163_v30 = vsel %vm5155_vm0, %v5142_v1, %v5145_v38  ;;  %v4891_v41 = vand.u32 2147483647, %v4890_v45  ;;  %v5160_v3 = vsel %vm5158_vm14, %v5148_v44, 2102212464  ;;  %v5164_v52 = vsel %vm5158_vm14, %v5151_v25, 920167782 }
 0x5e2   : > { %v6417_v6 = vmin.u32 %v5397_v0, %v11581_v57  ;;  %v4893_v47 = vcvt.s32.f32 %v4886_v32  ;;  %vm5156_vm11 = vcmp.lt.s32.totalorder %v11552_v21, 2  ;;  %v5165_v58 = vsel %vm5157_vm10, %v5148_v44, %v5164_v52  ;;  %v6851_v32 = vld [vmem:[%s12413_s7 + $0x30] sm:$0xff]  }
 0x5e3   : > { %v5167_v51 = vsel %vm5155_vm0, %v5145_v38, %v5148_v44  ;;  %v5159_v17 = vsel %vm5155_vm0, %v5139_v43, %v5142_v1  ;;  %v5166_v53 = vsel %vm5156_vm11, %v5163_v30, %v5165_v58  ;;  %v5168_v60 = vsel %vm5158_vm14, %v5154_v24, 1326507024  ;;  %6575 = vmatprep.subr.bf16.mxu0 %v6851_v32  ;;  %6601 = vmatprep.subr.bf16.mxu1 %v6851_v32 }
 0x5e4   : > { %v5399_v45 = vclz %v6417_v6  ;;  %v5161_v28 = vsel %vm5157_vm10, %v5145_v38, %v5160_v3  ;;  %v5169_v44 = vsel %vm5157_vm10, %v5151_v25, %v5168_v60  ;;  %v4894_v0 = vmul.f32 %v4893_v47, %v4891_v41  ;;  %6576 = vmatpush3.bf16.msra.mxu0 %v6851_v32  ;;  %6609 = vmatpush3.bf16.msra.mxu1 %v6851_v32 }
 0x5e5   : > { %v11628_v9 = vmul.u32.u64.low %v11586_v46, %v5166_v53  ;;  %v11629_v1 = vmul.u32.u64.high %v11586_v46, %v5166_v53, %v11628_v9  ;;  %v5170_v24 = vsel %vm5156_vm11, %v5167_v51, %v5169_v44  ;;  %v6420_v30 = vadd.s32 4294967169, %v5439_v29 }
 0x5e6   : > { %v6418_v43 = vadd.s32 4294967294, %v5399_v45  ;;  %7007 = vsinq.f32 %v11546_v15  ;;  %vm12654_vm1 = vcmp.lt.s32.totalorder %v11266_v7, 0  ;;  %v5162_v41 = vsel %vm5156_vm11, %v5159_v17, %v5161_v28  ;;  %v6852_v15 = vld [vmem:[%s12413_s7 + $0x38] sm:$0xff]  }
 0x5e7   : > { %v11637_v38 = vmul.u32.u64.low %v11586_v46, %v5170_v24  ;;  %v11638_v25 = vmul.u32.u64.high %v11586_v46, %v5170_v24, %v11637_v38  ;;  %v11640_v2 = vpop.eup %7005  ;;  %v5445_v6 = vadd.s32 1, %v6420_v30  ;;  %v11646_v29 = vadd.f32 %v11308_v37, %v11083_v49  ;;  %6577 = vmatprep.subr.bf16.mxu0 %v6852_v15  ;;  %6602 = vmatprep.subr.bf16.mxu1 %v6852_v15 }
 0x5e8   : > { %13062 = vst [vmem:[#allocation25_spill] sm:$0xff] %v11640_v2  ;;  %vm6419_vm4 = vcmp.lt.s32.totalorder %v6418_v43, 0  ;;  %v5387_v3 = vadd.s32 %v11491_v27, %v11488_v50  ;;  %v5181_v47 = vadd.s32 1, %v11629_v1  ;;  %v11656_v21 = vadd.f32 %v11308_v37, %v11210_v8  ;;  %6578 = vmatpush3.bf16.msra.mxu0 %v6852_v15  ;;  %6610 = vmatpush3.bf16.msra.mxu1 %v6852_v15 }
 0x5e9   : > { %v5402_v52 = vsel %vm6419_vm4, 0, %v6418_v43  ;;  %v4895_v58 = vxor.u32 2147483648, %v4894_v0  ;;  %v5443_v49 = vor.u32 8388608, %v11590_v59  ;;  %v5178_v53 = vmul.u32 %v11586_v46, %v5162_v41 }
 0x5ea   : > { %v5403_v51 = vsub.s32 32, %v5402_v52  ;;  %v5407_v45 = vsub.s32 4294967266, %v5402_v52  ;;  %v5404_v17 = vshll.u32 %v11581_v57, %v5402_v52  ;;  %vm5180_vm0 = vc.u32 %v11638_v25, %v11628_v9 }
 0x5eb   : > { %vm5446_vm10 = vcmp.gt.s32.totalorder %v5445_v6, 0  ;;  %v5182_v8 = vsel %vm5180_vm0, %v5181_v47, %v11629_v1  ;;  %v5417_v32 = vsub.s32 4, %v11562_v39  ;;  %v4896_v46 = vsel %vm12654_vm1, %v4895_v58, %v4894_v0 }
 0x5ec   : > { %v5405_v50 = vshrl.u32 %v5387_v3, %v5403_v51  ;;  %v5408_v27 = vadd.s32 127, %v5407_v45  ;;  %v5447_v60 = vsel %vm5446_vm10, %v5445_v6, 0  ;;  %v5183_v59 = vadd.s32 %v5182_v8, %v5178_v53 }
 0x5ed   : > { %v5449_v28 = vand.u32 31, %v5447_v60  ;;  %v5230_v24 = vand.u32 2139095040, %v11646_v29  ;;  %v5448_v38 = vshrl.u32 %v5447_v60, 5  ;;  %vm5333_vm14 = vcmp.lt.s32.totalorder %v11312_v22, 0 }
 0x5ee   : > { %v5406_v57 = vor.u32 %v5405_v50, %v5404_v17  ;;  %v5409_v43 = vshll.u32 %v5408_v27, 23  ;;  %v5184_v30 = vadd.s32 536870912, %v5183_v59  ;;  %v13065_v17 = vand.u32 2147483647, %v11266_v7 }
 0x5ef   : > { %v5450_v41 = vsub.s32 32, %v5449_v28  ;;  %v5452_v1 = vshll.u32 %v12686_v62, %v5449_v28  ;;  %v5455_v3 = vshll.u32 %v12693_v34, %v5449_v28  ;;  %v5458_v52 = vshll.u32 %v12694_v12, %v5449_v28 }
 0x5f0   : > { %v5410_v6 = vor.u32 4788187, %v5409_v43  ;;  %v5413_v15 = vcvt.s32.f32 %v5406_v57  ;;  %v11673_v47 = vpop.eup %7007  ;;  %v11675_v0 = vshrl.u32 %v5184_v30, 30  ;;  %v5461_v45 = vshll.u32 %v12695_v5, %v5449_v28 }
 0x5f1   : > { %13063 = vst [vmem:[#allocation9_spill] sm:$0xff] %v11673_v47  ;;  %v5453_v58 = vshrl.u32 %v12693_v34, %v5450_v41  ;;  %v5456_v51 = vshrl.u32 %v12694_v12, %v5450_v41  ;;  %vm11682_vm11 = vcmp.le.f32.partialorder %v13065_v17, 0.7853982  ;;  %v5459_v27 = vshrl.u32 %v12695_v5, %v5450_v41 }
 0x5f2   : > { %13064 = vst [vmem:[#allocation33_spill] sm:$0xff] %v11675_v0  ;;  %v5411_v50 = vand.u32 2147483647, %v5410_v6  ;;  %v5462_v8 = vshrl.u32 %v13018_v56, %v5450_v41  ;;  %v5464_v60 = vshll.u32 %v13018_v56, %v5449_v28  ;;  %v5186_v57 = vshll.u32 %v11675_v0, 30 }
 0x5f3   : > { %v5454_v43 = vor.u32 %v5453_v58, %v5452_v1  ;;  %v5457_v30 = vor.u32 %v5456_v51, %v5455_v3  ;;  %v5465_v44 = vshrl.u32 %v13019_v26, %v5450_v41  ;;  %v13068_v2 = vand.u32 2147483647, %v11312_v22 }
 0x5f4   : > { %v5414_v47 = vmul.f32 %v5413_v15, %v5411_v50  ;;  %v5460_v6 = vor.u32 %v5459_v27, %v5458_v52  ;;  %v5463_v20 = vor.u32 %v5462_v8, %v5461_v45  ;;  %v5483_v55 = vshll.u32 %v5443_v49, 8 }
 0x5f5   : > { %vm11693_vm4 = vcmp.le.f32.partialorder %v13068_v2, 0.7853982  ;;  %v11697_v40 = vsub.s32 %v5183_v59, %v5186_v57  ;;  %v5466_v10 = vor.u32 %v5465_v44, %v5464_v60  ;;  %vm5467_vm0 = vcmp.lt.s32.totalorder %v5448_v38, 1 }
 0x5f6   : > { %v5231_v28 = vshrl.u32 %v5230_v24, 23  ;;  %v5451_v1 = vshrl.u32 %v12686_v62, %v5450_v41  ;;  %vm5468_vm10 = vcmp.lt.s32.totalorder %v5448_v38, 2  ;;  %vm5470_vm6 = vcmp.lt.s32.totalorder %v5448_v38, 4 }
 0x5f7   : > { %v5475_v3 = vsel %vm5467_vm0, %v5454_v43, %v5457_v30  ;;  %v5189_v2 = vsub.s32 0, %v11697_v40  ;;  %vm5469_vm3 = vcmp.lt.s32.totalorder %v5448_v38, 3  ;;  %v5472_v58 = vsel %vm5470_vm6, %v5460_v6, 2102212464 }
 0x5f8   : > { %v5476_v51 = vsel %vm5470_vm6, %v5463_v20, 920167782  ;;  %v5415_v15 = vxor.u32 2147483648, %v5414_v47  ;;  %v5479_v49 = vsel %vm5467_vm0, %v5457_v30, %v5460_v6  ;;  %v5480_v59 = vsel %vm5470_vm6, %v5466_v10, 1326507024 }
 0x5f9   : > { %v5477_v52 = vsel %vm5469_vm3, %v5460_v6, %v5476_v51  ;;  %v5418_v44 = vsel %vm5333_vm14, %v5417_v32, %v11562_v39  ;;  %v6409_v24 = vmin.u32 %v5189_v2, %v11697_v40  ;;  %v5471_v41 = vsel %vm5467_vm0, %v5451_v1, %v5454_v43 }
 0x5fa   : > { %v5478_v45 = vsel %vm5468_vm10, %v5475_v3, %v5477_v52  ;;  %v5473_v50 = vsel %vm5469_vm3, %v5457_v30, %v5472_v58  ;;  %v5481_v27 = vsel %vm5469_vm3, %v5463_v20, %v5480_v59  ;;  %v4899_v10 = vsel %vm11682_vm11, %v11266_v7, %v4896_v46 }
 0x5fb   : > { %v11709_v8 = vmul.u32.u64.low %v5483_v55, %v5478_v45  ;;  %v11710_v60 = vmul.u32.u64.high %v5483_v55, %v5478_v45, %v11709_v8  ;;  %v5191_v57 = vclz %v6409_v24  ;;  %v5482_v6 = vsel %vm5468_vm10, %v5479_v49, %v5481_v27 }
 0x5fc   : > { %v11719_v39 = vadd.f32 %v11308_v37, %v11219_v23  ;;  %v5416_v32 = vsel %vm5333_vm14, %v5415_v15, %v5414_v47  ;;  %v11723_v43 = vmul.u32.u64.low %v5483_v55, %v5482_v6  ;;  %v11724_v20 = vmul.u32.u64.high %v5483_v55, %v5482_v6, %v11723_v43 }
 0x5fd   : > { %v6412_v30 = vadd.s32 4294967169, %v5231_v28  ;;  %v5420_v1 = vsel %vm11693_vm4, 0, %v5418_v44  ;;  %v6410_v3 = vadd.s32 4294967294, %v5191_v57  ;;  %v5474_v46 = vsel %vm5468_vm10, %v5471_v41, %v5473_v50 }
 0x5fe   : > { %v13071_v2 = vand.u32 2147483647, %v11646_v29  ;;  %7009 = vcosq.f32 %v4899_v10  ;;  %v5493_v23 = vadd.s32 1, %v11710_v60  ;;  %v5750_v52 = vand.u32 2139095040, %v11656_v21 }
 0x5ff   : > { %v5237_v51 = vadd.s32 1, %v6412_v30  ;;  %7011 = vsinq.f32 %v4899_v10  ;;  %v11736_v47 = vsel %vm11693_vm4, %v11312_v22, %v5416_v32  ;;  %v5179_v28 = vadd.s32 %v11628_v9, %v11638_v25 }
 0x600   : > { %v5234_v58 = vand.u32 8388607, %v13071_v2  ;;  %vm6411_vm3 = vcmp.lt.s32.totalorder %v6410_v3, 0  ;;  %v5490_v15 = vmul.u32 %v5483_v55, %v5474_v46  ;;  %vm5492_vm6 = vc.u32 %v11724_v20, %v11709_v8 }
 0x601   : > { %v5194_v38 = vsel %vm6411_vm3, 0, %v6410_v3  ;;  %vm5238_vm14 = vcmp.gt.s32.totalorder %v5237_v51, 0  ;;  %v5494_v44 = vsel %vm5492_vm6, %v5493_v23, %v11710_v60  ;;  %v12648_v17 = vand.u32 2147483647, %v11656_v21 }
 0x602   : > { %v5195_v49 = vsub.s32 32, %v5194_v38  ;;  %v5199_v59 = vsub.s32 4294967266, %v5194_v38  ;;  %v5235_v24 = vor.u32 8388608, %v5234_v58  ;;  %v5495_v41 = vadd.s32 %v5494_v44, %v5490_v15 }
 0x603   : > { %v5239_v45 = vsel %vm5238_vm14, %v5237_v51, 0  ;;  %v5751_v50 = vshrl.u32 %v5750_v52, 23  ;;  %v5196_v27 = vshll.u32 %v11697_v40, %v5194_v38  ;;  %7013 = vcosq.f32 %v11736_v47 }
 0x604   : > { %v5197_v9 = vshrl.u32 %v5179_v28, %v5195_v49  ;;  %v5200_v25 = vadd.s32 127, %v5199_v59  ;;  %v5241_v10 = vand.u32 31, %v5239_v45  ;;  %v11746_v55 = vadd.s32 3, %v5420_v1 }
 0x605   : > { %v5496_v57 = vadd.s32 536870912, %v5495_v41  ;;  %v11750_v6 = vadd.f32 %v11308_v37, %v11331_v16  ;;  %v11752_v30 = vshll.u32 %v5235_v24, 8  ;;  %v5240_v46 = vshrl.u32 %v5239_v45, 5 }
 0x606   : > { %v5198_v60 = vor.u32 %v5197_v9, %v5196_v27  ;;  %v5201_v32 = vshll.u32 %v5200_v25, 23  ;;  %v5242_v43 = vsub.s32 32, %v5241_v10  ;;  %v6432_v40 = vadd.s32 4294967169, %v5751_v50 }
 0x607   : > { %v5497_v3 = vshrl.u32 %v5496_v57, 30  ;;  %v11756_v2 = vand.u32 8388607, %v12648_v17  ;;  %v5244_v1 = vshll.u32 %v12686_v62, %v5241_v10  ;;  %v5247_v37 = vshll.u32 %v12693_v34, %v5241_v10 }
 0x608   : > { %v5202_v58 = vor.u32 4788187, %v5201_v32  ;;  %v5245_v23 = vshrl.u32 %v12693_v34, %v5242_v43  ;;  %v11761_v16 = vpop.eup %7009  ;;  %vm5437_vm4 = vcmp.lt.s32.totalorder %v11527_v36, 0  ;;  %v5248_v52 = vshrl.u32 %v12694_v12, %v5242_v43 }
 0x609   : > { %13072 = vst [vmem:[#allocation38_spill] sm:$0xff] %v11761_v16  ;;  %v5498_v51 = vshll.u32 %v5497_v3, 30  ;;  %v5250_v28 = vshll.u32 %v12694_v12, %v5241_v10  ;;  %v5251_v38 = vshrl.u32 %v12695_v5, %v5242_v43  ;;  %v11767_v15 = vpop.eup %7011  ;;  %vm12675_vm0 = vcmp.lt.s32.totalorder %v11352_v19, 0 }
 0x60a   : > { %v5203_v49 = vand.u32 2147483647, %v5202_v58  ;;  %v5205_v59 = vcvt.s32.f32 %v5198_v60  ;;  %v5253_v44 = vshll.u32 %v12695_v5, %v5241_v10  ;;  %v5254_v24 = vshrl.u32 %v13018_v56, %v5242_v43 }
 0x60b   : > { %v11772_v45 = vsub.s32 %v5495_v41, %v5498_v51  ;;  %v5246_v50 = vor.u32 %v5245_v23, %v5244_v1  ;;  %v5252_v27 = vor.u32 %v5251_v38, %v5250_v28  ;;  %v5256_v9 = vshll.u32 %v13018_v56, %v5241_v10 }
 0x60c   : > { %v5206_v25 = vmul.f32 %v5205_v59, %v5203_v49  ;;  %v5249_v57 = vor.u32 %v5248_v52, %v5247_v37  ;;  %v5255_v32 = vor.u32 %v5254_v24, %v5253_v44  ;;  %v5257_v17 = vshrl.u32 %v13019_v26, %v5242_v43 }
 0x60d   : > { %v5501_v22 = vsub.s32 0, %v11772_v45  ;;  %v5243_v58 = vshrl.u32 %v12686_v62, %v5242_v43  ;;  %v5757_v60 = vadd.s32 1, %v6432_v40  ;;  %v13073_v16 = vand.u32 2147483647, %v11352_v19  ;;  %v11791_v43 = vpop.eup %7013 }
 0x60e   : > { %v13074_v41 = vmov 0  ;;  %v13077_v10 = vand.u32 2147483647, %v11527_v36  ;;  %v5521_v23 = vsub.s32 4, %v5497_v3  ;;  %v5258_v37 = vor.u32 %v5257_v17, %v5256_v9  ;;  %13080 = vst [vmem:[#allocation34_spill] sm:$0xff] %v11791_v43 }
 0x60f   : > { %vm11781_vm10 = vcmp.le.f32.partialorder %v13073_v16, 0.7853982  ;;  %vm5259_vm6 = vcmp.lt.s32.totalorder %v5240_v46, 1  ;;  %vm5262_vm14 = vcmp.lt.s32.totalorder %v5240_v46, 4  ;;  %v5207_v40 = vxor.u32 2147483648, %v5206_v25 }
 0x610   : > { %v13075_v41 = vsel %vm11781_vm10, 4294967295, %v13074_v41  ;;  %vm11787_vm3 = vcmp.le.f32.partialorder %v13077_v10, 0.7853982  ;;  %v6421_v51 = vmin.u32 %v5501_v22, %v11772_v45  ;;  %vm5261_vm1 = vcmp.lt.s32.totalorder %v5240_v46, 3 }
 0x611   : > { %13076 = vst [vmem:[#allocation22_spill] sm:$0xff] %v13075_v41  ;;  %v5264_v16 = vsel %vm5262_vm14, %v5252_v27, 2102212464  ;;  %v5263_v52 = vsel %vm5259_vm6, %v5243_v58, %v5246_v50  ;;  %v5267_v38 = vsel %vm5259_vm6, %v5246_v50, %v5249_v57  ;;  %v5268_v49 = vsel %vm5262_vm14, %v5255_v32, 920167782 }
 0x612   : > { %v5265_v28 = vsel %vm5261_vm1, %v5249_v57, %v5264_v16  ;;  %v5503_v59 = vclz %v6421_v51  ;;  %vm5260_vm8 = vcmp.lt.s32.totalorder %v5240_v46, 2  ;;  %v5269_v17 = vsel %vm5261_vm1, %v5252_v27, %v5268_v49 }
 0x613   : > { %v5755_v44 = vor.u32 8388608, %v11756_v2  ;;  %v11803_v22 = vsel %vm5437_vm4, %v5521_v23, %v5497_v3  ;;  %v5270_v24 = vsel %vm5260_vm8, %v5267_v38, %v5269_v17  ;;  %v5271_v9 = vsel %vm5259_vm6, %v5249_v57, %v5252_v27 }
 0x614   : > { %v5272_v58 = vsel %vm5262_vm14, %v5258_v37, 1326507024  ;;  %v5208_v50 = vsel %vm12675_vm0, %v5207_v40, %v5206_v25  ;;  %v6422_v10 = vadd.s32 4294967294, %v5503_v59  ;;  %v5266_v16 = vsel %vm5260_vm8, %v5263_v52, %v5265_v28 }
 0x615   : > { %v5273_v51 = vsel %vm5261_vm1, %v5255_v32, %v5272_v58  ;;  %v11811_v49 = vmul.u32.u64.low %v11752_v30, %v5270_v24  ;;  %v11812_v2 = vmul.u32.u64.high %v11752_v30, %v5270_v24, %v11811_v49  ;;  %vm5758_vm9 = vcmp.gt.s32.totalorder %v5757_v60, 0 }
 0x616   : > { %v5274_v0 = vsel %vm5260_vm8, %v5271_v9, %v5273_v51  ;;  %vm6423_vm13 = vcmp.lt.s32.totalorder %v6422_v10, 0  ;;  %v5759_v57 = vsel %vm5758_vm9, %v5757_v60, 0  ;;  %v5491_v25 = vadd.s32 %v11709_v8, %v11724_v20 }
 0x617   : > { %v11816_v3 = vmul.u32.u64.low %v11752_v30, %v5274_v0  ;;  %v11817_v27 = vmul.u32.u64.high %v11752_v30, %v5274_v0, %v11816_v3  ;;  %v5506_v23 = vsel %vm6423_vm13, 0, %v6422_v10  ;;  %v5761_v37 = vand.u32 31, %v5759_v57 }
 0x618   : > { %v11821_v46 = vshll.u32 %v5755_v44, 8  ;;  %v11826_v32 = vsel %vm11781_vm10, %v11352_v19, %v5208_v50  ;;  %v5507_v40 = vsub.s32 32, %v5506_v23  ;;  %v5511_v52 = vsub.s32 4294967266, %v5506_v23 }
 0x619   : > { %v5524_v0 = vsel %vm11787_vm3, 0, %v11803_v22  ;;  %v5508_v60 = vshll.u32 %v11772_v45, %v5506_v23  ;;  %v5282_v28 = vmul.u32 %v11752_v30, %v5266_v16  ;;  %v5285_v8 = vadd.s32 1, %v11812_v2 }
 0x61a   : > { %v5762_v20 = vsub.s32 32, %v5761_v37  ;;  %v5509_v38 = vshrl.u32 %v5491_v25, %v5507_v40  ;;  %v5512_v59 = vadd.s32 127, %v5511_v52  ;;  %vm5284_vm13 = vc.u32 %v11817_v27, %v11811_v49 }
 0x61b   : > { %v5764_v17 = vshll.u32 %v12686_v62, %v5761_v37  ;;  %v5286_v44 = vsel %vm5284_vm13, %v5285_v8, %v11812_v2  ;;  %v5767_v22 = vshll.u32 %v12693_v34, %v5761_v37  ;;  %v5760_v50 = vshrl.u32 %v5759_v57, 5 }
 0x61c   : > { %v5765_v24 = vshrl.u32 %v12693_v34, %v5762_v20  ;;  %v5768_v45 = vshrl.u32 %v12694_v12, %v5762_v20  ;;  %v5510_v9 = vor.u32 %v5509_v38, %v5508_v60  ;;  %v5513_v30 = vshll.u32 %v5512_v59, 23 }
 0x61d   : > { %v5287_v58 = vadd.s32 %v5286_v44, %v5282_v28  ;;  %v5770_v51 = vshll.u32 %v12694_v12, %v5761_v37  ;;  %v5771_v3 = vshrl.u32 %v12695_v5, %v5762_v20  ;;  %v5773_v2 = vshll.u32 %v12695_v5, %v5761_v37 }
 0x61e   : > { %v5766_v10 = vor.u32 %v5765_v24, %v5764_v17  ;;  %v5769_v16 = vor.u32 %v5768_v45, %v5767_v22  ;;  %v5514_v25 = vor.u32 4788187, %v5513_v30  ;;  %v5774_v40 = vshrl.u32 %v13018_v56, %v5762_v20 }
 0x61f   : > { %v5288_v23 = vadd.s32 536870912, %v5287_v58  ;;  %v5772_v52 = vor.u32 %v5771_v3, %v5770_v51  ;;  %v5776_v8 = vshll.u32 %v13018_v56, %v5761_v37  ;;  %v5777_v60 = vshrl.u32 %v13019_v26, %v5762_v20 }
 0x620   : > { %v5542_v28 = vand.u32 2139095040, %v11719_v39  ;;  %v5515_v57 = vand.u32 2147483647, %v5514_v25  ;;  %v5517_v38 = vcvt.s32.f32 %v5510_v9  ;;  %v5775_v17 = vor.u32 %v5774_v40, %v5773_v2 }
 0x621   : > { %v11848_v59 = vshrl.u32 %v5288_v23, 30  ;;  %v5763_v44 = vshrl.u32 %v12686_v62, %v5762_v20  ;;  %v5778_v24 = vor.u32 %v5777_v60, %v5776_v8  ;;  %vm5779_vm9 = vcmp.lt.s32.totalorder %v5760_v50, 1 }
 0x622   : > { %vm5781_vm8 = vcmp.lt.s32.totalorder %v5760_v50, 3  ;;  %v5518_v22 = vmul.f32 %v5517_v38, %v5515_v57  ;;  %vm5782_vm1 = vcmp.lt.s32.totalorder %v5760_v50, 4  ;;  %v5787_v30 = vsel %vm5779_vm9, %v5766_v10, %v5769_v16 }
 0x623   : > { %13081 = vst [vmem:[#allocation40_spill] sm:$0xff] %v11848_v59  ;;  %v5290_v45 = vshll.u32 %v11848_v59, 30  ;;  %v5784_v37 = vsel %vm5782_vm1, %v5772_v52, 2102212464  ;;  %v5788_v51 = vsel %vm5782_vm1, %v5775_v17, 920167782  ;;  %v5791_v3 = vsel %vm5779_vm9, %v5769_v16, %v5772_v52 }
 0x624   : > { %v5792_v43 = vsel %vm5782_vm1, %v5778_v24, 1326507024  ;;  %vm5780_vm6 = vcmp.lt.s32.totalorder %v5760_v50, 2  ;;  %v5789_v9 = vsel %vm5781_vm8, %v5772_v52, %v5788_v51  ;;  %v13082_v25 = vand.u32 2147483647, %v11719_v39 }
 0x625   : > { %v11852_v41 = vsub.s32 %v5287_v58, %v5290_v45  ;;  %v5783_v23 = vsel %vm5779_vm9, %v5763_v44, %v5766_v10  ;;  %v5790_v2 = vsel %vm5780_vm6, %v5787_v30, %v5789_v9  ;;  %v5793_v40 = vsel %vm5781_vm8, %v5775_v17, %v5792_v43 }
 0x626   : > { %v5546_v20 = vand.u32 8388607, %v13082_v25  ;;  %v5543_v8 = vshrl.u32 %v5542_v28, 23  ;;  %v5519_v60 = vxor.u32 2147483648, %v5518_v22  ;;  %v5785_v38 = vsel %vm5781_vm8, %v5769_v16, %v5784_v37 }
 0x627   : > { %v5293_v57 = vsub.s32 0, %v11852_v41  ;;  %v5794_v58 = vsel %vm5780_vm6, %v5791_v3, %v5793_v40  ;;  %7015 = vsinq.f32 %v11736_v47  ;;  %v11867_v10 = vadd.s32 3, %v5524_v0 }
 0x628   : > { %v11864_v52 = vmul.u32.u64.low %v11821_v46, %v5794_v58  ;;  %v11865_v24 = vmul.u32.u64.high %v11821_v46, %v5794_v58, %v11864_v52  ;;  %v6424_v45 = vadd.s32 4294967169, %v5543_v8  ;;  %7017 = vcosq.f32 %v11826_v32 }
 0x629   : > { %v6413_v44 = vmin.u32 %v5293_v57, %v11852_v41  ;;  %v11871_v43 = vmul.u32.u64.low %v11821_v46, %v5790_v2  ;;  %v11872_v28 = vmul.u32.u64.high %v11821_v46, %v5790_v2, %v11871_v43  ;;  %v5786_v16 = vsel %vm5780_vm6, %v5783_v23, %v5785_v38 }
 0x62a   : > { %v5547_v17 = vor.u32 8388608, %v5546_v20  ;;  %v5549_v47 = vadd.s32 1, %v6424_v45  ;;  %7019 = vsinq.f32 %v11826_v32  ;;  %v5520_v30 = vsel %vm5437_vm4, %v5519_v60, %v5518_v22 }
 0x62b   : > { %v5295_v0 = vclz %v6413_v44  ;;  %v5854_v37 = vand.u32 2139095040, %v11750_v6  ;;  %v5283_v51 = vadd.s32 %v11811_v49, %v11817_v27  ;;  %vm5804_vm14 = vc.u32 %v11865_v24, %v11871_v43  ;;  %v7048_v49 = vld [vmem:[%s12412_s6] ss:$0 sm:$0xff] }
 0x62c   : > { %vm5550_vm13 = vcmp.gt.s32.totalorder %v5549_v47, 0  ;;  %v12660_v50 = vand.u32 2147483647, %v11750_v6  ;;  %v5802_v9 = vmul.u32 %v11821_v46, %v5786_v16  ;;  %v5805_v32 = vadd.s32 1, %v11872_v28 }
 0x62d   : > { %v6414_v3 = vadd.s32 4294967294, %v5295_v0  ;;  %v5551_v25 = vsel %vm5550_vm13, %v5549_v47, 0  ;;  %v11891_v22 = vsel %vm11787_vm3, %v11527_v36, %v5520_v30  ;;  %v11893_v23 = vshll.u32 %v5547_v17, 8 }
 0x62e   : > { %v5553_v20 = vand.u32 31, %v5551_v25  ;;  %v11899_v27 = vadd.f32 %v7048_v49, %v11413_v31  ;;  %v5806_v46 = vsel %vm5804_vm14, %v5805_v32, %v11872_v28  ;;  %v11902_v2 = vshrl.u32 %v5551_v25, 5 }
 0x62f   : > { %vm6415_vm4 = vcmp.lt.s32.totalorder %v6414_v3, 0  ;;  %v5855_v40 = vshrl.u32 %v5854_v37, 23  ;;  %v5807_v1 = vadd.s32 %v5806_v46, %v5802_v9  ;;  %v11906_v57 = vand.u32 8388607, %v12660_v50 }
 0x630   : > { %v5298_v8 = vsel %vm6415_vm4, 0, %v6414_v3  ;;  %v5554_v60 = vsub.s32 32, %v5553_v20  ;;  %v5556_v31 = vshll.u32 %v12686_v62, %v5553_v20  ;;  %v5559_v16 = vshll.u32 %v12693_v34, %v5553_v20 }
 0x631   : > { %v5299_v38 = vsub.s32 32, %v5298_v8  ;;  %v5300_v58 = vshll.u32 %v11852_v41, %v5298_v8  ;;  %v5303_v52 = vsub.s32 4294967266, %v5298_v8  ;;  %v11910_v45 = vpop.eup %7015  ;;  %v5808_v44 = vadd.s32 536870912, %v5807_v1 }
 0x632   : > { %13083 = vst [vmem:[#allocation43_spill] sm:$0xff] %v11910_v45  ;;  %v5557_v28 = vshrl.u32 %v12693_v34, %v5554_v60  ;;  %v5560_v17 = vshrl.u32 %v12694_v12, %v5554_v60  ;;  %v5562_v0 = vshll.u32 %v12694_v12, %v5553_v20  ;;  %v5563_v37 = vshrl.u32 %v12695_v5, %v5554_v60  ;;  %v11917_v3 = vpop.eup %7017 }
 0x633   : > { %v5301_v47 = vshrl.u32 %v5283_v51, %v5299_v38  ;;  %v5304_v30 = vadd.s32 127, %v5303_v52  ;;  %13084 = vst [vmem:[#allocation45_spill] sm:$0xff] %v11917_v3  ;;  %v11919_v41 = vshrl.u32 %v5808_v44, 30  ;;  %v5565_v25 = vshll.u32 %v12695_v5, %v5553_v20 }
 0x634   : > { %v5558_v9 = vor.u32 %v5557_v28, %v5556_v31  ;;  %v5561_v32 = vor.u32 %v5560_v17, %v5559_v16  ;;  %v11922_v49 = vpop.eup %7019  ;;  %v5564_v50 = vor.u32 %v5563_v37, %v5562_v0  ;;  %v5566_v51 = vshrl.u32 %v13018_v56, %v5554_v60 }
 0x635   : > { %13085 = vst [vmem:[#allocation35_spill] sm:$0xff] %v11919_v41  ;;  %v5302_v46 = vor.u32 %v5301_v47, %v5300_v58  ;;  %v5305_v8 = vshll.u32 %v5304_v30, 23  ;;  %vm12674_vm3 = vcmp.lt.s32.totalorder %v11646_v29, 0  ;;  %v5810_v38 = vshll.u32 %v11919_v41, 30 }
 0x636   : > { %v5568_v52 = vshll.u32 %v13018_v56, %v5553_v20  ;;  %v5569_v44 = vshrl.u32 %v13019_v26, %v5554_v60  ;;  %v6436_v45 = vadd.s32 4294967169, %v5855_v40  ;;  %v5555_v28 = vshrl.u32 %v12686_v62, %v5554_v60 }
 0x637   : > { %v5306_v31 = vor.u32 4788187, %v5305_v8  ;;  %v5567_v16 = vor.u32 %v5566_v51, %v5565_v25  ;;  %vm5571_vm9 = vcmp.lt.s32.totalorder %v11902_v2, 1  ;;  %v5309_v58 = vcvt.s32.f32 %v5302_v46 }
 0x638   : > { %v11931_v17 = vsub.s32 %v5807_v1, %v5810_v38  ;;  %v5570_v47 = vor.u32 %v5569_v44, %v5568_v52  ;;  %vm5574_vm8 = vcmp.lt.s32.totalorder %v11902_v2, 4  ;;  %v13086_v30 = vand.u32 2147483647, %v11646_v29 }
 0x639   : > { %v13087_v0 = vmov 0  ;;  %v5307_v20 = vand.u32 2147483647, %v5306_v31  ;;  %vm5572_vm6 = vcmp.lt.s32.totalorder %v11902_v2, 2  ;;  %v5576_v40 = vsel %vm5574_vm8, %v5564_v50, 2102212464 }
 0x63a   : > { %vm11936_vm1 = vcmp.le.f32.partialorder %v13086_v30, 0.7853982  ;;  %v5579_v60 = vsel %vm5571_vm9, %v5558_v9, %v5561_v32  ;;  %v5813_v37 = vsub.s32 0, %v11931_v17  ;;  %vm5573_vm14 = vcmp.lt.s32.totalorder %v11902_v2, 3 }
 0x63b   : > { %v13088_v0 = vsel %vm11936_vm1, 4294967295, %v13087_v0  ;;  %v5580_v1 = vsel %vm5574_vm8, %v5567_v16, 920167782  ;;  %v5583_v25 = vsel %vm5571_vm9, %v5561_v32, %v5564_v50  ;;  %v5310_v46 = vmul.f32 %v5309_v58, %v5307_v20 }
 0x63c   : > { %13089 = vst [vmem:[#allocation41_spill] sm:$0xff] %v13088_v0  ;;  %v5575_v8 = vsel %vm5571_vm9, %v5555_v28, %v5558_v9  ;;  %v5581_v51 = vsel %vm5573_vm14, %v5564_v50, %v5580_v1  ;;  %v5584_v38 = vsel %vm5574_vm8, %v5570_v47, 1326507024  ;;  %v6433_v52 = vmin.u32 %v5813_v37, %v11931_v17 }
 0x63d   : > { %v5577_v44 = vsel %vm5573_vm14, %v5561_v32, %v5576_v40  ;;  %v5582_v31 = vsel %vm5572_vm6, %v5579_v60, %v5581_v51  ;;  %v5585_v30 = vsel %vm5573_vm14, %v5567_v16, %v5584_v38  ;;  %v5311_v41 = vxor.u32 2147483648, %v5310_v46 }
 0x63e   : > { %v5586_v36 = vsel %vm5572_vm6, %v5583_v25, %v5585_v30  ;;  %v11949_v59 = vmul.u32.u64.low %v11893_v23, %v5582_v31  ;;  %v11950_v3 = vmul.u32.u64.high %v11893_v23, %v5582_v31, %v11949_v59  ;;  %7021 = vcosq.f32 %v11891_v22 }
 0x63f   : > { %v5815_v50 = vclz %v6433_v52  ;;  %v11955_v9 = vmul.u32.u64.low %v11893_v23, %v5586_v36  ;;  %v11956_v28 = vmul.u32.u64.high %v11893_v23, %v5586_v36, %v11955_v9  ;;  %v5312_v32 = vsel %vm12674_vm3, %v5311_v41, %v5310_v46 }
 0x640   : > { %v5578_v16 = vsel %vm5572_vm6, %v5575_v8, %v5577_v44  ;;  %v5861_v58 = vadd.s32 1, %v6436_v45  ;;  %v5646_v47 = vand.u32 2139095040, %v11899_v27  ;;  %7023 = vsinq.f32 %v11891_v22 }
 0x641   : > { %v5803_v20 = vadd.s32 %v11871_v43, %v11865_v24  ;;  %v6434_v40 = vadd.s32 4294967294, %v5815_v50  ;;  %v5859_v60 = vor.u32 8388608, %v11906_v57  ;;  %v5597_v36 = vadd.s32 1, %v11950_v3 }
 0x642   : > { %vm5862_vm13 = vcmp.gt.s32.totalorder %v5861_v58, 0  ;;  %v12669_v37 = vand.u32 2147483647, %v11899_v27  ;;  %v5647_v41 = vshrl.u32 %v5646_v47, 23  ;;  %v11972_v2 = vsel %vm11936_vm1, %v11646_v29, %v5312_v32 }
 0x643   : > { %vm6435_vm4 = vcmp.lt.s32.totalorder %v6434_v40, 0  ;;  %v5594_v22 = vmul.u32 %v11893_v23, %v5578_v16  ;;  %vm5596_vm9 = vc.u32 %v11956_v28, %v11949_v59  ;;  %v5863_v57 = vsel %vm5862_vm13, %v5861_v58, 0 }
 0x644   : > { %v5818_v24 = vsel %vm6435_vm4, 0, %v6434_v40  ;;  %v5598_v43 = vsel %vm5596_vm9, %v5597_v36, %v11950_v3  ;;  %v6428_v45 = vadd.s32 4294967169, %v5647_v41  ;;  %v11978_v8 = vshll.u32 %v5859_v60, 8 }
 0x645   : > { %v5819_v1 = vsub.s32 32, %v5818_v24  ;;  %v5823_v25 = vsub.s32 4294967266, %v5818_v24  ;;  %v5599_v46 = vadd.s32 %v5598_v43, %v5594_v22  ;;  %v5820_v51 = vshll.u32 %v11931_v17, %v5818_v24 }
 0x646   : > { %v5864_v38 = vshrl.u32 %v5863_v57, 5  ;;  %v5865_v52 = vand.u32 31, %v5863_v57  ;;  %v11983_v23 = vand.u32 8388607, %v12669_v37  ;;  %v11985_v50 = vadd.s32 1, %v6428_v45 }
 0x647   : > { %v5821_v44 = vshrl.u32 %v5803_v20, %v5819_v1  ;;  %v5824_v31 = vadd.s32 127, %v5823_v25  ;;  %v5600_v30 = vadd.s32 536870912, %v5599_v46  ;;  %vm12672_vm8 = vcmp.lt.s32.totalorder %v11656_v21, 0 }
 0x648   : > { %v5866_v3 = vsub.s32 32, %v5865_v52  ;;  %v5868_v9 = vshll.u32 %v12686_v62, %v5865_v52  ;;  %v5871_v32 = vshll.u32 %v12693_v34, %v5865_v52  ;;  %v5874_v16 = vshll.u32 %v12694_v12, %v5865_v52  ;;  %v11990_v58 = vpop.eup %7021 }
 0x649   : > { %13090 = vst [vmem:[#allocation44_spill] sm:$0xff] %v11990_v58  ;;  %v5822_v17 = vor.u32 %v5821_v44, %v5820_v51  ;;  %v5825_v47 = vshll.u32 %v5824_v31, 23  ;;  %v11992_v40 = vshrl.u32 %v5600_v30, 30  ;;  %v5877_v60 = vshll.u32 %v12695_v5, %v5865_v52 }
 0x64a   : > { %v5867_v20 = vshrl.u32 %v12686_v62, %v5866_v3  ;;  %v5869_v36 = vshrl.u32 %v12693_v34, %v5866_v3  ;;  %v5872_v41 = vshrl.u32 %v12694_v12, %v5866_v3  ;;  %v5875_v22 = vshrl.u32 %v12695_v5, %v5866_v3  ;;  %v11999_v24 = vpop.eup %7023 }
 0x64b   : > { %v5826_v43 = vor.u32 4788187, %v5825_v47  ;;  %v5829_v57 = vcvt.s32.f32 %v5822_v17  ;;  %v5602_v45 = vshll.u32 %v11992_v40, 30  ;;  %v5878_v1 = vshrl.u32 %v13018_v56, %v5866_v3 }
 0x64c   : > { %v5870_v25 = vor.u32 %v5869_v36, %v5868_v9  ;;  %v5873_v51 = vor.u32 %v5872_v41, %v5871_v32  ;;  %v5876_v44 = vor.u32 %v5875_v22, %v5874_v16  ;;  %v5880_v31 = vshll.u32 %v13018_v56, %v5865_v52 }
 0x64d   : > { %v5827_v30 = vand.u32 2147483647, %v5826_v43  ;;  %v12005_v37 = vsub.s32 %v5599_v46, %v5602_v45  ;;  %v5879_v58 = vor.u32 %v5878_v1, %v5877_v60  ;;  %v5881_v0 = vshrl.u32 %v13019_v26, %v5866_v3 }
 0x64e   : > { %vm5883_vm6 = vcmp.lt.s32.totalorder %v5864_v38, 1  ;;  %vm5884_vm14 = vcmp.lt.s32.totalorder %v5864_v38, 2  ;;  %vm5885_vm13 = vcmp.lt.s32.totalorder %v5864_v38, 3  ;;  %vm5886_vm4 = vcmp.lt.s32.totalorder %v5864_v38, 4 }
 0x64f   : > { %v13091_v17 = vand.u32 2147483647, %v11656_v21  ;;  %v5830_v9 = vmul.f32 %v5829_v57, %v5827_v30  ;;  %v5605_v32 = vsub.s32 0, %v12005_v37  ;;  %v5882_v52 = vor.u32 %v5881_v0, %v5880_v31 }
 0x650   : > { %v5887_v16 = vsel %vm5883_vm6, %v5867_v20, %v5870_v25  ;;  %v5888_v46 = vsel %vm5886_vm4, %v5876_v44, 2102212464  ;;  %v5891_v60 = vsel %vm5883_vm6, %v5870_v25, %v5873_v51  ;;  %v5892_v3 = vsel %vm5886_vm4, %v5879_v58, 920167782 }
 0x651   : > { %vm12010_vm9 = vcmp.le.f32.partialorder %v13091_v17, 0.7853982  ;;  %v5895_v36 = vsel %vm5883_vm6, %v5873_v51, %v5876_v44  ;;  %v5831_v41 = vxor.u32 2147483648, %v5830_v9  ;;  %v6425_v22 = vmin.u32 %v5605_v32, %v12005_v37 }
 0x652   : > { %v5889_v43 = vsel %vm5885_vm13, %v5873_v51, %v5888_v46  ;;  %v5893_v45 = vsel %vm5885_vm13, %v5876_v44, %v5892_v3  ;;  %7025 = vcosq.f32 %v11972_v2  ;;  %v5896_v0 = vsel %vm5886_vm4, %v5882_v52, 1326507024 }
 0x653   : > { %v5894_v57 = vsel %vm5884_vm14, %v5891_v60, %v5893_v45  ;;  %v4377_v20 = vsub.s32 4, %v10973_v54  ;;  %v5607_v1 = vclz %v6425_v22  ;;  %v5897_v25 = vsel %vm5885_vm13, %v5879_v58, %v5896_v0 }
 0x654   : > { %v5651_v31 = vor.u32 8388608, %v11983_v23  ;;  %vm5654_vm6 = vcmp.gt.s32.totalorder %v11985_v50, 0  ;;  %v5890_v30 = vsel %vm5884_vm14, %v5887_v16, %v5889_v43  ;;  %v5898_v51 = vsel %vm5884_vm14, %v5895_v36, %v5897_v25 }
 0x655   : > { %v12030_v44 = vmul.u32.u64.low %v11978_v8, %v5894_v57  ;;  %v12031_v17 = vmul.u32.u64.high %v11978_v8, %v5894_v57, %v12030_v44  ;;  %v5832_v32 = vsel %vm12672_vm8, %v5831_v41, %v5830_v9  ;;  %v6426_v52 = vadd.s32 4294967294, %v5607_v1 }
 0x656   : > { %v12037_v46 = vmul.u32.u64.low %v11978_v8, %v5898_v51  ;;  %v12038_v58 = vmul.u32.u64.high %v11978_v8, %v5898_v51, %v12037_v46  ;;  %7027 = vsinq.f32 %v11972_v2  ;;  %v5595_v23 = vadd.s32 %v11949_v59, %v11956_v28 }
 0x657   : > { %v5655_v38 = vsel %vm5654_vm6, %v11985_v50, 0  ;;  %vm13094_vm14 = vcmp.lt.s32.totalorder %v10842_v11, 0  ;;  %vm6427_vm13 = vcmp.lt.s32.totalorder %v6426_v52, 0  ;;  %v5906_v60 = vmul.u32 %v11978_v8, %v5890_v30 }
 0x658   : > { %v4378_v16 = vsel %vm13094_vm14, %v4377_v20, %v10973_v54  ;;  %v5657_v9 = vand.u32 31, %v5655_v38  ;;  %v12053_v2 = vsel %vm12010_vm9, %v11656_v21, %v5832_v32  ;;  %v5610_v36 = vsel %vm6427_vm13, 0, %v6426_v52 }
 0x659   : > { %v4380_v3 = vsel %vm11259_vm12, 0, %v4378_v16  ;;  %v5909_v59 = vadd.s32 1, %v12031_v17  ;;  %v12056_v28 = vshll.u32 %v5651_v31, 8  ;;  %v5611_v50 = vsub.s32 32, %v5610_v36 }
 0x65a   : > { %v5615_v41 = vsub.s32 4294967266, %v5610_v36  ;;  %v5656_v54 = vshrl.u32 %v5655_v38, 5  ;;  %v4384_v22 = vadd.s32 3, %v4380_v3  ;;  %v5612_v8 = vshll.u32 %v12005_v37, %v5610_v36 }
 0x65b   : > { %vm5908_vm4 = vc.u32 %v12038_v58, %v12030_v44  ;;  %v5658_v13 = vsub.s32 32, %v5657_v9  ;;  %v5660_v43 = vshll.u32 %v12686_v62, %v5657_v9  ;;  %v5613_v45 = vshrl.u32 %v5595_v23, %v5611_v50 }
 0x65c   : > { %v5616_v57 = vadd.s32 127, %v5615_v41  ;;  %v5910_v0 = vsel %vm5908_vm4, %v5909_v59, %v12031_v17  ;;  %v5663_v20 = vshll.u32 %v12693_v34, %v5657_v9  ;;  %v12064_v1 = vpop.eup %7025  ;;  %v5666_v37 = vshll.u32 %v12694_v12, %v5657_v9 }
 0x65d   : > { %v5911_v25 = vadd.s32 %v5910_v0, %v5906_v60  ;;  %v5661_v31 = vshrl.u32 %v12693_v34, %v5658_v13  ;;  %v5664_v30 = vshrl.u32 %v12694_v12, %v5658_v13  ;;  %v5614_v51 = vor.u32 %v5613_v45, %v5612_v8 }
 0x65e   : > { %v5617_v32 = vshll.u32 %v5616_v57, 23  ;;  %v5659_v52 = vshrl.u32 %v12686_v62, %v5658_v13  ;;  %v5667_v46 = vshrl.u32 %v12695_v5, %v5658_v13  ;;  %vm12673_vm12 = vcmp.lt.s32.totalorder %v11719_v39, 0 }
 0x65f   : > { %v5912_v17 = vadd.s32 536870912, %v5911_v25  ;;  %v5662_v23 = vor.u32 %v5661_v31, %v5660_v43  ;;  %v5669_v38 = vshll.u32 %v12695_v5, %v5657_v9  ;;  %v5670_v16 = vshrl.u32 %v13018_v56, %v5658_v13 }
 0x660   : > { %v13095_v34 = vand.u32 2147483647, %v11719_v39  ;;  %v5618_v12 = vor.u32 4788187, %v5617_v32  ;;  %v5621_v3 = vcvt.s32.f32 %v5614_v51  ;;  %v5665_v36 = vor.u32 %v5664_v30, %v5663_v20  ;;  %v12080_v59 = vpop.eup %7027 }
 0x661   : > { %v5668_v62 = vor.u32 %v5667_v46, %v5666_v37  ;;  %v12082_v50 = vshrl.u32 %v5912_v17, 30  ;;  %v5671_v41 = vor.u32 %v5670_v16, %v5669_v38  ;;  %v5672_v8 = vshll.u32 %v13018_v56, %v5657_v9 }
 0x662   : > { %vm12076_vm6 = vcmp.le.f32.partialorder %v13095_v34, 0.7853982  ;;  %v5673_v5 = vshrl.u32 %v13019_v26, %v5658_v13  ;;  %v5619_v43 = vand.u32 2147483647, %v5618_v12  ;;  %vm5675_vm14 = vcmp.lt.s32.totalorder %v5656_v54, 1 }
 0x663   : > { %vm5676_vm13 = vcmp.lt.s32.totalorder %v5656_v54, 2  ;;  %vm5678_vm4 = vcmp.lt.s32.totalorder %v5656_v54, 4  ;;  %v5914_v45 = vshll.u32 %v12082_v50, 30  ;;  %vm5677_vm8 = vcmp.lt.s32.totalorder %v5656_v54, 3 }
 0x664   : > { %v5674_v57 = vor.u32 %v5673_v5, %v5672_v8  ;;  %v5680_v0 = vsel %vm5678_vm4, %v5668_v62, 2102212464  ;;  %v5622_v20 = vmul.f32 %v5621_v3, %v5619_v43  ;;  %v5679_v31 = vsel %vm5675_vm14, %v5659_v52, %v5662_v23 }
 0x665   : > { %v5683_v30 = vsel %vm5675_vm14, %v5662_v23, %v5665_v36  ;;  %v5684_v37 = vsel %vm5678_vm4, %v5671_v41, 920167782  ;;  %v12089_v51 = vsub.s32 %v5911_v25, %v5914_v45  ;;  %v5681_v56 = vsel %vm5677_vm8, %v5665_v36, %v5680_v0 }
 0x666   : > { %v5685_v9 = vsel %vm5677_vm8, %v5668_v62, %v5684_v37  ;;  %v5687_v26 = vsel %vm5675_vm14, %v5665_v36, %v5668_v62  ;;  %7029 = vcosq.f32 %v12053_v2  ;;  %v5623_v13 = vxor.u32 2147483648, %v5622_v20 }
 0x667   : > { %v5686_v32 = vsel %vm5676_vm13, %v5683_v30, %v5685_v9  ;;  %v5688_v46 = vsel %vm5678_vm4, %v5674_v57, 1326507024  ;;  %v5917_v17 = vsub.s32 0, %v12089_v51  ;;  %v5682_v16 = vsel %vm5676_vm13, %v5679_v31, %v5681_v56  ;;  %v13099_v9 = vld [vmem:[#allocation24_spill] sm:$0xff] }
 0x668   : > { %v5689_v38 = vsel %vm5677_vm8, %v5671_v41, %v5688_v46  ;;  %v12096_v52 = vmul.u32.u64.low %v12056_v28, %v5686_v32  ;;  %v12097_v23 = vmul.u32.u64.high %v12056_v28, %v5686_v32, %v12096_v52  ;;  %v5624_v25 = vsel %vm12673_vm12, %v5623_v13, %v5622_v20  ;;  %v13101_v46 = vld [vmem:[#allocation5_spill] sm:$0xff] }
 0x669   : > { %v5690_v34 = vsel %vm5676_vm13, %v5687_v26, %v5689_v38  ;;  %v4385_v12 = vand.u32 3, %v4384_v22  ;;  %v12107_v3 = vsel %vm12076_vm6, %v11719_v39, %v5624_v25  ;;  %v6437_v36 = vmin.u32 %v5917_v17, %v12089_v51  ;;  %v13102_v38 = vld [vmem:[#allocation26_spill] sm:$0xff] }
 0x66a   : > { %v12111_v62 = vmul.u32.u64.low %v12056_v28, %v5690_v34  ;;  %v12112_v41 = vmul.u32.u64.high %v12056_v28, %v5690_v34, %v12111_v62  ;;  %v12115_v8 = vand.u32 3, %v11746_v55  ;;  %v12118_v5 = vand.u32 3, %v11867_v10 }
 0x66b   : > { %7031 = vsinq.f32 %v12053_v2  ;;  %v4388_v54 = vxor.u32 2147483648, %v11372_v48  ;;  %v5907_v22 = vadd.s32 %v12030_v44, %v12038_v58  ;;  %v5919_v43 = vclz %v6437_v36 }
 0x66c   : > { %v5698_v45 = vmul.u32 %v12056_v28, %v5682_v16  ;;  %v5701_v57 = vadd.s32 1, %v12097_v23  ;;  %7033 = vcosq.f32 %v12107_v3  ;;  %v4391_v55 = vxor.u32 2147483648, %v11366_v18 }
 0x66d   : > { %v4481_v10 = vsub.s32 4, %v11103_v14  ;;  %v6438_v0 = vadd.s32 4294967294, %v5919_v43  ;;  %vm5700_vm14 = vc.u32 %v12112_v41, %v12096_v52  ;;  %vm4387_vm13 = vcmp.eq.s32.totalorder %v4385_v12, 0 }
 0x66e   : > { %vm4390_vm4 = vcmp.eq.s32.totalorder %v4385_v12, 2  ;;  %v5702_v44 = vsel %vm5700_vm14, %v5701_v57, %v12097_v23  ;;  %vm4383_vm12 = vweird.f32 %v10842_v11  ;;  %v4389_v58 = vsel %vm4387_vm13, %v11366_v18, %v4388_v54  ;;  %v13103_v54 = vld [vmem:[#allocation11_spill] sm:$0xff]  ;;  %v13111_v11 = vld [vmem:[#allocation8_spill] sm:$0xff] }
 0x66f   : > { %v4392_v2 = vsel %vm4390_vm4, %v4391_v55, %v11372_v48  ;;  %vm13098_vm3 = vcmp.lt.s32.totalorder %v10866_v42, 0  ;;  %vm6439_vm0 = vcmp.lt.s32.totalorder %v6438_v0, 0  ;;  %v5703_v20 = vadd.s32 %v5702_v44, %v5698_v45 }
 0x670   : > { %v4482_v28 = vsel %vm13098_vm3, %v4481_v10, %v11103_v14  ;;  %v4492_v30 = vxor.u32 2147483648, %v11560_v33  ;;  %v12142_v37 = vpop.eup %7029  ;;  %v5922_v18 = vsel %vm6439_vm0, 0, %v6438_v0  ;;  %v4495_v48 = vxor.u32 2147483648, %v11390_v61 }
 0x671   : > { %v4484_v31 = vsel %vm11279_vm15, 0, %v4482_v28  ;;  %v5923_v14 = vsub.s32 32, %v5922_v18  ;;  %v5927_v26 = vsub.s32 4294967266, %v5922_v18  ;;  %v5704_v13 = vadd.s32 536870912, %v5703_v20 }
 0x672   : > { %v4488_v56 = vadd.s32 3, %v4484_v31  ;;  %vm13100_vm3 = vcmp.lt.s32.totalorder %v4385_v12, 2  ;;  %vm4595_vm15 = vcmp.eq.s32.totalorder %v13099_v9, 0  ;;  %v4596_v17 = vxor.u32 2147483648, %v13101_v46 }
 0x673   : > { %v4393_v63 = vsel %vm13100_vm3, %v4389_v58, %v4392_v2  ;;  %v4599_v23 = vxor.u32 2147483648, %v13102_v38  ;;  %v5924_v25 = vshll.u32 %v12089_v51, %v5922_v18  ;;  %v5925_v16 = vshrl.u32 %v5907_v22, %v5923_v14 }
 0x674   : > { %v4489_v32 = vand.u32 3, %v4488_v56  ;;  %v5928_v34 = vadd.s32 127, %v5927_v26  ;;  %v12152_v36 = vshrl.u32 %v5704_v13, 30  ;;  %v4597_v12 = vsel %vm4595_vm15, %v13102_v38, %v4596_v17  ;;  %v13109_v56 = vld [vmem:[#allocation13_spill] sm:$0xff]  ;;  %v13113_v17 = vld [vmem:[#allocation18_spill] sm:$0xff] }
 0x675   : > { %v12154_v62 = vpop.eup %7031  ;;  %vm4598_vm3 = vcmp.eq.s32.totalorder %v13099_v9, 2  ;;  %vm4695_vm14 = vweird.f32 %v13103_v54  ;;  %v5926_v43 = vor.u32 %v5925_v16, %v5924_v25  ;;  %v4700_v0 = vxor.u32 2147483648, %v11384_v4 }
 0x676   : > { %vm4491_vm0 = vcmp.eq.s32.totalorder %v4489_v32, 0  ;;  %vm4494_vm4 = vcmp.eq.s32.totalorder %v4489_v32, 2  ;;  %v5929_v45 = vshll.u32 %v5928_v34, 23  ;;  %v5706_v57 = vshll.u32 %v12152_v36, 30  ;;  %v12161_v22 = vpop.eup %7033 }
 0x677   : > { %v4493_v51 = vsel %vm4491_vm0, %v11390_v61, %v4492_v30  ;;  %vm4490_vm8 = vcmp.lt.s32.totalorder %v4489_v32, 2  ;;  %v4496_v55 = vsel %vm4494_vm4, %v4495_v48, %v11560_v33  ;;  %v4600_v10 = vsel %vm4598_vm3, %v4599_v23, %v13101_v46  ;;  %v13114_v23 = vld [vmem:[#allocation6_spill] sm:$0xff] }
 0x678   : > { %v13104_v44 = vand.u32 2147483647, %v11750_v6  ;;  %v5930_v2 = vor.u32 4788187, %v5929_v45  ;;  %v12173_v28 = vsub.s32 %v5703_v20, %v5706_v57  ;;  %v4394_v61 = vsel %vm4383_vm12, nan, %v4393_v63 }
 0x679   : > { %v4497_v31 = vsel %vm4490_vm8, %v4493_v51, %v4496_v55  ;;  %v5933_v30 = vcvt.s32.f32 %v5926_v43  ;;  %vm13107_vm0 = vweird.f32 %v10866_v42  ;;  %vm13108_vm4 = vcmp.lt.s32.totalorder %v13099_v9, 2  ;;  %v13112_v42 = vld [vmem:[#allocation4_spill] sm:$0xff]  ;;  %v13117_v55 = vld [vmem:[#allocation7_spill] sm:$0xff]  ;;  %v13127_v43 = vld [vmem:[#allocation37_spill] sm:$0xff] }
 0x67a   : > { %vm12169_vm15 = vcmp.le.f32.partialorder %v13104_v44, 0.7853982  ;;  %v4498_v33 = vsel %vm13107_vm0, nan, %v4497_v31  ;;  %v4601_v18 = vsel %vm13108_vm4, %v4597_v12, %v4600_v10  ;;  %vm4699_vm3 = vcmp.eq.s32.totalorder %v13109_v56, 0  ;;  %v13120_v31 = vld [vmem:[#allocation17_spill] sm:$0xff] }
 0x67b   : > { %v5931_v48 = vand.u32 2147483647, %v5930_v2  ;;  %v5709_v14 = vsub.s32 0, %v12173_v28  ;;  %v5955_v26 = vpack.c.bf16 %v4498_v33, %v4394_v61  ;;  %vm13110_vm13 = vweird.f32 %v10839_v35  ;;  %v13121_v33 = vld [vmem:[#allocation19_spill] sm:$0xff] }
 0x67c   : > { %v4602_v20 = vsel %vm13110_vm13, nan, %v4601_v18  ;;  %7035 = vsinq.f32 %v12107_v3  ;;  %v4701_v13 = vsel %vm4699_vm3, %v13111_v11, %v4700_v0  ;;  %v4703_v63 = vxor.u32 2147483648, %v13111_v11 }
 0x67d   : > { %v4793_v32 = vsub.s32 4, %v13112_v42  ;;  %v5934_v46 = vmul.f32 %v5933_v30, %v5931_v48  ;;  %v6429_v9 = vmin.u32 %v5709_v14, %v12173_v28  ;;  %6579 = vmatprep.mubr.bf16.mxu0 %v5955_v26  ;;  %vm4702_vm12 = vcmp.eq.s32.totalorder %v13109_v56, 2  ;;  %v13122_v48 = vld [vmem:[#allocation38_spill] sm:$0xff] }
 0x67e   : > { %v4897_v38 = vsub.s32 4, %v13113_v17  ;;  %v5699_v35 = vadd.s32 %v12096_v52, %v12112_v41  ;;  %vm4698_vm8 = vcmp.lt.s32.totalorder %v13109_v56, 2  ;;  %v4704_v3 = vsel %vm4702_vm12, %v4703_v63, %v11384_v4 }
 0x67f   : > { %vm13115_vm13 = vcmp.lt.s32.totalorder %v13114_v23, 0  ;;  %v5935_v16 = vxor.u32 2147483648, %v5934_v46  ;;  %v5711_v34 = vclz %v6429_v9  ;;  %v4705_v12 = vsel %vm4698_vm8, %v4701_v13, %v4704_v3 }
 0x680   : > { %v4794_v25 = vsel %vm13115_vm13, %v4793_v32, %v13112_v42  ;;  %v4706_v57 = vsel %vm4695_vm14, nan, %v4705_v12  ;;  %v4804_v52 = vxor.u32 2147483648, %v13117_v55  ;;  %vm13118_vm0 = vcmp.lt.s32.totalorder %v11266_v7, 0  ;;  %v13123_v32 = vld [vmem:[#allocation23_spill] sm:$0xff] }
 0x681   : > { %v4796_v45 = vsel %vm11501_vm5, 0, %v4794_v25  ;;  %v4898_v4 = vsel %vm13118_vm0, %v4897_v38, %v13113_v17  ;;  %vm13119_vm4 = vcmp.lt.s32.totalorder %v11750_v6, 0  ;;  %v6430_v10 = vadd.s32 4294967294, %v5711_v34  ;;  %v13126_v34 = vld [vmem:[#allocation27_spill] sm:$0xff] }
 0x682   : > { %v4800_v51 = vadd.s32 3, %v4796_v45  ;;  %v5936_v41 = vsel %vm13119_vm4, %v5935_v16, %v5934_v46  ;;  %v5956_v0 = vpack.c.bf16 %v4706_v57, %v4602_v20  ;;  %v4900_v44 = vsel %vm11682_vm11, 0, %v4898_v4 }
 0x683   : > { %v12214_v54 = vsel %vm12169_vm15, %v11750_v6, %v5936_v41  ;;  %vm4799_vm5 = vweird.f32 %v13114_v23  ;;  %v4904_v61 = vadd.s32 3, %v4900_v44  ;;  %v5001_v30 = vsub.s32 4, %v13120_v31 }
 0x684   : > { %v4801_v2 = vand.u32 3, %v4800_v51  ;;  %vm6431_vm14 = vcmp.lt.s32.totalorder %v6430_v10, 0  ;;  %6580 = vmatmul.mubr.bf16.vlgmr.msra.gmra.mrb[16].mxu0 %v5956_v0  ;;  %v4807_v18 = vxor.u32 2147483648, %v13121_v33  ;;  %vm4903_vm3 = vweird.f32 %v11266_v7 }
 0x685   : > { %v4908_v53 = vxor.u32 2147483648, %v11767_v15  ;;  %7037 = vcosq.f32 %v12214_v54  ;;  %v5714_v56 = vsel %vm6431_vm14, 0, %v6430_v10  ;;  %v4911_v14 = vxor.u32 2147483648, %v13122_v48 }
 0x686   : > { %vm4803_vm11 = vcmp.eq.s32.totalorder %v4801_v2, 0  ;;  %v5715_v26 = vsub.s32 32, %v5714_v56  ;;  %v5719_v20 = vsub.s32 4294967266, %v5714_v56  ;;  %vm4802_vm12 = vcmp.lt.s32.totalorder %v4801_v2, 2  ;;  %v12224_v13 = vpop.eup %7035 }
 0x687   : > { %v4805_v11 = vsel %vm4803_vm11, %v13121_v33, %v4804_v52  ;;  %v5716_v63 = vshll.u32 %v12173_v28, %v5714_v56  ;;  %vm4806_vm8 = vcmp.eq.s32.totalorder %v4801_v2, 2  ;;  %v4905_v42 = vand.u32 3, %v4904_v61  ;;  %v13128_v52 = vld [vmem:[#allocation10_spill] sm:$0xff] }
 0x688   : > { %vm13124_vm13 = vcmp.lt.s32.totalorder %v13123_v32, 0  ;;  %v5717_v9 = vshrl.u32 %v5699_v35, %v5715_v26  ;;  %v5720_v17 = vadd.s32 127, %v5719_v20  ;;  %v4808_v38 = vsel %vm4806_vm8, %v4807_v18, %v13117_v55  ;;  %v13134_v18 = vld [vmem:[#allocation9_spill] sm:$0xff] }
 0x689   : > { %v5002_v46 = vsel %vm13124_vm13, %v5001_v30, %v13120_v31  ;;  %v4809_v16 = vsel %vm4802_vm12, %v4805_v11, %v4808_v38  ;;  %vm4907_vm0 = vcmp.eq.s32.totalorder %v4905_v42, 0  ;;  %v5012_v12 = vxor.u32 2147483648, %v13126_v34  ;;  %v13136_v20 = vld [vmem:[#allocation33_spill] sm:$0xff] }
 0x68a   : > { %v5004_v25 = vsel %vm11394_vm7, 0, %v5002_v46  ;;  %v5015_v45 = vxor.u32 2147483648, %v13127_v43  ;;  %v5718_v28 = vor.u32 %v5717_v9, %v5716_v63  ;;  %v5721_v57 = vshll.u32 %v5720_v17, 23  ;;  %v13137_v63 = vld [vmem:[#allocation25_spill] sm:$0xff] }
 0x68b   : > { %v4909_v51 = vsel %vm4907_vm0, %v13122_v48, %v4908_v53  ;;  %vm4910_vm4 = vcmp.eq.s32.totalorder %v4905_v42, 2  ;;  %vm12676_vm14 = vcmp.lt.s32.totalorder %v11899_v27, 0  ;;  %vm4906_vm11 = vcmp.lt.s32.totalorder %v4905_v42, 2 }
 0x68c   : > { %v4912_v35 = vsel %vm4910_vm4, %v4911_v14, %v11767_v15  ;;  %v5008_v55 = vadd.s32 3, %v5004_v25  ;;  %v5105_v4 = vsub.s32 4, %v13128_v52  ;;  %v13129_v41 = vand.u32 2147483647, %v11899_v27  ;;  %v13132_v15 = vld [vmem:[#allocation20_spill] sm:$0xff] }
 0x68d   : > { %v5722_v0 = vor.u32 4788187, %v5721_v57  ;;  %v5725_v44 = vcvt.s32.f32 %v5718_v28  ;;  %v4810_v2 = vsel %vm4799_vm5, nan, %v4809_v16  ;;  %v4913_v61 = vsel %vm4906_vm11, %v4909_v51, %v4912_v35 }
 0x68e   : > { %vm12241_vm7 = vcmp.le.f32.partialorder %v13129_v41, 0.7853982  ;;  %v4914_v31 = vsel %vm4903_vm3, nan, %v4913_v61  ;;  %v5009_v30 = vand.u32 3, %v5008_v55  ;;  %vm13133_vm12 = vcmp.lt.s32.totalorder %v13132_v15, 0 }
 0x68f   : > { %v5106_v33 = vsel %vm13133_vm12, %v5105_v4, %v13128_v52  ;;  %v5116_v53 = vxor.u32 2147483648, %v13134_v18  ;;  %v5723_v56 = vand.u32 2147483647, %v5722_v0  ;;  %v5957_v48 = vpack.c.bf16 %v4914_v31, %v4810_v2  ;;  %v12256_v23 = vpop.eup %7037  ;;  %v13141_v0 = vld [vmem:[#allocation40_spill] sm:$0xff] }
 0x690   : > { %v5108_v26 = vsel %vm11532_vm2, 0, %v5106_v33  ;;  %v5209_v11 = vsub.s32 4, %v13136_v20  ;;  %vm5011_vm5 = vcmp.eq.s32.totalorder %v5009_v30, 0  ;;  %vm5014_vm8 = vcmp.eq.s32.totalorder %v5009_v30, 2  ;;  %v13142_v33 = vld [vmem:[#allocation21_spill] sm:$0xff] }
 0x691   : > { %v5112_v7 = vadd.s32 3, %v5108_v26  ;;  %v5119_v42 = vxor.u32 2147483648, %v13137_v63  ;;  %v5726_v46 = vmul.f32 %v5725_v44, %v5723_v56  ;;  %6583 = vmatprep.mubr.bf16.mxu0 %v5957_v48  ;;  %v5013_v9 = vsel %vm5011_vm5, %v13127_v43, %v5012_v12 }
 0x692   : > { %v5016_v17 = vsel %vm5014_vm8, %v5015_v45, %v13126_v34  ;;  %vm13138_vm3 = vcmp.lt.s32.totalorder %v11352_v19, 0  ;;  %vm5007_vm2 = vweird.f32 %v13123_v32  ;;  %vm5010_vm13 = vcmp.lt.s32.totalorder %v5009_v30, 2  ;;  %v13140_v34 = vld [vmem:[#allocation45_spill] sm:$0xff]  ;;  %v13144_v32 = vld [vmem:[#allocation16_spill] sm:$0xff] }
 0x693   : > { %v5210_v38 = vsel %vm13138_vm3, %v5209_v11, %v13136_v20  ;;  %v5113_v3 = vand.u32 3, %v5112_v7  ;;  %v5727_v28 = vxor.u32 2147483648, %v5726_v46  ;;  %v5017_v57 = vsel %vm5010_vm13, %v5013_v9, %v5016_v17  ;;  %v13147_v11 = vld [vmem:[#allocation34_spill] sm:$0xff]  ;;  %v13148_v9 = vld [vmem:[#allocation44_spill] sm:$0xff] }
 0x694   : > { %v5212_v16 = vsel %vm11781_vm10, 0, %v5210_v38  ;;  %v5220_v35 = vxor.u32 2147483648, %v11922_v49  ;;  %v5223_v12 = vxor.u32 2147483648, %v13140_v34  ;;  %vm5111_vm10 = vweird.f32 %v13132_v15 }
 0x695   : > { %v5216_v51 = vadd.s32 3, %v5212_v16  ;;  %vm5114_vm0 = vcmp.lt.s32.totalorder %v5113_v3, 2  ;;  %vm5115_vm4 = vcmp.eq.s32.totalorder %v5113_v3, 0  ;;  %vm5118_vm11 = vcmp.eq.s32.totalorder %v5113_v3, 2 }
 0x696   : > { %v5728_v43 = vsel %vm12676_vm14, %v5727_v28, %v5726_v46  ;;  %v5117_v45 = vsel %vm5115_vm4, %v13137_v63, %v5116_v53  ;;  %v5120_v55 = vsel %vm5118_vm11, %v5119_v42, %v13134_v18  ;;  %v5313_v44 = vsub.s32 4, %v13141_v0 }
 0x697   : > { %v5217_v52 = vand.u32 3, %v5216_v51  ;;  %v5731_v4 = vsel %vm12241_vm7, %v11899_v27, %v5728_v43  ;;  %v5121_v41 = vsel %vm5114_vm0, %v5117_v45, %v5120_v55  ;;  %7039 = vsinq.f32 %v12214_v54 }
 0x698   : > { %v5018_v2 = vsel %vm5007_vm2, nan, %v5017_v57  ;;  %v5122_v61 = vsel %vm5111_vm10, nan, %v5121_v41  ;;  %7041 = vsinq.f32 %v5731_v4  ;;  %vm5527_vm8 = vweird.f32 %v13142_v33 }
 0x699   : > { %vm5219_vm12 = vcmp.eq.s32.totalorder %v5217_v52, 0  ;;  %v5958_v31 = vpack.c.bf16 %v5122_v61, %v5018_v2  ;;  %vm5222_vm5 = vcmp.eq.s32.totalorder %v5217_v52, 2  ;;  %7043 = vcosq.f32 %v5731_v4 }
 0x69a   : > { %v5221_v30 = vsel %vm5219_vm12, %v13140_v34, %v5220_v35  ;;  %vm5215_vm3 = vweird.f32 %v11352_v19  ;;  %v5224_v15 = vsel %vm5222_vm5, %v5223_v12, %v11922_v49  ;;  %vm13143_vm13 = vcmp.lt.s32.totalorder %v11646_v29, 0  ;;  %v13146_v49 = vld [vmem:[#allocation43_spill] sm:$0xff] }
 0x69b   : > { %v5314_v54 = vsel %vm13143_vm13, %v5313_v44, %v13141_v0  ;;  %vm5423_vm2 = vweird.f32 %v13144_v32  ;;  %6584 = vmatmul.mubr.bf16.gmra.mrb[20].mxu0 %v5958_v31  ;;  %vm5218_vm0 = vcmp.lt.s32.totalorder %v5217_v52, 2  ;;  %v5324_v56 = vxor.u32 2147483648, %v12080_v59  ;;  %v13150_v0 = vld [vmem:[#allocation35_spill] sm:$0xff] }
 0x69c   : > { %v5316_v53 = vsel %vm11936_vm1, 0, %v5314_v54  ;;  %v5327_v48 = vxor.u32 2147483648, %v12064_v1  ;;  %v5225_v14 = vsel %vm5218_vm0, %v5221_v30, %v5224_v15  ;;  %vm5426_vm4 = vcmp.lt.s32.totalorder %v12115_v8, 2 }
 0x69d   : > { %v5320_v26 = vadd.s32 3, %v5316_v53  ;;  %v5428_v20 = vxor.u32 2147483648, %v13146_v49  ;;  %vm5427_vm11 = vcmp.eq.s32.totalorder %v12115_v8, 0  ;;  %vm5430_vm10 = vcmp.eq.s32.totalorder %v12115_v8, 2 }
 0x69e   : > { %v5431_v7 = vxor.u32 2147483648, %v13147_v11  ;;  %v5532_v63 = vxor.u32 2147483648, %v11999_v24  ;;  %vm5531_vm1 = vcmp.eq.s32.totalorder %v12118_v5, 0  ;;  %v5535_v17 = vxor.u32 2147483648, %v13148_v9 }
 0x69f   : > { %v5321_v42 = vand.u32 3, %v5320_v26  ;;  %v5429_v46 = vsel %vm5427_vm11, %v13147_v11, %v5428_v20  ;;  %vm5530_vm12 = vcmp.lt.s32.totalorder %v12118_v5, 2  ;;  %v5625_v25 = vsub.s32 4, %v11992_v40 }
 0x6a0   : > { %v5432_v38 = vsel %vm5430_vm10, %v5431_v7, %v13146_v49  ;;  %v5533_v3 = vsel %vm5531_vm1, %v13148_v9, %v5532_v63  ;;  %vm5534_vm14 = vcmp.eq.s32.totalorder %v12118_v5, 2  ;;  %vm5319_vm11 = vweird.f32 %v11646_v29 }
 0x6a1   : > { %vm5322_vm5 = vcmp.lt.s32.totalorder %v5321_v42, 2  ;;  %vm5323_vm13 = vcmp.eq.s32.totalorder %v5321_v42, 0  ;;  %vm5326_vm0 = vcmp.eq.s32.totalorder %v5321_v42, 2  ;;  %v5433_v57 = vsel %vm5426_vm4, %v5429_v46, %v5432_v38  ;;  %v12312_v35 = vpop.eup %7039 }
 0x6a2   : > { %v5325_v16 = vsel %vm5323_vm13, %v12064_v1, %v5324_v56  ;;  %v5328_v28 = vsel %vm5326_vm0, %v5327_v48, %v12080_v59  ;;  %v5536_v51 = vsel %vm5534_vm14, %v5535_v17, %v11999_v24  ;;  %vm13149_vm10 = vcmp.lt.s32.totalorder %v11719_v39, 0  ;;  %v7042_v5 = vpop.eup %7041 }
 0x6a3   : > { %v5329_v34 = vsel %vm5322_vm5, %v5325_v16, %v5328_v28  ;;  %v5537_v12 = vsel %vm5530_vm12, %v5533_v3, %v5536_v51  ;;  %v5626_v43 = vsel %vm13149_vm10, %v5625_v25, %v11992_v40  ;;  %v5226_v1 = vsel %vm5215_vm3, nan, %v5225_v14  ;;  %v7044_v45 = vpop.eup %7043 }
 0x6a4   : > { %v5330_v59 = vsel %vm5319_vm11, nan, %v5329_v34  ;;  %v5538_v8 = vsel %vm5527_vm8, nan, %v5537_v12  ;;  %v5628_v24 = vsel %vm12076_vm6, 0, %v5626_v43  ;;  %v5434_v29 = vsel %vm5423_vm2, nan, %v5433_v57 }
 0x6a5   : > { %v5959_v55 = vpack.c.bf16 %v5330_v59, %v5226_v1  ;;  %v5632_v52 = vadd.s32 3, %v5628_v24  ;;  %v5729_v4 = vsub.s32 4, %v12152_v36  ;;  %v5960_v40 = vpack.c.bf16 %v5538_v8, %v5434_v29 }
 0x6a6   : > { %vm5631_vm14 = vweird.f32 %v11719_v39  ;;  %v5636_v19 = vxor.u32 2147483648, %v12224_v13  ;;  %v5639_v41 = vxor.u32 2147483648, %v12161_v22  ;;  %v5833_v44 = vsub.s32 4, %v13150_v0 }
 0x6a7   : > { %6587 = vmatprep.mubr.bf16.mxu1 %v5959_v55  ;;  %v5633_v60 = vand.u32 3, %v5632_v52  ;;  %vm13151_vm6 = vcmp.lt.s32.totalorder %v11899_v27, 0  ;;  %vm5735_vm8 = vweird.f32 %v11899_v27  ;;  %v5740_v61 = vxor.u32 2147483648, %v7042_v5 }
 0x6a8   : > { %v5730_v2 = vsel %vm13151_vm6, %v5729_v4, %v12152_v36  ;;  %6588 = vmatmul.mubr.bf16.vlgmr.msra.gmra.mrb[16].mxu1 %v5960_v40  ;;  %v5743_v30 = vxor.u32 2147483648, %v7044_v45  ;;  %vm13152_vm3 = vcmp.lt.s32.totalorder %v11656_v21, 0  ;;  %v5937_v15 = vsub.s32 4, %v12082_v50 }
 0x6a9   : > { %v5732_v31 = vsel %vm12241_vm7, 0, %v5730_v2  ;;  %v5834_v33 = vsel %vm13152_vm3, %v5833_v44, %v13150_v0  ;;  %vm5635_vm2 = vcmp.eq.s32.totalorder %v5633_v60, 0  ;;  %vm5638_vm4 = vcmp.eq.s32.totalorder %v5633_v60, 2 }
 0x6aa   : > { %v5736_v54 = vadd.s32 3, %v5732_v31  ;;  %v5844_v32 = vxor.u32 2147483648, %v12154_v62  ;;  %v5637_v36 = vsel %vm5635_vm2, %v12161_v22, %v5636_v19  ;;  %v5640_v18 = vsel %vm5638_vm4, %v5639_v41, %v12224_v13 }
 0x6ab   : > { %v5836_v10 = vsel %vm12010_vm9, 0, %v5834_v33  ;;  %vm13153_vm7 = vcmp.lt.s32.totalorder %v11750_v6, 0  ;;  %vm5634_vm1 = vcmp.lt.s32.totalorder %v5633_v60, 2  ;;  %v5847_v49 = vxor.u32 2147483648, %v12142_v37 }
 0x6ac   : > { %v5938_v53 = vsel %vm13153_vm7, %v5937_v15, %v12082_v50  ;;  %v5737_v56 = vand.u32 3, %v5736_v54  ;;  %v5840_v48 = vadd.s32 3, %v5836_v10  ;;  %v5641_v26 = vsel %vm5634_vm1, %v5637_v36, %v5640_v18 }
 0x6ad   : > { %v5940_v14 = vsel %vm12169_vm15, 0, %v5938_v53  ;;  %v5948_v22 = vxor.u32 2147483648, %v12312_v35  ;;  %v5951_v50 = vxor.u32 2147483648, %v12256_v23  ;;  %v5642_v63 = vsel %vm5631_vm14, nan, %v5641_v26 }
 0x6ae   : > { %v5944_v20 = vadd.s32 3, %v5940_v14  ;;  %vm5738_vm12 = vcmp.lt.s32.totalorder %v5737_v56, 2  ;;  %vm5739_vm5 = vcmp.eq.s32.totalorder %v5737_v56, 0  ;;  %vm5742_vm13 = vcmp.eq.s32.totalorder %v5737_v56, 2 }
 0x6af   : > { %v5841_v47 = vand.u32 3, %v5840_v48  ;;  %v5741_v13 = vsel %vm5739_vm5, %v7044_v45, %v5740_v61  ;;  %v5744_v11 = vsel %vm5742_vm13, %v5743_v30, %v7042_v5  ;;  %vm5839_vm14 = vweird.f32 %v11656_v21 }
 0x6b0   : > { %v5945_v7 = vand.u32 3, %v5944_v20  ;;  %v5745_v58 = vsel %vm5738_vm12, %v5741_v13, %v5744_v11  ;;  %vm6147_vm3 = vcmask 7168  }
 0x6b1   : > { %vm5843_vm9 = vcmp.eq.s32.totalorder %v5841_v47, 0  ;;  %vm5846_vm15 = vcmp.eq.s32.totalorder %v5841_v47, 2  ;;  %v5746_v42 = vsel %vm5735_vm8, nan, %v5745_v58  ;;  %vm5842_vm0 = vcmp.lt.s32.totalorder %v5841_v47, 2 }
 0x6b2   : > { %v5845_v46 = vsel %vm5843_vm9, %v12142_v37, %v5844_v32  ;;  %v5848_v9 = vsel %vm5846_vm15, %v5847_v49, %v12154_v62  ;;  %v5961_v17 = vpack.c.bf16 %v5746_v42, %v5642_v63  ;;  %vm5947_vm11 = vcmp.eq.s32.totalorder %v5945_v7, 0  ;;  %v6440_v62 = vld [vmem:[#allocation3] ss:$0 sm:$0xff] }
 0x6b3   : > { %v5849_v38 = vsel %vm5842_vm0, %v5845_v46, %v5848_v9  ;;  %vm5950_vm10 = vcmp.eq.s32.totalorder %v5945_v7, 2  ;;  %vm5946_vm6 = vcmp.lt.s32.totalorder %v5945_v7, 2  ;;  %v5949_v39 = vsel %vm5947_vm11, %v12256_v23, %v5948_v22 }
 0x6b4   : > { %v5952_v3 = vsel %vm5950_vm10, %v5951_v50, %v12312_v35  ;;  %6591 = vmatprep.mubr.bf16.mxu1 %v5961_v17  ;;  %vm5943_vm8 = vweird.f32 %v11750_v6  ;;  %v5850_v25 = vsel %vm5839_vm14, nan, %v5849_v38 }
 0x6b5   : > { %v5953_v27 = vsel %vm5946_vm6, %v5949_v39, %v5952_v3 }
 0x6b6   : > { %v5954_v37 = vsel %vm5943_vm8, nan, %v5953_v27 }
 0x6b7   : > { %v5962_v16 = vpack.c.bf16 %v5954_v37, %v5850_v25 }
 0x6b9   : > { %6592 = vmatmul.mubr.bf16.gmra.mrb[20].mxu1 %v5962_v16 }
 0x757   : > { %v6581_v23 = vpop.f32.mrb[16].mxu0 }
 0x758   : > { %v6093_v21 = vadd.f32 %v6581_v23, %v6440_v62  ;;  %v6084_v6 = vpop.f32.mrb[17].mxu0 }
 0x759   : > { %v6085_v28 = vadd.f32 %v6440_v62, %v6084_v6  ;;  %v6582_v57 = vpop.f32.mrb[18].mxu0 }
 0x75a   : > { %6150 = vst.msk [vmem:[%s12369_s26 + $0x10] sm:$0xff] %vm6147_vm3, %v6093_v21  ;;  %v6096_v51 = vadd.f32 %v6582_v57, %v6440_v62  ;;  %v6087_v35 = vpop.f32.mrb[19].mxu0 }
 0x75b   : > { %6148 = vst.msk [vmem:[%s12369_s26] sm:$0xff] %vm6147_vm3, %v6085_v28  ;;  %v6088_v34 = vadd.f32 %v6440_v62, %v6087_v35 }
 0x75c   : > { %6151 = vst.msk [vmem:[%s12369_s26 + $0x18] sm:$0xff] %vm6147_vm3, %v6096_v51 }
 0x75d   : > { %6149 = vst.msk [vmem:[%s12369_s26 + $0x8] sm:$0xff] %vm6147_vm3, %v6088_v34 }
 0x76e   : > { %v6585_v12 = vpop.f32.mrb[20].mxu0 }
 0x76f   : > { %v6109_v43 = vadd.f32 %v6585_v12, %v6440_v62  ;;  %v6100_v5 = vpop.f32.mrb[21].mxu0 }
 0x770   : > { %v6101_v1 = vadd.f32 %v6440_v62, %v6100_v5  ;;  %v6586_v59 = vpop.f32.mrb[22].mxu0 }
 0x771   : > { %6154 = vst.msk [vmem:[%s12369_s26 + $0x30] sm:$0xff] %vm6147_vm3, %v6109_v43  ;;  %v6112_v8 = vadd.f32 %v6586_v59, %v6440_v62  ;;  %v6103_v24 = vpop.f32.mrb[23].mxu0 }
 0x772   : > { %6152 = vst.msk [vmem:[%s12369_s26 + $0x20] sm:$0xff] %vm6147_vm3, %v6101_v1  ;;  %v6104_v45 = vadd.f32 %v6440_v62, %v6103_v24 }
 0x773   : > { %6155 = vst.msk [vmem:[%s12369_s26 + $0x38] sm:$0xff] %vm6147_vm3, %v6112_v8 }
 0x774   : > { %6153 = vst.msk [vmem:[%s12369_s26 + $0x28] sm:$0xff] %vm6147_vm3, %v6104_v45 }
 0x77b   : > { %v6589_v55 = vpop.f32.mrb[16].mxu1 }
 0x77c   : > { %v6125_v29 = vadd.f32 %v6589_v55, %v6440_v62  ;;  %v6116_v52 = vpop.f32.mrb[17].mxu1 }
 0x77d   : > { %v6117_v4 = vadd.f32 %v6440_v62, %v6116_v52  ;;  %v6590_v40 = vpop.f32.mrb[18].mxu1 }
 0x77e   : > { %6158 = vst.msk [vmem:[%s12369_s26 + $0x50] sm:$0xff] %vm6147_vm3, %v6125_v29  ;;  %v6128_v19 = vadd.f32 %v6590_v40, %v6440_v62  ;;  %v6119_v41 = vpop.f32.mrb[19].mxu1 }
 0x77f   : > { %6156 = vst.msk [vmem:[%s12369_s26 + $0x40] sm:$0xff] %vm6147_vm3, %v6117_v4  ;;  %v6120_v0 = vadd.f32 %v6440_v62, %v6119_v41 }
 0x780   : > { %6159 = vst.msk [vmem:[%s12369_s26 + $0x58] sm:$0xff] %vm6147_vm3, %v6128_v19 }
 0x781   : > { %6157 = vst.msk [vmem:[%s12369_s26 + $0x48] sm:$0xff] %vm6147_vm3, %v6120_v0 }
 0x78c   : > { %v6593_v44 = vpop.f32.mrb[20].mxu1 }
 0x78d   : > { %v6141_v60 = vadd.f32 %v6593_v44, %v6440_v62  ;;  %v6132_v2 = vpop.f32.mrb[21].mxu1 }
 0x78e   : > { %v6133_v61 = vadd.f32 %v6440_v62, %v6132_v2  ;;  %v6594_v31 = vpop.f32.mrb[22].mxu1 }
 0x78f   : > { %6162 = vst.msk [vmem:[%s12369_s26 + $0x70] sm:$0xff] %vm6147_vm3, %v6141_v60  ;;  %v6144_v30 = vadd.f32 %v6594_v31, %v6440_v62  ;;  %v6135_v33 = vpop.f32.mrb[23].mxu1 }
 0x790   : > { %6160 = vst.msk [vmem:[%s12369_s26 + $0x60] sm:$0xff] %vm6147_vm3, %v6133_v61  ;;  %v6136_v15 = vadd.f32 %v6440_v62, %v6135_v33 }
 0x791   : > { %6163 = vst.msk [vmem:[%s12369_s26 + $0x78] sm:$0xff] %vm6147_vm3, %v6144_v30 }
 0x792   : > { %6161 = vst.msk [vmem:[%s12369_s26 + $0x68] sm:$0xff] %vm6147_vm3, %v6136_v15 }
 0x793 PF: > { %s21_s11 = sadd.s32 1, %s7055_s11  }
 0x794   : > { %p18_p4 = scmp.ge.s32.totalorder %s21_s11, 4  }
 0x796   :  { %20 = sbr.rel (!%p18_p4) target bundleno = 3 (0x3), region = 86 }

</bundles_post_ra>
